<compile_context>
chip_gen: v5e
topology: v5e:2x2
jax: 0.10.0
libtpu: 0.0.40
codegen_flags: <defaults>
</compile_context>

<pallas_src>
import math

import numpy as np
import jax
import jax.numpy as jnp
from jax import lax
from jax.experimental import pallas as pl
from jax.experimental.pallas import tpu as pltpu


B_TILE = 32          # images per grid step (v6e/v7x sweet spot; ~16 on v5e)


# ----------------------------------------------------------------------------
# Fused Pallas kernel: whole forward pass for B_TILE images per grid step.
# Row convention everywhere: row index = (spatial index) * B_TILE + b.
# ----------------------------------------------------------------------------
def lenet_fused_kernel(x_ref, cb1_ref, b1_ref, cb2_ref, b2_ref,
                       w1h_ref, bf1_ref, w2_ref, bf2_ref, w3_ref, bf3_ref,
                       o_ref, p1_scr, p2_scr):
    f32 = jnp.float32
    bf16 = jnp.bfloat16
    H = 128                      # lane offset of the wp=1 half of merged bands
    bt = o_ref.shape[0]          # B_TILE
    m2 = p2_scr.shape[0]         # 5 * B_TILE

    # ---- conv1 (3->6, k=5) + bias + ReLU + 2x2 maxpool ----------------------
    # x_ref: (8, 7*bt, 96).  Slab t holds image rows {4s+t}; lanes = (w,ci).
    # Merged band cb1[kh]: cols [0:112)=even output cols, [128:240)=odd cols.
    def conv1_class(c):                                   # conv1 rows 4s + c
        acc = jnp.dot(x_ref[c], cb1_ref[0], preferred_element_type=f32)
        for kh in range(1, 5):
            acc = acc + jnp.dot(x_ref[c + kh], cb1_ref[kh],
                                preferred_element_type=f32)
        return jnp.maximum(acc[:, :H], acc[:, H:])        # fold column parity

    b1 = b1_ref[...]                                      # (1, 128)
    # even pooled rows <- conv1 rows {4s,4s+1}; odd <- {4s+2,4s+3}.
    p1_scr[0, :, :] = jnp.maximum(
        jnp.maximum(conv1_class(0), conv1_class(1)) + b1, 0.0).astype(bf16)
    p1_scr[1, :, :] = jnp.maximum(
        jnp.maximum(conv1_class(2), conv1_class(3)) + b1, 0.0).astype(bf16)

    # ---- conv2 (6->16, k=5) + bias + ReLU + 2x2 maxpool ---------------------
    # p1_scr[parity, s*bt+b, w1*8+co] = pooled conv1 row 2s+parity.
    def conv2_class(hp):                                  # conv2 rows 2q + hp
        acc = None
        for kh in range(5):
            u = hp + kh
            lhs = p1_scr[u % 2, (u // 2) * bt:(u // 2) * bt + m2, :]
            t = jnp.dot(lhs, cb2_ref[kh], preferred_element_type=f32)
            acc = t if acc is None else acc + t
        return jnp.maximum(acc[:, :H], acc[:, H:])        # fold column parity

    p2_scr[...] = jnp.maximum(
        jnp.maximum(conv2_class(0), conv2_class(1)) + b2_ref[...],
        0.0).astype(bf16)                                 # (5*bt, 128)

    # ---- fc1 (400->120): PyTorch NCHW flatten folded into w1h ---------------
    acc = None
    for h in range(5):
        t = jnp.dot(p2_scr[h * bt:(h + 1) * bt, :], w1h_ref[h],
                    preferred_element_type=f32)           # (bt, 128)
        acc = t if acc is None else acc + t
    a1 = jnp.maximum(acc + bf1_ref[...], 0.0).astype(bf16)

    # ---- fc2 (120->84) + ReLU, fc3 (84->10) ---------------------------------
    a2 = jnp.maximum(jnp.dot(a1, w2_ref[...], preferred_element_type=f32)
                     + bf2_ref[...], 0.0).astype(bf16)
    o_ref[...] = (jnp.dot(a2, w3_ref[...], preferred_element_type=f32)
                  + bf3_ref[...])                         # (bt, 128) f32


# ----------------------------------------------------------------------------
# Parameters (PyTorch-style layouts + init), packed once into kernel layout.
# ----------------------------------------------------------------------------
def init_params(key, layer1_size=120, layer2_size=84):
    ks = jax.random.split(key, 10)

    def u(k, shape, fan_in):
        bound = 1.0 / math.sqrt(fan_in)
        return jax.random.uniform(k, shape, jnp.float32, -bound, bound)

    return {
        "conv1_w": u(ks[0], (6, 3, 5, 5), 3 * 5 * 5),
        "conv1_b": u(ks[1], (6,), 3 * 5 * 5),
        "conv2_w": u(ks[2], (16, 6, 5, 5), 6 * 5 * 5),
        "conv2_b": u(ks[3], (16,), 6 * 5 * 5),
        "fc1_w": u(ks[4], (layer1_size, 16 * 5 * 5), 16 * 5 * 5),
        "fc1_b": u(ks[5], (layer1_size,), 16 * 5 * 5),
        "fc2_w": u(ks[6], (layer2_size, layer1_size), layer1_size),
        "fc2_b": u(ks[7], (layer2_size,), layer1_size),
        "fc3_w": u(ks[8], (10, layer2_size), layer2_size),
        "fc3_b": u(ks[9], (10,), layer2_size),
    }


def pack_params(params, mm_dtype=jnp.bfloat16):
    """One-time packing of PyTorch-layout weights into the kernel's layout."""
    w1 = np.asarray(params["conv1_w"], np.float32)    # (6, 3, 5, 5)
    b1 = np.asarray(params["conv1_b"], np.float32)
    w2 = np.asarray(params["conv2_w"], np.float32)    # (16, 6, 5, 5)
    b2 = np.asarray(params["conv2_b"], np.float32)
    f1w = np.asarray(params["fc1_w"], np.float32)     # (L1, 400)
    f1b = np.asarray(params["fc1_b"], np.float32)
    f2w = np.asarray(params["fc2_w"], np.float32)     # (L2, L1)
    f2b = np.asarray(params["fc2_b"], np.float32)
    f3w = np.asarray(params["fc3_w"], np.float32)     # (10, L2)
    f3b = np.asarray(params["fc3_b"], np.float32)
    L1, L2 = f1w.shape[0], f2w.shape[0]
    assert L1 <= 128 and L2 <= 128, "fc layer sizes must fit one 128-lane tile"

    # conv1 merged bands (5, 96, 256): for kh, wp-half `128*wp`,
    #   B[(2*w1 + wp + kw)*3 + ci, 128*wp + w1*8 + co] = w1[co, ci, kh, kw]
    cb1 = np.zeros((5, 96, 256), np.float32)
    for kh in range(5):
        for wp in range(2):
            off = 128 * wp
            for w1i in range(14):
                for kw in range(5):
                    w = 2 * w1i + wp + kw
                    cb1[kh, w * 3:w * 3 + 3,
                        off + w1i * 8:off + w1i * 8 + 6] = w1[:, :, kh, kw].T

    # conv2 merged bands (5, 128, 256):
    #   B[(2*q + wp + kw)*8 + ci, 128*wp + q*16 + co] = w2[co, ci, kh, kw]
    cb2 = np.zeros((5, 128, 256), np.float32)
    for kh in range(5):
        for wp in range(2):
            off = 128 * wp
            for q in range(5):
                for kw in range(5):
                    w1i = 2 * q + wp + kw
                    cb2[kh, w1i * 8:w1i * 8 + 6,
                        off + q * 16:off + q * 16 + 16] = w2[:, :, kh, kw].T

    # fc1 packed per pooled row h; flatten order is PyTorch's (c, h, w).
    w1h = np.zeros((5, 128, 128), np.float32)
    for h in range(5):
        for w in range(5):
            for c in range(16):
                w1h[h, w * 16 + c, :L1] = f1w[:, c * 25 + h * 5 + w]

    w2p = np.zeros((128, 128), np.float32); w2p[:L1, :L2] = f2w.T
    w3p = np.zeros((128, 128), np.float32); w3p[:L2, :10] = f3w.T

    b1row = np.zeros((1, 128), np.float32)
    b1row[0, :112] = np.tile(np.concatenate([b1, np.zeros(2, np.float32)]), 14)
    b2row = np.zeros((1, 128), np.float32)
    b2row[0, :80] = np.tile(b2, 5)
    bf1 = np.zeros((1, 128), np.float32); bf1[0, :L1] = f1b
    bf2 = np.zeros((1, 128), np.float32); bf2[0, :L2] = f2b
    bf3 = np.zeros((1, 128), np.float32); bf3[0, :10] = f3b

    return {
        "cb1": jnp.asarray(cb1, mm_dtype), "b1": jnp.asarray(b1row, jnp.float32),
        "cb2": jnp.asarray(cb2, mm_dtype), "b2": jnp.asarray(b2row, jnp.float32),
        "w1h": jnp.asarray(w1h, mm_dtype), "bf1": jnp.asarray(bf1, jnp.float32),
        "w2": jnp.asarray(w2p, mm_dtype), "bf2": jnp.asarray(bf2, jnp.float32),
        "w3": jnp.asarray(w3p, mm_dtype), "bf3": jnp.asarray(bf3, jnp.float32),
    }


# ----------------------------------------------------------------------------
# Forward pass (matches Net.forward semantics)
# ----------------------------------------------------------------------------
@jax.jit
def net_forward(x_nchw, packed):
    B = x_nchw.shape[0]
    bt = B_TILE if B >= B_TILE else ((B + 7) // 8) * 8   # multiple of 8
    nb = -(-B // bt)
    Bp = nb * bt
    m1, m2 = 7 * bt, 5 * bt

    # Single fused relayout: NCHW -> NHWC -> bf16 -> (B,32,96) -> per-row-
    # offset slabs (8, 7 rows each) -> batch-inner (row = s*bt + b).
    x = jnp.transpose(x_nchw, (0, 2, 3, 1)).astype(jnp.bfloat16).reshape(B, 32, 96)
    if Bp != B:
        x = jnp.pad(x, ((0, Bp - B), (0, 0), (0, 0)))
    row_idx = jnp.arange(8)[:, None] + 4 * jnp.arange(7)[None, :]   # (8, 7)
    xp = x[:, row_idx, :]                                           # (Bp,8,7,96)
    xp = xp.reshape(nb, bt, 8, 7, 96).transpose(0, 2, 3, 1, 4)      # (nb,8,7,bt,96)
    xp = xp.reshape(nb, 8, m1, 96)

    wbytes = 2 * (5 * 96 * 256 + 5 * 128 * 256 + 5 * 128 * 128 + 2 * 128 * 128) \
        + 5 * 128 * 4
    flops_per_step = 2 * (20 * m1 * 96 * 256 + 10 * m2 * 128 * 256
                          + 7 * bt * 128 * 128)
    bytes_per_step = 8 * m1 * 96 * 2 + wbytes + bt * 128 * 4

    out = pl.pallas_call(
        lenet_fused_kernel,
        out_shape=jax.ShapeDtypeStruct((Bp, 128), jnp.float32),
        grid=(nb,),
        in_specs=[
            pl.BlockSpec((None, 8, m1, 96), lambda i: (i, 0, 0, 0)),  # images
            pl.BlockSpec((5, 96, 256), lambda i: (0, 0, 0)),          # conv1 bands
            pl.BlockSpec((1, 128), lambda i: (0, 0)),                 # conv1 bias
            pl.BlockSpec((5, 128, 256), lambda i: (0, 0, 0)),         # conv2 bands
            pl.BlockSpec((1, 128), lambda i: (0, 0)),                 # conv2 bias
            pl.BlockSpec((5, 128, 128), lambda i: (0, 0, 0)),         # fc1 packed
            pl.BlockSpec((1, 128), lambda i: (0, 0)),                 # fc1 bias
            pl.BlockSpec((128, 128), lambda i: (0, 0)),               # fc2
            pl.BlockSpec((1, 128), lambda i: (0, 0)),                 # fc2 bias
            pl.BlockSpec((128, 128), lambda i: (0, 0)),               # fc3
            pl.BlockSpec((1, 128), lambda i: (0, 0)),                 # fc3 bias
        ],
        out_specs=pl.BlockSpec((bt, 128), lambda i: (i, 0)),
        scratch_shapes=[
            pltpu.VMEM((2, m1, 128), jnp.bfloat16),   # pooled conv1 (parity split)
            pltpu.VMEM((m2, 128), jnp.bfloat16),      # pooled conv2
        ],
        compiler_params=pltpu.CompilerParams(
            dimension_semantics=("parallel",)),
        cost_estimate=pl.CostEstimate(
            flops=nb * flops_per_step, transcendentals=0,
            bytes_accessed=nb * bytes_per_step),
    )(xp, packed["cb1"], packed["b1"], packed["cb2"], packed["b2"],
      packed["w1h"], packed["bf1"], packed["w2"], packed["bf2"],
      packed["w3"], packed["bf3"])

    return out[:B, :10]                                              # (B, 10)


# ----------------------------------------------------------------------------
# Pure-JAX f32 reference (PyTorch semantics) for correctness checking.
# ----------------------------------------------------------------------------
def reference_forward(x, params):
    def conv(x, w, b):
        y = lax.conv_general_dilated(x, w, (1, 1), "VALID",
                                     dimension_numbers=("NCHW", "OIHW", "NCHW"))
        return y + b[None, :, None, None]

    def pool(x):
        return lax.reduce_window(x, -jnp.inf, lax.max,
                                 (1, 1, 2, 2), (1, 1, 2, 2), "VALID")

    x = pool(jax.nn.relu(conv(x, params["conv1_w"], params["conv1_b"])))
    x = pool(jax.nn.relu(conv(x, params["conv2_w"], params["conv2_b"])))
    x = x.reshape(x.shape[0], -1)                       # NCHW flatten (c,h,w)
    x = jax.nn.relu(x @ params["fc1_w"].T + params["fc1_b"])
    x = jax.nn.relu(x @ params["fc2_w"].T + params["fc2_b"])
    return x @ params["fc3_w"].T + params["fc3_b"]


if __name__ == "__main__":
    key = jax.random.PRNGKey(0)
    k_params, k_x = jax.random.split(key)

    params = init_params(k_params)
    packed = pack_params(params)             # one-time weight packing

    # CIFAR-like input: spatial size 32 so the flatten is exactly 16*5*5.
    # B=48 exercises multiple grid steps (2 x B_TILE=32 tiles) + tail padding.
    x = jax.random.normal(k_x, (48, 3, 32, 32), dtype=jnp.float32)

    logits = net_forward(x, packed)
    jax.block_until_ready(logits)
    assert logits.shape == (48, 10), logits.shape

    ref = reference_forward(x, params)
    err = float(jnp.max(jnp.abs(logits - ref)))
    assert err < 5e-2, f"max|kernel - reference| too large: {err}"

    print("KERNEL_OK")
</pallas_src>

<mosaic_0001>
module attributes {stable_mosaic.version = 11 : i64} {
  func.func @lenet_fused_kernel(%arg0: i32, %arg1: memref<1x8x224x96xbf16, #tpu.memory_space<vmem>>, %arg2: memref<5x96x256xbf16, #tpu.memory_space<vmem>>, %arg3: memref<1x128xf32, #tpu.memory_space<vmem>>, %arg4: memref<5x128x256xbf16, #tpu.memory_space<vmem>>, %arg5: memref<1x128xf32, #tpu.memory_space<vmem>>, %arg6: memref<5x128x128xbf16, #tpu.memory_space<vmem>>, %arg7: memref<1x128xf32, #tpu.memory_space<vmem>>, %arg8: memref<128x128xbf16, #tpu.memory_space<vmem>>, %arg9: memref<1x128xf32, #tpu.memory_space<vmem>>, %arg10: memref<128x128xbf16, #tpu.memory_space<vmem>>, %arg11: memref<1x128xf32, #tpu.memory_space<vmem>>, %arg12: memref<32x128xf32, #tpu.memory_space<vmem>>, %arg13: memref<2x224x128xbf16, #tpu.memory_space<vmem>>, %arg14: memref<160x128xbf16, #tpu.memory_space<vmem>>) attributes {dimension_semantics = [#tpu.dimension_semantics<parallel>], iteration_bounds = array<i64: 2>, scalar_prefetch = 0 : i64, scratch_operands = 2 : i64, tpu.core_type = #tpu.core_type<tc>, window_params = [{transform_indices = @transform_0, window_bounds = array<i64: 1, 8, 224, 96>}, {pipeline_mode = #tpu.pipeline_mode<synchronous>, transform_indices = @transform_1, window_bounds = array<i64: 5, 96, 256>}, {pipeline_mode = #tpu.pipeline_mode<synchronous>, transform_indices = @transform_2, window_bounds = array<i64: 1, 128>}, {pipeline_mode = #tpu.pipeline_mode<synchronous>, transform_indices = @transform_3, window_bounds = array<i64: 5, 128, 256>}, {pipeline_mode = #tpu.pipeline_mode<synchronous>, transform_indices = @transform_4, window_bounds = array<i64: 1, 128>}, {pipeline_mode = #tpu.pipeline_mode<synchronous>, transform_indices = @transform_5, window_bounds = array<i64: 5, 128, 128>}, {pipeline_mode = #tpu.pipeline_mode<synchronous>, transform_indices = @transform_6, window_bounds = array<i64: 1, 128>}, {pipeline_mode = #tpu.pipeline_mode<synchronous>, transform_indices = @transform_7, window_bounds = array<i64: 128, 128>}, {pipeline_mode = #tpu.pipeline_mode<synchronous>, transform_indices = @transform_8, window_bounds = array<i64: 1, 128>}, {pipeline_mode = #tpu.pipeline_mode<synchronous>, transform_indices = @transform_9, window_bounds = array<i64: 128, 128>}, {pipeline_mode = #tpu.pipeline_mode<synchronous>, transform_indices = @transform_10, window_bounds = array<i64: 1, 128>}, {transform_indices = @transform_11, window_bounds = array<i64: 32, 128>}]} {
    %c0 = arith.constant 0 : index
    %c0_0 = arith.constant 0 : index
    %0 = vector.load %arg3[%c0, %c0_0] : memref<1x128xf32, #tpu.memory_space<vmem>>, vector<1x128xf32>
    %c0_1 = arith.constant 0 : index
    %c0_2 = arith.constant 0 : index
    %c0_3 = arith.constant 0 : index
    %c0_4 = arith.constant 0 : index
    %1 = vector.load %arg1[%c0_1, %c0_2, %c0_3, %c0_4] : memref<1x8x224x96xbf16, #tpu.memory_space<vmem>>, vector<1x1x224x96xbf16>
    %2 = vector.shape_cast %1 : vector<1x1x224x96xbf16> to vector<224x96xbf16>
    %c0_5 = arith.constant 0 : index
    %c0_6 = arith.constant 0 : index
    %c0_7 = arith.constant 0 : index
    %3 = vector.load %arg2[%c0_5, %c0_6, %c0_7] : memref<5x96x256xbf16, #tpu.memory_space<vmem>>, vector<1x96x256xbf16>
    %4 = vector.shape_cast %3 : vector<1x96x256xbf16> to vector<96x256xbf16>
    %cst = arith.constant dense<0.000000e+00> : vector<224x256xf32>
    %5 = tpu.matmul %2, %4, %cst {dimension_numbers = #tpu.dot_dimension_numbers<[1], [0], [0], [1], [0, 0, 1, 1], [], []>} : vector<224x96xbf16>, vector<96x256xbf16>, vector<224x256xf32> -> vector<224x256xf32>
    %c0_8 = arith.constant 0 : index
    %c1 = arith.constant 1 : index
    %c0_9 = arith.constant 0 : index
    %c0_10 = arith.constant 0 : index
    %6 = vector.load %arg1[%c0_8, %c1, %c0_9, %c0_10] : memref<1x8x224x96xbf16, #tpu.memory_space<vmem>>, vector<1x1x224x96xbf16>
    %7 = vector.shape_cast %6 : vector<1x1x224x96xbf16> to vector<224x96xbf16>
    %c1_11 = arith.constant 1 : index
    %c0_12 = arith.constant 0 : index
    %c0_13 = arith.constant 0 : index
    %8 = vector.load %arg2[%c1_11, %c0_12, %c0_13] : memref<5x96x256xbf16, #tpu.memory_space<vmem>>, vector<1x96x256xbf16>
    %9 = vector.shape_cast %8 : vector<1x96x256xbf16> to vector<96x256xbf16>
    %cst_14 = arith.constant dense<0.000000e+00> : vector<224x256xf32>
    %10 = tpu.matmul %7, %9, %cst_14 {dimension_numbers = #tpu.dot_dimension_numbers<[1], [0], [0], [1], [0, 0, 1, 1], [], []>} : vector<224x96xbf16>, vector<96x256xbf16>, vector<224x256xf32> -> vector<224x256xf32>
    %11 = arith.addf %5, %10 : vector<224x256xf32>
    %c0_15 = arith.constant 0 : index
    %c2 = arith.constant 2 : index
    %c0_16 = arith.constant 0 : index
    %c0_17 = arith.constant 0 : index
    %12 = vector.load %arg1[%c0_15, %c2, %c0_16, %c0_17] : memref<1x8x224x96xbf16, #tpu.memory_space<vmem>>, vector<1x1x224x96xbf16>
    %13 = vector.shape_cast %12 : vector<1x1x224x96xbf16> to vector<224x96xbf16>
    %c2_18 = arith.constant 2 : index
    %c0_19 = arith.constant 0 : index
    %c0_20 = arith.constant 0 : index
    %14 = vector.load %arg2[%c2_18, %c0_19, %c0_20] : memref<5x96x256xbf16, #tpu.memory_space<vmem>>, vector<1x96x256xbf16>
    %15 = vector.shape_cast %14 : vector<1x96x256xbf16> to vector<96x256xbf16>
    %cst_21 = arith.constant dense<0.000000e+00> : vector<224x256xf32>
    %16 = tpu.matmul %13, %15, %cst_21 {dimension_numbers = #tpu.dot_dimension_numbers<[1], [0], [0], [1], [0, 0, 1, 1], [], []>} : vector<224x96xbf16>, vector<96x256xbf16>, vector<224x256xf32> -> vector<224x256xf32>
    %17 = arith.addf %11, %16 : vector<224x256xf32>
    %c0_22 = arith.constant 0 : index
    %c3 = arith.constant 3 : index
    %c0_23 = arith.constant 0 : index
    %c0_24 = arith.constant 0 : index
    %18 = vector.load %arg1[%c0_22, %c3, %c0_23, %c0_24] : memref<1x8x224x96xbf16, #tpu.memory_space<vmem>>, vector<1x1x224x96xbf16>
    %19 = vector.shape_cast %18 : vector<1x1x224x96xbf16> to vector<224x96xbf16>
    %c3_25 = arith.constant 3 : index
    %c0_26 = arith.constant 0 : index
    %c0_27 = arith.constant 0 : index
    %20 = vector.load %arg2[%c3_25, %c0_26, %c0_27] : memref<5x96x256xbf16, #tpu.memory_space<vmem>>, vector<1x96x256xbf16>
    %21 = vector.shape_cast %20 : vector<1x96x256xbf16> to vector<96x256xbf16>
    %cst_28 = arith.constant dense<0.000000e+00> : vector<224x256xf32>
    %22 = tpu.matmul %19, %21, %cst_28 {dimension_numbers = #tpu.dot_dimension_numbers<[1], [0], [0], [1], [0, 0, 1, 1], [], []>} : vector<224x96xbf16>, vector<96x256xbf16>, vector<224x256xf32> -> vector<224x256xf32>
    %23 = arith.addf %17, %22 : vector<224x256xf32>
    %c0_29 = arith.constant 0 : index
    %c4 = arith.constant 4 : index
    %c0_30 = arith.constant 0 : index
    %c0_31 = arith.constant 0 : index
    %24 = vector.load %arg1[%c0_29, %c4, %c0_30, %c0_31] : memref<1x8x224x96xbf16, #tpu.memory_space<vmem>>, vector<1x1x224x96xbf16>
    %25 = vector.shape_cast %24 : vector<1x1x224x96xbf16> to vector<224x96xbf16>
    %c4_32 = arith.constant 4 : index
    %c0_33 = arith.constant 0 : index
    %c0_34 = arith.constant 0 : index
    %26 = vector.load %arg2[%c4_32, %c0_33, %c0_34] : memref<5x96x256xbf16, #tpu.memory_space<vmem>>, vector<1x96x256xbf16>
    %27 = vector.shape_cast %26 : vector<1x96x256xbf16> to vector<96x256xbf16>
    %cst_35 = arith.constant dense<0.000000e+00> : vector<224x256xf32>
    %28 = tpu.matmul %25, %27, %cst_35 {dimension_numbers = #tpu.dot_dimension_numbers<[1], [0], [0], [1], [0, 0, 1, 1], [], []>} : vector<224x96xbf16>, vector<96x256xbf16>, vector<224x256xf32> -> vector<224x256xf32>
    %29 = arith.addf %23, %28 : vector<224x256xf32>
    %30 = vector.extract_strided_slice %29 {offsets = [0, 0], sizes = [224, 128], strides = [1, 1]} : vector<224x256xf32> to vector<224x128xf32>
    %31 = vector.extract_strided_slice %29 {offsets = [0, 128], sizes = [224, 128], strides = [1, 1]} : vector<224x256xf32> to vector<224x128xf32>
    %32 = arith.maximumf %30, %31 : vector<224x128xf32>
    %c0_36 = arith.constant 0 : index
    %c1_37 = arith.constant 1 : index
    %c0_38 = arith.constant 0 : index
    %c0_39 = arith.constant 0 : index
    %33 = vector.load %arg1[%c0_36, %c1_37, %c0_38, %c0_39] : memref<1x8x224x96xbf16, #tpu.memory_space<vmem>>, vector<1x1x224x96xbf16>
    %34 = vector.shape_cast %33 : vector<1x1x224x96xbf16> to vector<224x96xbf16>
    %c0_40 = arith.constant 0 : index
    %c0_41 = arith.constant 0 : index
    %c0_42 = arith.constant 0 : index
    %35 = vector.load %arg2[%c0_40, %c0_41, %c0_42] : memref<5x96x256xbf16, #tpu.memory_space<vmem>>, vector<1x96x256xbf16>
    %36 = vector.shape_cast %35 : vector<1x96x256xbf16> to vector<96x256xbf16>
    %cst_43 = arith.constant dense<0.000000e+00> : vector<224x256xf32>
    %37 = tpu.matmul %34, %36, %cst_43 {dimension_numbers = #tpu.dot_dimension_numbers<[1], [0], [0], [1], [0, 0, 1, 1], [], []>} : vector<224x96xbf16>, vector<96x256xbf16>, vector<224x256xf32> -> vector<224x256xf32>
    %c0_44 = arith.constant 0 : index
    %c2_45 = arith.constant 2 : index
    %c0_46 = arith.constant 0 : index
    %c0_47 = arith.constant 0 : index
    %38 = vector.load %arg1[%c0_44, %c2_45, %c0_46, %c0_47] : memref<1x8x224x96xbf16, #tpu.memory_space<vmem>>, vector<1x1x224x96xbf16>
    %39 = vector.shape_cast %38 : vector<1x1x224x96xbf16> to vector<224x96xbf16>
    %c1_48 = arith.constant 1 : index
    %c0_49 = arith.constant 0 : index
    %c0_50 = arith.constant 0 : index
    %40 = vector.load %arg2[%c1_48, %c0_49, %c0_50] : memref<5x96x256xbf16, #tpu.memory_space<vmem>>, vector<1x96x256xbf16>
    %41 = vector.shape_cast %40 : vector<1x96x256xbf16> to vector<96x256xbf16>
    %cst_51 = arith.constant dense<0.000000e+00> : vector<224x256xf32>
    %42 = tpu.matmul %39, %41, %cst_51 {dimension_numbers = #tpu.dot_dimension_numbers<[1], [0], [0], [1], [0, 0, 1, 1], [], []>} : vector<224x96xbf16>, vector<96x256xbf16>, vector<224x256xf32> -> vector<224x256xf32>
    %43 = arith.addf %37, %42 : vector<224x256xf32>
    %c0_52 = arith.constant 0 : index
    %c3_53 = arith.constant 3 : index
    %c0_54 = arith.constant 0 : index
    %c0_55 = arith.constant 0 : index
    %44 = vector.load %arg1[%c0_52, %c3_53, %c0_54, %c0_55] : memref<1x8x224x96xbf16, #tpu.memory_space<vmem>>, vector<1x1x224x96xbf16>
    %45 = vector.shape_cast %44 : vector<1x1x224x96xbf16> to vector<224x96xbf16>
    %c2_56 = arith.constant 2 : index
    %c0_57 = arith.constant 0 : index
    %c0_58 = arith.constant 0 : index
    %46 = vector.load %arg2[%c2_56, %c0_57, %c0_58] : memref<5x96x256xbf16, #tpu.memory_space<vmem>>, vector<1x96x256xbf16>
    %47 = vector.shape_cast %46 : vector<1x96x256xbf16> to vector<96x256xbf16>
    %cst_59 = arith.constant dense<0.000000e+00> : vector<224x256xf32>
    %48 = tpu.matmul %45, %47, %cst_59 {dimension_numbers = #tpu.dot_dimension_numbers<[1], [0], [0], [1], [0, 0, 1, 1], [], []>} : vector<224x96xbf16>, vector<96x256xbf16>, vector<224x256xf32> -> vector<224x256xf32>
    %49 = arith.addf %43, %48 : vector<224x256xf32>
    %c0_60 = arith.constant 0 : index
    %c4_61 = arith.constant 4 : index
    %c0_62 = arith.constant 0 : index
    %c0_63 = arith.constant 0 : index
    %50 = vector.load %arg1[%c0_60, %c4_61, %c0_62, %c0_63] : memref<1x8x224x96xbf16, #tpu.memory_space<vmem>>, vector<1x1x224x96xbf16>
    %51 = vector.shape_cast %50 : vector<1x1x224x96xbf16> to vector<224x96xbf16>
    %c3_64 = arith.constant 3 : index
    %c0_65 = arith.constant 0 : index
    %c0_66 = arith.constant 0 : index
    %52 = vector.load %arg2[%c3_64, %c0_65, %c0_66] : memref<5x96x256xbf16, #tpu.memory_space<vmem>>, vector<1x96x256xbf16>
    %53 = vector.shape_cast %52 : vector<1x96x256xbf16> to vector<96x256xbf16>
    %cst_67 = arith.constant dense<0.000000e+00> : vector<224x256xf32>
    %54 = tpu.matmul %51, %53, %cst_67 {dimension_numbers = #tpu.dot_dimension_numbers<[1], [0], [0], [1], [0, 0, 1, 1], [], []>} : vector<224x96xbf16>, vector<96x256xbf16>, vector<224x256xf32> -> vector<224x256xf32>
    %55 = arith.addf %49, %54 : vector<224x256xf32>
    %c0_68 = arith.constant 0 : index
    %c5 = arith.constant 5 : index
    %c0_69 = arith.constant 0 : index
    %c0_70 = arith.constant 0 : index
    %56 = vector.load %arg1[%c0_68, %c5, %c0_69, %c0_70] : memref<1x8x224x96xbf16, #tpu.memory_space<vmem>>, vector<1x1x224x96xbf16>
    %57 = vector.shape_cast %56 : vector<1x1x224x96xbf16> to vector<224x96xbf16>
    %c4_71 = arith.constant 4 : index
    %c0_72 = arith.constant 0 : index
    %c0_73 = arith.constant 0 : index
    %58 = vector.load %arg2[%c4_71, %c0_72, %c0_73] : memref<5x96x256xbf16, #tpu.memory_space<vmem>>, vector<1x96x256xbf16>
    %59 = vector.shape_cast %58 : vector<1x96x256xbf16> to vector<96x256xbf16>
    %cst_74 = arith.constant dense<0.000000e+00> : vector<224x256xf32>
    %60 = tpu.matmul %57, %59, %cst_74 {dimension_numbers = #tpu.dot_dimension_numbers<[1], [0], [0], [1], [0, 0, 1, 1], [], []>} : vector<224x96xbf16>, vector<96x256xbf16>, vector<224x256xf32> -> vector<224x256xf32>
    %61 = arith.addf %55, %60 : vector<224x256xf32>
    %62 = vector.extract_strided_slice %61 {offsets = [0, 0], sizes = [224, 128], strides = [1, 1]} : vector<224x256xf32> to vector<224x128xf32>
    %63 = vector.extract_strided_slice %61 {offsets = [0, 128], sizes = [224, 128], strides = [1, 1]} : vector<224x256xf32> to vector<224x128xf32>
    %64 = arith.maximumf %62, %63 : vector<224x128xf32>
    %65 = arith.maximumf %32, %64 : vector<224x128xf32>
    %66 = vector.broadcast %0 : vector<1x128xf32> to vector<224x128xf32>
    %67 = arith.addf %65, %66 : vector<224x128xf32>
    %cst_75 = arith.constant 0.000000e+00 : f32
    %68 = vector.broadcast %cst_75 : f32 to vector<224x128xf32>
    %69 = arith.maximumf %67, %68 : vector<224x128xf32>
    %70 = arith.truncf %69 : vector<224x128xf32> to vector<224x128xbf16>
    %c0_76 = arith.constant 0 : index
    %c0_77 = arith.constant 0 : index
    %c0_78 = arith.constant 0 : index
    %71 = vector.load %arg13[%c0_76, %c0_77, %c0_78] : memref<2x224x128xbf16, #tpu.memory_space<vmem>>, vector<1x224x128xbf16>
    %72 = vector.shape_cast %71 : vector<1x224x128xbf16> to vector<224x128xbf16>
    %73 = vector.shape_cast %70 : vector<224x128xbf16> to vector<1x224x128xbf16>
    tpu.vector_store %arg13[%c0_76, %c0_77, %c0_78], %73 {strides = array<i32>} : memref<2x224x128xbf16, #tpu.memory_space<vmem>>, vector<1x224x128xbf16>,
    %c0_79 = arith.constant 0 : index
    %c2_80 = arith.constant 2 : index
    %c0_81 = arith.constant 0 : index
    %c0_82 = arith.constant 0 : index
    %74 = vector.load %arg1[%c0_79, %c2_80, %c0_81, %c0_82] : memref<1x8x224x96xbf16, #tpu.memory_space<vmem>>, vector<1x1x224x96xbf16>
    %75 = vector.shape_cast %74 : vector<1x1x224x96xbf16> to vector<224x96xbf16>
    %c0_83 = arith.constant 0 : index
    %c0_84 = arith.constant 0 : index
    %c0_85 = arith.constant 0 : index
    %76 = vector.load %arg2[%c0_83, %c0_84, %c0_85] : memref<5x96x256xbf16, #tpu.memory_space<vmem>>, vector<1x96x256xbf16>
    %77 = vector.shape_cast %76 : vector<1x96x256xbf16> to vector<96x256xbf16>
    %cst_86 = arith.constant dense<0.000000e+00> : vector<224x256xf32>
    %78 = tpu.matmul %75, %77, %cst_86 {dimension_numbers = #tpu.dot_dimension_numbers<[1], [0], [0], [1], [0, 0, 1, 1], [], []>} : vector<224x96xbf16>, vector<96x256xbf16>, vector<224x256xf32> -> vector<224x256xf32>
    %c0_87 = arith.constant 0 : index
    %c3_88 = arith.constant 3 : index
    %c0_89 = arith.constant 0 : index
    %c0_90 = arith.constant 0 : index
    %79 = vector.load %arg1[%c0_87, %c3_88, %c0_89, %c0_90] : memref<1x8x224x96xbf16, #tpu.memory_space<vmem>>, vector<1x1x224x96xbf16>
    %80 = vector.shape_cast %79 : vector<1x1x224x96xbf16> to vector<224x96xbf16>
    %c1_91 = arith.constant 1 : index
    %c0_92 = arith.constant 0 : index
    %c0_93 = arith.constant 0 : index
    %81 = vector.load %arg2[%c1_91, %c0_92, %c0_93] : memref<5x96x256xbf16, #tpu.memory_space<vmem>>, vector<1x96x256xbf16>
    %82 = vector.shape_cast %81 : vector<1x96x256xbf16> to vector<96x256xbf16>
    %cst_94 = arith.constant dense<0.000000e+00> : vector<224x256xf32>
    %83 = tpu.matmul %80, %82, %cst_94 {dimension_numbers = #tpu.dot_dimension_numbers<[1], [0], [0], [1], [0, 0, 1, 1], [], []>} : vector<224x96xbf16>, vector<96x256xbf16>, vector<224x256xf32> -> vector<224x256xf32>
    %84 = arith.addf %78, %83 : vector<224x256xf32>
    %c0_95 = arith.constant 0 : index
    %c4_96 = arith.constant 4 : index
    %c0_97 = arith.constant 0 : index
    %c0_98 = arith.constant 0 : index
    %85 = vector.load %arg1[%c0_95, %c4_96, %c0_97, %c0_98] : memref<1x8x224x96xbf16, #tpu.memory_space<vmem>>, vector<1x1x224x96xbf16>
    %86 = vector.shape_cast %85 : vector<1x1x224x96xbf16> to vector<224x96xbf16>
    %c2_99 = arith.constant 2 : index
    %c0_100 = arith.constant 0 : index
    %c0_101 = arith.constant 0 : index
    %87 = vector.load %arg2[%c2_99, %c0_100, %c0_101] : memref<5x96x256xbf16, #tpu.memory_space<vmem>>, vector<1x96x256xbf16>
    %88 = vector.shape_cast %87 : vector<1x96x256xbf16> to vector<96x256xbf16>
    %cst_102 = arith.constant dense<0.000000e+00> : vector<224x256xf32>
    %89 = tpu.matmul %86, %88, %cst_102 {dimension_numbers = #tpu.dot_dimension_numbers<[1], [0], [0], [1], [0, 0, 1, 1], [], []>} : vector<224x96xbf16>, vector<96x256xbf16>, vector<224x256xf32> -> vector<224x256xf32>
    %90 = arith.addf %84, %89 : vector<224x256xf32>
    %c0_103 = arith.constant 0 : index
    %c5_104 = arith.constant 5 : index
    %c0_105 = arith.constant 0 : index
    %c0_106 = arith.constant 0 : index
    %91 = vector.load %arg1[%c0_103, %c5_104, %c0_105, %c0_106] : memref<1x8x224x96xbf16, #tpu.memory_space<vmem>>, vector<1x1x224x96xbf16>
    %92 = vector.shape_cast %91 : vector<1x1x224x96xbf16> to vector<224x96xbf16>
    %c3_107 = arith.constant 3 : index
    %c0_108 = arith.constant 0 : index
    %c0_109 = arith.constant 0 : index
    %93 = vector.load %arg2[%c3_107, %c0_108, %c0_109] : memref<5x96x256xbf16, #tpu.memory_space<vmem>>, vector<1x96x256xbf16>
    %94 = vector.shape_cast %93 : vector<1x96x256xbf16> to vector<96x256xbf16>
    %cst_110 = arith.constant dense<0.000000e+00> : vector<224x256xf32>
    %95 = tpu.matmul %92, %94, %cst_110 {dimension_numbers = #tpu.dot_dimension_numbers<[1], [0], [0], [1], [0, 0, 1, 1], [], []>} : vector<224x96xbf16>, vector<96x256xbf16>, vector<224x256xf32> -> vector<224x256xf32>
    %96 = arith.addf %90, %95 : vector<224x256xf32>
    %c0_111 = arith.constant 0 : index
    %c6 = arith.constant 6 : index
    %c0_112 = arith.constant 0 : index
    %c0_113 = arith.constant 0 : index
    %97 = vector.load %arg1[%c0_111, %c6, %c0_112, %c0_113] : memref<1x8x224x96xbf16, #tpu.memory_space<vmem>>, vector<1x1x224x96xbf16>
    %98 = vector.shape_cast %97 : vector<1x1x224x96xbf16> to vector<224x96xbf16>
    %c4_114 = arith.constant 4 : index
    %c0_115 = arith.constant 0 : index
    %c0_116 = arith.constant 0 : index
    %99 = vector.load %arg2[%c4_114, %c0_115, %c0_116] : memref<5x96x256xbf16, #tpu.memory_space<vmem>>, vector<1x96x256xbf16>
    %100 = vector.shape_cast %99 : vector<1x96x256xbf16> to vector<96x256xbf16>
    %cst_117 = arith.constant dense<0.000000e+00> : vector<224x256xf32>
    %101 = tpu.matmul %98, %100, %cst_117 {dimension_numbers = #tpu.dot_dimension_numbers<[1], [0], [0], [1], [0, 0, 1, 1], [], []>} : vector<224x96xbf16>, vector<96x256xbf16>, vector<224x256xf32> -> vector<224x256xf32>
    %102 = arith.addf %96, %101 : vector<224x256xf32>
    %103 = vector.extract_strided_slice %102 {offsets = [0, 0], sizes = [224, 128], strides = [1, 1]} : vector<224x256xf32> to vector<224x128xf32>
    %104 = vector.extract_strided_slice %102 {offsets = [0, 128], sizes = [224, 128], strides = [1, 1]} : vector<224x256xf32> to vector<224x128xf32>
    %105 = arith.maximumf %103, %104 : vector<224x128xf32>
    %c0_118 = arith.constant 0 : index
    %c3_119 = arith.constant 3 : index
    %c0_120 = arith.constant 0 : index
    %c0_121 = arith.constant 0 : index
    %106 = vector.load %arg1[%c0_118, %c3_119, %c0_120, %c0_121] : memref<1x8x224x96xbf16, #tpu.memory_space<vmem>>, vector<1x1x224x96xbf16>
    %107 = vector.shape_cast %106 : vector<1x1x224x96xbf16> to vector<224x96xbf16>
    %c0_122 = arith.constant 0 : index
    %c0_123 = arith.constant 0 : index
    %c0_124 = arith.constant 0 : index
    %108 = vector.load %arg2[%c0_122, %c0_123, %c0_124] : memref<5x96x256xbf16, #tpu.memory_space<vmem>>, vector<1x96x256xbf16>
    %109 = vector.shape_cast %108 : vector<1x96x256xbf16> to vector<96x256xbf16>
    %cst_125 = arith.constant dense<0.000000e+00> : vector<224x256xf32>
    %110 = tpu.matmul %107, %109, %cst_125 {dimension_numbers = #tpu.dot_dimension_numbers<[1], [0], [0], [1], [0, 0, 1, 1], [], []>} : vector<224x96xbf16>, vector<96x256xbf16>, vector<224x256xf32> -> vector<224x256xf32>
    %c0_126 = arith.constant 0 : index
    %c4_127 = arith.constant 4 : index
    %c0_128 = arith.constant 0 : index
    %c0_129 = arith.constant 0 : index
    %111 = vector.load %arg1[%c0_126, %c4_127, %c0_128, %c0_129] : memref<1x8x224x96xbf16, #tpu.memory_space<vmem>>, vector<1x1x224x96xbf16>
    %112 = vector.shape_cast %111 : vector<1x1x224x96xbf16> to vector<224x96xbf16>
    %c1_130 = arith.constant 1 : index
    %c0_131 = arith.constant 0 : index
    %c0_132 = arith.constant 0 : index
    %113 = vector.load %arg2[%c1_130, %c0_131, %c0_132] : memref<5x96x256xbf16, #tpu.memory_space<vmem>>, vector<1x96x256xbf16>
    %114 = vector.shape_cast %113 : vector<1x96x256xbf16> to vector<96x256xbf16>
    %cst_133 = arith.constant dense<0.000000e+00> : vector<224x256xf32>
    %115 = tpu.matmul %112, %114, %cst_133 {dimension_numbers = #tpu.dot_dimension_numbers<[1], [0], [0], [1], [0, 0, 1, 1], [], []>} : vector<224x96xbf16>, vector<96x256xbf16>, vector<224x256xf32> -> vector<224x256xf32>
    %116 = arith.addf %110, %115 : vector<224x256xf32>
    %c0_134 = arith.constant 0 : index
    %c5_135 = arith.constant 5 : index
    %c0_136 = arith.constant 0 : index
    %c0_137 = arith.constant 0 : index
    %117 = vector.load %arg1[%c0_134, %c5_135, %c0_136, %c0_137] : memref<1x8x224x96xbf16, #tpu.memory_space<vmem>>, vector<1x1x224x96xbf16>
    %118 = vector.shape_cast %117 : vector<1x1x224x96xbf16> to vector<224x96xbf16>
    %c2_138 = arith.constant 2 : index
    %c0_139 = arith.constant 0 : index
    %c0_140 = arith.constant 0 : index
    %119 = vector.load %arg2[%c2_138, %c0_139, %c0_140] : memref<5x96x256xbf16, #tpu.memory_space<vmem>>, vector<1x96x256xbf16>
    %120 = vector.shape_cast %119 : vector<1x96x256xbf16> to vector<96x256xbf16>
    %cst_141 = arith.constant dense<0.000000e+00> : vector<224x256xf32>
    %121 = tpu.matmul %118, %120, %cst_141 {dimension_numbers = #tpu.dot_dimension_numbers<[1], [0], [0], [1], [0, 0, 1, 1], [], []>} : vector<224x96xbf16>, vector<96x256xbf16>, vector<224x256xf32> -> vector<224x256xf32>
    %122 = arith.addf %116, %121 : vector<224x256xf32>
    %c0_142 = arith.constant 0 : index
    %c6_143 = arith.constant 6 : index
    %c0_144 = arith.constant 0 : index
    %c0_145 = arith.constant 0 : index
    %123 = vector.load %arg1[%c0_142, %c6_143, %c0_144, %c0_145] : memref<1x8x224x96xbf16, #tpu.memory_space<vmem>>, vector<1x1x224x96xbf16>
    %124 = vector.shape_cast %123 : vector<1x1x224x96xbf16> to vector<224x96xbf16>
    %c3_146 = arith.constant 3 : index
    %c0_147 = arith.constant 0 : index
    %c0_148 = arith.constant 0 : index
    %125 = vector.load %arg2[%c3_146, %c0_147, %c0_148] : memref<5x96x256xbf16, #tpu.memory_space<vmem>>, vector<1x96x256xbf16>
    %126 = vector.shape_cast %125 : vector<1x96x256xbf16> to vector<96x256xbf16>
    %cst_149 = arith.constant dense<0.000000e+00> : vector<224x256xf32>
    %127 = tpu.matmul %124, %126, %cst_149 {dimension_numbers = #tpu.dot_dimension_numbers<[1], [0], [0], [1], [0, 0, 1, 1], [], []>} : vector<224x96xbf16>, vector<96x256xbf16>, vector<224x256xf32> -> vector<224x256xf32>
    %128 = arith.addf %122, %127 : vector<224x256xf32>
    %c0_150 = arith.constant 0 : index
    %c7 = arith.constant 7 : index
    %c0_151 = arith.constant 0 : index
    %c0_152 = arith.constant 0 : index
    %129 = vector.load %arg1[%c0_150, %c7, %c0_151, %c0_152] : memref<1x8x224x96xbf16, #tpu.memory_space<vmem>>, vector<1x1x224x96xbf16>
    %130 = vector.shape_cast %129 : vector<1x1x224x96xbf16> to vector<224x96xbf16>
    %c4_153 = arith.constant 4 : index
    %c0_154 = arith.constant 0 : index
    %c0_155 = arith.constant 0 : index
    %131 = vector.load %arg2[%c4_153, %c0_154, %c0_155] : memref<5x96x256xbf16, #tpu.memory_space<vmem>>, vector<1x96x256xbf16>
    %132 = vector.shape_cast %131 : vector<1x96x256xbf16> to vector<96x256xbf16>
    %cst_156 = arith.constant dense<0.000000e+00> : vector<224x256xf32>
    %133 = tpu.matmul %130, %132, %cst_156 {dimension_numbers = #tpu.dot_dimension_numbers<[1], [0], [0], [1], [0, 0, 1, 1], [], []>} : vector<224x96xbf16>, vector<96x256xbf16>, vector<224x256xf32> -> vector<224x256xf32>
    %134 = arith.addf %128, %133 : vector<224x256xf32>
    %135 = vector.extract_strided_slice %134 {offsets = [0, 0], sizes = [224, 128], strides = [1, 1]} : vector<224x256xf32> to vector<224x128xf32>
    %136 = vector.extract_strided_slice %134 {offsets = [0, 128], sizes = [224, 128], strides = [1, 1]} : vector<224x256xf32> to vector<224x128xf32>
    %137 = arith.maximumf %135, %136 : vector<224x128xf32>
    %138 = arith.maximumf %105, %137 : vector<224x128xf32>
    %139 = vector.broadcast %0 : vector<1x128xf32> to vector<224x128xf32>
    %140 = arith.addf %138, %139 : vector<224x128xf32>
    %cst_157 = arith.constant 0.000000e+00 : f32
    %141 = vector.broadcast %cst_157 : f32 to vector<224x128xf32>
    %142 = arith.maximumf %140, %141 : vector<224x128xf32>
    %143 = arith.truncf %142 : vector<224x128xf32> to vector<224x128xbf16>
    %c1_158 = arith.constant 1 : index
    %c0_159 = arith.constant 0 : index
    %c0_160 = arith.constant 0 : index
    %144 = vector.load %arg13[%c1_158, %c0_159, %c0_160] : memref<2x224x128xbf16, #tpu.memory_space<vmem>>, vector<1x224x128xbf16>
    %145 = vector.shape_cast %144 : vector<1x224x128xbf16> to vector<224x128xbf16>
    %146 = vector.shape_cast %143 : vector<224x128xbf16> to vector<1x224x128xbf16>
    tpu.vector_store %arg13[%c1_158, %c0_159, %c0_160], %146 {strides = array<i32>} : memref<2x224x128xbf16, #tpu.memory_space<vmem>>, vector<1x224x128xbf16>,
    %c0_161 = arith.constant 0 : index
    %c0_162 = arith.constant 0 : index
    %c0_163 = arith.constant 0 : index
    %147 = vector.load %arg13[%c0_161, %c0_162, %c0_163] : memref<2x224x128xbf16, #tpu.memory_space<vmem>>, vector<1x160x128xbf16>
    %148 = vector.shape_cast %147 : vector<1x160x128xbf16> to vector<160x128xbf16>
    %c0_164 = arith.constant 0 : index
    %c0_165 = arith.constant 0 : index
    %c0_166 = arith.constant 0 : index
    %149 = vector.load %arg4[%c0_164, %c0_165, %c0_166] : memref<5x128x256xbf16, #tpu.memory_space<vmem>>, vector<1x128x256xbf16>
    %150 = vector.shape_cast %149 : vector<1x128x256xbf16> to vector<128x256xbf16>
    %cst_167 = arith.constant dense<0.000000e+00> : vector<160x256xf32>
    %151 = tpu.matmul %148, %150, %cst_167 {dimension_numbers = #tpu.dot_dimension_numbers<[1], [0], [0], [1], [0, 0, 1, 1], [], []>} : vector<160x128xbf16>, vector<128x256xbf16>, vector<160x256xf32> -> vector<160x256xf32>
    %c1_168 = arith.constant 1 : index
    %c0_169 = arith.constant 0 : index
    %c0_170 = arith.constant 0 : index
    %152 = vector.load %arg13[%c1_168, %c0_169, %c0_170] : memref<2x224x128xbf16, #tpu.memory_space<vmem>>, vector<1x160x128xbf16>
    %153 = vector.shape_cast %152 : vector<1x160x128xbf16> to vector<160x128xbf16>
    %c1_171 = arith.constant 1 : index
    %c0_172 = arith.constant 0 : index
    %c0_173 = arith.constant 0 : index
    %154 = vector.load %arg4[%c1_171, %c0_172, %c0_173] : memref<5x128x256xbf16, #tpu.memory_space<vmem>>, vector<1x128x256xbf16>
    %155 = vector.shape_cast %154 : vector<1x128x256xbf16> to vector<128x256xbf16>
    %cst_174 = arith.constant dense<0.000000e+00> : vector<160x256xf32>
    %156 = tpu.matmul %153, %155, %cst_174 {dimension_numbers = #tpu.dot_dimension_numbers<[1], [0], [0], [1], [0, 0, 1, 1], [], []>} : vector<160x128xbf16>, vector<128x256xbf16>, vector<160x256xf32> -> vector<160x256xf32>
    %157 = arith.addf %151, %156 : vector<160x256xf32>
    %c0_175 = arith.constant 0 : index
    %c32 = arith.constant 32 : index
    %c0_176 = arith.constant 0 : index
    %158 = vector.load %arg13[%c0_175, %c32, %c0_176] : memref<2x224x128xbf16, #tpu.memory_space<vmem>>, vector<1x160x128xbf16>
    %159 = vector.shape_cast %158 : vector<1x160x128xbf16> to vector<160x128xbf16>
    %c2_177 = arith.constant 2 : index
    %c0_178 = arith.constant 0 : index
    %c0_179 = arith.constant 0 : index
    %160 = vector.load %arg4[%c2_177, %c0_178, %c0_179] : memref<5x128x256xbf16, #tpu.memory_space<vmem>>, vector<1x128x256xbf16>
    %161 = vector.shape_cast %160 : vector<1x128x256xbf16> to vector<128x256xbf16>
    %cst_180 = arith.constant dense<0.000000e+00> : vector<160x256xf32>
    %162 = tpu.matmul %159, %161, %cst_180 {dimension_numbers = #tpu.dot_dimension_numbers<[1], [0], [0], [1], [0, 0, 1, 1], [], []>} : vector<160x128xbf16>, vector<128x256xbf16>, vector<160x256xf32> -> vector<160x256xf32>
    %163 = arith.addf %157, %162 : vector<160x256xf32>
    %c1_181 = arith.constant 1 : index
    %c32_182 = arith.constant 32 : index
    %c0_183 = arith.constant 0 : index
    %164 = vector.load %arg13[%c1_181, %c32_182, %c0_183] : memref<2x224x128xbf16, #tpu.memory_space<vmem>>, vector<1x160x128xbf16>
    %165 = vector.shape_cast %164 : vector<1x160x128xbf16> to vector<160x128xbf16>
    %c3_184 = arith.constant 3 : index
    %c0_185 = arith.constant 0 : index
    %c0_186 = arith.constant 0 : index
    %166 = vector.load %arg4[%c3_184, %c0_185, %c0_186] : memref<5x128x256xbf16, #tpu.memory_space<vmem>>, vector<1x128x256xbf16>
    %167 = vector.shape_cast %166 : vector<1x128x256xbf16> to vector<128x256xbf16>
    %cst_187 = arith.constant dense<0.000000e+00> : vector<160x256xf32>
    %168 = tpu.matmul %165, %167, %cst_187 {dimension_numbers = #tpu.dot_dimension_numbers<[1], [0], [0], [1], [0, 0, 1, 1], [], []>} : vector<160x128xbf16>, vector<128x256xbf16>, vector<160x256xf32> -> vector<160x256xf32>
    %169 = arith.addf %163, %168 : vector<160x256xf32>
    %c0_188 = arith.constant 0 : index
    %c64 = arith.constant 64 : index
    %c0_189 = arith.constant 0 : index
    %170 = vector.load %arg13[%c0_188, %c64, %c0_189] : memref<2x224x128xbf16, #tpu.memory_space<vmem>>, vector<1x160x128xbf16>
    %171 = vector.shape_cast %170 : vector<1x160x128xbf16> to vector<160x128xbf16>
    %c4_190 = arith.constant 4 : index
    %c0_191 = arith.constant 0 : index
    %c0_192 = arith.constant 0 : index
    %172 = vector.load %arg4[%c4_190, %c0_191, %c0_192] : memref<5x128x256xbf16, #tpu.memory_space<vmem>>, vector<1x128x256xbf16>
    %173 = vector.shape_cast %172 : vector<1x128x256xbf16> to vector<128x256xbf16>
    %cst_193 = arith.constant dense<0.000000e+00> : vector<160x256xf32>
    %174 = tpu.matmul %171, %173, %cst_193 {dimension_numbers = #tpu.dot_dimension_numbers<[1], [0], [0], [1], [0, 0, 1, 1], [], []>} : vector<160x128xbf16>, vector<128x256xbf16>, vector<160x256xf32> -> vector<160x256xf32>
    %175 = arith.addf %169, %174 : vector<160x256xf32>
    %176 = vector.extract_strided_slice %175 {offsets = [0, 0], sizes = [160, 128], strides = [1, 1]} : vector<160x256xf32> to vector<160x128xf32>
    %177 = vector.extract_strided_slice %175 {offsets = [0, 128], sizes = [160, 128], strides = [1, 1]} : vector<160x256xf32> to vector<160x128xf32>
    %178 = arith.maximumf %176, %177 : vector<160x128xf32>
    %c1_194 = arith.constant 1 : index
    %c0_195 = arith.constant 0 : index
    %c0_196 = arith.constant 0 : index
    %179 = vector.load %arg13[%c1_194, %c0_195, %c0_196] : memref<2x224x128xbf16, #tpu.memory_space<vmem>>, vector<1x160x128xbf16>
    %180 = vector.shape_cast %179 : vector<1x160x128xbf16> to vector<160x128xbf16>
    %c0_197 = arith.constant 0 : index
    %c0_198 = arith.constant 0 : index
    %c0_199 = arith.constant 0 : index
    %181 = vector.load %arg4[%c0_197, %c0_198, %c0_199] : memref<5x128x256xbf16, #tpu.memory_space<vmem>>, vector<1x128x256xbf16>
    %182 = vector.shape_cast %181 : vector<1x128x256xbf16> to vector<128x256xbf16>
    %cst_200 = arith.constant dense<0.000000e+00> : vector<160x256xf32>
    %183 = tpu.matmul %180, %182, %cst_200 {dimension_numbers = #tpu.dot_dimension_numbers<[1], [0], [0], [1], [0, 0, 1, 1], [], []>} : vector<160x128xbf16>, vector<128x256xbf16>, vector<160x256xf32> -> vector<160x256xf32>
    %c0_201 = arith.constant 0 : index
    %c32_202 = arith.constant 32 : index
    %c0_203 = arith.constant 0 : index
    %184 = vector.load %arg13[%c0_201, %c32_202, %c0_203] : memref<2x224x128xbf16, #tpu.memory_space<vmem>>, vector<1x160x128xbf16>
    %185 = vector.shape_cast %184 : vector<1x160x128xbf16> to vector<160x128xbf16>
    %c1_204 = arith.constant 1 : index
    %c0_205 = arith.constant 0 : index
    %c0_206 = arith.constant 0 : index
    %186 = vector.load %arg4[%c1_204, %c0_205, %c0_206] : memref<5x128x256xbf16, #tpu.memory_space<vmem>>, vector<1x128x256xbf16>
    %187 = vector.shape_cast %186 : vector<1x128x256xbf16> to vector<128x256xbf16>
    %cst_207 = arith.constant dense<0.000000e+00> : vector<160x256xf32>
    %188 = tpu.matmul %185, %187, %cst_207 {dimension_numbers = #tpu.dot_dimension_numbers<[1], [0], [0], [1], [0, 0, 1, 1], [], []>} : vector<160x128xbf16>, vector<128x256xbf16>, vector<160x256xf32> -> vector<160x256xf32>
    %189 = arith.addf %183, %188 : vector<160x256xf32>
    %c1_208 = arith.constant 1 : index
    %c32_209 = arith.constant 32 : index
    %c0_210 = arith.constant 0 : index
    %190 = vector.load %arg13[%c1_208, %c32_209, %c0_210] : memref<2x224x128xbf16, #tpu.memory_space<vmem>>, vector<1x160x128xbf16>
    %191 = vector.shape_cast %190 : vector<1x160x128xbf16> to vector<160x128xbf16>
    %c2_211 = arith.constant 2 : index
    %c0_212 = arith.constant 0 : index
    %c0_213 = arith.constant 0 : index
    %192 = vector.load %arg4[%c2_211, %c0_212, %c0_213] : memref<5x128x256xbf16, #tpu.memory_space<vmem>>, vector<1x128x256xbf16>
    %193 = vector.shape_cast %192 : vector<1x128x256xbf16> to vector<128x256xbf16>
    %cst_214 = arith.constant dense<0.000000e+00> : vector<160x256xf32>
    %194 = tpu.matmul %191, %193, %cst_214 {dimension_numbers = #tpu.dot_dimension_numbers<[1], [0], [0], [1], [0, 0, 1, 1], [], []>} : vector<160x128xbf16>, vector<128x256xbf16>, vector<160x256xf32> -> vector<160x256xf32>
    %195 = arith.addf %189, %194 : vector<160x256xf32>
    %c0_215 = arith.constant 0 : index
    %c64_216 = arith.constant 64 : index
    %c0_217 = arith.constant 0 : index
    %196 = vector.load %arg13[%c0_215, %c64_216, %c0_217] : memref<2x224x128xbf16, #tpu.memory_space<vmem>>, vector<1x160x128xbf16>
    %197 = vector.shape_cast %196 : vector<1x160x128xbf16> to vector<160x128xbf16>
    %c3_218 = arith.constant 3 : index
    %c0_219 = arith.constant 0 : index
    %c0_220 = arith.constant 0 : index
    %198 = vector.load %arg4[%c3_218, %c0_219, %c0_220] : memref<5x128x256xbf16, #tpu.memory_space<vmem>>, vector<1x128x256xbf16>
    %199 = vector.shape_cast %198 : vector<1x128x256xbf16> to vector<128x256xbf16>
    %cst_221 = arith.constant dense<0.000000e+00> : vector<160x256xf32>
    %200 = tpu.matmul %197, %199, %cst_221 {dimension_numbers = #tpu.dot_dimension_numbers<[1], [0], [0], [1], [0, 0, 1, 1], [], []>} : vector<160x128xbf16>, vector<128x256xbf16>, vector<160x256xf32> -> vector<160x256xf32>
    %201 = arith.addf %195, %200 : vector<160x256xf32>
    %c1_222 = arith.constant 1 : index
    %c64_223 = arith.constant 64 : index
    %c0_224 = arith.constant 0 : index
    %202 = vector.load %arg13[%c1_222, %c64_223, %c0_224] : memref<2x224x128xbf16, #tpu.memory_space<vmem>>, vector<1x160x128xbf16>
    %203 = vector.shape_cast %202 : vector<1x160x128xbf16> to vector<160x128xbf16>
    %c4_225 = arith.constant 4 : index
    %c0_226 = arith.constant 0 : index
    %c0_227 = arith.constant 0 : index
    %204 = vector.load %arg4[%c4_225, %c0_226, %c0_227] : memref<5x128x256xbf16, #tpu.memory_space<vmem>>, vector<1x128x256xbf16>
    %205 = vector.shape_cast %204 : vector<1x128x256xbf16> to vector<128x256xbf16>
    %cst_228 = arith.constant dense<0.000000e+00> : vector<160x256xf32>
    %206 = tpu.matmul %203, %205, %cst_228 {dimension_numbers = #tpu.dot_dimension_numbers<[1], [0], [0], [1], [0, 0, 1, 1], [], []>} : vector<160x128xbf16>, vector<128x256xbf16>, vector<160x256xf32> -> vector<160x256xf32>
    %207 = arith.addf %201, %206 : vector<160x256xf32>
    %208 = vector.extract_strided_slice %207 {offsets = [0, 0], sizes = [160, 128], strides = [1, 1]} : vector<160x256xf32> to vector<160x128xf32>
    %209 = vector.extract_strided_slice %207 {offsets = [0, 128], sizes = [160, 128], strides = [1, 1]} : vector<160x256xf32> to vector<160x128xf32>
    %210 = arith.maximumf %208, %209 : vector<160x128xf32>
    %211 = arith.maximumf %178, %210 : vector<160x128xf32>
    %c0_229 = arith.constant 0 : index
    %c0_230 = arith.constant 0 : index
    %212 = vector.load %arg5[%c0_229, %c0_230] : memref<1x128xf32, #tpu.memory_space<vmem>>, vector<1x128xf32>
    %213 = vector.broadcast %212 : vector<1x128xf32> to vector<160x128xf32>
    %214 = arith.addf %211, %213 : vector<160x128xf32>
    %cst_231 = arith.constant 0.000000e+00 : f32
    %215 = vector.broadcast %cst_231 : f32 to vector<160x128xf32>
    %216 = arith.maximumf %214, %215 : vector<160x128xf32>
    %217 = arith.truncf %216 : vector<160x128xf32> to vector<160x128xbf16>
    %c0_232 = arith.constant 0 : index
    %c0_233 = arith.constant 0 : index
    %218 = vector.load %arg14[%c0_232, %c0_233] : memref<160x128xbf16, #tpu.memory_space<vmem>>, vector<160x128xbf16>
    tpu.vector_store %arg14[%c0_232, %c0_233], %217 {strides = array<i32>} : memref<160x128xbf16, #tpu.memory_space<vmem>>, vector<160x128xbf16>,
    %c0_234 = arith.constant 0 : index
    %c0_235 = arith.constant 0 : index
    %219 = vector.load %arg14[%c0_234, %c0_235] : memref<160x128xbf16, #tpu.memory_space<vmem>>, vector<32x128xbf16>
    %c0_236 = arith.constant 0 : index
    %c0_237 = arith.constant 0 : index
    %c0_238 = arith.constant 0 : index
    %220 = vector.load %arg6[%c0_236, %c0_237, %c0_238] : memref<5x128x128xbf16, #tpu.memory_space<vmem>>, vector<1x128x128xbf16>
    %221 = vector.shape_cast %220 : vector<1x128x128xbf16> to vector<128x128xbf16>
    %cst_239 = arith.constant dense<0.000000e+00> : vector<32x128xf32>
    %222 = tpu.matmul %219, %221, %cst_239 {dimension_numbers = #tpu.dot_dimension_numbers<[1], [0], [0], [1], [0, 0, 1, 1], [], []>} : vector<32x128xbf16>, vector<128x128xbf16>, vector<32x128xf32> -> vector<32x128xf32>
    %c32_240 = arith.constant 32 : index
    %c0_241 = arith.constant 0 : index
    %223 = vector.load %arg14[%c32_240, %c0_241] : memref<160x128xbf16, #tpu.memory_space<vmem>>, vector<32x128xbf16>
    %c1_242 = arith.constant 1 : index
    %c0_243 = arith.constant 0 : index
    %c0_244 = arith.constant 0 : index
    %224 = vector.load %arg6[%c1_242, %c0_243, %c0_244] : memref<5x128x128xbf16, #tpu.memory_space<vmem>>, vector<1x128x128xbf16>
    %225 = vector.shape_cast %224 : vector<1x128x128xbf16> to vector<128x128xbf16>
    %cst_245 = arith.constant dense<0.000000e+00> : vector<32x128xf32>
    %226 = tpu.matmul %223, %225, %cst_245 {dimension_numbers = #tpu.dot_dimension_numbers<[1], [0], [0], [1], [0, 0, 1, 1], [], []>} : vector<32x128xbf16>, vector<128x128xbf16>, vector<32x128xf32> -> vector<32x128xf32>
    %227 = arith.addf %222, %226 : vector<32x128xf32>
    %c64_246 = arith.constant 64 : index
    %c0_247 = arith.constant 0 : index
    %228 = vector.load %arg14[%c64_246, %c0_247] : memref<160x128xbf16, #tpu.memory_space<vmem>>, vector<32x128xbf16>
    %c2_248 = arith.constant 2 : index
    %c0_249 = arith.constant 0 : index
    %c0_250 = arith.constant 0 : index
    %229 = vector.load %arg6[%c2_248, %c0_249, %c0_250] : memref<5x128x128xbf16, #tpu.memory_space<vmem>>, vector<1x128x128xbf16>
    %230 = vector.shape_cast %229 : vector<1x128x128xbf16> to vector<128x128xbf16>
    %cst_251 = arith.constant dense<0.000000e+00> : vector<32x128xf32>
    %231 = tpu.matmul %228, %230, %cst_251 {dimension_numbers = #tpu.dot_dimension_numbers<[1], [0], [0], [1], [0, 0, 1, 1], [], []>} : vector<32x128xbf16>, vector<128x128xbf16>, vector<32x128xf32> -> vector<32x128xf32>
    %232 = arith.addf %227, %231 : vector<32x128xf32>
    %c96 = arith.constant 96 : index
    %c0_252 = arith.constant 0 : index
    %233 = vector.load %arg14[%c96, %c0_252] : memref<160x128xbf16, #tpu.memory_space<vmem>>, vector<32x128xbf16>
    %c3_253 = arith.constant 3 : index
    %c0_254 = arith.constant 0 : index
    %c0_255 = arith.constant 0 : index
    %234 = vector.load %arg6[%c3_253, %c0_254, %c0_255] : memref<5x128x128xbf16, #tpu.memory_space<vmem>>, vector<1x128x128xbf16>
    %235 = vector.shape_cast %234 : vector<1x128x128xbf16> to vector<128x128xbf16>
    %cst_256 = arith.constant dense<0.000000e+00> : vector<32x128xf32>
    %236 = tpu.matmul %233, %235, %cst_256 {dimension_numbers = #tpu.dot_dimension_numbers<[1], [0], [0], [1], [0, 0, 1, 1], [], []>} : vector<32x128xbf16>, vector<128x128xbf16>, vector<32x128xf32> -> vector<32x128xf32>
    %237 = arith.addf %232, %236 : vector<32x128xf32>
    %c128 = arith.constant 128 : index
    %c0_257 = arith.constant 0 : index
    %238 = vector.load %arg14[%c128, %c0_257] : memref<160x128xbf16, #tpu.memory_space<vmem>>, vector<32x128xbf16>
    %c4_258 = arith.constant 4 : index
    %c0_259 = arith.constant 0 : index
    %c0_260 = arith.constant 0 : index
    %239 = vector.load %arg6[%c4_258, %c0_259, %c0_260] : memref<5x128x128xbf16, #tpu.memory_space<vmem>>, vector<1x128x128xbf16>
    %240 = vector.shape_cast %239 : vector<1x128x128xbf16> to vector<128x128xbf16>
    %cst_261 = arith.constant dense<0.000000e+00> : vector<32x128xf32>
    %241 = tpu.matmul %238, %240, %cst_261 {dimension_numbers = #tpu.dot_dimension_numbers<[1], [0], [0], [1], [0, 0, 1, 1], [], []>} : vector<32x128xbf16>, vector<128x128xbf16>, vector<32x128xf32> -> vector<32x128xf32>
    %242 = arith.addf %237, %241 : vector<32x128xf32>
    %c0_262 = arith.constant 0 : index
    %c0_263 = arith.constant 0 : index
    %243 = vector.load %arg7[%c0_262, %c0_263] : memref<1x128xf32, #tpu.memory_space<vmem>>, vector<1x128xf32>
    %244 = vector.broadcast %243 : vector<1x128xf32> to vector<32x128xf32>
    %245 = arith.addf %242, %244 : vector<32x128xf32>
    %cst_264 = arith.constant 0.000000e+00 : f32
    %246 = vector.broadcast %cst_264 : f32 to vector<32x128xf32>
    %247 = arith.maximumf %245, %246 : vector<32x128xf32>
    %248 = arith.truncf %247 : vector<32x128xf32> to vector<32x128xbf16>
    %c0_265 = arith.constant 0 : index
    %c0_266 = arith.constant 0 : index
    %249 = vector.load %arg8[%c0_265, %c0_266] : memref<128x128xbf16, #tpu.memory_space<vmem>>, vector<128x128xbf16>
    %cst_267 = arith.constant dense<0.000000e+00> : vector<32x128xf32>
    %250 = tpu.matmul %248, %249, %cst_267 {dimension_numbers = #tpu.dot_dimension_numbers<[1], [0], [0], [1], [0, 0, 1, 1], [], []>} : vector<32x128xbf16>, vector<128x128xbf16>, vector<32x128xf32> -> vector<32x128xf32>
    %c0_268 = arith.constant 0 : index
    %c0_269 = arith.constant 0 : index
    %251 = vector.load %arg9[%c0_268, %c0_269] : memref<1x128xf32, #tpu.memory_space<vmem>>, vector<1x128xf32>
    %252 = vector.broadcast %251 : vector<1x128xf32> to vector<32x128xf32>
    %253 = arith.addf %250, %252 : vector<32x128xf32>
    %cst_270 = arith.constant 0.000000e+00 : f32
    %254 = vector.broadcast %cst_270 : f32 to vector<32x128xf32>
    %255 = arith.maximumf %253, %254 : vector<32x128xf32>
    %256 = arith.truncf %255 : vector<32x128xf32> to vector<32x128xbf16>
    %c0_271 = arith.constant 0 : index
    %c0_272 = arith.constant 0 : index
    %257 = vector.load %arg10[%c0_271, %c0_272] : memref<128x128xbf16, #tpu.memory_space<vmem>>, vector<128x128xbf16>
    %cst_273 = arith.constant dense<0.000000e+00> : vector<32x128xf32>
    %258 = tpu.matmul %256, %257, %cst_273 {dimension_numbers = #tpu.dot_dimension_numbers<[1], [0], [0], [1], [0, 0, 1, 1], [], []>} : vector<32x128xbf16>, vector<128x128xbf16>, vector<32x128xf32> -> vector<32x128xf32>
    %c0_274 = arith.constant 0 : index
    %c0_275 = arith.constant 0 : index
    %259 = vector.load %arg11[%c0_274, %c0_275] : memref<1x128xf32, #tpu.memory_space<vmem>>, vector<1x128xf32>
    %260 = vector.broadcast %259 : vector<1x128xf32> to vector<32x128xf32>
    %261 = arith.addf %258, %260 : vector<32x128xf32>
    %c0_276 = arith.constant 0 : index
    %c0_277 = arith.constant 0 : index
    %262 = vector.load %arg12[%c0_276, %c0_277] : memref<32x128xf32, #tpu.memory_space<vmem>>, vector<32x128xf32>
    tpu.vector_store %arg12[%c0_276, %c0_277], %261 {strides = array<i32>} : memref<32x128xf32, #tpu.memory_space<vmem>>, vector<32x128xf32>,
    return
  }
  func.func @transform_0(%arg0: i32) -> (i32, i32, i32, i32) {
    %c0_i32 = arith.constant 0 : i32
    %c0_i32_0 = arith.constant 0 : i32
    %c0_i32_1 = arith.constant 0 : i32
    %c0_i32_2 = arith.constant 0 : i32
    return %arg0, %c0_i32, %c0_i32_0, %c0_i32_1 : i32, i32, i32, i32
  }
  func.func @transform_1(%arg0: i32) -> (i32, i32, i32) {
    %c0_i32 = arith.constant 0 : i32
    %c0_i32_0 = arith.constant 0 : i32
    %c0_i32_1 = arith.constant 0 : i32
    %c0_i32_2 = arith.constant 0 : i32
    return %c0_i32, %c0_i32_0, %c0_i32_1 : i32, i32, i32
  }
  func.func @transform_2(%arg0: i32) -> (i32, i32) {
    %c0_i32 = arith.constant 0 : i32
    %c0_i32_0 = arith.constant 0 : i32
    %c0_i32_1 = arith.constant 0 : i32
    return %c0_i32, %c0_i32_0 : i32, i32
  }
  func.func @transform_3(%arg0: i32) -> (i32, i32, i32) {
    %c0_i32 = arith.constant 0 : i32
    %c0_i32_0 = arith.constant 0 : i32
    %c0_i32_1 = arith.constant 0 : i32
    %c0_i32_2 = arith.constant 0 : i32
    return %c0_i32, %c0_i32_0, %c0_i32_1 : i32, i32, i32
  }
  func.func @transform_4(%arg0: i32) -> (i32, i32) {
    %c0_i32 = arith.constant 0 : i32
    %c0_i32_0 = arith.constant 0 : i32
    %c0_i32_1 = arith.constant 0 : i32
    return %c0_i32, %c0_i32_0 : i32, i32
  }
  func.func @transform_5(%arg0: i32) -> (i32, i32, i32) {
    %c0_i32 = arith.constant 0 : i32
    %c0_i32_0 = arith.constant 0 : i32
    %c0_i32_1 = arith.constant 0 : i32
    %c0_i32_2 = arith.constant 0 : i32
    return %c0_i32, %c0_i32_0, %c0_i32_1 : i32, i32, i32
  }
  func.func @transform_6(%arg0: i32) -> (i32, i32) {
    %c0_i32 = arith.constant 0 : i32
    %c0_i32_0 = arith.constant 0 : i32
    %c0_i32_1 = arith.constant 0 : i32
    return %c0_i32, %c0_i32_0 : i32, i32
  }
  func.func @transform_7(%arg0: i32) -> (i32, i32) {
    %c0_i32 = arith.constant 0 : i32
    %c0_i32_0 = arith.constant 0 : i32
    %c0_i32_1 = arith.constant 0 : i32
    return %c0_i32, %c0_i32_0 : i32, i32
  }
  func.func @transform_8(%arg0: i32) -> (i32, i32) {
    %c0_i32 = arith.constant 0 : i32
    %c0_i32_0 = arith.constant 0 : i32
    %c0_i32_1 = arith.constant 0 : i32
    return %c0_i32, %c0_i32_0 : i32, i32
  }
  func.func @transform_9(%arg0: i32) -> (i32, i32) {
    %c0_i32 = arith.constant 0 : i32
    %c0_i32_0 = arith.constant 0 : i32
    %c0_i32_1 = arith.constant 0 : i32
    return %c0_i32, %c0_i32_0 : i32, i32
  }
  func.func @transform_10(%arg0: i32) -> (i32, i32) {
    %c0_i32 = arith.constant 0 : i32
    %c0_i32_0 = arith.constant 0 : i32
    %c0_i32_1 = arith.constant 0 : i32
    return %c0_i32, %c0_i32_0 : i32, i32
  }
  func.func @transform_11(%arg0: i32) -> (i32, i32) {
    %c0_i32 = arith.constant 0 : i32
    %c0_i32_0 = arith.constant 0 : i32
    return %arg0, %c0_i32 : i32, i32
  }
}

</mosaic_0001>

<bundles_post_ra>
// kernel: net_forward.1
= control target key start
LH: loop header
LB: loop body
LE: loop exit
PB: predicated region body
PF: predicated region fallthrough
CT: control target
= control target key end

     0   :  { %s14307_s17 = smov 0   ;;  %s20279_s0 = inlined_call_operand.vmem [shape: bf16[2,8,224,96], index: 0, kind: input, shape index: {}]   ;;  %s20280_s1 = inlined_call_operand.vmem [shape: bf16[5,96,256], index: 1, kind: input, shape index: {}]   ;;  %s20281_s2 = inlined_call_operand.vmem [shape: f32[1,128], index: 2, kind: input, shape index: {}]   ;;  %s20282_s3 = inlined_call_operand.vmem [shape: bf16[5,128,256], index: 3, kind: input, shape index: {}]   ;;  %s20283_s4 = inlined_call_operand.vmem [shape: f32[1,128], index: 4, kind: input, shape index: {}]   ;;  %s20284_s5 = inlined_call_operand.vmem [shape: bf16[5,128,128], index: 5, kind: input, shape index: {}]   ;;  %s20285_s6 = inlined_call_operand.vmem [shape: f32[1,128], index: 6, kind: input, shape index: {}]   ;;  %s20286_s7 = inlined_call_operand.vmem [shape: bf16[128,128], index: 7, kind: input, shape index: {}]   ;;  %s20287_s8 = inlined_call_operand.vmem [shape: f32[1,128], index: 8, kind: input, shape index: {}]   ;;  %s20288_s9 = inlined_call_operand.vmem [shape: bf16[128,128], index: 9, kind: input, shape index: {}]   ;;  %s20289_s10 = inlined_call_operand.vmem [shape: f32[1,128], index: 10, kind: input, shape index: {}]   ;;  %s20290_s11 = inlined_call_operand.vmem [shape: f32[64,128], index: 11, kind: output, shape index: {}]  }
   0x1 LB: > { %s14313_s18 = sadd.s32 4294967295, %s14245_s17   ;;  %p10327_p0 = scmp.ge.s32.totalorder %s14245_s17, 1  ;;  %s14245_s17 = sphi %s14307_s17, %s21_s17  }
   0x2   : > { %p337_p1 = scmp.lt.s32.totalorder %s14245_s17, 3 }
   0x4   : > { %p338_p2 = pnand %p10327_p0, %p337_p1 }
   0x6   : > { %341 = sbr.rel (%p338_p2) target bundleno = 3654 (0xe46), region = 64 }
   0xb   : > { %v10469_v0 = vld [vmem:[%s20280_s1 + $0xb0] sm:$0xf]  ;;  %v13452_v1 = vld [vmem:[%s20280_s1 + $0xb4] sm:$0xf0]  ;;  %v13451_v2 = vld [vmem:[%s20280_s1 + $0xb4] sm:$0xf] }
   0xc   : > { %v14326_v3 = vor.u32 %v13452_v1, %v10469_v0  ;;  %v10471_v4 = vld [vmem:[%s20280_s1 + $0xb8] sm:$0xf0]  ;;  %v10601_v5 = vld [vmem:[%s20280_s1 + $0x50] sm:$0xf]  ;;  %v13426_v6 = vld [vmem:[%s20280_s1 + $0x54] sm:$0xf0] }
   0xd   : > { %v14337_v7 = vor.u32 %v13451_v2, %v10471_v4  ;;  %v14339_v8 = vor.u32 %v13426_v6, %v10601_v5  ;;  %v13425_v9 = vld [vmem:[%s20280_s1 + $0x54] sm:$0xf]  ;;  %v10603_v10 = vld [vmem:[%s20280_s1 + $0x58] sm:$0xf0]  ;;  %v10461_v11 = vld [vmem:[%s20280_s1 + $0xa0] sm:$0xf] }
   0xe   : > { %647 = vmatpush.bf16.msra.mxu0 %v14326_v3  ;;  %v14351_v12 = vor.u32 %v13425_v9, %v10603_v10  ;;  %v13450_v13 = vld [vmem:[%s20280_s1 + $0xa4] sm:$0xf0]  ;;  %v13449_v14 = vld [vmem:[%s20280_s1 + $0xa4] sm:$0xf]  ;;  %v10463_v15 = vld [vmem:[%s20280_s1 + $0xa8] sm:$0xf0] }
   0xf   : > { %726 = vmatpush.bf16.msra.mxu1 %v14337_v7  ;;  %977 = vmatpush.bf16.msra.mxu2 %v14339_v8  ;;  %v14364_v16 = vor.u32 %v13450_v13, %v10461_v11  ;;  %v14366_v17 = vor.u32 %v13449_v14, %v10463_v15  ;;  %v10593_v18 = vld [vmem:[%s20280_s1 + $0x40] sm:$0xf]  ;;  %v13424_v19 = vld [vmem:[%s20280_s1 + $0x44] sm:$0xf0]  ;;  %v13423_v20 = vld [vmem:[%s20280_s1 + $0x44] sm:$0xf] }
  0x10   : > { %1056 = vmatpush.bf16.msra.mxu3 %v14351_v12  ;;  %v14378_v21 = vor.u32 %v13424_v19, %v10593_v18  ;;  %v10595_v22 = vld [vmem:[%s20280_s1 + $0x48] sm:$0xf0]  ;;  %v10453_v23 = vld [vmem:[%s20280_s1 + $0x90] sm:$0xf]  ;;  %v13448_v24 = vld [vmem:[%s20280_s1 + $0x94] sm:$0xf0] }
  0x11   : > { %v14389_v25 = vor.u32 %v13423_v20, %v10595_v22  ;;  %v13447_v26 = vld [vmem:[%s20280_s1 + $0x94] sm:$0xf]  ;;  %v10455_v27 = vld [vmem:[%s20280_s1 + $0x98] sm:$0xf0]  ;;  %v10585_v28 = vld [vmem:[%s20280_s1 + $0x30] sm:$0xf]  ;;  %v14401_v29 = vor.u32 %v13448_v24, %v10453_v23 }
  0x12   : > { %648 = vmatpush.bf16.msra.mxu0 %v14364_v16  ;;  %v13422_v30 = vld [vmem:[%s20280_s1 + $0x34] sm:$0xf0]  ;;  %v13421_v31 = vld [vmem:[%s20280_s1 + $0x34] sm:$0xf]  ;;  %v10587_v32 = vld [vmem:[%s20280_s1 + $0x38] sm:$0xf0]  ;;  %v14414_v33 = vor.u32 %v13447_v26, %v10455_v27 }
  0x13   : > { %727 = vmatpush.bf16.msra.mxu1 %v14366_v17  ;;  %978 = vmatpush.bf16.msra.mxu2 %v14378_v21  ;;  %v14416_v34 = vor.u32 %v13422_v30, %v10585_v28  ;;  %v10445_v35 = vld [vmem:[%s20280_s1 + $0x80] sm:$0xf]  ;;  %v13446_v36 = vld [vmem:[%s20280_s1 + $0x84] sm:$0xf0]  ;;  %v13445_v37 = vld [vmem:[%s20280_s1 + $0x84] sm:$0xf]  ;;  %v14428_v38 = vor.u32 %v13421_v31, %v10587_v32 }
  0x14   : > { %1057 = vmatpush.bf16.msra.mxu3 %v14389_v25  ;;  %v10447_v39 = vld [vmem:[%s20280_s1 + $0x88] sm:$0xf0]  ;;  %v10577_v40 = vld [vmem:[%s20280_s1 + $0x20] sm:$0xf]  ;;  %v13420_v41 = vld [vmem:[%s20280_s1 + $0x24] sm:$0xf0]  ;;  %v14446_v44 = vor.u32 %v13446_v36, %v10445_v35 }
  0x15   : > { %v13419_v42 = vld [vmem:[%s20280_s1 + $0x24] sm:$0xf]  ;;  %v10579_v43 = vld [vmem:[%s20280_s1 + $0x28] sm:$0xf0]  ;;  %v14450_v45 = vor.u32 %v13445_v37, %v10447_v39  ;;  %v14452_v46 = vor.u32 %v13420_v41, %v10577_v40  ;;  %v10437_v47 = vld [vmem:[%s20280_s1 + $0x70] sm:$0xf] }
  0x16   : > { %649 = vmatpush.bf16.msra.mxu0 %v14401_v29  ;;  %v13444_v48 = vld [vmem:[%s20280_s1 + $0x74] sm:$0xf0]  ;;  %v13443_v49 = vld [vmem:[%s20280_s1 + $0x74] sm:$0xf]  ;;  %v14464_v50 = vor.u32 %v13419_v42, %v10579_v43  ;;  %v10439_v51 = vld [vmem:[%s20280_s1 + $0x78] sm:$0xf0] }
  0x17   : > { %728 = vmatpush.bf16.msra.mxu1 %v14414_v33  ;;  %979 = vmatpush.bf16.msra.mxu2 %v14416_v34  ;;  %v10569_v52 = vld [vmem:[%s20280_s1 + $0x10] sm:$0xf]  ;;  %v13418_v53 = vld [vmem:[%s20280_s1 + $0x14] sm:$0xf0]  ;;  %v13417_v54 = vld [vmem:[%s20280_s1 + $0x14] sm:$0xf]  ;;  %v14485_v57 = vor.u32 %v13444_v48, %v10437_v47  ;;  %v14498_v61 = vor.u32 %v13443_v49, %v10439_v51 }
  0x18   : > { %1058 = vmatpush.bf16.msra.mxu3 %v14428_v38  ;;  %v10571_v55 = vld [vmem:[%s20280_s1 + $0x18] sm:$0xf0]  ;;  %v10429_v56 = vld [vmem:[%s20280_s1 + $0x60] sm:$0xf]  ;;  %v13442_v58 = vld [vmem:[%s20280_s1 + $0x64] sm:$0xf0]  ;;  %v14500_v62 = vor.u32 %v13418_v53, %v10569_v52 }
  0x19   : > { %v13441_v59 = vld [vmem:[%s20280_s1 + $0x64] sm:$0xf]  ;;  %v10431_v60 = vld [vmem:[%s20280_s1 + $0x68] sm:$0xf0]  ;;  %v10561_v63 = vld [vmem:[%s20280_s1] sm:$0xf]  ;;  %v14510_v1 = vor.u32 %v13417_v54, %v10571_v55  ;;  %v14529_v10 = vor.u32 %v13442_v58, %v10429_v56 }
  0x1a   : > { %650 = vmatpush.bf16.msra.mxu0 %v14446_v44  ;;  %v13416_v0 = vld [vmem:[%s20280_s1 + $0x4] sm:$0xf0]  ;;  %p377_p3 = scmp.lt.s32.totalorder %s14313_s18, 1  ;;  %v13415_v2 = vld [vmem:[%s20280_s1 + $0x4] sm:$0xf]  ;;  %v14536_v13 = vor.u32 %v13441_v59, %v10431_v60  ;;  %vm602_vm0 = vcmask 785408  }
  0x1b   : > { %729 = vmatpush.bf16.msra.mxu1 %v14450_v45  ;;  %980 = vmatpush.bf16.msra.mxu2 %v14452_v46  ;;  %v10563_v4 = vld [vmem:[%s20280_s1 + $0x8] sm:$0xf0]  ;;  %v10945_v5 = vld [vmem:[%s20280_s1 + $0x170] sm:$0xf]  ;;  %v13504_v6 = vld [vmem:[%s20280_s1 + $0x174] sm:$0xf0]  ;;  %v14538_v14 = vor.u32 %v13416_v0, %v10561_v63 }
  0x1c   : > { %1059 = vmatpush.bf16.msra.mxu3 %v14464_v50  ;;  %s378_s13 = scalar_select %p377_p3, %s14313_s18, 1  ;;  %v13503_v9 = vld [vmem:[%s20280_s1 + $0x174] sm:$0xf]  ;;  %v10947_v11 = vld [vmem:[%s20280_s1 + $0x178] sm:$0xf0]  ;;  %v14541_v15 = vor.u32 %v13415_v2, %v10563_v4  ;;  %v14543_v18 = vor.u32 %v13504_v6, %v10945_v5 }
  0x1d   : > { %v10773_v19 = vld [vmem:[%s20280_s1 + $0x110] sm:$0xf]  ;;  %v13478_v20 = vld [vmem:[%s20280_s1 + $0x114] sm:$0xf0]  ;;  %v14556_v22 = vor.u32 %v13503_v9, %v10947_v11  ;;  %v13477_v23 = vld [vmem:[%s20280_s1 + $0x114] sm:$0xf] }
  0x1e   : > { %651 = vmatpush.bf16.msra.mxu0 %v14485_v57  ;;  %s14128_s22 = smul.u32 896, %s378_s13  ;;  %v10775_v24 = vld [vmem:[%s20280_s1 + $0x118] sm:$0xf0]  ;;  %v14569_v28 = vor.u32 %v13478_v20, %v10773_v19  ;;  %v10937_v31 = vld [vmem:[%s20280_s1 + $0x160] sm:$0xf]  ;;  %s10329_s30 = sshll.u32 %s14313_s18, 2 }
  0x1f   : > { %730 = vmatpush.bf16.msra.mxu1 %v14498_v61  ;;  %981 = vmatpush.bf16.msra.mxu2 %v14500_v62  ;;  %20586 = vst [vmem:[#allocation4_spill] sm:$0xff] %v14556_v22  ;;  %v14573_v30 = vor.u32 %v13477_v23, %v10775_v24  ;;  %v13502_v32 = vld [vmem:[%s20280_s1 + $0x164] sm:$0xf0]  ;;  %v13501_v35 = vld [vmem:[%s20280_s1 + $0x164] sm:$0xf]  ;;  %p383_p4 = scmp.lt.s32.totalorder %s10329_s30, 7 }
  0x20   : > { %1060 = vmatpush.bf16.msra.mxu3 %v14510_v1  ;;  %s14554_s29 = scalar_lea.vmem %s20279_s0, %s14128_s22  ;;  %v14591_v36 = vor.u32 %v13502_v32, %v10937_v31  ;;  %v10939_v37 = vld [vmem:[%s20280_s1 + $0x168] sm:$0xf0]  ;;  %v10765_v39 = vld [vmem:[%s20280_s1 + $0x100] sm:$0xf]  ;;  %v13476_v40 = vld [vmem:[%s20280_s1 + $0x104] sm:$0xf0] }
  0x21   : > { %v13427_v26 = vld [vmem:[%s14554_s29 + $0x70] sm:$0xff]  ;;  %v13401_v27 = vld [vmem:[%s14554_s29] sm:$0xff]  ;;  %v14602_v41 = vor.u32 %v13501_v35, %v10939_v37  ;;  %v14604_v42 = vor.u32 %v13476_v40, %v10765_v39  ;;  %v10767_v47 = vld [vmem:[%s20280_s1 + $0x108] sm:$0xf0]  ;;  %s21445_s30 = smov (!%p383_p4, %s10329_s30), 7 }
  0x22   : > { %652 = vmatpush.bf16.msra.mxu0 %v14529_v10  ;;  %20587 = vst [vmem:[#allocation5_spill] sm:$0xff] %v14591_v36  ;;  %v13475_v43 = vld [vmem:[%s20280_s1 + $0x104] sm:$0xf]  ;;  %v13428_v49 = vld [vmem:[%s14554_s29 + $0x78] sm:$0xff]  ;;  %v13402_v51 = vld [vmem:[%s14554_s29 + $0x8] sm:$0xff]  ;;  %s10330_s12 = sshll.u32 %s21445_s30, 3 }
  0x23   : > { %731 = vmatpush.bf16.msra.mxu1 %v14536_v13  ;;  %982 = vmatpush.bf16.msra.mxu2 %v14538_v14  ;;  %20588 = vst [vmem:[#allocation6_spill] sm:$0xff] %v14602_v41  ;;  %v14613_v48 = vor.u32 %v13475_v43, %v10767_v47  ;;  %v13429_v52 = vld [vmem:[%s14554_s29 + $0x80] sm:$0xff]  ;;  %v13403_v53 = vld [vmem:[%s14554_s29 + $0x10] sm:$0xff]  ;;  %v13500_v55 = vld [vmem:[%s20280_s1 + $0x154] sm:$0xf0]  ;;  %s386_s19 = scalar_lea.vmem %s20290_s11, %s10330_s12 }
  0x24   : > { %1061 = vmatpush.bf16.msra.mxu3 %v14541_v15  ;;  %v10929_v54 = vld [vmem:[%s20280_s1 + $0x150] sm:$0xf]  ;;  %v13499_v56 = vld [vmem:[%s20280_s1 + $0x154] sm:$0xf]  ;;  %v10931_v59 = vld [vmem:[%s20280_s1 + $0x158] sm:$0xf0] }
  0x25   : > { %10475 = vmatmul.msk.bf16.vlgmr.msra.gmra.mxu0 %vm602_vm0, %v13427_v26  ;;  %v14639_v58 = vor.u32 %v13500_v55, %v10929_v54  ;;  %v10757_v60 = vld [vmem:[%s20280_s1 + $0xf0] sm:$0xf]  ;;  %v13474_v63 = vld [vmem:[%s20280_s1 + $0xf4] sm:$0xf0]  ;;  %v14650_v0 = vor.u32 %v13499_v56, %v10931_v59  ;;  %v13473_v4 = vld [vmem:[%s20280_s1 + $0xf4] sm:$0xf] }
  0x26   : > { %10489 = vmatmul.msk.bf16.vlgmr.msra.gmra.mxu1 %vm602_vm0, %v13427_v26  ;;  %10607 = vmatmul.msk.bf16.vlgmr.msra.gmra.mxu2 %vm602_vm0, %v13401_v27  ;;  %v14652_v2 = vor.u32 %v13474_v63, %v10757_v60  ;;  %v10759_v5 = vld [vmem:[%s20280_s1 + $0xf8] sm:$0xf0]  ;;  %v13430_v9 = vld [vmem:[%s14554_s29 + $0x88] sm:$0xff]  ;;  %v13431_v19 = vld [vmem:[%s14554_s29 + $0x90] sm:$0xff] }
  0x27   : > { %1777 = vmatpush.bf16.msrb.mxu2 %v14543_v18  ;;  %10621 = vmatmul.msk.bf16.vlgmr.msra.gmra.mxu3 %vm602_vm0, %v13401_v27  ;;  %20589 = vst [vmem:[#allocation7_spill] sm:$0xff] %v14639_v58  ;;  %v14661_v6 = vor.u32 %v13473_v4, %v10759_v5  ;;  %v13404_v11 = vld [vmem:[%s14554_s29 + $0x18] sm:$0xff]  ;;  %v13405_v20 = vld [vmem:[%s14554_s29 + $0x20] sm:$0xff]  ;;  %v13406_v24 = vld [vmem:[%s14554_s29 + $0x28] sm:$0xff] }
  0x28   : > { %1856 = vmatpush.bf16.msrb.mxu3 %v14556_v22  ;;  %1349 = vmatpush.bf16.msrb.mxu0 %v14569_v28  ;;  %20590 = vst [vmem:[#allocation8_spill] sm:$0xff] %v14650_v0  ;;  %v13432_v23 = vld [vmem:[%s14554_s29 + $0x98] sm:$0xff]  ;;  %v10921_v26 = vld [vmem:[%s20280_s1 + $0x140] sm:$0xf]  ;;  %v13498_v27 = vld [vmem:[%s20280_s1 + $0x144] sm:$0xf0] }
  0x29   : > { %1428 = vmatpush.bf16.msrb.mxu1 %v14573_v30  ;;  %v13497_v31 = vld [vmem:[%s20280_s1 + $0x144] sm:$0xf]  ;;  %v14693_v32 = vor.u32 %v13498_v27, %v10921_v26  ;;  %v10923_v35 = vld [vmem:[%s20280_s1 + $0x148] sm:$0xf0]  ;;  %v10749_v37 = vld [vmem:[%s20280_s1 + $0xe0] sm:$0xf] }
  0x2a   : > { %v13472_v39 = vld [vmem:[%s20280_s1 + $0xe4] sm:$0xf0]  ;;  %v14704_v40 = vor.u32 %v13497_v31, %v10923_v35  ;;  %v13471_v47 = vld [vmem:[%s20280_s1 + $0xe4] sm:$0xf]  ;;  %v13408_v55 = vld [vmem:[%s14554_s29 + $0x38] sm:$0xff] }
  0x2b   : > { %1778 = vmatpush.bf16.msrb.mxu2 %v14591_v36  ;;  %20591 = vst [vmem:[#allocation9_spill] sm:$0xff] %v14693_v32  ;;  %v14706_v43 = vor.u32 %v13472_v39, %v10749_v37  ;;  %v13434_v54 = vld [vmem:[%s14554_s29 + $0xa8] sm:$0xff]  ;;  %v10913_v56 = vld [vmem:[%s20280_s1 + $0x130] sm:$0xf]  ;;  %v13496_v59 = vld [vmem:[%s20280_s1 + $0x134] sm:$0xf0] }
  0x2c   : > { %1857 = vmatpush.bf16.msrb.mxu3 %v14602_v41  ;;  %1350 = vmatpush.bf16.msrb.mxu0 %v14604_v42  ;;  %20592 = vst [vmem:[#allocation10_spill] sm:$0xff] %v14704_v40  ;;  %v13495_v60 = vld [vmem:[%s20280_s1 + $0x134] sm:$0xf]  ;;  %v14741_v63 = vor.u32 %v13496_v59, %v10913_v56  ;;  %v10915_v4 = vld [vmem:[%s20280_s1 + $0x138] sm:$0xf0]  ;;  %v13409_v31 = vld [vmem:[%s14554_s29 + $0x40] sm:$0xff] }
  0x2d   : > { %1429 = vmatpush.bf16.msrb.mxu1 %v14613_v48  ;;  %v10741_v5 = vld [vmem:[%s20280_s1 + $0xd0] sm:$0xf] }
  0x2e   : > { %20593 = vst [vmem:[#allocation11_spill] sm:$0xff] %v14741_v63  ;;  %v13435_v26 = vld [vmem:[%s14554_s29 + $0xb0] sm:$0xff] }
  0x2f   : > { %1779 = vmatpush.bf16.msrb.mxu2 %v14639_v58 }
  0x30   : > { %1858 = vmatpush.bf16.msrb.mxu3 %v14650_v0  ;;  %1351 = vmatpush.bf16.msrb.mxu0 %v14652_v2 }
  0x31   : > { %1430 = vmatpush.bf16.msrb.mxu1 %v14661_v6 }
  0x33   : > { %1780 = vmatpush.bf16.msrb.mxu2 %v14693_v32 }
  0x34   : > { %1859 = vmatpush.bf16.msrb.mxu3 %v14704_v40  ;;  %1352 = vmatpush.bf16.msrb.mxu0 %v14706_v43 }
  0x35   : > { %10476 = vmatmul.msk.bf16.gmra.mxu0 %vm602_vm0, %v13428_v49 }
  0x36   : > { %10490 = vmatmul.msk.bf16.gmra.mxu1 %vm602_vm0, %v13428_v49  ;;  %10608 = vmatmul.msk.bf16.gmra.mxu2 %vm602_vm0, %v13402_v51  ;;  %v10751_v49 = vld [vmem:[%s20280_s1 + $0xe8] sm:$0xf0] }
  0x37   : > { %10622 = vmatmul.msk.bf16.gmra.mxu3 %vm602_vm0, %v13402_v51  ;;  %v14715_v51 = vor.u32 %v13471_v47, %v10751_v49  ;;  %1781 = vmatpush.bf16.msrb.mxu2 %v14741_v63 }
  0x39   : > { %1431 = vmatpush.bf16.msrb.mxu1 %v14715_v51 }
  0x45   : > { %10477 = vmatmul.msk.bf16.gmra.mxu0 %vm602_vm0, %v13429_v52 }
  0x46   : > { %10491 = vmatmul.msk.bf16.gmra.mxu1 %vm602_vm0, %v13429_v52  ;;  %10609 = vmatmul.msk.bf16.gmra.mxu2 %vm602_vm0, %v13403_v53  ;;  %v13433_v52 = vld [vmem:[%s14554_s29 + $0xa0] sm:$0xff] }
  0x47   : > { %10623 = vmatmul.msk.bf16.gmra.mxu3 %vm602_vm0, %v13403_v53  ;;  %v13407_v53 = vld [vmem:[%s14554_s29 + $0x30] sm:$0xff] }
  0x55   : > { %10478 = vmatmul.msk.bf16.gmra.mxu0 %vm602_vm0, %v13430_v9 }
  0x56   : > { %10492 = vmatmul.msk.bf16.gmra.mxu1 %vm602_vm0, %v13430_v9  ;;  %10610 = vmatmul.msk.bf16.gmra.mxu2 %vm602_vm0, %v13404_v11  ;;  %v13470_v9 = vld [vmem:[%s20280_s1 + $0xd4] sm:$0xf0] }
  0x57   : > { %10624 = vmatmul.msk.bf16.gmra.mxu3 %vm602_vm0, %v13404_v11  ;;  %v14752_v11 = vor.u32 %v13495_v60, %v10915_v4  ;;  %v13410_v4 = vld [vmem:[%s14554_s29 + $0x48] sm:$0xff] }
  0x59   : > { %20594 = vst [vmem:[#allocation12_spill] sm:$0xff] %v14752_v11  ;;  %1860 = vmatpush.bf16.msrb.mxu3 %v14752_v11 }
  0x65   : > { %10479 = vmatmul.msk.bf16.gmra.mxu0 %vm602_vm0, %v13431_v19 }
  0x66   : > { %10493 = vmatmul.msk.bf16.gmra.mxu1 %vm602_vm0, %v13431_v19  ;;  %10611 = vmatmul.msk.bf16.gmra.mxu2 %vm602_vm0, %v13405_v20  ;;  %v14754_v19 = vor.u32 %v13470_v9, %v10741_v5 }
  0x67   : > { %10625 = vmatmul.msk.bf16.gmra.mxu3 %vm602_vm0, %v13405_v20  ;;  %v13469_v20 = vld [vmem:[%s20280_s1 + $0xd4] sm:$0xf] }
  0x68   : > { %1353 = vmatpush.bf16.msrb.mxu0 %v14754_v19 }
  0x75   : > { %10480 = vmatmul.msk.bf16.gmra.mxu0 %vm602_vm0, %v13432_v23 }
  0x76   : > { %10494 = vmatmul.msk.bf16.gmra.mxu1 %vm602_vm0, %v13432_v23  ;;  %10612 = vmatmul.msk.bf16.gmra.mxu2 %vm602_vm0, %v13406_v24  ;;  %v10743_v23 = vld [vmem:[%s20280_s1 + $0xd8] sm:$0xf0] }
  0x77   : > { %10626 = vmatmul.msk.bf16.gmra.mxu3 %vm602_vm0, %v13406_v24  ;;  %v14763_v24 = vor.u32 %v13469_v20, %v10743_v23 }
  0x79   : > { %1432 = vmatpush.bf16.msrb.mxu1 %v14763_v24 }
  0x85   : > { %10481 = vmatmul.msk.bf16.gmra.mxu0 %vm602_vm0, %v13433_v52 }
  0x86   : > { %10495 = vmatmul.msk.bf16.gmra.mxu1 %vm602_vm0, %v13433_v52  ;;  %10613 = vmatmul.msk.bf16.gmra.mxu2 %vm602_vm0, %v13407_v53 }
  0x87   : > { %10627 = vmatmul.msk.bf16.gmra.mxu3 %vm602_vm0, %v13407_v53 }
  0x95   : > { %10482 = vmatmul.msk.bf16.gmra.mxu0 %vm602_vm0, %v13434_v54 }
  0x96   : > { %10496 = vmatmul.msk.bf16.gmra.mxu1 %vm602_vm0, %v13434_v54  ;;  %10614 = vmatmul.msk.bf16.gmra.mxu2 %vm602_vm0, %v13408_v55 }
  0x97   : > { %10628 = vmatmul.msk.bf16.gmra.mxu3 %vm602_vm0, %v13408_v55  ;;  %v13436_v55 = vld [vmem:[%s14554_s29 + $0xb8] sm:$0xff] }
  0xa2   : > { %v654_v27 = vpop.f32.mrf.mxu0 }
  0xa3   : > { %v733_v35 = vpop.f32.mrf.mxu1 }
  0xa5   : > { %10483 = vmatmul.msk.bf16.gmra.mxu0 %vm602_vm0, %v13435_v26 }
  0xa6   : > { %10497 = vmatmul.msk.bf16.gmra.mxu1 %vm602_vm0, %v13435_v26  ;;  %10615 = vmatmul.msk.bf16.gmra.mxu2 %vm602_vm0, %v13409_v31 }
  0xa7   : > { %10629 = vmatmul.msk.bf16.gmra.mxu3 %vm602_vm0, %v13409_v31 }
  0xa9   : > { %v984_v37 = vpop.f32.mrf.mxu2 }
  0xaa   : > { %v14774_v39 = vadd.f32 %v984_v37, %v654_v27  ;;  %v1063_v47 = vpop.f32.mrf.mxu3  ;;  %v656_v49 = vpop.f32.mrf.mxu0 }
  0xab   : > { %v14776_v52 = vadd.f32 %v1063_v47, %v733_v35  ;;  %v735_v53 = vpop.f32.mrf.mxu1  ;;  %v13437_v47 = vld [vmem:[%s14554_s29 + $0xc0] sm:$0xff] }
  0xb1   : > { %v986_v54 = vpop.f32.mrf.mxu2 }
  0xb2   : > { %v14779_v56 = vadd.f32 %v986_v54, %v656_v49  ;;  %v1065_v59 = vpop.f32.mrf.mxu3  ;;  %v659_v60 = vpop.f32.mrf.mxu0 }
  0xb3   : > { %v14782_v5 = vadd.f32 %v1065_v59, %v735_v53  ;;  %v738_v9 = vpop.f32.mrf.mxu1  ;;  %v13411_v59 = vld [vmem:[%s14554_s29 + $0x50] sm:$0xff] }
  0xb5   : > { %10484 = vmatmul.msk.bf16.gmra.mxu0 %vm602_vm0, %v13436_v55 }
  0xb6   : > { %10498 = vmatmul.msk.bf16.gmra.mxu1 %vm602_vm0, %v13436_v55  ;;  %10616 = vmatmul.msk.bf16.gmra.mxu2 %vm602_vm0, %v13410_v4 }
  0xb7   : > { %10630 = vmatmul.msk.bf16.gmra.mxu3 %vm602_vm0, %v13410_v4  ;;  %v13494_v4 = vld [vmem:[%s20280_s1 + $0x124] sm:$0xf0] }
  0xb9   : > { %v989_v20 = vpop.f32.mrf.mxu2 }
  0xba   : > { %v14788_v23 = vadd.f32 %v989_v20, %v659_v60  ;;  %v1068_v26 = vpop.f32.mrf.mxu3  ;;  %v661_v27 = vpop.f32.mrf.mxu0  ;;  %v10905_v60 = vld [vmem:[%s20280_s1 + $0x120] sm:$0xf] }
  0xbb   : > { %v14790_v31 = vadd.f32 %v1068_v26, %v738_v9  ;;  %v740_v35 = vpop.f32.mrf.mxu1  ;;  %v13493_v9 = vld [vmem:[%s20280_s1 + $0x124] sm:$0xf]  ;;  %v14807_v20 = vor.u32 %v13494_v4, %v10905_v60  ;;  %v10907_v26 = vld [vmem:[%s20280_s1 + $0x128] sm:$0xf0] }
  0xbc   : > { %v13467_v60 = vld [vmem:[%s20280_s1 + $0xc4] sm:$0xf]  ;;  %v10735_v4 = vld [vmem:[%s20280_s1 + $0xc8] sm:$0xf0] }
  0xbd   : > { %20595 = vst [vmem:[#allocation13_spill] sm:$0xff] %v14807_v20  ;;  %v14831_v63 = vor.u32 %v13467_v60, %v10735_v4  ;;  %1782 = vmatpush.bf16.msrb.mxu2 %v14807_v20  ;;  %v13438_v4 = vld [vmem:[%s14554_s29 + $0xc8] sm:$0xff] }
  0xbf   : > { %1433 = vmatpush.bf16.msrb.mxu1 %v14831_v63 }
  0xc1   : > { %v991_v37 = vpop.f32.mrf.mxu2  ;;  %2447 = vmatpush.bf16.msra.mxu2 %v14326_v3 }
  0xc2   : > { %v14793_v49 = vadd.f32 %v991_v37, %v661_v27  ;;  %v1070_v53 = vpop.f32.mrf.mxu3  ;;  %v664_v54 = vpop.f32.mrf.mxu0  ;;  %v10733_v27 = vld [vmem:[%s20280_s1 + $0xc0] sm:$0xf]  ;;  %v14819_v37 = vor.u32 %v13493_v9, %v10907_v26 }
  0xc3   : > { %v14796_v55 = vadd.f32 %v1070_v53, %v740_v35  ;;  %v743_v11 = vpop.f32.mrf.mxu1  ;;  %v13468_v35 = vld [vmem:[%s20280_s1 + $0xc4] sm:$0xf0] }
  0xc4   : > { %20596 = vst [vmem:[#allocation14_spill] sm:$0xff] %v14819_v37  ;;  %v14821_v53 = vor.u32 %v13468_v35, %v10733_v27  ;;  %1861 = vmatpush.bf16.msrb.mxu3 %v14819_v37 }
  0xc5   : > { %10485 = vmatmul.msk.bf16.gmra.mxu0 %vm602_vm0, %v13437_v47  ;;  %2448 = vmatpush.bf16.msra.mxu2 %v14364_v16 }
  0xc6   : > { %10499 = vmatmul.msk.bf16.gmra.mxu1 %vm602_vm0, %v13437_v47  ;;  %10617 = vmatmul.msk.bf16.gmra.mxu2 %vm602_vm0, %v13411_v59 }
  0xc7   : > { %10631 = vmatmul.msk.bf16.gmra.mxu3 %vm602_vm0, %v13411_v59  ;;  %1354 = vmatpush.bf16.msrb.mxu0 %v14821_v53 }
  0xc8   : > { %2526 = vmatpush.bf16.msra.mxu3 %v14337_v7 }
  0xc9   : > { %v994_v9 = vpop.f32.mrf.mxu2  ;;  %2449 = vmatpush.bf16.msra.mxu2 %v14401_v29 }
  0xca   : > { %v14839_v47 = vadd.f32 %v994_v9, %v664_v54  ;;  %v1073_v26 = vpop.f32.mrf.mxu3  ;;  %v666_v27 = vpop.f32.mrf.mxu0  ;;  %v13412_v9 = vld [vmem:[%s14554_s29 + $0x58] sm:$0xff] }
  0xcb   : > { %v14842_v59 = vadd.f32 %v1073_v26, %v743_v11  ;;  %v745_v35 = vpop.f32.mrf.mxu1 }
  0xcc   : > { %2527 = vmatpush.bf16.msra.mxu3 %v14366_v17 }
  0xcd   : > { %2450 = vmatpush.bf16.msra.mxu2 %v14446_v44 }
  0xd0   : > { %2528 = vmatpush.bf16.msra.mxu3 %v14414_v33 }
  0xd1   : > { %v996_v60 = vpop.f32.mrf.mxu2  ;;  %2451 = vmatpush.bf16.msra.mxu2 %v14485_v57  ;;  %v13413_v57 = vld [vmem:[%s14554_s29 + $0x60] sm:$0xff] }
  0xd2   : > { %v14848_v37 = vadd.f32 %v996_v60, %v666_v27  ;;  %v1075_v3 = vpop.f32.mrf.mxu3  ;;  %v669_v54 = vpop.f32.mrf.mxu0  ;;  %v13439_v27 = vld [vmem:[%s14554_s29 + $0xd0] sm:$0xff] }
  0xd3   : > { %v14852_v20 = vadd.f32 %v1075_v3, %v745_v35  ;;  %v748_v7 = vpop.f32.mrf.mxu1 }
  0xd4   : > { %2529 = vmatpush.bf16.msra.mxu3 %v14450_v45 }
  0xd5   : > { %10486 = vmatmul.msk.bf16.gmra.mxu0 %vm602_vm0, %v13438_v4  ;;  %2452 = vmatpush.bf16.msra.mxu2 %v14529_v10 }
  0xd6   : > { %10500 = vmatmul.msk.bf16.gmra.mxu1 %vm602_vm0, %v13438_v4  ;;  %10618 = vmatmul.msk.bf16.gmra.mxu2 %vm602_vm0, %v13412_v9 }
  0xd7   : > { %10632 = vmatmul.msk.bf16.gmra.mxu3 %vm602_vm0, %v13412_v9 }
  0xd8   : > { %2530 = vmatpush.bf16.msra.mxu3 %v14498_v61 }
  0xd9   : > { %v999_v16 = vpop.f32.mrf.mxu2 }
  0xda   : > { %v14861_v17 = vadd.f32 %v999_v16, %v669_v54  ;;  %v1078_v29 = vpop.f32.mrf.mxu3  ;;  %v671_v33 = vpop.f32.mrf.mxu0  ;;  %v11117_v16 = vld [vmem:[%s20280_s1 + $0x1d0] sm:$0xf] }
  0xdb   : > { %v14863_v11 = vadd.f32 %v1078_v29, %v748_v7  ;;  %v750_v44 = vpop.f32.mrf.mxu1  ;;  %v13530_v29 = vld [vmem:[%s20280_s1 + $0x1d4] sm:$0xf0] }
  0xdc   : > { %2531 = vmatpush.bf16.msra.mxu3 %v14536_v13 }
  0xe1   : > { %v1001_v26 = vpop.f32.mrf.mxu2 }
  0xe2   : > { %v14869_v45 = vadd.f32 %v1001_v26, %v671_v33  ;;  %v1080_v35 = vpop.f32.mrf.mxu3  ;;  %v674_v60 = vpop.f32.mrf.mxu0  ;;  %v13529_v33 = vld [vmem:[%s20280_s1 + $0x1d4] sm:$0xf]  ;;  %v11119_v26 = vld [vmem:[%s20280_s1 + $0x1d8] sm:$0xf0] }
  0xe3   : > { %v14872_v4 = vadd.f32 %v1080_v35, %v750_v44  ;;  %v753_v3 = vpop.f32.mrf.mxu1  ;;  %v14891_v44 = vor.u32 %v13530_v29, %v11117_v16 }
  0xe5   : > { %10487 = vmatmul.msk.bf16.gmra.mxu0 %vm602_vm0, %v13439_v27 }
  0xe6   : > { %10501 = vmatmul.msk.bf16.gmra.mxu1 %vm602_vm0, %v13439_v27  ;;  %10619 = vmatmul.msk.bf16.gmra.mxu2 %vm602_vm0, %v13413_v57  ;;  %v14896_v27 = vor.u32 %v13529_v33, %v11119_v26 }
  0xe7   : > { %10633 = vmatmul.msk.bf16.gmra.mxu3 %vm602_vm0, %v13413_v57  ;;  %2205 = vmatpush.bf16.msra.mxu0 %v14891_v44 }
  0xe8   : > { %2284 = vmatpush.bf16.msra.mxu1 %v14896_v27 }
  0xe9   : > { %v1004_v61 = vpop.f32.mrf.mxu2 }
  0xea   : > { %v14878_v10 = vadd.f32 %v1004_v61, %v674_v60  ;;  %v1083_v13 = vpop.f32.mrf.mxu3  ;;  %v676_v54 = vpop.f32.mrf.mxu0  ;;  %v13440_v60 = vld [vmem:[%s14554_s29 + $0xd8] sm:$0xff] }
  0xeb   : > { %v14880_v9 = vadd.f32 %v1083_v13, %v753_v3  ;;  %v755_v7 = vpop.f32.mrf.mxu1  ;;  %v13414_v13 = vld [vmem:[%s14554_s29 + $0x68] sm:$0xff] }
  0xf1   : > { %v1006_v35 = vpop.f32.mrf.mxu2 }
  0xf2   : > { %v14901_v57 = vadd.f32 %v1006_v35, %v676_v54  ;;  %v1085_v3 = vpop.f32.mrf.mxu3  ;;  %v679_v61 = vpop.f32.mrf.mxu0 }
  0xf3   : > { %v14904_v16 = vadd.f32 %v1085_v3, %v755_v7  ;;  %v758_v29 = vpop.f32.mrf.mxu1  ;;  %v14915_v3 = vld [vmem:[%s14554_s29 + $0xe0] sm:$0xff] }
  0xf5   : > { %10488 = vmatmul.msk.bf16.gmra.mxu0 %vm602_vm0, %v13440_v60 }
  0xf6   : > { %10502 = vmatmul.msk.bf16.gmra.mxu1 %vm602_vm0, %v13440_v60  ;;  %10620 = vmatmul.msk.bf16.gmra.mxu2 %vm602_vm0, %v13414_v13  ;;  %v13479_v60 = vld [vmem:[%s14554_s29 + $0x150] sm:$0xff] }
  0xf7   : > { %10634 = vmatmul.msk.bf16.gmra.mxu3 %vm602_vm0, %v13414_v13 }
  0xf9   : > { %v1009_v33 = vpop.f32.mrf.mxu2 }
  0xfa   : > { %v14910_v26 = vadd.f32 %v1009_v33, %v679_v61  ;;  %v1088_v54 = vpop.f32.mrf.mxu3  ;;  %v681_v35 = vpop.f32.mrf.mxu0 }
  0xfb   : > { %v14912_v40 = vadd.f32 %v1088_v54, %v758_v29  ;;  %v760_v32 = vpop.f32.mrf.mxu1  ;;  %v11109_v54 = vld [vmem:[%s20280_s1 + $0x1c0] sm:$0xf] }
 0x101   : > { %v1011_v7 = vpop.f32.mrf.mxu2 }
 0x102   : > { %v14917_v0 = vadd.f32 %v1011_v7, %v681_v35  ;;  %v1090_v58 = vpop.f32.mrf.mxu3  ;;  %v684_v41 = vpop.f32.mrf.mxu0  ;;  %v13528_v35 = vld [vmem:[%s20280_s1 + $0x1c4] sm:$0xf0] }
 0x103   : > { %v14920_v36 = vadd.f32 %v1090_v58, %v760_v32  ;;  %v763_v22 = vpop.f32.mrf.mxu1 }
 0x105   : > { %10779 = vmatmul.msk.bf16.vlgmr.msrb.gmra.mxu0 %vm602_vm0, %v14915_v3 }
 0x106   : > { %10793 = vmatmul.msk.bf16.vlgmr.msrb.gmra.mxu1 %vm602_vm0, %v14915_v3  ;;  %10951 = vmatmul.msk.bf16.vlgmr.msrb.gmra.mxu2 %vm602_vm0, %v13479_v60 }
 0x107   : > { %10965 = vmatmul.msk.bf16.vlgmr.msrb.gmra.mxu3 %vm602_vm0, %v13479_v60  ;;  %2763 = vmatpush.bf16.msrb.mxu2 %v14569_v28  ;;  %v13527_v28 = vld [vmem:[%s20280_s1 + $0x1c4] sm:$0xf] }
 0x108   : > { %2842 = vmatpush.bf16.msrb.mxu3 %v14573_v30  ;;  %v14944_v30 = vor.u32 %v13528_v35, %v11109_v54  ;;  %v13480_v54 = vld [vmem:[%s14554_s29 + $0x158] sm:$0xff] }
 0x109   : > { %v1014_v61 = vpop.f32.mrf.mxu2 }
 0x10a   : > { %v14930_v13 = vadd.f32 %v1014_v61, %v684_v41  ;;  %v1093_v58 = vpop.f32.mrf.mxu3  ;;  %v686_v32 = vpop.f32.mrf.mxu0  ;;  %2206 = vmatpush.bf16.msra.mxu0 %v14944_v30 }
 0x10b   : > { %v14932_v29 = vadd.f32 %v1093_v58, %v763_v22  ;;  %v765_v33 = vpop.f32.mrf.mxu1  ;;  %2764 = vmatpush.bf16.msrb.mxu2 %v14604_v42  ;;  %v11111_v22 = vld [vmem:[%s20280_s1 + $0x1c8] sm:$0xf0] }
 0x10c   : > { %2843 = vmatpush.bf16.msrb.mxu3 %v14613_v48  ;;  %v14950_v41 = vor.u32 %v13527_v28, %v11111_v22  ;;  %v14957_v42 = vld [vmem:[%s14554_s29 + $0xe8] sm:$0xff]  ;;  %v14981_v22 = vld [vmem:[%s14554_s29 + $0xf0] sm:$0xff] }
 0x10d   : > { %20597 = vst [vmem:[#allocation15_spill] sm:$0xff] %v14957_v42 }
 0x10e   : > { %2285 = vmatpush.bf16.msra.mxu1 %v14950_v41  ;;  %20600 = vst [vmem:[#allocation18_spill] sm:$0xff] %v14981_v22 }
 0x10f   : > { %2765 = vmatpush.bf16.msrb.mxu2 %v14652_v2 }
 0x110   : > { %2844 = vmatpush.bf16.msrb.mxu3 %v14661_v6 }
 0x111   : > { %v1016_v7 = vpop.f32.mrf.mxu2 }
 0x112   : > { %v14959_v60 = vadd.f32 %v1016_v7, %v686_v32  ;;  %v1095_v61 = vpop.f32.mrf.mxu3  ;;  %v689_v58 = vpop.f32.mrf.mxu0 }
 0x113   : > { %v14962_v35 = vadd.f32 %v1095_v61, %v765_v33  ;;  %v768_v48 = vpop.f32.mrf.mxu1  ;;  %2766 = vmatpush.bf16.msrb.mxu2 %v14706_v43  ;;  %v13481_v61 = vld [vmem:[%s14554_s29 + $0x160] sm:$0xff] }
 0x114   : > { %2845 = vmatpush.bf16.msrb.mxu3 %v14715_v51 }
 0x115   : > { %10780 = vmatmul.msk.bf16.gmra.mxu0 %vm602_vm0, %v14957_v42 }
 0x116   : > { %10794 = vmatmul.msk.bf16.gmra.mxu1 %vm602_vm0, %v14957_v42  ;;  %10952 = vmatmul.msk.bf16.gmra.mxu2 %vm602_vm0, %v13480_v54 }
 0x117   : > { %10966 = vmatmul.msk.bf16.gmra.mxu3 %vm602_vm0, %v13480_v54  ;;  %2767 = vmatpush.bf16.msrb.mxu2 %v14754_v19 }
 0x118   : > { %2846 = vmatpush.bf16.msrb.mxu3 %v14763_v24 }
 0x119   : > { %v1019_v2 = vpop.f32.mrf.mxu2 }
 0x11a   : > { %v14974_v6 = vadd.f32 %v1019_v2, %v689_v58  ;;  %v1098_v43 = vpop.f32.mrf.mxu3  ;;  %v691_v51 = vpop.f32.mrf.mxu0 }
 0x11b   : > { %v14976_v32 = vadd.f32 %v1098_v43, %v768_v48  ;;  %v770_v33 = vpop.f32.mrf.mxu1  ;;  %2768 = vmatpush.bf16.msrb.mxu2 %v14821_v53 }
 0x11c   : > { %20598 = vst [vmem:[#allocation16_spill] sm:$0xff] %v14974_v6  ;;  %2847 = vmatpush.bf16.msrb.mxu3 %v14831_v63 }
 0x11d   : > { %20599 = vst [vmem:[#allocation17_spill] sm:$0xff] %v14976_v32 }
 0x121   : > { %v1021_v28 = vpop.f32.mrf.mxu2 }
 0x122   : > { %v14983_v7 = vadd.f32 %v1021_v28, %v691_v51  ;;  %v1100_v19 = vpop.f32.mrf.mxu3  ;;  %v694_v24 = vpop.f32.mrf.mxu0  ;;  %v14999_v28 = vld [vmem:[%s14554_s29 + $0xf8] sm:$0xff] }
 0x123   : > { %v14986_v58 = vadd.f32 %v1100_v19, %v770_v33  ;;  %v773_v54 = vpop.f32.mrf.mxu1  ;;  %20605 = vst [vmem:[#allocation23_spill] sm:$0xff] %v14999_v28 }
 0x124   : > { %20601 = vst [vmem:[#allocation19_spill] sm:$0xff] %v14983_v7 }
 0x125   : > { %20602 = vst [vmem:[#allocation20_spill] sm:$0xff] %v14986_v58  ;;  %10781 = vmatmul.msk.bf16.gmra.mxu0 %vm602_vm0, %v14981_v22 }
 0x126   : > { %10795 = vmatmul.msk.bf16.gmra.mxu1 %vm602_vm0, %v14981_v22  ;;  %10953 = vmatmul.msk.bf16.gmra.mxu2 %vm602_vm0, %v13481_v61  ;;  %v13482_v22 = vld [vmem:[%s14554_s29 + $0x168] sm:$0xff] }
 0x127   : > { %10967 = vmatmul.msk.bf16.gmra.mxu3 %vm602_vm0, %v13481_v61  ;;  %v13526_v61 = vld [vmem:[%s20280_s1 + $0x1b4] sm:$0xf0] }
 0x129   : > { %v1024_v63 = vpop.f32.mrf.mxu2 }
 0x12a   : > { %v14994_v53 = vadd.f32 %v1024_v63, %v694_v24  ;;  %v1103_v48 = vpop.f32.mrf.mxu3  ;;  %v696_v2 = vpop.f32.mrf.mxu0  ;;  %v11101_v24 = vld [vmem:[%s20280_s1 + $0x1b0] sm:$0xf] }
 0x12b   : > { %v14996_v43 = vadd.f32 %v1103_v48, %v773_v54  ;;  %v775_v51 = vpop.f32.mrf.mxu1  ;;  %v13525_v54 = vld [vmem:[%s20280_s1 + $0x1b4] sm:$0xf]  ;;  %v15015_v63 = vor.u32 %v13526_v61, %v11101_v24 }
 0x12c   : > { %20603 = vst [vmem:[#allocation21_spill] sm:$0xff] %v14994_v53 }
 0x12d   : > { %20604 = vst [vmem:[#allocation22_spill] sm:$0xff] %v14996_v43  ;;  %2207 = vmatpush.bf16.msra.mxu0 %v15015_v63  ;;  %v13483_v43 = vld [vmem:[%s14554_s29 + $0x170] sm:$0xff] }
 0x131   : > { %v1026_v33 = vpop.f32.mrf.mxu2 }
 0x132   : > { %v15001_v19 = vadd.f32 %v1026_v33, %v696_v2  ;;  %v1105_v58 = vpop.f32.mrf.mxu3  ;;  %v699_v7 = vpop.f32.mrf.mxu0 }
 0x133   : > { %v15004_v42 = vadd.f32 %v1105_v58, %v775_v51  ;;  %v778_v32 = vpop.f32.mrf.mxu1  ;;  %v11103_v58 = vld [vmem:[%s20280_s1 + $0x1b8] sm:$0xf0] }
 0x134   : > { %20606 = vst [vmem:[#allocation24_spill] sm:$0xff] %v15001_v19  ;;  %v15022_v48 = vor.u32 %v13525_v54, %v11103_v58 }
 0x135   : > { %20607 = vst [vmem:[#allocation25_spill] sm:$0xff] %v15004_v42  ;;  %10782 = vmatmul.msk.bf16.gmra.mxu0 %vm602_vm0, %v14999_v28  ;;  %v15035_v42 = vld [vmem:[%s14554_s29 + $0x100] sm:$0xff] }
 0x136   : > { %20608 = vst [vmem:[#allocation26_spill] sm:$0xff] %v15022_v48  ;;  %10796 = vmatmul.msk.bf16.gmra.mxu1 %vm602_vm0, %v14999_v28  ;;  %10954 = vmatmul.msk.bf16.gmra.mxu2 %vm602_vm0, %v13482_v22 }
 0x137   : > { %10968 = vmatmul.msk.bf16.gmra.mxu3 %vm602_vm0, %v13482_v22  ;;  %2286 = vmatpush.bf16.msra.mxu1 %v15022_v48  ;;  %20611 = vst [vmem:[#allocation29_spill] sm:$0xff] %v15035_v42 }
 0x139   : > { %v1029_v2 = vpop.f32.mrf.mxu2 }
 0x13a   : > { %v15030_v51 = vadd.f32 %v1029_v2, %v699_v7  ;;  %v1108_v33 = vpop.f32.mrf.mxu3  ;;  %v701_v24 = vpop.f32.mrf.mxu0 }
 0x13b   : > { %v15032_v61 = vadd.f32 %v1108_v33, %v778_v32  ;;  %v780_v54 = vpop.f32.mrf.mxu1 }
 0x13c   : > { %20609 = vst [vmem:[#allocation27_spill] sm:$0xff] %v15030_v51 }
 0x13d   : > { %20610 = vst [vmem:[#allocation28_spill] sm:$0xff] %v15032_v61 }
 0x141   : > { %v1031_v58 = vpop.f32.mrf.mxu2 }
 0x142   : > { %v15037_v28 = vadd.f32 %v1031_v58, %v701_v24  ;;  %v1110_v19 = vpop.f32.mrf.mxu3  ;;  %v704_v22 = vpop.f32.mrf.mxu0  ;;  %v15053_v58 = vld [vmem:[%s14554_s29 + $0x108] sm:$0xff] }
 0x143   : > { %v15040_v53 = vadd.f32 %v1110_v19, %v780_v54  ;;  %v783_v6 = vpop.f32.mrf.mxu1  ;;  %20616 = vst [vmem:[#allocation34_spill] sm:$0xff] %v15053_v58 }
 0x144   : > { %20612 = vst [vmem:[#allocation30_spill] sm:$0xff] %v15037_v28 }
 0x145   : > { %20613 = vst [vmem:[#allocation31_spill] sm:$0xff] %v15040_v53  ;;  %10783 = vmatmul.msk.bf16.gmra.mxu0 %vm602_vm0, %v15035_v42 }
 0x146   : > { %10797 = vmatmul.msk.bf16.gmra.mxu1 %vm602_vm0, %v15035_v42  ;;  %10955 = vmatmul.msk.bf16.gmra.mxu2 %vm602_vm0, %v13483_v43  ;;  %v13484_v42 = vld [vmem:[%s14554_s29 + $0x178] sm:$0xff] }
 0x147   : > { %10969 = vmatmul.msk.bf16.gmra.mxu3 %vm602_vm0, %v13483_v43 }
 0x149   : > { %v1034_v32 = vpop.f32.mrf.mxu2 }
 0x14a   : > { %v15048_v7 = vadd.f32 %v1034_v32, %v704_v22  ;;  %v1113_v2 = vpop.f32.mrf.mxu3  ;;  %v706_v33 = vpop.f32.mrf.mxu0 }
 0x14b   : > { %v15050_v24 = vadd.f32 %v1113_v2, %v783_v6  ;;  %v785_v19 = vpop.f32.mrf.mxu1 }
 0x14c   : > { %20614 = vst [vmem:[#allocation32_spill] sm:$0xff] %v15048_v7 }
 0x14d   : > { %20615 = vst [vmem:[#allocation33_spill] sm:$0xff] %v15050_v24 }
 0x151   : > { %v1036_v54 = vpop.f32.mrf.mxu2 }
 0x152   : > { %v15055_v53 = vadd.f32 %v1036_v54, %v706_v33  ;;  %v1115_v28 = vpop.f32.mrf.mxu3  ;;  %v709_v61 = vpop.f32.mrf.mxu0  ;;  %v11093_v33 = vld [vmem:[%s20280_s1 + $0x1a0] sm:$0xf] }
 0x153   : > { %v15058_v51 = vadd.f32 %v1115_v28, %v785_v19  ;;  %v788_v48 = vpop.f32.mrf.mxu1  ;;  %v13524_v19 = vld [vmem:[%s20280_s1 + $0x1a4] sm:$0xf0] }
 0x154   : > { %20617 = vst [vmem:[#allocation35_spill] sm:$0xff] %v15055_v53 }
 0x155   : > { %20618 = vst [vmem:[#allocation36_spill] sm:$0xff] %v15058_v51  ;;  %10784 = vmatmul.msk.bf16.gmra.mxu0 %vm602_vm0, %v15053_v58 }
 0x156   : > { %10798 = vmatmul.msk.bf16.gmra.mxu1 %vm602_vm0, %v15053_v58  ;;  %10956 = vmatmul.msk.bf16.gmra.mxu2 %vm602_vm0, %v13484_v42 }
 0x157   : > { %10970 = vmatmul.msk.bf16.gmra.mxu3 %vm602_vm0, %v13484_v42  ;;  %v13523_v42 = vld [vmem:[%s20280_s1 + $0x1a4] sm:$0xf] }
 0x159   : > { %v1039_v6 = vpop.f32.mrf.mxu2 }
 0x15a   : > { %v15066_v43 = vadd.f32 %v1039_v6, %v709_v61  ;;  %v1118_v22 = vpop.f32.mrf.mxu3  ;;  %v711_v32 = vpop.f32.mrf.mxu0  ;;  %v15079_v61 = vor.u32 %v13524_v19, %v11093_v33  ;;  %v13485_v33 = vld [vmem:[%s14554_s29 + $0x180] sm:$0xff] }
 0x15b   : > { %v15068_v28 = vadd.f32 %v1118_v22, %v788_v48  ;;  %v790_v2 = vpop.f32.mrf.mxu1  ;;  %v11095_v48 = vld [vmem:[%s20280_s1 + $0x1a8] sm:$0xf0]  ;;  %v15089_v22 = vld [vmem:[%s14554_s29 + $0x110] sm:$0xff] }
 0x15c   : > { %20619 = vst [vmem:[#allocation37_spill] sm:$0xff] %v15066_v43  ;;  %v15084_v54 = vor.u32 %v13523_v42, %v11095_v48  ;;  %2208 = vmatpush.bf16.msra.mxu0 %v15079_v61 }
 0x15d   : > { %20620 = vst [vmem:[#allocation38_spill] sm:$0xff] %v15068_v28 }
 0x15e   : > { %20621 = vst [vmem:[#allocation39_spill] sm:$0xff] %v15079_v61  ;;  %2287 = vmatpush.bf16.msra.mxu1 %v15084_v54 }
 0x15f   : > { %20622 = vst [vmem:[#allocation40_spill] sm:$0xff] %v15084_v54 }
 0x160   : > { %20623 = vst [vmem:[#allocation41_spill] sm:$0xff] %v15089_v22 }
 0x161   : > { %v1041_v6 = vpop.f32.mrf.mxu2 }
 0x162   : > { %v15091_v58 = vadd.f32 %v1041_v6, %v711_v32  ;;  %v1120_v28 = vpop.f32.mrf.mxu3  ;;  %v714_v43 = vpop.f32.mrf.mxu0 }
 0x163   : > { %v15094_v19 = vadd.f32 %v1120_v28, %v790_v2  ;;  %v793_v51 = vpop.f32.mrf.mxu1 }
 0x164   : > { %20624 = vst [vmem:[#allocation42_spill] sm:$0xff] %v15091_v58 }
 0x165   : > { %20625 = vst [vmem:[#allocation43_spill] sm:$0xff] %v15094_v19  ;;  %10785 = vmatmul.msk.bf16.gmra.mxu0 %vm602_vm0, %v15089_v22  ;;  %v15107_v19 = vld [vmem:[%s14554_s29 + $0x118] sm:$0xff] }
 0x166   : > { %10799 = vmatmul.msk.bf16.gmra.mxu1 %vm602_vm0, %v15089_v22  ;;  %10957 = vmatmul.msk.bf16.gmra.mxu2 %vm602_vm0, %v13485_v33  ;;  %20628 = vst [vmem:[#allocation46_spill] sm:$0xff] %v15107_v19  ;;  %v13486_v22 = vld [vmem:[%s14554_s29 + $0x188] sm:$0xff] }
 0x167   : > { %10971 = vmatmul.msk.bf16.gmra.mxu3 %vm602_vm0, %v13485_v33 }
 0x169   : > { %v1044_v32 = vpop.f32.mrf.mxu2 }
 0x16a   : > { %v15102_v42 = vadd.f32 %v1044_v32, %v714_v43  ;;  %v1123_v48 = vpop.f32.mrf.mxu3  ;;  %v716_v6 = vpop.f32.mrf.mxu0 }
 0x16b   : > { %v15104_v58 = vadd.f32 %v1123_v48, %v793_v51  ;;  %v795_v28 = vpop.f32.mrf.mxu1 }
 0x16c   : > { %20626 = vst [vmem:[#allocation44_spill] sm:$0xff] %v15102_v42 }
 0x16d   : > { %20627 = vst [vmem:[#allocation45_spill] sm:$0xff] %v15104_v58 }
 0x171   : > { %v1046_v2 = vpop.f32.mrf.mxu2 }
 0x172   : > { %v15109_v53 = vadd.f32 %v1046_v2, %v716_v6  ;;  %v1125_v24 = vpop.f32.mrf.mxu3  ;;  %v719_v7 = vpop.f32.mrf.mxu0  ;;  %v11085_v6 = vld [vmem:[%s20280_s1 + $0x190] sm:$0xf] }
 0x173   : > { %v15112_v54 = vadd.f32 %v1125_v24, %v795_v28  ;;  %v798_v61 = vpop.f32.mrf.mxu1  ;;  %v13522_v28 = vld [vmem:[%s20280_s1 + $0x194] sm:$0xf0] }
 0x174   : > { %20629 = vst [vmem:[#allocation47_spill] sm:$0xff] %v15109_v53 }
 0x175   : > { %20630 = vst [vmem:[#allocation48_spill] sm:$0xff] %v15112_v54  ;;  %10786 = vmatmul.msk.bf16.gmra.mxu0 %vm602_vm0, %v15107_v19  ;;  %v13487_v54 = vld [vmem:[%s14554_s29 + $0x190] sm:$0xff] }
 0x176   : > { %10800 = vmatmul.msk.bf16.gmra.mxu1 %vm602_vm0, %v15107_v19  ;;  %10958 = vmatmul.msk.bf16.gmra.mxu2 %vm602_vm0, %v13486_v22 }
 0x177   : > { %10972 = vmatmul.msk.bf16.gmra.mxu3 %vm602_vm0, %v13486_v22  ;;  %v13521_v22 = vld [vmem:[%s20280_s1 + $0x194] sm:$0xf] }
 0x179   : > { %v1049_v51 = vpop.f32.mrf.mxu2 }
 0x17a   : > { %v15120_v43 = vadd.f32 %v1049_v51, %v719_v7  ;;  %v1128_v33 = vpop.f32.mrf.mxu3  ;;  %v721_v32 = vpop.f32.mrf.mxu0  ;;  %v15133_v7 = vor.u32 %v13522_v28, %v11085_v6 }
 0x17b   : > { %v15122_v24 = vadd.f32 %v1128_v33, %v798_v61  ;;  %v800_v48 = vpop.f32.mrf.mxu1  ;;  %v11087_v61 = vld [vmem:[%s20280_s1 + $0x198] sm:$0xf0]  ;;  %v15143_v33 = vld [vmem:[%s14554_s29 + $0x120] sm:$0xff] }
 0x17c   : > { %20631 = vst [vmem:[#allocation49_spill] sm:$0xff] %v15120_v43  ;;  %v15138_v2 = vor.u32 %v13521_v22, %v11087_v61  ;;  %2209 = vmatpush.bf16.msra.mxu0 %v15133_v7 }
 0x17d   : > { %20632 = vst [vmem:[#allocation50_spill] sm:$0xff] %v15122_v24 }
 0x17e   : > { %2288 = vmatpush.bf16.msra.mxu1 %v15138_v2  ;;  %20633 = vst [vmem:[#allocation51_spill] sm:$0xff] %v15143_v33 }
 0x181   : > { %v1051_v51 = vpop.f32.mrf.mxu2 }
 0x182   : > { %v15145_v19 = vadd.f32 %v1051_v51, %v721_v32  ;;  %v1130_v24 = vpop.f32.mrf.mxu3  ;;  %v1356_v43 = vpop.f32.mrf.mxu0 }
 0x183   : > { %v15148_v6 = vadd.f32 %v1130_v24, %v800_v48  ;;  %v1505_v28 = vadd.f32 %v1356_v43, %v14774_v39  ;;  %v1435_v53 = vpop.f32.mrf.mxu1 }
 0x184   : > { %20634 = vst [vmem:[#allocation52_spill] sm:$0xff] %v15145_v19  ;;  %v1506_v22 = vadd.f32 %v1435_v53, %v14776_v52 }
 0x185   : > { %20635 = vst [vmem:[#allocation53_spill] sm:$0xff] %v15148_v6  ;;  %10787 = vmatmul.msk.bf16.gmra.mxu0 %vm602_vm0, %v15143_v33  ;;  %v15165_v6 = vld [vmem:[%s14554_s29 + $0x128] sm:$0xff] }
 0x186   : > { %10801 = vmatmul.msk.bf16.gmra.mxu1 %vm602_vm0, %v15143_v33  ;;  %10959 = vmatmul.msk.bf16.gmra.mxu2 %vm602_vm0, %v13487_v54  ;;  %20636 = vst [vmem:[#allocation54_spill] sm:$0xff] %v15165_v6 }
 0x187   : > { %10973 = vmatmul.msk.bf16.gmra.mxu3 %vm602_vm0, %v13487_v54  ;;  %v13488_v54 = vld [vmem:[%s14554_s29 + $0x198] sm:$0xff] }
 0x189   : > { %v1784_v32 = vpop.f32.mrf.mxu2 }
 0x18a   : > { %v15158_v24 = vadd.f32 %v1784_v32, %v1505_v28  ;;  %v1863_v48 = vpop.f32.mrf.mxu3  ;;  %v1358_v39 = vpop.f32.mrf.mxu0 }
 0x18b   : > { %v15160_v43 = vadd.f32 %v1863_v48, %v1506_v22  ;;  %v1507_v52 = vadd.f32 %v1358_v39, %v14779_v56  ;;  %v1437_v53 = vpop.f32.mrf.mxu1 }
 0x18c   : > { %v1508_v61 = vadd.f32 %v1437_v53, %v14782_v5  ;;  %v15187_v53 = vld [vmem:[%s14554_s29 + $0x130] sm:$0xff] }
 0x191   : > { %v1786_v51 = vpop.f32.mrf.mxu2 }
 0x192   : > { %v15167_v33 = vadd.f32 %v1786_v51, %v1507_v52  ;;  %v1865_v19 = vpop.f32.mrf.mxu3  ;;  %v1361_v58 = vpop.f32.mrf.mxu0 }
 0x193   : > { %v15170_v42 = vadd.f32 %v1865_v19, %v1508_v61  ;;  %v1509_v28 = vadd.f32 %v1361_v58, %v14788_v23  ;;  %v1440_v22 = vpop.f32.mrf.mxu1 }
 0x194   : > { %v1510_v32 = vadd.f32 %v1440_v22, %v14790_v31 }
 0x195   : > { %10788 = vmatmul.msk.bf16.gmra.mxu0 %vm602_vm0, %v15165_v6 }
 0x196   : > { %10802 = vmatmul.msk.bf16.gmra.mxu1 %vm602_vm0, %v15165_v6  ;;  %10960 = vmatmul.msk.bf16.gmra.mxu2 %vm602_vm0, %v13488_v54 }
 0x197   : > { %10974 = vmatmul.msk.bf16.gmra.mxu3 %vm602_vm0, %v13488_v54  ;;  %v13489_v54 = vld [vmem:[%s14554_s29 + $0x1a0] sm:$0xff] }
 0x199   : > { %v1789_v56 = vpop.f32.mrf.mxu2 }
 0x19a   : > { %v15180_v5 = vadd.f32 %v1789_v56, %v1509_v28  ;;  %v1868_v19 = vpop.f32.mrf.mxu3  ;;  %v1363_v23 = vpop.f32.mrf.mxu0 }
 0x19b   : > { %v15182_v58 = vadd.f32 %v1868_v19, %v1510_v32  ;;  %v1511_v31 = vadd.f32 %v1363_v23, %v14793_v49  ;;  %v1442_v48 = vpop.f32.mrf.mxu1  ;;  %v11077_v49 = vld [vmem:[%s20280_s1 + $0x180] sm:$0xf]  ;;  %v13519_v19 = vld [vmem:[%s20280_s1 + $0x184] sm:$0xf] }
 0x19c   : > { %v1512_v39 = vadd.f32 %v1442_v48, %v14796_v55  ;;  %v13520_v55 = vld [vmem:[%s20280_s1 + $0x184] sm:$0xf0] }
 0x19d   : > { %v15207_v23 = vor.u32 %v13520_v55, %v11077_v49  ;;  %v13490_v55 = vld [vmem:[%s14554_s29 + $0x1a8] sm:$0xff] }
 0x19f   : > { %2210 = vmatpush.bf16.msra.mxu0 %v15207_v23 }
 0x1a1   : > { %v1791_v52 = vpop.f32.mrf.mxu2 }
 0x1a2   : > { %v15189_v61 = vadd.f32 %v1791_v52, %v1511_v31  ;;  %v1870_v51 = vpop.f32.mrf.mxu3  ;;  %v1366_v22 = vpop.f32.mrf.mxu0 }
 0x1a3   : > { %v15192_v6 = vadd.f32 %v1870_v51, %v1512_v39  ;;  %v1513_v28 = vadd.f32 %v1366_v22, %v14839_v47  ;;  %v1445_v56 = vpop.f32.mrf.mxu1  ;;  %v11079_v47 = vld [vmem:[%s20280_s1 + $0x188] sm:$0xf0]  ;;  %2605 = vmatpush.bf16.msrb.mxu0 %v14339_v8 }
 0x1a4   : > { %v1514_v32 = vadd.f32 %v1445_v56, %v14842_v59  ;;  %v15215_v59 = vor.u32 %v13519_v19, %v11079_v47 }
 0x1a5   : > { %10789 = vmatmul.msk.bf16.gmra.mxu0 %vm602_vm0, %v15187_v53 }
 0x1a6   : > { %10803 = vmatmul.msk.bf16.gmra.mxu1 %vm602_vm0, %v15187_v53  ;;  %10961 = vmatmul.msk.bf16.gmra.mxu2 %vm602_vm0, %v13489_v54 }
 0x1a7   : > { %10975 = vmatmul.msk.bf16.gmra.mxu3 %vm602_vm0, %v13489_v54  ;;  %2289 = vmatpush.bf16.msra.mxu1 %v15215_v59 }
 0x1a8   : > { %2606 = vmatpush.bf16.msrb.mxu0 %v14378_v21 }
 0x1a9   : > { %v1794_v31 = vpop.f32.mrf.mxu2 }
 0x1aa   : > { %v15222_v48 = vadd.f32 %v1794_v31, %v1513_v28  ;;  %v1873_v39 = vpop.f32.mrf.mxu3  ;;  %v1368_v52 = vpop.f32.mrf.mxu0  ;;  %v15261_v31 = vld [vmem:[%s14554_s29 + $0x140] sm:$0xff] }
 0x1ab   : > { %2684 = vmatpush.bf16.msrb.mxu1 %v14351_v12  ;;  %v15224_v51 = vadd.f32 %v1873_v39, %v1514_v32  ;;  %v1515_v22 = vadd.f32 %v1368_v52, %v14848_v37  ;;  %v1447_v54 = vpop.f32.mrf.mxu1  ;;  %v15232_v12 = vld [vmem:[%s14554_s29 + $0x138] sm:$0xff] }
 0x1ac   : > { %v1516_v56 = vadd.f32 %v1447_v54, %v14852_v20  ;;  %2607 = vmatpush.bf16.msrb.mxu0 %v14416_v34 }
 0x1af   : > { %2685 = vmatpush.bf16.msrb.mxu1 %v14389_v25 }
 0x1b0   : > { %2608 = vmatpush.bf16.msrb.mxu0 %v14452_v46 }
 0x1b1   : > { %v1796_v8 = vpop.f32.mrf.mxu2 }
 0x1b2   : > { %v15235_v28 = vadd.f32 %v1796_v8, %v1515_v22  ;;  %v1875_v32 = vpop.f32.mrf.mxu3  ;;  %v1371_v49 = vpop.f32.mrf.mxu0  ;;  %v13491_v22 = vld [vmem:[%s14554_s29 + $0x1b0] sm:$0xff] }
 0x1b3   : > { %2686 = vmatpush.bf16.msrb.mxu1 %v14428_v38  ;;  %v15238_v37 = vadd.f32 %v1875_v32, %v1516_v56  ;;  %v1517_v20 = vadd.f32 %v1371_v49, %v14861_v17  ;;  %v1450_v19 = vpop.f32.mrf.mxu1 }
 0x1b4   : > { %v1518_v21 = vadd.f32 %v1450_v19, %v14863_v11  ;;  %2609 = vmatpush.bf16.msrb.mxu0 %v14500_v62  ;;  %v15283_v19 = vld [vmem:[%s14554_s29 + $0x148] sm:$0xff] }
 0x1b5   : > { %10790 = vmatmul.msk.bf16.gmra.mxu0 %vm602_vm0, %v15232_v12 }
 0x1b6   : > { %10804 = vmatmul.msk.bf16.gmra.mxu1 %vm602_vm0, %v15232_v12  ;;  %10962 = vmatmul.msk.bf16.gmra.mxu2 %vm602_vm0, %v13490_v55 }
 0x1b7   : > { %2687 = vmatpush.bf16.msrb.mxu1 %v14464_v50  ;;  %10976 = vmatmul.msk.bf16.gmra.mxu3 %vm602_vm0, %v13490_v55 }
 0x1b8   : > { %2610 = vmatpush.bf16.msrb.mxu0 %v14538_v14 }
 0x1b9   : > { %v1799_v25 = vpop.f32.mrf.mxu2 }
 0x1ba   : > { %v15252_v34 = vadd.f32 %v1799_v25, %v1517_v20  ;;  %v1878_v38 = vpop.f32.mrf.mxu3  ;;  %v1373_v46 = vpop.f32.mrf.mxu0 }
 0x1bb   : > { %2688 = vmatpush.bf16.msrb.mxu1 %v14510_v1  ;;  %v15254_v17 = vadd.f32 %v1878_v38, %v1518_v21  ;;  %v1519_v50 = vadd.f32 %v1373_v46, %v14869_v45  ;;  %v1452_v11 = vpop.f32.mrf.mxu1  ;;  %v13492_v46 = vld [vmem:[%s14554_s29 + $0x1b8] sm:$0xff] }
 0x1bc   : > { %v1520_v47 = vadd.f32 %v1452_v11, %v14872_v4 }
 0x1bf   : > { %2689 = vmatpush.bf16.msrb.mxu1 %v14541_v15 }
 0x1c1   : > { %v1801_v62 = vpop.f32.mrf.mxu2 }
 0x1c2   : > { %v15263_v39 = vadd.f32 %v1801_v62, %v1519_v50  ;;  %v1880_v1 = vpop.f32.mrf.mxu3  ;;  %v1376_v52 = vpop.f32.mrf.mxu0 }
 0x1c3   : > { %v15266_v54 = vadd.f32 %v1880_v1, %v1520_v47  ;;  %v1521_v56 = vadd.f32 %v1376_v52, %v14878_v10  ;;  %v1455_v45 = vpop.f32.mrf.mxu1 }
 0x1c4   : > { %v1522_v4 = vadd.f32 %v1455_v45, %v14880_v9 }
 0x1c5   : > { %10791 = vmatmul.msk.bf16.gmra.mxu0 %vm602_vm0, %v15261_v31 }
 0x1c6   : > { %10805 = vmatmul.msk.bf16.gmra.mxu1 %vm602_vm0, %v15261_v31  ;;  %10963 = vmatmul.msk.bf16.gmra.mxu2 %vm602_vm0, %v13491_v22 }
 0x1c7   : > { %10977 = vmatmul.msk.bf16.gmra.mxu3 %vm602_vm0, %v13491_v22 }
 0x1c9   : > { %v1804_v14 = vpop.f32.mrf.mxu2 }
 0x1ca   : > { %v15276_v15 = vadd.f32 %v1804_v14, %v1521_v56  ;;  %v1883_v8 = vpop.f32.mrf.mxu3  ;;  %v1378_v10 = vpop.f32.mrf.mxu0 }
 0x1cb   : > { %v15278_v32 = vadd.f32 %v1883_v8, %v1522_v4  ;;  %v1523_v9 = vadd.f32 %v1378_v10, %v14901_v57  ;;  %v1457_v49 = vpop.f32.mrf.mxu1  ;;  %v13505_v4 = vld [vmem:[%s14554_s29 + $0x1c0] sm:$0xff] }
 0x1cc   : > { %v1524_v55 = vadd.f32 %v1457_v49, %v14904_v16 }
 0x1d1   : > { %v1806_v20 = vpop.f32.mrf.mxu2 }
 0x1d2   : > { %v15285_v21 = vadd.f32 %v1806_v20, %v1523_v9  ;;  %v1885_v25 = vpop.f32.mrf.mxu3  ;;  %v1381_v38 = vpop.f32.mrf.mxu0 }
 0x1d3   : > { %v15288_v50 = vadd.f32 %v1885_v25, %v1524_v55  ;;  %v1525_v11 = vadd.f32 %v1381_v38, %v14910_v26  ;;  %v1460_v47 = vpop.f32.mrf.mxu1 }
 0x1d4   : > { %v1526_v62 = vadd.f32 %v1460_v47, %v14912_v40  ;;  %v20641_v47 = vld [vmem:[#allocation7_spill] sm:$0xff] }
 0x1d5   : > { %10792 = vmatmul.msk.bf16.gmra.mxu0 %vm602_vm0, %v15283_v19 }
 0x1d6   : > { %10806 = vmatmul.msk.bf16.gmra.mxu1 %vm602_vm0, %v15283_v19  ;;  %10964 = vmatmul.msk.bf16.gmra.mxu2 %vm602_vm0, %v13492_v46 }
 0x1d7   : > { %10978 = vmatmul.msk.bf16.gmra.mxu3 %vm602_vm0, %v13492_v46 }
 0x1d9   : > { %v1809_v57 = vpop.f32.mrf.mxu2 }
 0x1da   : > { %v15298_v16 = vadd.f32 %v1809_v57, %v1525_v11  ;;  %v1888_v1 = vpop.f32.mrf.mxu3  ;;  %v1383_v52 = vpop.f32.mrf.mxu0  ;;  %v13506_v57 = vld [vmem:[%s14554_s29 + $0x1c8] sm:$0xff] }
 0x1db   : > { %v15300_v26 = vadd.f32 %v1888_v1, %v1526_v62  ;;  %v1527_v22 = vadd.f32 %v1383_v52, %v14917_v0  ;;  %v1462_v40 = vpop.f32.mrf.mxu1  ;;  %v20637_v0 = vld [vmem:[#allocation4_spill] sm:$0xff] }
 0x1dc   : > { %v1528_v56 = vadd.f32 %v1462_v40, %v14920_v36 }
 0x1e1   : > { %v1811_v45 = vpop.f32.mrf.mxu2 }
 0x1e2   : > { %v15305_v14 = vadd.f32 %v1811_v45, %v1527_v22  ;;  %v1890_v8 = vpop.f32.mrf.mxu3  ;;  %v1386_v10 = vpop.f32.mrf.mxu0 }
 0x1e3   : > { %v15307_v9 = vadd.f32 %v1890_v8, %v1528_v56  ;;  %v1529_v49 = vadd.f32 %v1386_v10, %v14930_v13  ;;  %v1465_v55 = vpop.f32.mrf.mxu1  ;;  %v20644_v56 = vld [vmem:[#allocation39_spill] sm:$0xff]  ;;  %v20647_v8 = vld [vmem:[#allocation9_spill] sm:$0xff]  ;;  %v20648_v10 = vld [vmem:[#allocation10_spill] sm:$0xff] }
 0x1e4   : > { %v1530_v20 = vadd.f32 %v1465_v55, %v14932_v29  ;;  %v20650_v55 = vld [vmem:[#allocation11_spill] sm:$0xff] }
 0x1e5   : > { %11123 = vmatmul.msk.bf16.vlgmr.msra.gmra.mxu0 %vm602_vm0, %v13505_v4 }
 0x1e6   : > { %11137 = vmatmul.msk.bf16.vlgmr.msra.gmra.mxu1 %vm602_vm0, %v13505_v4  ;;  %11151 = vmatmul.msk.bf16.vlgmr.msra.gmra.mxu2 %vm602_vm0, %v14915_v3  ;;  %v20646_v4 = vld [vmem:[#allocation40_spill] sm:$0xff] }
 0x1e7   : > { %11165 = vmatmul.msk.bf16.vlgmr.msra.gmra.mxu3 %vm602_vm0, %v14915_v3  ;;  %3332 = vmatpush.bf16.msra.mxu2 %v14891_v44  ;;  %v20640_v3 = vld [vmem:[#allocation26_spill] sm:$0xff] }
 0x1e8   : > { %3411 = vmatpush.bf16.msra.mxu3 %v14896_v27  ;;  %2977 = vmatpush.bf16.msra.mxu0 %v14543_v18  ;;  %v20638_v18 = vld [vmem:[#allocation5_spill] sm:$0xff]  ;;  %v20639_v27 = vld [vmem:[#allocation6_spill] sm:$0xff] }
 0x1e9   : > { %v1814_v36 = vpop.f32.mrf.mxu2  ;;  %3056 = vmatpush.bf16.msra.mxu1 %v20637_v0 }
 0x1ea   : > { %v15321_v13 = vadd.f32 %v1814_v36, %v1529_v49  ;;  %v1893_v29 = vpop.f32.mrf.mxu3  ;;  %v1388_v25 = vpop.f32.mrf.mxu0  ;;  %v20649_v49 = vld [vmem:[#allocation15_spill] sm:$0xff]  ;;  %v20651_v36 = vld [vmem:[#allocation12_spill] sm:$0xff] }
 0x1eb   : > { %v15323_v38 = vadd.f32 %v1893_v29, %v1530_v20  ;;  %v1531_v46 = vadd.f32 %v1388_v25, %v14959_v60  ;;  %v1467_v11 = vpop.f32.mrf.mxu1  ;;  %3333 = vmatpush.bf16.msra.mxu2 %v14944_v30  ;;  %v20642_v60 = vld [vmem:[#allocation8_spill] sm:$0xff] }
 0x1ec   : > { %v1532_v44 = vadd.f32 %v1467_v11, %v14962_v35  ;;  %3412 = vmatpush.bf16.msra.mxu3 %v14950_v41  ;;  %2978 = vmatpush.bf16.msra.mxu0 %v20638_v18  ;;  %v20643_v41 = vld [vmem:[#allocation16_spill] sm:$0xff]  ;;  %v20652_v11 = vld [vmem:[#allocation19_spill] sm:$0xff] }
 0x1ed   : > { %3057 = vmatpush.bf16.msra.mxu1 %v20639_v27 }
 0x1ef   : > { %3334 = vmatpush.bf16.msra.mxu2 %v15015_v63  ;;  %v20645_v63 = vld [vmem:[#allocation17_spill] sm:$0xff] }
 0x1f0   : > { %3413 = vmatpush.bf16.msra.mxu3 %v20640_v3  ;;  %2979 = vmatpush.bf16.msra.mxu0 %v20641_v47  ;;  %v20655_v3 = vld [vmem:[#allocation14_spill] sm:$0xff] }
 0x1f1   : > { %v1816_v62 = vpop.f32.mrf.mxu2  ;;  %3058 = vmatpush.bf16.msra.mxu1 %v20642_v60 }
 0x1f2   : > { %v15336_v1 = vadd.f32 %v1816_v62, %v1531_v46  ;;  %v1895_v30 = vpop.f32.mrf.mxu3  ;;  %v1391_v35 = vpop.f32.mrf.mxu0  ;;  %v13507_v62 = vld [vmem:[%s14554_s29 + $0x1d0] sm:$0xff] }
 0x1f3   : > { %v15338_v52 = vadd.f32 %v1895_v30, %v1532_v44  ;;  %v1533_v22 = vadd.f32 %v1391_v35, %v20643_v41  ;;  %v1470_v40 = vpop.f32.mrf.mxu1  ;;  %3335 = vmatpush.bf16.msra.mxu2 %v20644_v56  ;;  %v20656_v41 = vld [vmem:[#allocation21_spill] sm:$0xff] }
 0x1f4   : > { %v1534_v45 = vadd.f32 %v1470_v40, %v20645_v63  ;;  %3414 = vmatpush.bf16.msra.mxu3 %v20646_v4  ;;  %2980 = vmatpush.bf16.msra.mxu0 %v20647_v8  ;;  %v20657_v40 = vld [vmem:[#allocation22_spill] sm:$0xff] }
 0x1f5   : > { %11124 = vmatmul.msk.bf16.gmra.mxu0 %vm602_vm0, %v13506_v57  ;;  %3059 = vmatpush.bf16.msra.mxu1 %v20648_v10 }
 0x1f6   : > { %11138 = vmatmul.msk.bf16.gmra.mxu1 %vm602_vm0, %v13506_v57  ;;  %11152 = vmatmul.msk.bf16.gmra.mxu2 %vm602_vm0, %v20649_v49 }
 0x1f7   : > { %11166 = vmatmul.msk.bf16.gmra.mxu3 %vm602_vm0, %v20649_v49  ;;  %3336 = vmatpush.bf16.msra.mxu2 %v15133_v7  ;;  %v20653_v7 = vld [vmem:[#allocation20_spill] sm:$0xff] }
 0x1f8   : > { %3415 = vmatpush.bf16.msra.mxu3 %v15138_v2  ;;  %2981 = vmatpush.bf16.msra.mxu0 %v20650_v55  ;;  %v20654_v2 = vld [vmem:[#allocation13_spill] sm:$0xff]  ;;  %v20659_v49 = vld [vmem:[#allocation24_spill] sm:$0xff] }
 0x1f9   : > { %v1819_v20 = vpop.f32.mrf.mxu2  ;;  %3060 = vmatpush.bf16.msra.mxu1 %v20651_v36  ;;  %v20660_v36 = vld [vmem:[#allocation25_spill] sm:$0xff] }
 0x1fa   : > { %v15356_v0 = vadd.f32 %v1819_v20, %v1533_v22  ;;  %v1898_v29 = vpop.f32.mrf.mxu3  ;;  %v1393_v25 = vpop.f32.mrf.mxu0 }
 0x1fb   : > { %v15358_v46 = vadd.f32 %v1898_v29, %v1534_v45  ;;  %v1535_v44 = vadd.f32 %v1393_v25, %v20652_v11  ;;  %v1472_v18 = vpop.f32.mrf.mxu1  ;;  %3337 = vmatpush.bf16.msra.mxu2 %v15207_v23  ;;  %v13508_v11 = vld [vmem:[%s14554_s29 + $0x1d8] sm:$0xff] }
 0x1fc   : > { %v1536_v27 = vadd.f32 %v1472_v18, %v20653_v7  ;;  %3416 = vmatpush.bf16.msra.mxu3 %v15215_v59  ;;  %2982 = vmatpush.bf16.msra.mxu0 %v20654_v2  ;;  %v20658_v59 = vld [vmem:[#allocation18_spill] sm:$0xff]  ;;  %v20661_v2 = vld [vmem:[#allocation27_spill] sm:$0xff] }
 0x1fd   : > { %3061 = vmatpush.bf16.msra.mxu1 %v20655_v3 }
 0x201   : > { %v1821_v47 = vpop.f32.mrf.mxu2 }
 0x202   : > { %v15367_v57 = vadd.f32 %v1821_v47, %v1535_v44  ;;  %v1900_v60 = vpop.f32.mrf.mxu3  ;;  %v1396_v30 = vpop.f32.mrf.mxu0 }
 0x203   : > { %v15369_v35 = vadd.f32 %v1900_v60, %v1536_v27  ;;  %v1537_v22 = vadd.f32 %v1396_v30, %v20656_v41  ;;  %v1475_v23 = vpop.f32.mrf.mxu1  ;;  %v20663_v30 = vld [vmem:[#allocation23_spill] sm:$0xff] }
 0x204   : > { %v1538_v56 = vadd.f32 %v1475_v23, %v20657_v40 }
 0x205   : > { %11125 = vmatmul.msk.bf16.gmra.mxu0 %vm602_vm0, %v13507_v62 }
 0x206   : > { %11139 = vmatmul.msk.bf16.gmra.mxu1 %vm602_vm0, %v13507_v62  ;;  %11153 = vmatmul.msk.bf16.gmra.mxu2 %vm602_vm0, %v20658_v59  ;;  %v20662_v62 = vld [vmem:[#allocation28_spill] sm:$0xff] }
 0x207   : > { %11167 = vmatmul.msk.bf16.gmra.mxu3 %vm602_vm0, %v20658_v59  ;;  %v20664_v59 = vld [vmem:[#allocation30_spill] sm:$0xff] }
 0x209   : > { %v1824_v63 = vpop.f32.mrf.mxu2 }
 0x20a   : > { %v15379_v45 = vadd.f32 %v1824_v63, %v1537_v22  ;;  %v1903_v4 = vpop.f32.mrf.mxu3  ;;  %v1398_v8 = vpop.f32.mrf.mxu0 }
 0x20b   : > { %v15381_v10 = vadd.f32 %v1903_v4, %v1538_v56  ;;  %v1539_v55 = vadd.f32 %v1398_v8, %v20659_v49  ;;  %v1477_v20 = vpop.f32.mrf.mxu1  ;;  %v20665_v8 = vld [vmem:[#allocation31_spill] sm:$0xff] }
 0x20c   : > { %v1540_v29 = vadd.f32 %v1477_v20, %v20660_v36  ;;  %v13509_v20 = vld [vmem:[%s14554_s29 + $0x1e0] sm:$0xff] }
 0x211   : > { %v1826_v25 = vpop.f32.mrf.mxu2 }
 0x212   : > { %v15386_v44 = vadd.f32 %v1826_v25, %v1539_v55  ;;  %v1905_v18 = vpop.f32.mrf.mxu3  ;;  %v1401_v7 = vpop.f32.mrf.mxu0 }
 0x213   : > { %v15388_v27 = vadd.f32 %v1905_v18, %v1540_v29  ;;  %v1541_v3 = vadd.f32 %v1401_v7, %v20661_v2  ;;  %v1480_v47 = vpop.f32.mrf.mxu1  ;;  %v20666_v18 = vld [vmem:[#allocation32_spill] sm:$0xff] }
 0x214   : > { %v1542_v60 = vadd.f32 %v1480_v47, %v20662_v62  ;;  %v20668_v62 = vld [vmem:[#allocation29_spill] sm:$0xff] }
 0x215   : > { %11126 = vmatmul.msk.bf16.gmra.mxu0 %vm602_vm0, %v13508_v11 }
 0x216   : > { %11140 = vmatmul.msk.bf16.gmra.mxu1 %vm602_vm0, %v13508_v11  ;;  %11154 = vmatmul.msk.bf16.gmra.mxu2 %vm602_vm0, %v20663_v30 }
 0x217   : > { %11168 = vmatmul.msk.bf16.gmra.mxu3 %vm602_vm0, %v20663_v30 }
 0x219   : > { %v1829_v41 = vpop.f32.mrf.mxu2 }
 0x21a   : > { %v15398_v22 = vadd.f32 %v1829_v41, %v1541_v3  ;;  %v1908_v23 = vpop.f32.mrf.mxu3  ;;  %v1403_v40 = vpop.f32.mrf.mxu0  ;;  %v20667_v3 = vld [vmem:[#allocation33_spill] sm:$0xff] }
 0x21b   : > { %v15400_v56 = vadd.f32 %v1908_v23, %v1542_v60  ;;  %v1543_v63 = vadd.f32 %v1403_v40, %v20664_v59  ;;  %v1482_v4 = vpop.f32.mrf.mxu1  ;;  %v20670_v59 = vld [vmem:[#allocation35_spill] sm:$0xff] }
 0x21c   : > { %v1544_v49 = vadd.f32 %v1482_v4, %v20665_v8  ;;  %v20671_v8 = vld [vmem:[#allocation36_spill] sm:$0xff] }
 0x221   : > { %v1831_v55 = vpop.f32.mrf.mxu2 }
 0x222   : > { %v15405_v36 = vadd.f32 %v1831_v55, %v1543_v63  ;;  %v1910_v29 = vpop.f32.mrf.mxu3  ;;  %v1406_v25 = vpop.f32.mrf.mxu0 }
 0x223   : > { %v15407_v11 = vadd.f32 %v1910_v29, %v1544_v49  ;;  %v1545_v7 = vadd.f32 %v1406_v25, %v20666_v18  ;;  %v1485_v2 = vpop.f32.mrf.mxu1 }
 0x224   : > { %v1546_v47 = vadd.f32 %v1485_v2, %v20667_v3  ;;  %v20674_v3 = vld [vmem:[#allocation37_spill] sm:$0xff] }
 0x225   : > { %11127 = vmatmul.msk.bf16.gmra.mxu0 %vm602_vm0, %v13509_v20 }
 0x226   : > { %11141 = vmatmul.msk.bf16.gmra.mxu1 %vm602_vm0, %v13509_v20  ;;  %11155 = vmatmul.msk.bf16.gmra.mxu2 %vm602_vm0, %v20668_v62  ;;  %v13510_v20 = vld [vmem:[%s14554_s29 + $0x1e8] sm:$0xff] }
 0x227   : > { %11169 = vmatmul.msk.bf16.gmra.mxu3 %vm602_vm0, %v20668_v62 }
 0x229   : > { %v1834_v60 = vpop.f32.mrf.mxu2 }
 0x22a   : > { %v15417_v30 = vadd.f32 %v1834_v60, %v1545_v7  ;;  %v1913_v41 = vpop.f32.mrf.mxu3  ;;  %v1408_v23 = vpop.f32.mrf.mxu0  ;;  %v20675_v60 = vld [vmem:[#allocation38_spill] sm:$0xff] }
 0x22b   : > { %v15419_v40 = vadd.f32 %v1913_v41, %v1546_v47  ;;  %v1547_v63 = vadd.f32 %v1408_v23, %v20670_v59  ;;  %v1487_v4 = vpop.f32.mrf.mxu1  ;;  %v20676_v41 = vld [vmem:[#allocation34_spill] sm:$0xff] }
 0x22c   : > { %v1548_v49 = vadd.f32 %v1487_v4, %v20671_v8 }
 0x22d   : > { %20669 = vst [vmem:[#allocation4_spill] sm:$0xff] %v15419_v40 }
 0x231   : > { %v1836_v55 = vpop.f32.mrf.mxu2 }
 0x232   : > { %v15424_v29 = vadd.f32 %v1836_v55, %v1547_v63  ;;  %v1915_v25 = vpop.f32.mrf.mxu3  ;;  %v1411_v18 = vpop.f32.mrf.mxu0 }
 0x233   : > { %v15426_v2 = vadd.f32 %v1915_v25, %v1548_v49  ;;  %v1549_v7 = vadd.f32 %v1411_v18, %v20674_v3  ;;  %v1490_v62 = vpop.f32.mrf.mxu1  ;;  %v20679_v49 = vld [vmem:[#allocation42_spill] sm:$0xff]  ;;  %v20680_v18 = vld [vmem:[#allocation43_spill] sm:$0xff] }
 0x234   : > { %20672 = vst [vmem:[#allocation5_spill] sm:$0xff] %v15424_v29  ;;  %v1550_v47 = vadd.f32 %v1490_v62, %v20675_v60 }
 0x235   : > { %20673 = vst [vmem:[#allocation6_spill] sm:$0xff] %v15426_v2  ;;  %11128 = vmatmul.msk.bf16.gmra.mxu0 %vm602_vm0, %v13510_v20 }
 0x236   : > { %11142 = vmatmul.msk.bf16.gmra.mxu1 %vm602_vm0, %v13510_v20  ;;  %11156 = vmatmul.msk.bf16.gmra.mxu2 %vm602_vm0, %v20676_v41  ;;  %v13511_v20 = vld [vmem:[%s14554_s29 + $0x1f0] sm:$0xff] }
 0x237   : > { %11170 = vmatmul.msk.bf16.gmra.mxu3 %vm602_vm0, %v20676_v41  ;;  %v20683_v41 = vld [vmem:[#allocation44_spill] sm:$0xff] }
 0x239   : > { %v1839_v23 = vpop.f32.mrf.mxu2 }
 0x23a   : > { %v15436_v59 = vadd.f32 %v1839_v23, %v1549_v7  ;;  %v1918_v63 = vpop.f32.mrf.mxu3  ;;  %v1413_v4 = vpop.f32.mrf.mxu0 }
 0x23b   : > { %v15438_v8 = vadd.f32 %v1918_v63, %v1550_v47  ;;  %v1551_v55 = vadd.f32 %v1413_v4, %v20679_v49  ;;  %v1492_v25 = vpop.f32.mrf.mxu1  ;;  %v20685_v63 = vld [vmem:[#allocation41_spill] sm:$0xff] }
 0x23c   : > { %20677 = vst [vmem:[#allocation26_spill] sm:$0xff] %v15436_v59  ;;  %v1552_v3 = vadd.f32 %v1492_v25, %v20680_v18  ;;  %v20684_v59 = vld [vmem:[#allocation45_spill] sm:$0xff]  ;;  %v20688_v25 = vld [vmem:[#allocation47_spill] sm:$0xff] }
 0x23d   : > { %20678 = vst [vmem:[#allocation7_spill] sm:$0xff] %v15438_v8 }
 0x241   : > { %v1841_v62 = vpop.f32.mrf.mxu2 }
 0x242   : > { %v15443_v60 = vadd.f32 %v1841_v62, %v1551_v55  ;;  %v1920_v2 = vpop.f32.mrf.mxu3  ;;  %v1416_v29 = vpop.f32.mrf.mxu0 }
 0x243   : > { %v15445_v40 = vadd.f32 %v1920_v2, %v1552_v3  ;;  %v1553_v7 = vadd.f32 %v1416_v29, %v20683_v41  ;;  %v1495_v23 = vpop.f32.mrf.mxu1  ;;  %v20689_v3 = vld [vmem:[#allocation48_spill] sm:$0xff] }
 0x244   : > { %20681 = vst [vmem:[#allocation8_spill] sm:$0xff] %v15443_v60  ;;  %v1554_v47 = vadd.f32 %v1495_v23, %v20684_v59 }
 0x245   : > { %20682 = vst [vmem:[#allocation16_spill] sm:$0xff] %v15445_v40  ;;  %11129 = vmatmul.msk.bf16.gmra.mxu0 %vm602_vm0, %v13511_v20 }
 0x246   : > { %11143 = vmatmul.msk.bf16.gmra.mxu1 %vm602_vm0, %v13511_v20  ;;  %11157 = vmatmul.msk.bf16.gmra.mxu2 %vm602_vm0, %v20685_v63  ;;  %v13512_v20 = vld [vmem:[%s14554_s29 + $0x1f8] sm:$0xff] }
 0x247   : > { %11171 = vmatmul.msk.bf16.gmra.mxu3 %vm602_vm0, %v20685_v63  ;;  %v20692_v63 = vld [vmem:[#allocation49_spill] sm:$0xff] }
 0x249   : > { %v1844_v4 = vpop.f32.mrf.mxu2 }
 0x24a   : > { %v15455_v49 = vadd.f32 %v1844_v4, %v1553_v7  ;;  %v1923_v2 = vpop.f32.mrf.mxu3  ;;  %v1418_v55 = vpop.f32.mrf.mxu0 }
 0x24b   : > { %v15457_v29 = vadd.f32 %v1923_v2, %v1554_v47  ;;  %v1555_v18 = vadd.f32 %v1418_v55, %v20688_v25  ;;  %v1497_v59 = vpop.f32.mrf.mxu1  ;;  %v20694_v2 = vld [vmem:[#allocation46_spill] sm:$0xff] }
 0x24c   : > { %20686 = vst [vmem:[#allocation39_spill] sm:$0xff] %v15455_v49  ;;  %v1556_v62 = vadd.f32 %v1497_v59, %v20689_v3  ;;  %v20693_v49 = vld [vmem:[#allocation50_spill] sm:$0xff]  ;;  %v20695_v59 = vld [vmem:[#allocation52_spill] sm:$0xff] }
 0x24d   : > { %20687 = vst [vmem:[#allocation17_spill] sm:$0xff] %v15457_v29 }
 0x251   : > { %v1846_v41 = vpop.f32.mrf.mxu2 }
 0x252   : > { %v15462_v23 = vadd.f32 %v1846_v41, %v1555_v18  ;;  %v1925_v40 = vpop.f32.mrf.mxu3  ;;  %v1421_v60 = vpop.f32.mrf.mxu0 }
 0x253   : > { %v15464_v8 = vadd.f32 %v1925_v40, %v1556_v62  ;;  %v1557_v7 = vadd.f32 %v1421_v60, %v20692_v63  ;;  %v1500_v4 = vpop.f32.mrf.mxu1  ;;  %v20696_v62 = vld [vmem:[#allocation53_spill] sm:$0xff] }
 0x254   : > { %20690 = vst [vmem:[#allocation40_spill] sm:$0xff] %v15462_v23  ;;  %v1558_v47 = vadd.f32 %v1500_v4, %v20693_v49 }
 0x255   : > { %20691 = vst [vmem:[#allocation9_spill] sm:$0xff] %v15464_v8  ;;  %11130 = vmatmul.msk.bf16.gmra.mxu0 %vm602_vm0, %v13512_v20 }
 0x256   : > { %11144 = vmatmul.msk.bf16.gmra.mxu1 %vm602_vm0, %v13512_v20  ;;  %11158 = vmatmul.msk.bf16.gmra.mxu2 %vm602_vm0, %v20694_v2  ;;  %v13513_v20 = vld [vmem:[%s14554_s29 + $0x200] sm:$0xff] }
 0x257   : > { %11172 = vmatmul.msk.bf16.gmra.mxu3 %vm602_vm0, %v20694_v2 }
 0x259   : > { %v1849_v55 = vpop.f32.mrf.mxu2 }
 0x25a   : > { %v15474_v25 = vadd.f32 %v1849_v55, %v1557_v7  ;;  %v1928_v40 = vpop.f32.mrf.mxu3  ;;  %v1423_v18 = vpop.f32.mrf.mxu0 }
 0x25b   : > { %v15476_v60 = vadd.f32 %v1928_v40, %v1558_v47  ;;  %v1559_v3 = vadd.f32 %v1423_v18, %v20695_v59  ;;  %v1502_v49 = vpop.f32.mrf.mxu1  ;;  %v20699_v40 = vld [vmem:[#allocation51_spill] sm:$0xff] }
 0x25c   : > { %v1560_v41 = vadd.f32 %v1502_v49, %v20696_v62  ;;  %v13514_v62 = vld [vmem:[%s14554_s29 + $0x208] sm:$0xff] }
 0x261   : > { %v1851_v63 = vpop.f32.mrf.mxu2 }
 0x262   : > { %v15481_v4 = vadd.f32 %v1851_v63, %v1559_v3  ;;  %v1930_v8 = vpop.f32.mrf.mxu3  ;;  %v2212_v23 = vpop.f32.mrf.mxu0  ;;  %v13515_v3 = vld [vmem:[%s14554_s29 + $0x210] sm:$0xff] }
 0x263   : > { %v15483_v29 = vadd.f32 %v1930_v8, %v1560_v41  ;;  %v15486_v7 = vadd.f32 %v2212_v23, %v15158_v24  ;;  %v2291_v2 = vpop.f32.mrf.mxu1 }
 0x264   : > { %v15489_v47 = vadd.f32 %v2291_v2, %v15160_v43 }
 0x265   : > { %20697 = vst [vmem:[#allocation10_spill] sm:$0xff] %v15486_v7  ;;  %11131 = vmatmul.msk.bf16.gmra.mxu0 %vm602_vm0, %v13513_v20  ;;  %v20757_v7 = vld [vmem:[#allocation17_spill] sm:$0xff] }
 0x266   : > { %20698 = vst [vmem:[#allocation15_spill] sm:$0xff] %v15489_v47  ;;  %11145 = vmatmul.msk.bf16.gmra.mxu1 %vm602_vm0, %v13513_v20  ;;  %11159 = vmatmul.msk.bf16.gmra.mxu2 %vm602_vm0, %v20699_v40 }
 0x267   : > { %11173 = vmatmul.msk.bf16.gmra.mxu3 %vm602_vm0, %v20699_v40  ;;  %v20704_v40 = vld [vmem:[#allocation54_spill] sm:$0xff] }
 0x269   : > { %v15499_v24 = vpop.f32.mrf.mxu2 }
 0x26a   : > { %v15501_v8 = vpop.f32.mrf.mxu3  ;;  %v2214_v23 = vpop.f32.mrf.mxu0 }
 0x26b   : > { %v15504_v43 = vadd.f32 %v2214_v23, %v15167_v33  ;;  %v2293_v18 = vpop.f32.mrf.mxu1 }
 0x26c   : > { %v15507_v59 = vadd.f32 %v2293_v18, %v15170_v42 }
 0x26d   : > { %20700 = vst [vmem:[#allocation11_spill] sm:$0xff] %v15504_v43 }
 0x26e   : > { %20701 = vst [vmem:[#allocation12_spill] sm:$0xff] %v15507_v59 }
 0x271   : > { %v15511_v49 = vpop.f32.mrf.mxu2 }
 0x272   : > { %v15514_v41 = vpop.f32.mrf.mxu3  ;;  %v2217_v63 = vpop.f32.mrf.mxu0 }
 0x273   : > { %v15517_v20 = vadd.f32 %v2217_v63, %v15180_v5  ;;  %v2296_v2 = vpop.f32.mrf.mxu1 }
 0x274   : > { %v15520_v33 = vadd.f32 %v2296_v2, %v15182_v58 }
 0x275   : > { %20702 = vst [vmem:[#allocation19_spill] sm:$0xff] %v15517_v20  ;;  %11132 = vmatmul.msk.bf16.gmra.mxu0 %vm602_vm0, %v13514_v62 }
 0x276   : > { %20703 = vst [vmem:[#allocation20_spill] sm:$0xff] %v15520_v33  ;;  %11146 = vmatmul.msk.bf16.gmra.mxu1 %vm602_vm0, %v13514_v62  ;;  %11160 = vmatmul.msk.bf16.gmra.mxu2 %vm602_vm0, %v20704_v40  ;;  %v13516_v62 = vld [vmem:[%s14554_s29 + $0x218] sm:$0xff] }
 0x277   : > { %11174 = vmatmul.msk.bf16.gmra.mxu3 %vm602_vm0, %v20704_v40 }
 0x279   : > { %v15530_v5 = vpop.f32.mrf.mxu2 }
 0x27a   : > { %v15532_v23 = vpop.f32.mrf.mxu3  ;;  %v2219_v18 = vpop.f32.mrf.mxu0 }
 0x27b   : > { %v15535_v58 = vadd.f32 %v2219_v18, %v15189_v61  ;;  %v2298_v63 = vpop.f32.mrf.mxu1 }
 0x27c   : > { %v15538_v2 = vadd.f32 %v2298_v63, %v15192_v6 }
 0x27d   : > { %20705 = vst [vmem:[#allocation13_spill] sm:$0xff] %v15535_v58  ;;  %v20748_v58 = vld [vmem:[#allocation7_spill] sm:$0xff] }
 0x27e   : > { %20706 = vst [vmem:[#allocation14_spill] sm:$0xff] %v15538_v2 }
 0x281   : > { %v15542_v42 = vpop.f32.mrf.mxu2 }
 0x282   : > { %v15545_v55 = vpop.f32.mrf.mxu3  ;;  %v2222_v40 = vpop.f32.mrf.mxu0 }
 0x283   : > { %v15548_v33 = vadd.f32 %v2222_v40, %v15222_v48  ;;  %v2301_v20 = vpop.f32.mrf.mxu1 }
 0x284   : > { %v15551_v61 = vadd.f32 %v2301_v20, %v15224_v51 }
 0x285   : > { %20707 = vst [vmem:[#allocation21_spill] sm:$0xff] %v15548_v33  ;;  %11133 = vmatmul.msk.bf16.gmra.mxu0 %vm602_vm0, %v13515_v3 }
 0x286   : > { %20708 = vst [vmem:[#allocation22_spill] sm:$0xff] %v15551_v61  ;;  %11147 = vmatmul.msk.bf16.gmra.mxu1 %vm602_vm0, %v13515_v3  ;;  %11161 = vmatmul.msk.bf16.gmra.mxu2 %vm602_vm0, %v15187_v53  ;;  %v13517_v3 = vld [vmem:[%s14554_s29 + $0x220] sm:$0xff] }
 0x287   : > { %11175 = vmatmul.msk.bf16.gmra.mxu3 %vm602_vm0, %v15187_v53 }
 0x289   : > { %v15561_v48 = vpop.f32.mrf.mxu2 }
 0x28a   : > { %v15563_v18 = vpop.f32.mrf.mxu3  ;;  %v2224_v63 = vpop.f32.mrf.mxu0 }
 0x28b   : > { %v15566_v51 = vadd.f32 %v2224_v63, %v15235_v28  ;;  %v2303_v20 = vpop.f32.mrf.mxu1 }
 0x28c   : > { %v15569_v40 = vadd.f32 %v2303_v20, %v15238_v37 }
 0x28d   : > { %20709 = vst [vmem:[#allocation18_spill] sm:$0xff] %v15566_v51 }
 0x28e   : > { %20710 = vst [vmem:[#allocation24_spill] sm:$0xff] %v15569_v40 }
 0x291   : > { %v15573_v6 = vpop.f32.mrf.mxu2 }
 0x292   : > { %v15576_v61 = vpop.f32.mrf.mxu3  ;;  %v2227_v53 = vpop.f32.mrf.mxu0 }
 0x293   : > { %v15579_v33 = vadd.f32 %v2227_v53, %v15252_v34  ;;  %v2306_v2 = vpop.f32.mrf.mxu1 }
 0x294   : > { %v15582_v28 = vadd.f32 %v2306_v2, %v15254_v17 }
 0x295   : > { %20711 = vst [vmem:[#allocation25_spill] sm:$0xff] %v15579_v33  ;;  %11134 = vmatmul.msk.bf16.gmra.mxu0 %vm602_vm0, %v13516_v62 }
 0x296   : > { %20712 = vst [vmem:[#allocation27_spill] sm:$0xff] %v15582_v28  ;;  %11148 = vmatmul.msk.bf16.gmra.mxu1 %vm602_vm0, %v13516_v62  ;;  %11162 = vmatmul.msk.bf16.gmra.mxu2 %vm602_vm0, %v15232_v12  ;;  %v13518_v62 = vld [vmem:[%s14554_s29 + $0x228] sm:$0xff] }
 0x297   : > { %11176 = vmatmul.msk.bf16.gmra.mxu3 %vm602_vm0, %v15232_v12 }
 0x299   : > { %v15592_v34 = vpop.f32.mrf.mxu2 }
 0x29a   : > { %v15594_v63 = vpop.f32.mrf.mxu3  ;;  %v2229_v20 = vpop.f32.mrf.mxu0 }
 0x29b   : > { %v15597_v17 = vadd.f32 %v2229_v20, %v15263_v39  ;;  %v2308_v2 = vpop.f32.mrf.mxu1 }
 0x29c   : > { %v15600_v53 = vadd.f32 %v2308_v2, %v15266_v54 }
 0x29d   : > { %20713 = vst [vmem:[#allocation28_spill] sm:$0xff] %v15597_v17 }
 0x29e   : > { %20714 = vst [vmem:[#allocation23_spill] sm:$0xff] %v15600_v53 }
 0x2a1   : > { %v15604_v37 = vpop.f32.mrf.mxu2 }
 0x2a2   : > { %v15607_v28 = vpop.f32.mrf.mxu3  ;;  %v2232_v12 = vpop.f32.mrf.mxu0 }
 0x2a3   : > { %v15610_v33 = vadd.f32 %v2232_v12, %v15276_v15  ;;  %v2311_v40 = vpop.f32.mrf.mxu1 }
 0x2a4   : > { %v15613_v39 = vadd.f32 %v2311_v40, %v15278_v32 }
 0x2a5   : > { %20715 = vst [vmem:[#allocation30_spill] sm:$0xff] %v15610_v33  ;;  %11135 = vmatmul.msk.bf16.gmra.mxu0 %vm602_vm0, %v13517_v3 }
 0x2a6   : > { %20716 = vst [vmem:[#allocation31_spill] sm:$0xff] %v15613_v39  ;;  %11149 = vmatmul.msk.bf16.gmra.mxu1 %vm602_vm0, %v13517_v3  ;;  %11163 = vmatmul.msk.bf16.gmra.mxu2 %vm602_vm0, %v15261_v31 }
 0x2a7   : > { %11177 = vmatmul.msk.bf16.gmra.mxu3 %vm602_vm0, %v15261_v31 }
 0x2a9   : > { %v15623_v15 = vpop.f32.mrf.mxu2 }
 0x2aa   : > { %v15625_v20 = vpop.f32.mrf.mxu3  ;;  %v2234_v2 = vpop.f32.mrf.mxu0 }
 0x2ab   : > { %v15628_v32 = vadd.f32 %v2234_v2, %v15285_v21  ;;  %v2313_v40 = vpop.f32.mrf.mxu1 }
 0x2ac   : > { %v15631_v12 = vadd.f32 %v2313_v40, %v15288_v50 }
 0x2ad   : > { %20717 = vst [vmem:[#allocation32_spill] sm:$0xff] %v15628_v32 }
 0x2ae   : > { %20718 = vst [vmem:[#allocation33_spill] sm:$0xff] %v15631_v12 }
 0x2b1   : > { %v15635_v54 = vpop.f32.mrf.mxu2 }
 0x2b2   : > { %v15638_v39 = vpop.f32.mrf.mxu3  ;;  %v2237_v31 = vpop.f32.mrf.mxu0 }
 0x2b3   : > { %v15641_v33 = vadd.f32 %v2237_v31, %v15298_v16  ;;  %v2316_v53 = vpop.f32.mrf.mxu1 }
 0x2b4   : > { %v15644_v21 = vadd.f32 %v2316_v53, %v15300_v26 }
 0x2b5   : > { %20719 = vst [vmem:[#allocation29_spill] sm:$0xff] %v15641_v33  ;;  %11136 = vmatmul.msk.bf16.gmra.mxu0 %vm602_vm0, %v13518_v62 }
 0x2b6   : > { %20720 = vst [vmem:[#allocation35_spill] sm:$0xff] %v15644_v21  ;;  %11150 = vmatmul.msk.bf16.gmra.mxu1 %vm602_vm0, %v13518_v62  ;;  %11164 = vmatmul.msk.bf16.gmra.mxu2 %vm602_vm0, %v15283_v19 }
 0x2b7   : > { %11178 = vmatmul.msk.bf16.gmra.mxu3 %vm602_vm0, %v15283_v19 }
 0x2b9   : > { %v15654_v16 = vpop.f32.mrf.mxu2 }
 0x2ba   : > { %v15656_v2 = vpop.f32.mrf.mxu3  ;;  %v2239_v26 = vpop.f32.mrf.mxu0 }
 0x2bb   : > { %v15659_v53 = vadd.f32 %v2239_v26, %v15305_v14  ;;  %v2318_v40 = vpop.f32.mrf.mxu1  ;;  %v14142_v14 = vld [vmem:[%s14554_s29 + $0x70] sm:$0xff] }
 0x2bc   : > { %v15662_v31 = vadd.f32 %v2318_v40, %v15307_v9  ;;  %v14143_v26 = vld [vmem:[%s14554_s29 + $0x150] sm:$0xff] }
 0x2bd   : > { %20721 = vst [vmem:[#allocation36_spill] sm:$0xff] %v15659_v53 }
 0x2be   : > { %20722 = vst [vmem:[#allocation37_spill] sm:$0xff] %v15662_v31 }
 0x2c1   : > { %v15666_v50 = vpop.f32.mrf.mxu2 }
 0x2c2   : > { %v15668_v3 = vpop.f32.mrf.mxu3  ;;  %v2242_v19 = vpop.f32.mrf.mxu0 }
 0x2c3   : > { %v15671_v21 = vadd.f32 %v2242_v19, %v15321_v13  ;;  %v2321_v33 = vpop.f32.mrf.mxu1 }
 0x2c4   : > { %v15674_v12 = vadd.f32 %v2321_v33, %v15323_v38 }
 0x2c5   : > { %20723 = vst [vmem:[#allocation38_spill] sm:$0xff] %v15671_v21  ;;  %11179 = vmatmul.msk.bf16.vlgmr.msrb.gmra.mxu0 %vm602_vm0, %v14142_v14 }
 0x2c6   : > { %20724 = vst [vmem:[#allocation34_spill] sm:$0xff] %v15674_v12  ;;  %11193 = vmatmul.msk.bf16.vlgmr.msrb.gmra.mxu1 %vm602_vm0, %v14142_v14  ;;  %11207 = vmatmul.msk.bf16.vlgmr.msrb.gmra.mxu2 %vm602_vm0, %v14143_v26 }
 0x2c7   : > { %11221 = vmatmul.msk.bf16.vlgmr.msrb.gmra.mxu3 %vm602_vm0, %v14143_v26 }
 0x2c9   : > { %v15684_v13 = vpop.f32.mrf.mxu2 }
 0x2ca   : > { %v15686_v40 = vpop.f32.mrf.mxu3  ;;  %v2244_v38 = vpop.f32.mrf.mxu0 }
 0x2cb   : > { %v15689_v33 = vadd.f32 %v2244_v38, %v15336_v1  ;;  %v2323_v19 = vpop.f32.mrf.mxu1  ;;  %v14144_v1 = vld [vmem:[%s14554_s29 + $0x78] sm:$0xff] }
 0x2cc   : > { %v15692_v9 = vadd.f32 %v2323_v19, %v15338_v52  ;;  %v14145_v38 = vld [vmem:[%s14554_s29 + $0x158] sm:$0xff] }
 0x2cd   : > { %20725 = vst [vmem:[#allocation42_spill] sm:$0xff] %v15689_v33 }
 0x2ce   : > { %20726 = vst [vmem:[#allocation43_spill] sm:$0xff] %v15692_v9 }
 0x2d1   : > { %v15696_v62 = vpop.f32.mrf.mxu2 }
 0x2d2   : > { %v15698_v12 = vpop.f32.mrf.mxu3  ;;  %v2247_v26 = vpop.f32.mrf.mxu0 }
 0x2d3   : > { %v15701_v21 = vadd.f32 %v2247_v26, %v15356_v0  ;;  %v2326_v31 = vpop.f32.mrf.mxu1 }
 0x2d4   : > { %v15704_v53 = vadd.f32 %v2326_v31, %v15358_v46 }
 0x2d5   : > { %20727 = vst [vmem:[#allocation44_spill] sm:$0xff] %v15701_v21  ;;  %11180 = vmatmul.msk.bf16.gmra.mxu0 %vm602_vm0, %v14144_v1 }
 0x2d6   : > { %20728 = vst [vmem:[#allocation45_spill] sm:$0xff] %v15704_v53  ;;  %11194 = vmatmul.msk.bf16.gmra.mxu1 %vm602_vm0, %v14144_v1  ;;  %11208 = vmatmul.msk.bf16.gmra.mxu2 %vm602_vm0, %v14145_v38 }
 0x2d7   : > { %11222 = vmatmul.msk.bf16.gmra.mxu3 %vm602_vm0, %v14145_v38 }
 0x2d9   : > { %v15714_v0 = vpop.f32.mrf.mxu2 }
 0x2da   : > { %v15716_v19 = vpop.f32.mrf.mxu3  ;;  %v2249_v46 = vpop.f32.mrf.mxu0 }
 0x2db   : > { %v15719_v31 = vadd.f32 %v2249_v46, %v15367_v57  ;;  %v2328_v26 = vpop.f32.mrf.mxu1  ;;  %v14146_v57 = vld [vmem:[%s14554_s29 + $0x80] sm:$0xff] }
 0x2dc   : > { %v15722_v52 = vadd.f32 %v2328_v26, %v15369_v35  ;;  %v14147_v46 = vld [vmem:[%s14554_s29 + $0x160] sm:$0xff] }
 0x2dd   : > { %20729 = vst [vmem:[#allocation41_spill] sm:$0xff] %v15719_v31 }
 0x2de   : > { %20730 = vst [vmem:[#allocation47_spill] sm:$0xff] %v15722_v52 }
 0x2e1   : > { %v15726_v14 = vpop.f32.mrf.mxu2 }
 0x2e2   : > { %v15728_v53 = vpop.f32.mrf.mxu3  ;;  %v2252_v38 = vpop.f32.mrf.mxu0 }
 0x2e3   : > { %v15731_v21 = vadd.f32 %v2252_v38, %v15379_v45  ;;  %v2331_v9 = vpop.f32.mrf.mxu1 }
 0x2e4   : > { %v15734_v33 = vadd.f32 %v2331_v9, %v15381_v10 }
 0x2e5   : > { %20731 = vst [vmem:[#allocation48_spill] sm:$0xff] %v15731_v21  ;;  %11181 = vmatmul.msk.bf16.gmra.mxu0 %vm602_vm0, %v14146_v57 }
 0x2e6   : > { %20732 = vst [vmem:[#allocation49_spill] sm:$0xff] %v15734_v33  ;;  %11195 = vmatmul.msk.bf16.gmra.mxu1 %vm602_vm0, %v14146_v57  ;;  %11209 = vmatmul.msk.bf16.gmra.mxu2 %vm602_vm0, %v14147_v46 }
 0x2e7   : > { %11223 = vmatmul.msk.bf16.gmra.mxu3 %vm602_vm0, %v14147_v46 }
 0x2e9   : > { %v15744_v45 = vpop.f32.mrf.mxu2 }
 0x2ea   : > { %v15746_v26 = vpop.f32.mrf.mxu3  ;;  %v2254_v10 = vpop.f32.mrf.mxu0 }
 0x2eb   : > { %v15749_v9 = vadd.f32 %v2254_v10, %v15386_v44  ;;  %v2333_v38 = vpop.f32.mrf.mxu1  ;;  %v14148_v44 = vld [vmem:[%s14554_s29 + $0x88] sm:$0xff] }
 0x2ec   : > { %v15752_v35 = vadd.f32 %v2333_v38, %v15388_v27  ;;  %v14149_v10 = vld [vmem:[%s14554_s29 + $0x168] sm:$0xff] }
 0x2ed   : > { %20733 = vst [vmem:[#allocation50_spill] sm:$0xff] %v15749_v9  ;;  %v20740_v9 = vld [vmem:[#allocation4_spill] sm:$0xff] }
 0x2ee   : > { %20734 = vst [vmem:[#allocation46_spill] sm:$0xff] %v15752_v35 }
 0x2f1   : > { %v15756_v1 = vpop.f32.mrf.mxu2 }
 0x2f2   : > { %v15758_v33 = vpop.f32.mrf.mxu3  ;;  %v2257_v46 = vpop.f32.mrf.mxu0 }
 0x2f3   : > { %v15761_v21 = vadd.f32 %v2257_v46, %v15398_v22  ;;  %v2336_v52 = vpop.f32.mrf.mxu1 }
 0x2f4   : > { %v15764_v31 = vadd.f32 %v2336_v52, %v15400_v56 }
 0x2f5   : > { %20735 = vst [vmem:[#allocation52_spill] sm:$0xff] %v15761_v21  ;;  %11182 = vmatmul.msk.bf16.gmra.mxu0 %vm602_vm0, %v14148_v44 }
 0x2f6   : > { %20736 = vst [vmem:[#allocation53_spill] sm:$0xff] %v15764_v31  ;;  %11196 = vmatmul.msk.bf16.gmra.mxu1 %vm602_vm0, %v14148_v44  ;;  %11210 = vmatmul.msk.bf16.gmra.mxu2 %vm602_vm0, %v14149_v10 }
 0x2f7   : > { %11224 = vmatmul.msk.bf16.gmra.mxu3 %vm602_vm0, %v14149_v10 }
 0x2f9   : > { %v15774_v22 = vpop.f32.mrf.mxu2 }
 0x2fa   : > { %v15776_v38 = vpop.f32.mrf.mxu3  ;;  %v2259_v56 = vpop.f32.mrf.mxu0 }
 0x2fb   : > { %v15779_v52 = vadd.f32 %v2259_v56, %v15405_v36  ;;  %v2338_v46 = vpop.f32.mrf.mxu1  ;;  %v14150_v36 = vld [vmem:[%s14554_s29 + $0x90] sm:$0xff] }
 0x2fc   : > { %v15782_v27 = vadd.f32 %v2338_v46, %v15407_v11  ;;  %v14151_v56 = vld [vmem:[%s14554_s29 + $0x170] sm:$0xff] }
 0x2fd   : > { %20737 = vst [vmem:[#allocation51_spill] sm:$0xff] %v15779_v52  ;;  %v20746_v52 = vld [vmem:[#allocation26_spill] sm:$0xff] }
 0x2fe   : > { %20738 = vst [vmem:[#allocation54_spill] sm:$0xff] %v15782_v27  ;;  %v20744_v27 = vld [vmem:[#allocation6_spill] sm:$0xff] }
 0x301   : > { %v15786_v57 = vpop.f32.mrf.mxu2 }
 0x302   : > { %v15788_v31 = vpop.f32.mrf.mxu3  ;;  %v2262_v10 = vpop.f32.mrf.mxu0 }
 0x303   : > { %v15791_v21 = vadd.f32 %v2262_v10, %v15417_v30  ;;  %v2341_v35 = vpop.f32.mrf.mxu1 }
 0x304   : > { %v15794_v32 = vadd.f32 %v2341_v35, %v20740_v9  ;;  %v20742_v9 = vld [vmem:[#allocation5_spill] sm:$0xff] }
 0x305   : > { %20739 = vst [vmem:[#allocation55_spill] sm:$0xff] %v15791_v21  ;;  %11183 = vmatmul.msk.bf16.gmra.mxu0 %vm602_vm0, %v14150_v36 }
 0x306   : > { %20741 = vst [vmem:[#allocation4_spill] sm:$0xff] %v15794_v32  ;;  %11197 = vmatmul.msk.bf16.gmra.mxu1 %vm602_vm0, %v14150_v36  ;;  %11211 = vmatmul.msk.bf16.gmra.mxu2 %vm602_vm0, %v14151_v56 }
 0x307   : > { %11225 = vmatmul.msk.bf16.gmra.mxu3 %vm602_vm0, %v14151_v56 }
 0x309   : > { %v15804_v30 = vpop.f32.mrf.mxu2 }
 0x30a   : > { %v15806_v46 = vpop.f32.mrf.mxu3  ;;  %v2264_v35 = vpop.f32.mrf.mxu0 }
 0x30b   : > { %v15809_v10 = vadd.f32 %v2264_v35, %v20742_v9  ;;  %v2343_v44 = vpop.f32.mrf.mxu1  ;;  %v14152_v35 = vld [vmem:[%s14554_s29 + $0x98] sm:$0xff] }
 0x30c   : > { %v15812_v11 = vadd.f32 %v2343_v44, %v20744_v27  ;;  %v14153_v44 = vld [vmem:[%s14554_s29 + $0x178] sm:$0xff] }
 0x30d   : > { %20743 = vst [vmem:[#allocation5_spill] sm:$0xff] %v15809_v10  ;;  %v20755_v10 = vld [vmem:[#allocation39_spill] sm:$0xff] }
 0x30e   : > { %20745 = vst [vmem:[#allocation6_spill] sm:$0xff] %v15812_v11  ;;  %v20753_v11 = vld [vmem:[#allocation16_spill] sm:$0xff] }
 0x311   : > { %v15816_v32 = vpop.f32.mrf.mxu2 }
 0x312   : > { %v15818_v21 = vpop.f32.mrf.mxu3  ;;  %v2267_v56 = vpop.f32.mrf.mxu0 }
 0x313   : > { %v15821_v17 = vadd.f32 %v2267_v56, %v20746_v52  ;;  %v2346_v51 = vpop.f32.mrf.mxu1 }
 0x314   : > { %v15824_v59 = vadd.f32 %v2346_v51, %v20748_v58  ;;  %v20751_v51 = vld [vmem:[#allocation8_spill] sm:$0xff] }
 0x315   : > { %20747 = vst [vmem:[#allocation26_spill] sm:$0xff] %v15821_v17  ;;  %11184 = vmatmul.msk.bf16.gmra.mxu0 %vm602_vm0, %v14152_v35 }
 0x316   : > { %20749 = vst [vmem:[#allocation7_spill] sm:$0xff] %v15824_v59  ;;  %11198 = vmatmul.msk.bf16.gmra.mxu1 %vm602_vm0, %v14152_v35  ;;  %11212 = vmatmul.msk.bf16.gmra.mxu2 %vm602_vm0, %v14153_v44 }
 0x317   : > { %11226 = vmatmul.msk.bf16.gmra.mxu3 %vm602_vm0, %v14153_v44 }
 0x319   : > { %v15834_v52 = vpop.f32.mrf.mxu2 }
 0x31a   : > { %v15836_v9 = vpop.f32.mrf.mxu3  ;;  %v2269_v58 = vpop.f32.mrf.mxu0 }
 0x31b   : > { %20750 = vst [vmem:[#allocation56_spill] sm:$0xff] %v15836_v9  ;;  %v15839_v56 = vadd.f32 %v2269_v58, %v20751_v51  ;;  %v2348_v36 = vpop.f32.mrf.mxu1  ;;  %v14154_v58 = vld [vmem:[%s14554_s29 + $0xa0] sm:$0xff] }
 0x31c   : > { %v15842_v27 = vadd.f32 %v2348_v36, %v20753_v11  ;;  %v14155_v36 = vld [vmem:[%s14554_s29 + $0x180] sm:$0xff] }
 0x31d   : > { %20752 = vst [vmem:[#allocation8_spill] sm:$0xff] %v15839_v56 }
 0x31e   : > { %20754 = vst [vmem:[#allocation16_spill] sm:$0xff] %v15842_v27  ;;  %v20763_v27 = vld [vmem:[#allocation9_spill] sm:$0xff] }
 0x321   : > { %v15846_v59 = vpop.f32.mrf.mxu2 }
 0x322   : > { %v15848_v17 = vpop.f32.mrf.mxu3  ;;  %v2272_v44 = vpop.f32.mrf.mxu0 }
 0x323   : > { %v15851_v43 = vadd.f32 %v2272_v44, %v20755_v10  ;;  %v2351_v47 = vpop.f32.mrf.mxu1 }
 0x324   : > { %v15854_v9 = vadd.f32 %v2351_v47, %v20757_v7  ;;  %v20761_v47 = vld [vmem:[#allocation40_spill] sm:$0xff] }
 0x325   : > { %20756 = vst [vmem:[#allocation39_spill] sm:$0xff] %v15851_v43  ;;  %11185 = vmatmul.msk.bf16.gmra.mxu0 %vm602_vm0, %v14154_v58 }
 0x326   : > { %20758 = vst [vmem:[#allocation17_spill] sm:$0xff] %v15854_v9  ;;  %11199 = vmatmul.msk.bf16.gmra.mxu1 %vm602_vm0, %v14154_v58  ;;  %11213 = vmatmul.msk.bf16.gmra.mxu2 %vm602_vm0, %v14155_v36 }
 0x327   : > { %11227 = vmatmul.msk.bf16.gmra.mxu3 %vm602_vm0, %v14155_v36 }
 0x329   : > { %v15864_v10 = vpop.f32.mrf.mxu2 }
 0x32a   : > { %20759 = vst [vmem:[#allocation57_spill] sm:$0xff] %v15864_v10  ;;  %v15866_v51 = vpop.f32.mrf.mxu3  ;;  %v2274_v7 = vpop.f32.mrf.mxu0 }
 0x32b   : > { %20760 = vst [vmem:[#allocation58_spill] sm:$0xff] %v15866_v51  ;;  %v15869_v44 = vadd.f32 %v2274_v7, %v20761_v47  ;;  %v2353_v35 = vpop.f32.mrf.mxu1  ;;  %v14156_v7 = vld [vmem:[%s14554_s29 + $0xa8] sm:$0xff] }
 0x32c   : > { %v15872_v11 = vadd.f32 %v2353_v35, %v20763_v27  ;;  %v14157_v35 = vld [vmem:[%s14554_s29 + $0x188] sm:$0xff] }
 0x32d   : > { %20762 = vst [vmem:[#allocation40_spill] sm:$0xff] %v15869_v44 }
 0x32e   : > { %20764 = vst [vmem:[#allocation9_spill] sm:$0xff] %v15872_v11  ;;  %v14158_v11 = vld [vmem:[%s14554_s29 + $0xb0] sm:$0xff] }
 0x331   : > { %v15876_v9 = vpop.f32.mrf.mxu2 }
 0x332   : > { %v15878_v43 = vpop.f32.mrf.mxu3  ;;  %v2277_v36 = vpop.f32.mrf.mxu0 }
 0x333   : > { %v15881_v56 = vadd.f32 %v2277_v36, %v15474_v25  ;;  %v2356_v51 = vpop.f32.mrf.mxu1 }
 0x334   : > { %v15884_v10 = vadd.f32 %v2356_v51, %v15476_v60 }
 0x335   : > { %20765 = vst [vmem:[#allocation59_spill] sm:$0xff] %v15881_v56  ;;  %11186 = vmatmul.msk.bf16.gmra.mxu0 %vm602_vm0, %v14156_v7 }
 0x336   : > { %20766 = vst [vmem:[#allocation60_spill] sm:$0xff] %v15884_v10  ;;  %11200 = vmatmul.msk.bf16.gmra.mxu1 %vm602_vm0, %v14156_v7  ;;  %11214 = vmatmul.msk.bf16.gmra.mxu2 %vm602_vm0, %v14157_v35 }
 0x337   : > { %11228 = vmatmul.msk.bf16.gmra.mxu3 %vm602_vm0, %v14157_v35 }
 0x339   : > { %v15894_v25 = vpop.f32.mrf.mxu2 }
 0x33a   : > { %20767 = vst [vmem:[#allocation61_spill] sm:$0xff] %v15894_v25  ;;  %v15896_v47 = vpop.f32.mrf.mxu3  ;;  %v2279_v60 = vpop.f32.mrf.mxu0 }
 0x33b   : > { %20768 = vst [vmem:[#allocation62_spill] sm:$0xff] %v15896_v47  ;;  %v15899_v51 = vadd.f32 %v2279_v60, %v15481_v4  ;;  %v2358_v36 = vpop.f32.mrf.mxu1  ;;  %v14159_v4 = vld [vmem:[%s14554_s29 + $0x190] sm:$0xff] }
 0x33c   : > { %v15902_v27 = vadd.f32 %v2358_v36, %v15483_v29 }
 0x33d   : > { %20769 = vst [vmem:[#allocation63_spill] sm:$0xff] %v15899_v51 }
 0x33e   : > { %20770 = vst [vmem:[#allocation64_spill] sm:$0xff] %v15902_v27 }
 0x341   : > { %v15906_v58 = vpop.f32.mrf.mxu2 }
 0x342   : > { %20771 = vst [vmem:[#allocation65_spill] sm:$0xff] %v15906_v58  ;;  %v15908_v10 = vpop.f32.mrf.mxu3  ;;  %v2612_v35 = vpop.f32.mrf.mxu0 }
 0x343   : > { %20772 = vst [vmem:[#allocation66_spill] sm:$0xff] %v15908_v10  ;;  %v2691_v56 = vpop.f32.mrf.mxu1  ;;  %v2613_v29 = vadd.f32 %v2612_v35, %v15499_v24 }
 0x344   : > { %v2692_v60 = vadd.f32 %v2691_v56, %v15501_v8  ;;  %v14160_v56 = vld [vmem:[%s14554_s29 + $0xb8] sm:$0xff] }
 0x345   : > { %11187 = vmatmul.msk.bf16.gmra.mxu0 %vm602_vm0, %v14158_v11 }
 0x346   : > { %11201 = vmatmul.msk.bf16.gmra.mxu1 %vm602_vm0, %v14158_v11  ;;  %11215 = vmatmul.msk.bf16.gmra.mxu2 %vm602_vm0, %v14159_v4 }
 0x347   : > { %11229 = vmatmul.msk.bf16.gmra.mxu3 %vm602_vm0, %v14159_v4 }
 0x349   : > { %v2770_v36 = vpop.f32.mrf.mxu2 }
 0x34a   : > { %v15918_v7 = vadd.f32 %v2770_v36, %v2613_v29  ;;  %v2849_v27 = vpop.f32.mrf.mxu3  ;;  %v2614_v51 = vpop.f32.mrf.mxu0 }
 0x34b   : > { %v15920_v44 = vadd.f32 %v2849_v27, %v2692_v60  ;;  %v2693_v10 = vpop.f32.mrf.mxu1  ;;  %v2615_v11 = vadd.f32 %v2614_v51, %v15511_v49  ;;  %v14161_v27 = vld [vmem:[%s14554_s29 + $0x198] sm:$0xff] }
 0x34c   : > { %v2694_v58 = vadd.f32 %v2693_v10, %v15514_v41 }
 0x351   : > { %v2772_v47 = vpop.f32.mrf.mxu2 }
 0x352   : > { %v15924_v4 = vadd.f32 %v2772_v47, %v2615_v11  ;;  %v2851_v24 = vpop.f32.mrf.mxu3  ;;  %v2617_v35 = vpop.f32.mrf.mxu0 }
 0x353   : > { %v15926_v25 = vadd.f32 %v2851_v24, %v2694_v58  ;;  %v2696_v8 = vpop.f32.mrf.mxu1  ;;  %v2618_v49 = vadd.f32 %v2617_v35, %v15530_v5 }
 0x354   : > { %v2697_v41 = vadd.f32 %v2696_v8, %v15532_v23  ;;  %v14162_v8 = vld [vmem:[%s14554_s29 + $0xc0] sm:$0xff] }
 0x355   : > { %11188 = vmatmul.msk.bf16.gmra.mxu0 %vm602_vm0, %v14160_v56 }
 0x356   : > { %11202 = vmatmul.msk.bf16.gmra.mxu1 %vm602_vm0, %v14160_v56  ;;  %11216 = vmatmul.msk.bf16.gmra.mxu2 %vm602_vm0, %v14161_v27 }
 0x357   : > { %11230 = vmatmul.msk.bf16.gmra.mxu3 %vm602_vm0, %v14161_v27 }
 0x359   : > { %v2775_v10 = vpop.f32.mrf.mxu2 }
 0x35a   : > { %v15936_v47 = vadd.f32 %v2775_v10, %v2618_v49  ;;  %v2854_v58 = vpop.f32.mrf.mxu3  ;;  %v2619_v51 = vpop.f32.mrf.mxu0  ;;  %v14163_v49 = vld [vmem:[%s14554_s29 + $0x1a0] sm:$0xff] }
 0x35b   : > { %v15938_v29 = vadd.f32 %v2854_v58, %v2697_v41  ;;  %v2698_v60 = vpop.f32.mrf.mxu1  ;;  %v2620_v36 = vadd.f32 %v2619_v51, %v15542_v42 }
 0x35c   : > { %v2699_v11 = vadd.f32 %v2698_v60, %v15545_v55 }
 0x361   : > { %v2777_v24 = vpop.f32.mrf.mxu2 }
 0x362   : > { %v15942_v56 = vadd.f32 %v2777_v24, %v2620_v36  ;;  %v2856_v5 = vpop.f32.mrf.mxu3  ;;  %v2622_v35 = vpop.f32.mrf.mxu0 }
 0x363   : > { %v15944_v27 = vadd.f32 %v2856_v5, %v2699_v11  ;;  %v2701_v23 = vpop.f32.mrf.mxu1  ;;  %v2623_v55 = vadd.f32 %v2622_v35, %v15561_v48 }
 0x364   : > { %v2702_v42 = vadd.f32 %v2701_v23, %v15563_v18  ;;  %v14164_v23 = vld [vmem:[%s14554_s29 + $0xc8] sm:$0xff] }
 0x365   : > { %11189 = vmatmul.msk.bf16.gmra.mxu0 %vm602_vm0, %v14162_v8 }
 0x366   : > { %11203 = vmatmul.msk.bf16.gmra.mxu1 %vm602_vm0, %v14162_v8  ;;  %11217 = vmatmul.msk.bf16.gmra.mxu2 %vm602_vm0, %v14163_v49 }
 0x367   : > { %11231 = vmatmul.msk.bf16.gmra.mxu3 %vm602_vm0, %v14163_v49 }
 0x369   : > { %v2780_v41 = vpop.f32.mrf.mxu2 }
 0x36a   : > { %v15954_v10 = vadd.f32 %v2780_v41, %v2623_v55  ;;  %v2859_v58 = vpop.f32.mrf.mxu3  ;;  %v2624_v51 = vpop.f32.mrf.mxu0  ;;  %v14165_v55 = vld [vmem:[%s14554_s29 + $0x1a8] sm:$0xff] }
 0x36b   : > { %v15956_v60 = vadd.f32 %v2859_v58, %v2702_v42  ;;  %v2703_v36 = vpop.f32.mrf.mxu1  ;;  %v2625_v11 = vadd.f32 %v2624_v51, %v15573_v6 }
 0x36c   : > { %v2704_v24 = vadd.f32 %v2703_v36, %v15576_v61 }
 0x371   : > { %v2782_v5 = vpop.f32.mrf.mxu2 }
 0x372   : > { %v15960_v8 = vadd.f32 %v2782_v5, %v2625_v11  ;;  %v2861_v48 = vpop.f32.mrf.mxu3  ;;  %v2627_v35 = vpop.f32.mrf.mxu0 }
 0x373   : > { %v15962_v49 = vadd.f32 %v2861_v48, %v2704_v24  ;;  %v2706_v18 = vpop.f32.mrf.mxu1  ;;  %v2628_v61 = vadd.f32 %v2627_v35, %v15592_v34 }
 0x374   : > { %v2707_v6 = vadd.f32 %v2706_v18, %v15594_v63  ;;  %v14166_v18 = vld [vmem:[%s14554_s29 + $0xd0] sm:$0xff] }
 0x375   : > { %11190 = vmatmul.msk.bf16.gmra.mxu0 %vm602_vm0, %v14164_v23 }
 0x376   : > { %11204 = vmatmul.msk.bf16.gmra.mxu1 %vm602_vm0, %v14164_v23  ;;  %11218 = vmatmul.msk.bf16.gmra.mxu2 %vm602_vm0, %v14165_v55 }
 0x377   : > { %11232 = vmatmul.msk.bf16.gmra.mxu3 %vm602_vm0, %v14165_v55 }
 0x379   : > { %v2785_v42 = vpop.f32.mrf.mxu2 }
 0x37a   : > { %v15972_v41 = vadd.f32 %v2785_v42, %v2628_v61  ;;  %v2864_v58 = vpop.f32.mrf.mxu3  ;;  %v2629_v51 = vpop.f32.mrf.mxu0  ;;  %v14167_v61 = vld [vmem:[%s14554_s29 + $0x1b0] sm:$0xff] }
 0x37b   : > { %v15974_v36 = vadd.f32 %v2864_v58, %v2707_v6  ;;  %v2708_v11 = vpop.f32.mrf.mxu1  ;;  %v2630_v24 = vadd.f32 %v2629_v51, %v15604_v37  ;;  %v13570_v37 = vld [vmem:[%s20280_s1 + $0x54] sm:$0xf0]  ;;  %v13569_v6 = vld [vmem:[%s20280_s1 + $0x54] sm:$0xf]  ;;  %v11675_v51 = vld [vmem:[%s20280_s1 + $0x58] sm:$0xf0] }
 0x37c   : > { %v2709_v5 = vadd.f32 %v2708_v11, %v15607_v28  ;;  %v11673_v28 = vld [vmem:[%s20280_s1 + $0x50] sm:$0xf] }
 0x37d   : > { %v15998_v58 = vor.u32 %v13570_v37, %v11673_v28  ;;  %v11543_v37 = vld [vmem:[%s20280_s1 + $0xb8] sm:$0xf0] }
 0x37f   : > { %20773 = vst [vmem:[#allocation67_spill] sm:$0xff] %v15998_v58  ;;  %4299 = vmatpush.bf16.msrb.mxu2 %v15998_v58  ;;  %v14168_v58 = vld [vmem:[%s14554_s29 + $0xd8] sm:$0xff] }
 0x381   : > { %v2787_v48 = vpop.f32.mrf.mxu2 }
 0x382   : > { %v15978_v23 = vadd.f32 %v2787_v48, %v2630_v24  ;;  %v2866_v34 = vpop.f32.mrf.mxu3  ;;  %v2632_v35 = vpop.f32.mrf.mxu0 }
 0x383   : > { %v15980_v55 = vadd.f32 %v2866_v34, %v2709_v5  ;;  %v2711_v63 = vpop.f32.mrf.mxu1  ;;  %v2633_v42 = vadd.f32 %v2632_v35, %v15623_v15  ;;  %v16004_v5 = vor.u32 %v13569_v6, %v11675_v51  ;;  %v11541_v35 = vld [vmem:[%s20280_s1 + $0xb0] sm:$0xf] }
 0x384   : > { %v2712_v11 = vadd.f32 %v2711_v63, %v15625_v20  ;;  %v13596_v20 = vld [vmem:[%s20280_s1 + $0xb4] sm:$0xf0]  ;;  %v13595_v63 = vld [vmem:[%s20280_s1 + $0xb4] sm:$0xf] }
 0x385   : > { %11191 = vmatmul.msk.bf16.gmra.mxu0 %vm602_vm0, %v14166_v18  ;;  %20774 = vst [vmem:[#allocation68_spill] sm:$0xff] %v16004_v5  ;;  %4378 = vmatpush.bf16.msrb.mxu3 %v16004_v5  ;;  %v16021_v28 = vor.u32 %v13596_v20, %v11541_v35  ;;  %v16026_v6 = vor.u32 %v13595_v63, %v11543_v37  ;;  %v14169_v63 = vld [vmem:[%s14554_s29 + $0x1b8] sm:$0xff] }
 0x386   : > { %11205 = vmatmul.msk.bf16.gmra.mxu1 %vm602_vm0, %v14166_v18  ;;  %11219 = vmatmul.msk.bf16.gmra.mxu2 %vm602_vm0, %v14167_v61 }
 0x387   : > { %11233 = vmatmul.msk.bf16.gmra.mxu3 %vm602_vm0, %v14167_v61  ;;  %20775 = vst [vmem:[#allocation69_spill] sm:$0xff] %v16021_v28  ;;  %3969 = vmatpush.bf16.msrb.mxu0 %v16021_v28 }
 0x388   : > { %20776 = vst [vmem:[#allocation70_spill] sm:$0xff] %v16026_v6  ;;  %4048 = vmatpush.bf16.msrb.mxu1 %v16026_v6 }
 0x389   : > { %v2790_v24 = vpop.f32.mrf.mxu2 }
 0x38a   : > { %v16006_v48 = vadd.f32 %v2790_v24, %v2633_v42  ;;  %v2869_v34 = vpop.f32.mrf.mxu3  ;;  %v2634_v18 = vpop.f32.mrf.mxu0 }
 0x38b   : > { %v16009_v61 = vadd.f32 %v2869_v34, %v2712_v11  ;;  %v2713_v15 = vpop.f32.mrf.mxu1  ;;  %v2635_v42 = vadd.f32 %v2634_v18, %v15635_v54 }
 0x38c   : > { %v2714_v51 = vadd.f32 %v2713_v15, %v15638_v39 }
 0x391   : > { %v2792_v11 = vpop.f32.mrf.mxu2 }
 0x392   : > { %v16032_v24 = vadd.f32 %v2792_v11, %v2635_v42  ;;  %v2871_v34 = vpop.f32.mrf.mxu3  ;;  %v2637_v35 = vpop.f32.mrf.mxu0 }
 0x393   : > { %v16034_v20 = vadd.f32 %v2871_v34, %v2714_v51  ;;  %v2716_v5 = vpop.f32.mrf.mxu1  ;;  %v2638_v39 = vadd.f32 %v2637_v35, %v15654_v16  ;;  %v13531_v35 = vld [vmem:[%s14554_s29 + $0x230] sm:$0xff] }
 0x394   : > { %v2717_v54 = vadd.f32 %v2716_v5, %v15656_v2 }
 0x395   : > { %11192 = vmatmul.msk.bf16.gmra.mxu0 %vm602_vm0, %v14168_v58 }
 0x396   : > { %11206 = vmatmul.msk.bf16.gmra.mxu1 %vm602_vm0, %v14168_v58  ;;  %11220 = vmatmul.msk.bf16.gmra.mxu2 %vm602_vm0, %v14169_v63 }
 0x397   : > { %11234 = vmatmul.msk.bf16.gmra.mxu3 %vm602_vm0, %v14169_v63 }
 0x399   : > { %v2795_v18 = vpop.f32.mrf.mxu2 }
 0x39a   : > { %v16044_v15 = vadd.f32 %v2795_v18, %v2638_v39  ;;  %v2874_v37 = vpop.f32.mrf.mxu3  ;;  %v2639_v42 = vpop.f32.mrf.mxu0  ;;  %v14170_v39 = vld [vmem:[%s14554_s29 + $0x1c0] sm:$0xff] }
 0x39b   : > { %v16046_v51 = vadd.f32 %v2874_v37, %v2717_v54  ;;  %v2718_v11 = vpop.f32.mrf.mxu1  ;;  %v2640_v58 = vadd.f32 %v2639_v42, %v15666_v50 }
 0x39c   : > { %v2719_v34 = vadd.f32 %v2718_v11, %v15668_v3 }
 0x3a1   : > { %v2797_v6 = vpop.f32.mrf.mxu2 }
 0x3a2   : > { %v16050_v28 = vadd.f32 %v2797_v6, %v2640_v58  ;;  %v2876_v63 = vpop.f32.mrf.mxu3  ;;  %v2642_v16 = vpop.f32.mrf.mxu0  ;;  %v11665_v58 = vld [vmem:[%s20280_s1 + $0x40] sm:$0xf] }
 0x3a3   : > { %v16053_v2 = vadd.f32 %v2876_v63, %v2719_v34  ;;  %v2721_v5 = vpop.f32.mrf.mxu1  ;;  %v2643_v3 = vadd.f32 %v2642_v16, %v15684_v13  ;;  %v13568_v34 = vld [vmem:[%s20280_s1 + $0x44] sm:$0xf0]  ;;  %v13567_v13 = vld [vmem:[%s20280_s1 + $0x44] sm:$0xf]  ;;  %v11667_v63 = vld [vmem:[%s20280_s1 + $0x48] sm:$0xf0] }
 0x3a4   : > { %v2722_v50 = vadd.f32 %v2721_v5, %v15686_v40  ;;  %v16075_v40 = vor.u32 %v13568_v34, %v11665_v58  ;;  %v11533_v16 = vld [vmem:[%s20280_s1 + $0xa0] sm:$0xf]  ;;  %v16086_v5 = vor.u32 %v13567_v13, %v11667_v63 }
 0x3a5   : > { %11235 = vmatmul.msk.bf16.vlgmr.msra.gmra.mxu0 %vm602_vm0, %v14170_v39 }
 0x3a6   : > { %11249 = vmatmul.msk.bf16.vlgmr.msra.gmra.mxu1 %vm602_vm0, %v14170_v39  ;;  %11347 = vmatmul.msk.bf16.vlgmr.msra.gmra.mxu2 %vm602_vm0, %v13531_v35  ;;  %20778 = vst [vmem:[#allocation72_spill] sm:$0xff] %v16075_v40 }
 0x3a7   : > { %11361 = vmatmul.msk.bf16.vlgmr.msra.gmra.mxu3 %vm602_vm0, %v13531_v35  ;;  %v13594_v35 = vld [vmem:[%s20280_s1 + $0xa4] sm:$0xf0]  ;;  %20779 = vst [vmem:[#allocation73_spill] sm:$0xff] %v16086_v5  ;;  %4300 = vmatpush.bf16.msrb.mxu2 %v16075_v40 }
 0x3a8   : > { %v16088_v39 = vor.u32 %v13594_v35, %v11533_v16  ;;  %4379 = vmatpush.bf16.msrb.mxu3 %v16086_v5  ;;  %v13532_v35 = vld [vmem:[%s14554_s29 + $0x238] sm:$0xff] }
 0x3a9   : > { %v2800_v6 = vpop.f32.mrf.mxu2 }
 0x3aa   : > { %v16062_v54 = vadd.f32 %v2800_v6, %v2643_v3  ;;  %v2879_v18 = vpop.f32.mrf.mxu3  ;;  %v2644_v37 = vpop.f32.mrf.mxu0  ;;  %20780 = vst [vmem:[#allocation74_spill] sm:$0xff] %v16088_v39  ;;  %v13593_v3 = vld [vmem:[%s20280_s1 + $0xa4] sm:$0xf]  ;;  %3970 = vmatpush.bf16.msrb.mxu0 %v16088_v39 }
 0x3ab   : > { %v16064_v42 = vadd.f32 %v2879_v18, %v2722_v50  ;;  %v2723_v11 = vpop.f32.mrf.mxu1  ;;  %v11535_v50 = vld [vmem:[%s20280_s1 + $0xa8] sm:$0xf0]  ;;  %v2645_v18 = vadd.f32 %v2644_v37, %v15696_v62 }
 0x3ac   : > { %v16097_v6 = vor.u32 %v13593_v3, %v11535_v50  ;;  %v2724_v58 = vadd.f32 %v2723_v11, %v15698_v12  ;;  %v14171_v50 = vld [vmem:[%s14554_s29 + $0x1c8] sm:$0xff] }
 0x3ad   : > { %20777 = vst [vmem:[#allocation71_spill] sm:$0xff] %v16064_v42 }
 0x3ae   : > { %20781 = vst [vmem:[#allocation75_spill] sm:$0xff] %v16097_v6  ;;  %4049 = vmatpush.bf16.msrb.mxu1 %v16097_v6 }
 0x3b1   : > { %v2802_v34 = vpop.f32.mrf.mxu2 }
 0x3b2   : > { %v16104_v13 = vadd.f32 %v2802_v34, %v2645_v18  ;;  %v2881_v63 = vpop.f32.mrf.mxu3  ;;  %v2647_v16 = vpop.f32.mrf.mxu0 }
 0x3b3   : > { %v16107_v42 = vadd.f32 %v2881_v63, %v2724_v58  ;;  %v2726_v3 = vpop.f32.mrf.mxu1  ;;  %v2648_v12 = vadd.f32 %v2647_v16, %v15714_v0  ;;  %v13533_v16 = vld [vmem:[%s14554_s29 + $0x240] sm:$0xff] }
 0x3b4   : > { %v2727_v62 = vadd.f32 %v2726_v3, %v15716_v19 }
 0x3b5   : > { %11236 = vmatmul.msk.bf16.gmra.mxu0 %vm602_vm0, %v14171_v50 }
 0x3b6   : > { %11250 = vmatmul.msk.bf16.gmra.mxu1 %vm602_vm0, %v14171_v50  ;;  %11348 = vmatmul.msk.bf16.gmra.mxu2 %vm602_vm0, %v13532_v35 }
 0x3b7   : > { %11362 = vmatmul.msk.bf16.gmra.mxu3 %vm602_vm0, %v13532_v35 }
 0x3b9   : > { %v2805_v37 = vpop.f32.mrf.mxu2 }
 0x3ba   : > { %v16116_v11 = vadd.f32 %v2805_v37, %v2648_v12  ;;  %v2884_v18 = vpop.f32.mrf.mxu3  ;;  %v2649_v58 = vpop.f32.mrf.mxu0  ;;  %v14172_v12 = vld [vmem:[%s14554_s29 + $0x1d0] sm:$0xff] }
 0x3bb   : > { %v16118_v34 = vadd.f32 %v2884_v18, %v2727_v62  ;;  %v2728_v63 = vpop.f32.mrf.mxu1  ;;  %v2650_v50 = vadd.f32 %v2649_v58, %v15726_v14 }
 0x3bc   : > { %v2729_v5 = vadd.f32 %v2728_v63, %v15728_v53 }
 0x3c1   : > { %v2807_v40 = vpop.f32.mrf.mxu2 }
 0x3c2   : > { %v16122_v6 = vadd.f32 %v2807_v40, %v2650_v50  ;;  %v2886_v35 = vpop.f32.mrf.mxu3  ;;  %v2652_v0 = vpop.f32.mrf.mxu0 }
 0x3c3   : > { %v16125_v19 = vadd.f32 %v2886_v35, %v2729_v5  ;;  %v2731_v3 = vpop.f32.mrf.mxu1  ;;  %v2653_v53 = vadd.f32 %v2652_v0, %v15744_v45  ;;  %v13534_v0 = vld [vmem:[%s14554_s29 + $0x248] sm:$0xff] }
 0x3c4   : > { %v2732_v14 = vadd.f32 %v2731_v3, %v15746_v26 }
 0x3c5   : > { %11237 = vmatmul.msk.bf16.gmra.mxu0 %vm602_vm0, %v14172_v12 }
 0x3c6   : > { %11251 = vmatmul.msk.bf16.gmra.mxu1 %vm602_vm0, %v14172_v12  ;;  %11349 = vmatmul.msk.bf16.gmra.mxu2 %vm602_vm0, %v13533_v16 }
 0x3c7   : > { %11363 = vmatmul.msk.bf16.gmra.mxu3 %vm602_vm0, %v13533_v16 }
 0x3c9   : > { %v2810_v40 = vpop.f32.mrf.mxu2 }
 0x3ca   : > { %v16134_v62 = vadd.f32 %v2810_v40, %v2653_v53  ;;  %v2889_v5 = vpop.f32.mrf.mxu3  ;;  %v2654_v37 = vpop.f32.mrf.mxu0  ;;  %v11657_v53 = vld [vmem:[%s20280_s1 + $0x30] sm:$0xf]  ;;  %v11659_v40 = vld [vmem:[%s20280_s1 + $0x38] sm:$0xf0] }
 0x3cb   : > { %v16136_v18 = vadd.f32 %v2889_v5, %v2732_v14  ;;  %v2733_v58 = vpop.f32.mrf.mxu1  ;;  %v2655_v63 = vadd.f32 %v2654_v37, %v15756_v1  ;;  %v13566_v1 = vld [vmem:[%s20280_s1 + $0x34] sm:$0xf0]  ;;  %v11525_v5 = vld [vmem:[%s20280_s1 + $0x90] sm:$0xf] }
 0x3cc   : > { %v2734_v50 = vadd.f32 %v2733_v58, %v15758_v33  ;;  %v13565_v33 = vld [vmem:[%s20280_s1 + $0x34] sm:$0xf]  ;;  %v16154_v14 = vor.u32 %v13566_v1, %v11657_v53  ;;  %v13592_v37 = vld [vmem:[%s20280_s1 + $0x94] sm:$0xf0] }
 0x3cd   : > { %v14173_v58 = vld [vmem:[%s14554_s29 + $0x1d8] sm:$0xff] }
 0x3ce   : > { %20782 = vst [vmem:[#allocation76_spill] sm:$0xff] %v16154_v14  ;;  %4301 = vmatpush.bf16.msrb.mxu2 %v16154_v14 }
 0x3d1   : > { %v2812_v35 = vpop.f32.mrf.mxu2 }
 0x3d2   : > { %v16140_v12 = vadd.f32 %v2812_v35, %v2655_v63  ;;  %v2891_v16 = vpop.f32.mrf.mxu3  ;;  %v2657_v45 = vpop.f32.mrf.mxu0  ;;  %v16167_v63 = vor.u32 %v13565_v33, %v11659_v40  ;;  %v13591_v35 = vld [vmem:[%s20280_s1 + $0x94] sm:$0xf] }
 0x3d3   : > { %v16143_v26 = vadd.f32 %v2891_v16, %v2734_v50  ;;  %v2736_v3 = vpop.f32.mrf.mxu1  ;;  %v16169_v50 = vor.u32 %v13592_v37, %v11525_v5  ;;  %v11527_v16 = vld [vmem:[%s20280_s1 + $0x98] sm:$0xf0]  ;;  %v2658_v1 = vadd.f32 %v2657_v45, %v15774_v22 }
 0x3d4   : > { %20783 = vst [vmem:[#allocation77_spill] sm:$0xff] %v16167_v63  ;;  %v16179_v53 = vor.u32 %v13591_v35, %v11527_v16  ;;  %4380 = vmatpush.bf16.msrb.mxu3 %v16167_v63  ;;  %v2737_v33 = vadd.f32 %v2736_v3, %v15776_v38  ;;  %v13535_v3 = vld [vmem:[%s14554_s29 + $0x250] sm:$0xff] }
 0x3d5   : > { %11238 = vmatmul.msk.bf16.gmra.mxu0 %vm602_vm0, %v14173_v58  ;;  %20784 = vst [vmem:[#allocation78_spill] sm:$0xff] %v16169_v50 }
 0x3d6   : > { %11252 = vmatmul.msk.bf16.gmra.mxu1 %vm602_vm0, %v14173_v58  ;;  %11350 = vmatmul.msk.bf16.gmra.mxu2 %vm602_vm0, %v13534_v0  ;;  %20785 = vst [vmem:[#allocation79_spill] sm:$0xff] %v16179_v53 }
 0x3d7   : > { %11364 = vmatmul.msk.bf16.gmra.mxu3 %vm602_vm0, %v13534_v0  ;;  %3971 = vmatpush.bf16.msrb.mxu0 %v16169_v50 }
 0x3d8   : > { %4050 = vmatpush.bf16.msrb.mxu1 %v16179_v53 }
 0x3d9   : > { %v2815_v40 = vpop.f32.mrf.mxu2 }
 0x3da   : > { %v16188_v5 = vadd.f32 %v2815_v40, %v2658_v1  ;;  %v2894_v37 = vpop.f32.mrf.mxu3  ;;  %v2659_v58 = vpop.f32.mrf.mxu0  ;;  %v14174_v1 = vld [vmem:[%s14554_s29 + $0x1e0] sm:$0xff] }
 0x3db   : > { %v16190_v0 = vadd.f32 %v2894_v37, %v2737_v33  ;;  %v2738_v35 = vpop.f32.mrf.mxu1  ;;  %v2660_v22 = vadd.f32 %v2659_v58, %v15786_v57 }
 0x3dc   : > { %v2739_v45 = vadd.f32 %v2738_v35, %v15788_v31 }
 0x3e1   : > { %v2817_v16 = vpop.f32.mrf.mxu2 }
 0x3e2   : > { %v16194_v63 = vadd.f32 %v2817_v16, %v2660_v22  ;;  %v2896_v14 = vpop.f32.mrf.mxu3  ;;  %v2662_v38 = vpop.f32.mrf.mxu0 }
 0x3e3   : > { %v16197_v50 = vadd.f32 %v2896_v14, %v2739_v45  ;;  %v2741_v53 = vpop.f32.mrf.mxu1  ;;  %v2663_v31 = vadd.f32 %v2662_v38, %v15804_v30  ;;  %v13536_v38 = vld [vmem:[%s14554_s29 + $0x258] sm:$0xff] }
 0x3e4   : > { %v2742_v57 = vadd.f32 %v2741_v53, %v15806_v46 }
 0x3e5   : > { %11239 = vmatmul.msk.bf16.gmra.mxu0 %vm602_vm0, %v14174_v1 }
 0x3e6   : > { %11253 = vmatmul.msk.bf16.gmra.mxu1 %vm602_vm0, %v14174_v1  ;;  %11351 = vmatmul.msk.bf16.gmra.mxu2 %vm602_vm0, %v13535_v3 }
 0x3e7   : > { %11365 = vmatmul.msk.bf16.gmra.mxu3 %vm602_vm0, %v13535_v3 }
 0x3e9   : > { %v2820_v33 = vpop.f32.mrf.mxu2 }
 0x3ea   : > { %v16206_v40 = vadd.f32 %v2820_v33, %v2663_v31  ;;  %v2899_v14 = vpop.f32.mrf.mxu3  ;;  %v2664_v37 = vpop.f32.mrf.mxu0  ;;  %v14175_v31 = vld [vmem:[%s14554_s29 + $0x1e8] sm:$0xff] }
 0x3eb   : > { %v16208_v58 = vadd.f32 %v2899_v14, %v2742_v57  ;;  %v2743_v35 = vpop.f32.mrf.mxu1  ;;  %v2665_v22 = vadd.f32 %v2664_v37, %v15816_v32  ;;  %v11649_v32 = vld [vmem:[%s20280_s1 + $0x20] sm:$0xf]  ;;  %v13563_v57 = vld [vmem:[%s20280_s1 + $0x24] sm:$0xf]  ;;  %v11651_v37 = vld [vmem:[%s20280_s1 + $0x28] sm:$0xf0] }
 0x3ec   : > { %v2744_v45 = vadd.f32 %v2743_v35, %v15818_v21  ;;  %v13564_v21 = vld [vmem:[%s20280_s1 + $0x24] sm:$0xf0]  ;;  %v20787_v35 = vld [vmem:[#allocation56_spill] sm:$0xff] }
 0x3ed   : > { %v16232_v14 = vor.u32 %v13564_v21, %v11649_v32  ;;  %v13589_v32 = vld [vmem:[%s20280_s1 + $0x84] sm:$0xf] }
 0x3ef   : > { %20786 = vst [vmem:[#allocation80_spill] sm:$0xff] %v16232_v14  ;;  %4302 = vmatpush.bf16.msrb.mxu2 %v16232_v14 }
 0x3f1   : > { %v2822_v16 = vpop.f32.mrf.mxu2 }
 0x3f2   : > { %v16212_v1 = vadd.f32 %v2822_v16, %v2665_v22  ;;  %v2901_v3 = vpop.f32.mrf.mxu3  ;;  %v2667_v30 = vpop.f32.mrf.mxu0  ;;  %v16238_v16 = vor.u32 %v13563_v57, %v11651_v37  ;;  %v11519_v57 = vld [vmem:[%s20280_s1 + $0x88] sm:$0xf0] }
 0x3f3   : > { %v16215_v46 = vadd.f32 %v2901_v3, %v2744_v45  ;;  %v2746_v53 = vpop.f32.mrf.mxu1  ;;  %v2668_v33 = vadd.f32 %v2667_v30, %v15834_v52  ;;  %v11517_v30 = vld [vmem:[%s20280_s1 + $0x80] sm:$0xf] }
 0x3f4   : > { %v2747_v22 = vadd.f32 %v2746_v53, %v20787_v35  ;;  %20788 = vst [vmem:[#allocation56_spill] sm:$0xff] %v16238_v16  ;;  %4381 = vmatpush.bf16.msrb.mxu3 %v16238_v16  ;;  %v13590_v53 = vld [vmem:[%s20280_s1 + $0x84] sm:$0xf0] }
 0x3f5   : > { %11240 = vmatmul.msk.bf16.gmra.mxu0 %vm602_vm0, %v14175_v31  ;;  %v16255_v21 = vor.u32 %v13590_v53, %v11517_v30  ;;  %v13537_v53 = vld [vmem:[%s14554_s29 + $0x260] sm:$0xff] }
 0x3f6   : > { %11254 = vmatmul.msk.bf16.gmra.mxu1 %vm602_vm0, %v14175_v31  ;;  %11352 = vmatmul.msk.bf16.gmra.mxu2 %vm602_vm0, %v13536_v38 }
 0x3f7   : > { %11366 = vmatmul.msk.bf16.gmra.mxu3 %vm602_vm0, %v13536_v38  ;;  %20790 = vst [vmem:[#allocation82_spill] sm:$0xff] %v16255_v21  ;;  %3972 = vmatpush.bf16.msrb.mxu0 %v16255_v21 }
 0x3f9   : > { %v2825_v45 = vpop.f32.mrf.mxu2 }
 0x3fa   : > { %v16240_v3 = vadd.f32 %v2825_v45, %v2668_v33  ;;  %v2904_v38 = vpop.f32.mrf.mxu3  ;;  %v2669_v31 = vpop.f32.mrf.mxu0  ;;  %v16260_v33 = vor.u32 %v13589_v32, %v11519_v57 }
 0x3fb   : > { %v16243_v39 = vadd.f32 %v2904_v38, %v2747_v22  ;;  %v2748_v52 = vpop.f32.mrf.mxu1  ;;  %v2670_v37 = vadd.f32 %v2669_v31, %v15846_v59  ;;  %v20793_v59 = vld [vmem:[#allocation57_spill] sm:$0xff]  ;;  %v20794_v31 = vld [vmem:[#allocation58_spill] sm:$0xff] }
 0x3fc   : > { %20791 = vst [vmem:[#allocation83_spill] sm:$0xff] %v16260_v33  ;;  %4051 = vmatpush.bf16.msrb.mxu1 %v16260_v33  ;;  %v2749_v35 = vadd.f32 %v2748_v52, %v15848_v17 }
 0x3fd   : > { %20789 = vst [vmem:[#allocation81_spill] sm:$0xff] %v16243_v39  ;;  %v14176_v39 = vld [vmem:[%s14554_s29 + $0x1f0] sm:$0xff] }
 0x401   : > { %v2827_v22 = vpop.f32.mrf.mxu2 }
 0x402   : > { %v16266_v45 = vadd.f32 %v2827_v22, %v2670_v37  ;;  %v2906_v38 = vpop.f32.mrf.mxu3  ;;  %v2672_v30 = vpop.f32.mrf.mxu0 }
 0x403   : > { %v16269_v16 = vadd.f32 %v2906_v38, %v2749_v35  ;;  %v2751_v14 = vpop.f32.mrf.mxu1  ;;  %v2673_v17 = vadd.f32 %v2672_v30, %v20793_v59  ;;  %v13538_v59 = vld [vmem:[%s14554_s29 + $0x268] sm:$0xff] }
 0x404   : > { %v2752_v52 = vadd.f32 %v2751_v14, %v20794_v31 }
 0x405   : > { %20792 = vst [vmem:[#allocation84_spill] sm:$0xff] %v16269_v16  ;;  %11241 = vmatmul.msk.bf16.gmra.mxu0 %vm602_vm0, %v14176_v39 }
 0x406   : > { %11255 = vmatmul.msk.bf16.gmra.mxu1 %vm602_vm0, %v14176_v39  ;;  %11353 = vmatmul.msk.bf16.gmra.mxu2 %vm602_vm0, %v13537_v53 }
 0x407   : > { %11367 = vmatmul.msk.bf16.gmra.mxu3 %vm602_vm0, %v13537_v53 }
 0x409   : > { %v2830_v32 = vpop.f32.mrf.mxu2 }
 0x40a   : > { %v16278_v57 = vadd.f32 %v2830_v32, %v2673_v17  ;;  %v2909_v37 = vpop.f32.mrf.mxu3  ;;  %v2674_v35 = vpop.f32.mrf.mxu0  ;;  %v14177_v17 = vld [vmem:[%s14554_s29 + $0x1f8] sm:$0xff] }
 0x40b   : > { %v16280_v22 = vadd.f32 %v2909_v37, %v2752_v52  ;;  %v2753_v38 = vpop.f32.mrf.mxu1  ;;  %v2675_v39 = vadd.f32 %v2674_v35, %v15876_v9 }
 0x40c   : > { %20795 = vst [vmem:[#allocation57_spill] sm:$0xff] %v16278_v57  ;;  %v2754_v33 = vadd.f32 %v2753_v38, %v15878_v43  ;;  %v20799_v43 = vld [vmem:[#allocation61_spill] sm:$0xff] }
 0x40d   : > { %20796 = vst [vmem:[#allocation58_spill] sm:$0xff] %v16280_v22 }
 0x411   : > { %v2832_v21 = vpop.f32.mrf.mxu2 }
 0x412   : > { %v16284_v16 = vadd.f32 %v2832_v21, %v2675_v39  ;;  %v2911_v53 = vpop.f32.mrf.mxu3  ;;  %v2677_v30 = vpop.f32.mrf.mxu0  ;;  %v20800_v21 = vld [vmem:[#allocation62_spill] sm:$0xff] }
 0x413   : > { %v16287_v14 = vadd.f32 %v2911_v53, %v2754_v33  ;;  %v2756_v31 = vpop.f32.mrf.mxu1  ;;  %v2678_v9 = vadd.f32 %v2677_v30, %v20799_v43  ;;  %v20802_v53 = vld [vmem:[#allocation65_spill] sm:$0xff]  ;;  %v13539_v43 = vld [vmem:[%s14554_s29 + $0x270] sm:$0xff] }
 0x414   : > { %20797 = vst [vmem:[#allocation85_spill] sm:$0xff] %v16284_v16  ;;  %v2757_v52 = vadd.f32 %v2756_v31, %v20800_v21  ;;  %v11641_v21 = vld [vmem:[%s20280_s1 + $0x10] sm:$0xf] }
 0x415   : > { %20798 = vst [vmem:[#allocation86_spill] sm:$0xff] %v16287_v14  ;;  %11242 = vmatmul.msk.bf16.gmra.mxu0 %vm602_vm0, %v14177_v17 }
 0x416   : > { %11256 = vmatmul.msk.bf16.gmra.mxu1 %vm602_vm0, %v14177_v17  ;;  %11354 = vmatmul.msk.bf16.gmra.mxu2 %vm602_vm0, %v13538_v59  ;;  %v20803_v17 = vld [vmem:[#allocation66_spill] sm:$0xff] }
 0x417   : > { %11368 = vmatmul.msk.bf16.gmra.mxu3 %vm602_vm0, %v13538_v59 }
 0x419   : > { %v2835_v32 = vpop.f32.mrf.mxu2 }
 0x41a   : > { %v16296_v37 = vadd.f32 %v2835_v32, %v2678_v9  ;;  %v2914_v33 = vpop.f32.mrf.mxu3  ;;  %v2679_v35 = vpop.f32.mrf.mxu0  ;;  %v13561_v32 = vld [vmem:[%s20280_s1 + $0x14] sm:$0xf] }
 0x41b   : > { %v16298_v38 = vadd.f32 %v2914_v33, %v2757_v52  ;;  %v2758_v39 = vpop.f32.mrf.mxu1  ;;  %v2680_v14 = vadd.f32 %v2679_v35, %v20802_v53  ;;  %v13562_v52 = vld [vmem:[%s20280_s1 + $0x14] sm:$0xf0]  ;;  %v14178_v35 = vld [vmem:[%s14554_s29 + $0x200] sm:$0xff] }
 0x41c   : > { %v2759_v16 = vadd.f32 %v2758_v39, %v20803_v17  ;;  %v13588_v33 = vld [vmem:[%s20280_s1 + $0x74] sm:$0xf0]  ;;  %v13587_v17 = vld [vmem:[%s20280_s1 + $0x74] sm:$0xf] }
 0x41d   : > { %20801 = vst [vmem:[#allocation61_spill] sm:$0xff] %v16298_v38 }
 0x421   : > { %v2837_v22 = vpop.f32.mrf.mxu2 }
 0x422   : > { %v16302_v57 = vadd.f32 %v2837_v22, %v2680_v14  ;;  %v2916_v59 = vpop.f32.mrf.mxu3  ;;  %v2984_v30 = vpop.f32.mrf.mxu0  ;;  %v16316_v22 = vor.u32 %v13562_v52, %v11641_v21  ;;  %v11509_v14 = vld [vmem:[%s20280_s1 + $0x70] sm:$0xf] }
 0x423   : > { %v16305_v31 = vadd.f32 %v2916_v59, %v2759_v16  ;;  %v3063_v9 = vpop.f32.mrf.mxu1  ;;  %v11643_v16 = vld [vmem:[%s20280_s1 + $0x18] sm:$0xf0]  ;;  %v16331_v53 = vor.u32 %v13588_v33, %v11509_v14  ;;  %v3133_v52 = vadd.f32 %v2984_v30, %v15918_v7 }
 0x424   : > { %20804 = vst [vmem:[#allocation62_spill] sm:$0xff] %v16302_v57  ;;  %v16329_v39 = vor.u32 %v13561_v32, %v11643_v16  ;;  %v11511_v59 = vld [vmem:[%s20280_s1 + $0x78] sm:$0xf0]  ;;  %4303 = vmatpush.bf16.msrb.mxu2 %v16316_v22  ;;  %v3134_v32 = vadd.f32 %v3063_v9, %v15920_v44 }
 0x425   : > { %20805 = vst [vmem:[#allocation65_spill] sm:$0xff] %v16305_v31  ;;  %11243 = vmatmul.msk.bf16.gmra.mxu0 %vm602_vm0, %v14178_v35  ;;  %v16341_v21 = vor.u32 %v13587_v17, %v11511_v59  ;;  %v20811_v31 = vld [vmem:[#allocation15_spill] sm:$0xff] }
 0x426   : > { %20806 = vst [vmem:[#allocation66_spill] sm:$0xff] %v16316_v22  ;;  %11257 = vmatmul.msk.bf16.gmra.mxu1 %vm602_vm0, %v14178_v35  ;;  %11355 = vmatmul.msk.bf16.gmra.mxu2 %vm602_vm0, %v13539_v43  ;;  %v20810_v22 = vld [vmem:[#allocation10_spill] sm:$0xff] }
 0x427   : > { %20807 = vst [vmem:[#allocation87_spill] sm:$0xff] %v16329_v39  ;;  %11369 = vmatmul.msk.bf16.gmra.mxu3 %vm602_vm0, %v13539_v43  ;;  %3973 = vmatpush.bf16.msrb.mxu0 %v16331_v53  ;;  %v20812_v7 = vmax.f32 %v20810_v22, %v20811_v31  ;;  %v20814_v31 = vld [vmem:[#allocation12_spill] sm:$0xff] }
 0x428   : > { %20808 = vst [vmem:[#allocation88_spill] sm:$0xff] %v16331_v53  ;;  %4382 = vmatpush.bf16.msrb.mxu3 %v16329_v39  ;;  %4052 = vmatpush.bf16.msrb.mxu1 %v16341_v21 }
 0x429   : > { %20809 = vst [vmem:[#allocation89_spill] sm:$0xff] %v16341_v21  ;;  %v3339_v16 = vpop.f32.mrf.mxu2  ;;  %v13540_v21 = vld [vmem:[%s14554_s29 + $0x278] sm:$0xff] }
 0x42a   : > { %v3488_v14 = vadd.f32 %v3339_v16, %v3133_v52  ;;  %v3418_v33 = vpop.f32.mrf.mxu3  ;;  %v2986_v35 = vpop.f32.mrf.mxu0  ;;  %v16359_v52 = vld [vmem:[%s20281_s2] ss:$0 sm:$0xff] }
 0x42b   : > { %v3489_v17 = vadd.f32 %v3418_v33, %v3134_v32  ;;  %v3065_v43 = vpop.f32.mrf.mxu1  ;;  %v3135_v39 = vadd.f32 %v2986_v35, %v15924_v4  ;;  %v14179_v33 = vld [vmem:[%s14554_s29 + $0x208] sm:$0xff] }
 0x42c   : > { %v3136_v53 = vadd.f32 %v3065_v43, %v15926_v25  ;;  %v20813_v4 = vld [vmem:[#allocation11_spill] sm:$0xff] }
 0x42d   : > { %v3544_v59 = vmax.f32 %v3488_v14, %v3489_v17  ;;  %v20815_v22 = vmax.f32 %v20813_v4, %v20814_v31  ;;  %v20817_v4 = vld [vmem:[#allocation20_spill] sm:$0xff] }
 0x42f   : > { %v3572_v30 = vmax.f32 %v20812_v7, %v3544_v59 }
 0x431   : > { %v3341_v44 = vpop.f32.mrf.mxu2  ;;  %v3603_v25 = vadd.f32 %v16359_v52, %v3572_v30 }
 0x432   : > { %v3490_v9 = vadd.f32 %v3341_v44, %v3135_v39  ;;  %v3420_v57 = vpop.f32.mrf.mxu3  ;;  %v2989_v38 = vpop.f32.mrf.mxu0 }
 0x433   : > { %v3491_v32 = vadd.f32 %v3420_v57, %v3136_v53  ;;  %v3068_v16 = vpop.f32.mrf.mxu1  ;;  %v3137_v35 = vadd.f32 %v2989_v38, %v15936_v47  ;;  %v3631_v44 = vmax.f32 %v3603_v25, 0.0  ;;  %v13541_v25 = vld [vmem:[%s14554_s29 + $0x280] sm:$0xff] }
 0x434   : > { %v3138_v53 = vadd.f32 %v3068_v16, %v15938_v29 }
 0x435   : > { %v3545_v14 = vmax.f32 %v3490_v9, %v3491_v32  ;;  %11244 = vmatmul.msk.bf16.gmra.mxu0 %vm602_vm0, %v14179_v33 }
 0x436   : > { %11258 = vmatmul.msk.bf16.gmra.mxu1 %vm602_vm0, %v14179_v33  ;;  %11356 = vmatmul.msk.bf16.gmra.mxu2 %vm602_vm0, %v13540_v21 }
 0x437   : > { %v3573_v39 = vmax.f32 %v20815_v22, %v3545_v14  ;;  %11370 = vmatmul.msk.bf16.gmra.mxu3 %vm602_vm0, %v13540_v21  ;;  %v20816_v21 = vld [vmem:[#allocation19_spill] sm:$0xff] }
 0x438   : > { %v20818_v47 = vmax.f32 %v20816_v21, %v20817_v4 }
 0x439   : > { %v3604_v57 = vadd.f32 %v16359_v52, %v3573_v39  ;;  %v3344_v17 = vpop.f32.mrf.mxu2 }
 0x43a   : > { %v3492_v43 = vadd.f32 %v3344_v17, %v3137_v35  ;;  %v3423_v59 = vpop.f32.mrf.mxu3  ;;  %v2991_v7 = vpop.f32.mrf.mxu0 }
 0x43b   : > { %v3632_v9 = vmax.f32 %v3604_v57, 0.0  ;;  %v3493_v30 = vadd.f32 %v3423_v59, %v3138_v53  ;;  %v3070_v32 = vpop.f32.mrf.mxu1  ;;  %v3139_v31 = vadd.f32 %v2991_v7, %v15942_v56  ;;  %v14180_v59 = vld [vmem:[%s14554_s29 + $0x210] sm:$0xff]  ;;  %v20819_v56 = vld [vmem:[#allocation13_spill] sm:$0xff]  ;;  %v20820_v7 = vld [vmem:[#allocation14_spill] sm:$0xff] }
 0x43c   : > { %v3140_v29 = vadd.f32 %v3070_v32, %v15944_v27  ;;  %v20821_v27 = vmax.f32 %v20819_v56, %v20820_v7  ;;  %v11501_v56 = vld [vmem:[%s20280_s1 + $0x60] sm:$0xf] }
 0x43d   : > { %v13898_v33 = vpack.c.bf16 %v3632_v9, %v3631_v44  ;;  %v3546_v14 = vmax.f32 %v3492_v43, %v3493_v30 }
 0x43f   : > { %13899 = vst [vmem:[#allocation2 + $0xb0] sm:$0xff] %v13898_v33   ;;  %v3574_v38 = vmax.f32 %v20818_v47, %v3546_v14 }
 0x441   : > { %v3346_v16 = vpop.f32.mrf.mxu2  ;;  %v3605_v43 = vadd.f32 %v16359_v52, %v3574_v38 }
 0x442   : > { %v3494_v22 = vadd.f32 %v3346_v16, %v3139_v31  ;;  %v3425_v39 = vpop.f32.mrf.mxu3  ;;  %v2994_v35 = vpop.f32.mrf.mxu0 }
 0x443   : > { %v3495_v57 = vadd.f32 %v3425_v39, %v3140_v29  ;;  %v3073_v53 = vpop.f32.mrf.mxu1  ;;  %v3141_v9 = vadd.f32 %v2994_v35, %v15954_v10  ;;  %v3633_v47 = vmax.f32 %v3605_v43, 0.0  ;;  %v20822_v39 = vld [vmem:[#allocation21_spill] sm:$0xff]  ;;  %v11633_v10 = vld [vmem:[%s20280_s1] sm:$0xf]  ;;  %v11635_v43 = vld [vmem:[%s20280_s1 + $0x8] sm:$0xf0] }
 0x444   : > { %v3142_v32 = vadd.f32 %v3073_v53, %v15956_v60  ;;  %v13560_v60 = vld [vmem:[%s20280_s1 + $0x4] sm:$0xf0] }
 0x445   : > { %v3547_v17 = vmax.f32 %v3494_v22, %v3495_v57  ;;  %11245 = vmatmul.msk.bf16.gmra.mxu0 %vm602_vm0, %v14180_v59  ;;  %v20823_v57 = vld [vmem:[#allocation22_spill] sm:$0xff]  ;;  %v16401_v53 = vor.u32 %v13560_v60, %v11633_v10 }
 0x446   : > { %11259 = vmatmul.msk.bf16.gmra.mxu1 %vm602_vm0, %v14180_v59  ;;  %11357 = vmatmul.msk.bf16.gmra.mxu2 %vm602_vm0, %v13541_v25  ;;  %v13559_v59 = vld [vmem:[%s20280_s1 + $0x4] sm:$0xf] }
 0x447   : > { %v3575_v44 = vmax.f32 %v20821_v27, %v3547_v17  ;;  %11371 = vmatmul.msk.bf16.gmra.mxu3 %vm602_vm0, %v13541_v25  ;;  %v20824_v25 = vmax.f32 %v20822_v39, %v20823_v57  ;;  %4304 = vmatpush.bf16.msrb.mxu2 %v16401_v53  ;;  %v20826_v39 = vld [vmem:[#allocation24_spill] sm:$0xff] }
 0x449   : > { %v3606_v30 = vadd.f32 %v16359_v52, %v3575_v44  ;;  %v3349_v33 = vpop.f32.mrf.mxu2  ;;  %v16413_v44 = vor.u32 %v13559_v59, %v11635_v43 }
 0x44a   : > { %v3496_v14 = vadd.f32 %v3349_v33, %v3141_v9  ;;  %v3428_v21 = vpop.f32.mrf.mxu3  ;;  %v2996_v4 = vpop.f32.mrf.mxu0  ;;  %v13585_v9 = vld [vmem:[%s20280_s1 + $0x64] sm:$0xf] }
 0x44b   : > { %v3634_v31 = vmax.f32 %v3606_v30, 0.0  ;;  %v3497_v29 = vadd.f32 %v3428_v21, %v3142_v32  ;;  %v3075_v38 = vpop.f32.mrf.mxu1  ;;  %v3143_v35 = vadd.f32 %v2996_v4, %v15960_v8  ;;  %v13586_v8 = vld [vmem:[%s20280_s1 + $0x64] sm:$0xf0]  ;;  %v11503_v30 = vld [vmem:[%s20280_s1 + $0x68] sm:$0xf0]  ;;  %4383 = vmatpush.bf16.msrb.mxu3 %v16413_v44 }
 0x44c   : > { %v3144_v7 = vadd.f32 %v3075_v38, %v15962_v49  ;;  %v13542_v49 = vld [vmem:[%s14554_s29 + $0x288] sm:$0xff]  ;;  %v16426_v21 = vor.u32 %v13586_v8, %v11501_v56  ;;  %v16428_v4 = vor.u32 %v13585_v9, %v11503_v30  ;;  %v14181_v38 = vld [vmem:[%s14554_s29 + $0x218] sm:$0xff] }
 0x44d   : > { %v13903_v16 = vpack.c.bf16 %v3634_v31, %v3633_v47  ;;  %v3548_v22 = vmax.f32 %v3496_v14, %v3497_v29 }
 0x44e   : > { %3974 = vmatpush.bf16.msrb.mxu0 %v16426_v21  ;;  %4053 = vmatpush.bf16.msrb.mxu1 %v16428_v4 }
 0x44f   : > { %14085 = vst [vmem:[#allocation2] sm:$0xff] %v13903_v16   ;;  %v3576_v17 = vmax.f32 %v20824_v25, %v3548_v22  ;;  %v20825_v22 = vld [vmem:[#allocation18_spill] sm:$0xff] }
 0x450   : > { %v20827_v57 = vmax.f32 %v20825_v22, %v20826_v39 }
 0x451   : > { %v3351_v27 = vpop.f32.mrf.mxu2  ;;  %v3607_v16 = vadd.f32 %v16359_v52, %v3576_v17 }
 0x452   : > { %v3498_v32 = vadd.f32 %v3351_v27, %v3143_v35  ;;  %v3430_v33 = vpop.f32.mrf.mxu3  ;;  %v2999_v14 = vpop.f32.mrf.mxu0 }
 0x453   : > { %v3499_v47 = vadd.f32 %v3430_v33, %v3144_v7  ;;  %v3078_v31 = vpop.f32.mrf.mxu1  ;;  %v3145_v10 = vadd.f32 %v2999_v14, %v15972_v41  ;;  %v3635_v27 = vmax.f32 %v3607_v16, 0.0  ;;  %v20828_v33 = vld [vmem:[#allocation25_spill] sm:$0xff]  ;;  %v13543_v16 = vld [vmem:[%s14554_s29 + $0x290] sm:$0xff] }
 0x454   : > { %v3146_v35 = vadd.f32 %v3078_v31, %v15974_v36 }
 0x455   : > { %v3549_v29 = vmax.f32 %v3498_v32, %v3499_v47  ;;  %11246 = vmatmul.msk.bf16.gmra.mxu0 %vm602_vm0, %v14181_v38 }
 0x456   : > { %11260 = vmatmul.msk.bf16.gmra.mxu1 %vm602_vm0, %v14181_v38  ;;  %11358 = vmatmul.msk.bf16.gmra.mxu2 %vm602_vm0, %v13542_v49 }
 0x457   : > { %v3577_v25 = vmax.f32 %v20827_v57, %v3549_v29  ;;  %11372 = vmatmul.msk.bf16.gmra.mxu3 %vm602_vm0, %v13542_v49  ;;  %v20829_v49 = vld [vmem:[#allocation27_spill] sm:$0xff] }
 0x458   : > { %v20830_v41 = vmax.f32 %v20828_v33, %v20829_v49 }
 0x459   : > { %v3608_v60 = vadd.f32 %v16359_v52, %v3577_v25  ;;  %v3354_v59 = vpop.f32.mrf.mxu2 }
 0x45a   : > { %v3500_v43 = vadd.f32 %v3354_v59, %v3145_v10  ;;  %v3433_v56 = vpop.f32.mrf.mxu3  ;;  %v3001_v7 = vpop.f32.mrf.mxu0  ;;  %v14182_v10 = vld [vmem:[%s14554_s29 + $0x220] sm:$0xff] }
 0x45b   : > { %v3636_v8 = vmax.f32 %v3608_v60, 0.0  ;;  %v3501_v17 = vadd.f32 %v3433_v56, %v3146_v35  ;;  %v3080_v9 = vpop.f32.mrf.mxu1  ;;  %v3147_v47 = vadd.f32 %v3001_v7, %v15978_v23  ;;  %v20831_v23 = vld [vmem:[#allocation28_spill] sm:$0xff]  ;;  %v20832_v35 = vld [vmem:[#allocation23_spill] sm:$0xff] }
 0x45c   : > { %v3148_v36 = vadd.f32 %v3080_v9, %v15980_v55  ;;  %v20833_v55 = vmax.f32 %v20831_v23, %v20832_v35 }
 0x45d   : > { %v13908_v30 = vpack.c.bf16 %v3636_v8, %v3635_v27  ;;  %v3550_v32 = vmax.f32 %v3500_v43, %v3501_v17 }
 0x45f   : > { %14086 = vst [vmem:[#allocation2 + $0xd8] sm:$0xff] %v13908_v30   ;;  %v3578_v14 = vmax.f32 %v20830_v41, %v3550_v32 }
 0x461   : > { %v3356_v31 = vpop.f32.mrf.mxu2  ;;  %v3609_v60 = vadd.f32 %v16359_v52, %v3578_v14 }
 0x462   : > { %v3502_v29 = vadd.f32 %v3356_v31, %v3147_v47  ;;  %v3435_v38 = vpop.f32.mrf.mxu3  ;;  %v3004_v22 = vpop.f32.mrf.mxu0  ;;  %v20834_v47 = vld [vmem:[#allocation30_spill] sm:$0xff] }
 0x463   : > { %v3503_v39 = vadd.f32 %v3435_v38, %v3148_v36  ;;  %v3083_v57 = vpop.f32.mrf.mxu1  ;;  %v3149_v43 = vadd.f32 %v3004_v22, %v16006_v48  ;;  %v3637_v30 = vmax.f32 %v3609_v60, 0.0  ;;  %v20835_v36 = vld [vmem:[#allocation31_spill] sm:$0xff] }
 0x464   : > { %v3150_v7 = vadd.f32 %v3083_v57, %v16009_v61  ;;  %v20836_v31 = vmax.f32 %v20834_v47, %v20835_v36  ;;  %v12017_v61 = vld [vmem:[%s20280_s1 + $0x170] sm:$0xf] }
 0x465   : > { %v3551_v25 = vmax.f32 %v3502_v29, %v3503_v39  ;;  %11247 = vmatmul.msk.bf16.gmra.mxu0 %vm602_vm0, %v14182_v10  ;;  %v13648_v29 = vld [vmem:[%s20280_s1 + $0x174] sm:$0xf0]  ;;  %v12019_v39 = vld [vmem:[%s20280_s1 + $0x178] sm:$0xf0] }
 0x466   : > { %11261 = vmatmul.msk.bf16.gmra.mxu1 %vm602_vm0, %v14182_v10  ;;  %11359 = vmatmul.msk.bf16.gmra.mxu2 %vm602_vm0, %v13543_v16  ;;  %v16473_v22 = vor.u32 %v13648_v29, %v12017_v61 }
 0x467   : > { %v3579_v59 = vmax.f32 %v20833_v55, %v3551_v25  ;;  %11373 = vmatmul.msk.bf16.gmra.mxu3 %vm602_vm0, %v13543_v16  ;;  %v13647_v16 = vld [vmem:[%s20280_s1 + $0x174] sm:$0xf] }
 0x468   : > { %v16482_v10 = vor.u32 %v13647_v16, %v12019_v39  ;;  %5095 = vmatpush.bf16.msra.mxu2 %v16473_v22 }
 0x469   : > { %v3610_v56 = vadd.f32 %v16359_v52, %v3579_v59  ;;  %v3359_v27 = vpop.f32.mrf.mxu2 }
 0x46a   : > { %v3504_v8 = vadd.f32 %v3359_v27, %v3149_v43  ;;  %v3438_v17 = vpop.f32.mrf.mxu3  ;;  %v3006_v9 = vpop.f32.mrf.mxu0  ;;  %5174 = vmatpush.bf16.msra.mxu3 %v16482_v10  ;;  %v11845_v43 = vld [vmem:[%s20280_s1 + $0x110] sm:$0xf]  ;;  %v11847_v27 = vld [vmem:[%s20280_s1 + $0x118] sm:$0xf0] }
 0x46b   : > { %v3638_v32 = vmax.f32 %v3610_v56, 0.0  ;;  %v3505_v33 = vadd.f32 %v3438_v17, %v3150_v7  ;;  %v3085_v49 = vpop.f32.mrf.mxu1  ;;  %v3151_v38 = vadd.f32 %v3006_v9, %v16032_v24  ;;  %v13544_v24 = vld [vmem:[%s14554_s29 + $0x298] sm:$0xff]  ;;  %v13621_v7 = vld [vmem:[%s20280_s1 + $0x114] sm:$0xf]  ;;  %v14183_v17 = vld [vmem:[%s14554_s29 + $0x228] sm:$0xff] }
 0x46c   : > { %v3152_v57 = vadd.f32 %v3085_v49, %v16034_v20  ;;  %v13622_v20 = vld [vmem:[%s20280_s1 + $0x114] sm:$0xf0]  ;;  %v16503_v9 = vor.u32 %v13621_v7, %v11847_v27 }
 0x46d   : > { %v13913_v41 = vpack.c.bf16 %v3638_v32, %v3637_v30  ;;  %v3552_v14 = vmax.f32 %v3504_v8, %v3505_v33  ;;  %v16493_v56 = vor.u32 %v13622_v20, %v11845_v43  ;;  %v20837_v32 = vld [vmem:[#allocation32_spill] sm:$0xff]  ;;  %v20838_v33 = vld [vmem:[#allocation33_spill] sm:$0xff] }
 0x46e   : > { %v20839_v49 = vmax.f32 %v20837_v32, %v20838_v33  ;;  %4748 = vmatpush.bf16.msra.mxu1 %v16503_v9  ;;  %v13571_v43 = vld [vmem:[%s14554_s29 + $0x150] sm:$0xff] }
 0x46f   : > { %14087 = vst [vmem:[#allocation2 + $0x18] sm:$0xff] %v13913_v41   ;;  %v3580_v48 = vmax.f32 %v20836_v31, %v3552_v14  ;;  %4669 = vmatpush.bf16.msra.mxu0 %v16493_v56 }
 0x471   : > { %v3361_v25 = vpop.f32.mrf.mxu2  ;;  %v3611_v30 = vadd.f32 %v16359_v52, %v3580_v48 }
 0x472   : > { %v3506_v60 = vadd.f32 %v3361_v25, %v3151_v38  ;;  %v3440_v23 = vpop.f32.mrf.mxu3  ;;  %v3009_v35 = vpop.f32.mrf.mxu0 }
 0x473   : > { %v3507_v55 = vadd.f32 %v3440_v23, %v3152_v57  ;;  %v3088_v59 = vpop.f32.mrf.mxu1  ;;  %v3153_v14 = vadd.f32 %v3009_v35, %v16044_v15  ;;  %v3639_v38 = vmax.f32 %v3611_v30, 0.0  ;;  %v20840_v15 = vld [vmem:[#allocation29_spill] sm:$0xff]  ;;  %v20841_v23 = vld [vmem:[#allocation35_spill] sm:$0xff] }
 0x474   : > { %v3154_v36 = vadd.f32 %v3088_v59, %v16046_v51  ;;  %v20842_v35 = vmax.f32 %v20840_v15, %v20841_v23  ;;  %v20847_v23 = vld [vmem:[#allocation38_spill] sm:$0xff] }
 0x475   : > { %v3553_v8 = vmax.f32 %v3506_v60, %v3507_v55  ;;  %11248 = vmatmul.msk.bf16.gmra.mxu0 %vm602_vm0, %v14183_v17 }
 0x476   : > { %11262 = vmatmul.msk.bf16.gmra.mxu1 %vm602_vm0, %v14183_v17  ;;  %11360 = vmatmul.msk.bf16.gmra.mxu2 %vm602_vm0, %v13544_v24 }
 0x477   : > { %v3581_v41 = vmax.f32 %v20839_v49, %v3553_v8  ;;  %11374 = vmatmul.msk.bf16.gmra.mxu3 %vm602_vm0, %v13544_v24  ;;  %v13545_v8 = vld [vmem:[%s14554_s29 + $0xe0] sm:$0xff]  ;;  %v20844_v49 = vld [vmem:[#allocation37_spill] sm:$0xff] }
 0x479   : > { %v3612_v47 = vadd.f32 %v16359_v52, %v3581_v41  ;;  %v3364_v31 = vpop.f32.mrf.mxu2 }
 0x47a   : > { %v3508_v61 = vadd.f32 %v3364_v31, %v3153_v14  ;;  %v3443_v48 = vpop.f32.mrf.mxu3  ;;  %v3011_v29 = vpop.f32.mrf.mxu0 }
 0x47b   : > { %v3640_v16 = vmax.f32 %v3612_v47, 0.0  ;;  %v3509_v39 = vadd.f32 %v3443_v48, %v3154_v36  ;;  %v3090_v57 = vpop.f32.mrf.mxu1  ;;  %v3155_v55 = vadd.f32 %v3011_v29, %v16050_v28  ;;  %v20843_v28 = vld [vmem:[#allocation36_spill] sm:$0xff]  ;;  %v20846_v36 = vld [vmem:[#allocation71_spill] sm:$0xff] }
 0x47c   : > { %v3156_v51 = vadd.f32 %v3090_v57, %v16053_v2  ;;  %v20845_v2 = vmax.f32 %v20843_v28, %v20844_v49  ;;  %v11837_v49 = vld [vmem:[%s20280_s1 + $0x100] sm:$0xf] }
 0x47d   : > { %v13918_v25 = vpack.c.bf16 %v3640_v16, %v3639_v38  ;;  %v3554_v60 = vmax.f32 %v3508_v61, %v3509_v39 }
 0x47f   : > { %14088 = vst [vmem:[#allocation2 + $0x50] sm:$0xff] %v13918_v25   ;;  %v3582_v24 = vmax.f32 %v20842_v35, %v3554_v60  ;;  %v20848_v35 = vld [vmem:[#allocation34_spill] sm:$0xff] }
 0x481   : > { %v3366_v59 = vpop.f32.mrf.mxu2  ;;  %v3613_v33 = vadd.f32 %v16359_v52, %v3582_v24 }
 0x482   : > { %v3510_v20 = vadd.f32 %v3366_v59, %v3155_v55  ;;  %v3445_v7 = vpop.f32.mrf.mxu3  ;;  %v3014_v27 = vpop.f32.mrf.mxu0 }
 0x483   : > { %v3511_v17 = vadd.f32 %v3445_v7, %v3156_v51  ;;  %v3093_v30 = vpop.f32.mrf.mxu1  ;;  %v3157_v14 = vadd.f32 %v3014_v27, %v16062_v54  ;;  %v3641_v16 = vmax.f32 %v3613_v33, 0.0  ;;  %v20849_v54 = vmax.f32 %v20847_v23, %v20848_v35  ;;  %v13646_v33 = vld [vmem:[%s20280_s1 + $0x164] sm:$0xf0] }
 0x484   : > { %v3158_v31 = vadd.f32 %v3093_v30, %v20846_v36  ;;  %v11839_v36 = vld [vmem:[%s20280_s1 + $0x108] sm:$0xf0] }
 0x485   : > { %v3555_v32 = vmax.f32 %v3510_v20, %v3511_v17  ;;  %11547 = vmatmul.msk.bf16.vlgmr.msrb.gmra.mxu0 %vm602_vm0, %v13571_v43 }
 0x486   : > { %11561 = vmatmul.msk.bf16.vlgmr.msrb.gmra.mxu1 %vm602_vm0, %v13571_v43  ;;  %11679 = vmatmul.msk.bf16.vlgmr.msrb.gmra.mxu2 %vm602_vm0, %v13545_v8  ;;  %v13572_v43 = vld [vmem:[%s14554_s29 + $0x158] sm:$0xff] }
 0x487   : > { %v3583_v41 = vmax.f32 %v20845_v2, %v3555_v32  ;;  %11693 = vmatmul.msk.bf16.vlgmr.msrb.gmra.mxu3 %vm602_vm0, %v13545_v8  ;;  %v13546_v8 = vld [vmem:[%s14554_s29 + $0xe8] sm:$0xff]  ;;  %v12009_v32 = vld [vmem:[%s20280_s1 + $0x160] sm:$0xf] }
 0x488   : > { %v16548_v28 = vor.u32 %v13646_v33, %v12009_v32  ;;  %v13573_v32 = vld [vmem:[%s14554_s29 + $0x160] sm:$0xff] }
 0x489   : > { %v3614_v47 = vadd.f32 %v16359_v52, %v3583_v41  ;;  %v3369_v61 = vpop.f32.mrf.mxu2 }
 0x48a   : > { %v3512_v48 = vadd.f32 %v3369_v61, %v3157_v14  ;;  %v3448_v29 = vpop.f32.mrf.mxu3  ;;  %v3016_v38 = vpop.f32.mrf.mxu0  ;;  %v13620_v14 = vld [vmem:[%s20280_s1 + $0x104] sm:$0xf0]  ;;  %5096 = vmatpush.bf16.msra.mxu2 %v16548_v28 }
 0x48b   : > { %v3642_v39 = vmax.f32 %v3614_v47, 0.0  ;;  %v3513_v57 = vadd.f32 %v3448_v29, %v3158_v31  ;;  %v3095_v25 = vpop.f32.mrf.mxu1  ;;  %v3159_v55 = vadd.f32 %v3016_v38, %v16104_v13  ;;  %v12011_v13 = vld [vmem:[%s20280_s1 + $0x168] sm:$0xf0]  ;;  %v13619_v47 = vld [vmem:[%s20280_s1 + $0x104] sm:$0xf]  ;;  %v16573_v31 = vor.u32 %v13620_v14, %v11837_v49  ;;  %v13547_v49 = vld [vmem:[%s14554_s29 + $0xf0] sm:$0xff] }
 0x48c   : > { %v3160_v51 = vadd.f32 %v3095_v25, %v16107_v42  ;;  %v13645_v42 = vld [vmem:[%s20280_s1 + $0x164] sm:$0xf]  ;;  %v16575_v61 = vor.u32 %v13619_v47, %v11839_v36  ;;  %v20851_v38 = vld [vmem:[#allocation43_spill] sm:$0xff] }
 0x48d   : > { %v13923_v60 = vpack.c.bf16 %v3642_v39, %v3641_v16  ;;  %v3556_v15 = vmax.f32 %v3512_v48, %v3513_v57  ;;  %v16560_v41 = vor.u32 %v13645_v42, %v12011_v13  ;;  %v20850_v29 = vld [vmem:[#allocation42_spill] sm:$0xff]  ;;  %4670 = vmatpush.bf16.msra.mxu0 %v16573_v31 }
 0x48e   : > { %v20852_v16 = vmax.f32 %v20850_v29, %v20851_v38  ;;  %4749 = vmatpush.bf16.msra.mxu1 %v16575_v61 }
 0x48f   : > { %14089 = vst [vmem:[#allocation2 + $0x68] sm:$0xff] %v13923_v60   ;;  %v3584_v24 = vmax.f32 %v20849_v54, %v3556_v15  ;;  %5175 = vmatpush.bf16.msra.mxu3 %v16560_v41 }
 0x491   : > { %v3371_v59 = vpop.f32.mrf.mxu2  ;;  %v3615_v48 = vadd.f32 %v16359_v52, %v3584_v24 }
 0x492   : > { %v3514_v20 = vadd.f32 %v3371_v59, %v3159_v55  ;;  %v3450_v7 = vpop.f32.mrf.mxu3  ;;  %v3019_v27 = vpop.f32.mrf.mxu0 }
 0x493   : > { %v3515_v17 = vadd.f32 %v3450_v7, %v3160_v51  ;;  %v3098_v30 = vpop.f32.mrf.mxu1  ;;  %v3161_v57 = vadd.f32 %v3019_v27, %v16116_v11  ;;  %v3643_v24 = vmax.f32 %v3615_v48, 0.0  ;;  %v20854_v7 = vld [vmem:[#allocation45_spill] sm:$0xff]  ;;  %v20857_v48 = vld [vmem:[#allocation47_spill] sm:$0xff] }
 0x494   : > { %v3162_v60 = vadd.f32 %v3098_v30, %v16118_v34 }
 0x495   : > { %v3557_v2 = vmax.f32 %v3514_v20, %v3515_v17  ;;  %11548 = vmatmul.msk.bf16.gmra.mxu0 %vm602_vm0, %v13572_v43  ;;  %v20853_v20 = vld [vmem:[#allocation44_spill] sm:$0xff] }
 0x496   : > { %11562 = vmatmul.msk.bf16.gmra.mxu1 %vm602_vm0, %v13572_v43  ;;  %11680 = vmatmul.msk.bf16.gmra.mxu2 %vm602_vm0, %v13546_v8  ;;  %v20855_v27 = vmax.f32 %v20853_v20, %v20854_v7 }
 0x497   : > { %v3585_v39 = vmax.f32 %v20852_v16, %v3557_v2  ;;  %11694 = vmatmul.msk.bf16.gmra.mxu3 %vm602_vm0, %v13546_v8 }
 0x499   : > { %v3616_v25 = vadd.f32 %v16359_v52, %v3585_v39  ;;  %v3374_v15 = vpop.f32.mrf.mxu2 }
 0x49a   : > { %v3516_v23 = vadd.f32 %v3374_v15, %v3161_v57  ;;  %v3453_v35 = vpop.f32.mrf.mxu3  ;;  %v3021_v54 = vpop.f32.mrf.mxu0 }
 0x49b   : > { %v3644_v55 = vmax.f32 %v3616_v25, 0.0  ;;  %v3517_v51 = vadd.f32 %v3453_v35, %v3162_v60  ;;  %v3100_v11 = vpop.f32.mrf.mxu1  ;;  %v3163_v34 = vadd.f32 %v3021_v54, %v16122_v6  ;;  %v20856_v6 = vld [vmem:[#allocation41_spill] sm:$0xff] }
 0x49c   : > { %v3164_v17 = vadd.f32 %v3100_v11, %v16125_v19  ;;  %v20858_v19 = vmax.f32 %v20856_v6, %v20857_v48  ;;  %v20859_v11 = vld [vmem:[#allocation48_spill] sm:$0xff] }
 0x49d   : > { %v13928_v59 = vpack.c.bf16 %v3644_v55, %v3643_v24  ;;  %v3558_v43 = vmax.f32 %v3516_v23, %v3517_v51 }
 0x49f   : > { %14090 = vst [vmem:[#allocation2 + $0x30] sm:$0xff] %v13928_v59   ;;  %v3586_v8 = vmax.f32 %v20855_v27, %v3558_v43  ;;  %v20860_v59 = vld [vmem:[#allocation49_spill] sm:$0xff]  ;;  %v13574_v27 = vld [vmem:[%s14554_s29 + $0x168] sm:$0xff] }
 0x4a1   : > { %v3376_v30 = vpop.f32.mrf.mxu2  ;;  %v3617_v36 = vadd.f32 %v16359_v52, %v3586_v8 }
 0x4a2   : > { %v3518_v33 = vadd.f32 %v3376_v30, %v3163_v34  ;;  %v3455_v42 = vpop.f32.mrf.mxu3  ;;  %v3024_v13 = vpop.f32.mrf.mxu0  ;;  %v13548_v30 = vld [vmem:[%s14554_s29 + $0xf8] sm:$0xff] }
 0x4a3   : > { %v3519_v2 = vadd.f32 %v3455_v42, %v3164_v17  ;;  %v3103_v14 = vpop.f32.mrf.mxu1  ;;  %v3165_v38 = vadd.f32 %v3024_v13, %v16134_v62  ;;  %v3645_v23 = vmax.f32 %v3617_v36, 0.0  ;;  %v20861_v62 = vmax.f32 %v20859_v11, %v20860_v59  ;;  %v13643_v11 = vld [vmem:[%s20280_s1 + $0x154] sm:$0xf]  ;;  %v12003_v59 = vld [vmem:[%s20280_s1 + $0x158] sm:$0xf0] }
 0x4a4   : > { %v3166_v39 = vadd.f32 %v3103_v14, %v16136_v18 }
 0x4a5   : > { %v3559_v47 = vmax.f32 %v3518_v33, %v3519_v2  ;;  %11549 = vmatmul.msk.bf16.gmra.mxu0 %vm602_vm0, %v13573_v32 }
 0x4a6   : > { %11563 = vmatmul.msk.bf16.gmra.mxu1 %vm602_vm0, %v13573_v32  ;;  %11681 = vmatmul.msk.bf16.gmra.mxu2 %vm602_vm0, %v13547_v49 }
 0x4a7   : > { %v3587_v29 = vmax.f32 %v20858_v19, %v3559_v47  ;;  %11695 = vmatmul.msk.bf16.gmra.mxu3 %vm602_vm0, %v13547_v49  ;;  %v20863_v49 = vld [vmem:[#allocation46_spill] sm:$0xff] }
 0x4a9   : > { %v3618_v16 = vadd.f32 %v16359_v52, %v3587_v29  ;;  %v3379_v57 = vpop.f32.mrf.mxu2 }
 0x4aa   : > { %v3520_v25 = vadd.f32 %v3379_v57, %v3165_v38  ;;  %v3458_v60 = vpop.f32.mrf.mxu3  ;;  %v3026_v15 = vpop.f32.mrf.mxu0 }
 0x4ab   : > { %v3646_v35 = vmax.f32 %v3618_v16, 0.0  ;;  %v3521_v54 = vadd.f32 %v3458_v60, %v3166_v39  ;;  %v3105_v24 = vpop.f32.mrf.mxu1  ;;  %v3167_v20 = vadd.f32 %v3026_v15, %v16140_v12  ;;  %v20862_v12 = vld [vmem:[#allocation50_spill] sm:$0xff]  ;;  %v20865_v15 = vld [vmem:[#allocation52_spill] sm:$0xff] }
 0x4ac   : > { %v3168_v18 = vadd.f32 %v3105_v24, %v16143_v26  ;;  %v20864_v26 = vmax.f32 %v20862_v12, %v20863_v49  ;;  %v13644_v24 = vld [vmem:[%s20280_s1 + $0x154] sm:$0xf0]  ;;  %v20868_v49 = vld [vmem:[#allocation51_spill] sm:$0xff] }
 0x4ad   : > { %v13933_v55 = vpack.c.bf16 %v3646_v35, %v3645_v23  ;;  %v3560_v51 = vmax.f32 %v3520_v25, %v3521_v54  ;;  %v20866_v23 = vld [vmem:[#allocation53_spill] sm:$0xff] }
 0x4ae   : > { %v20867_v35 = vmax.f32 %v20865_v15, %v20866_v23  ;;  %v20871_v23 = vld [vmem:[#allocation55_spill] sm:$0xff] }
 0x4af   : > { %14091 = vst [vmem:[#allocation2 + $0x48] sm:$0xff] %v13933_v55   ;;  %v3588_v43 = vmax.f32 %v20861_v62, %v3560_v51  ;;  %v11829_v62 = vld [vmem:[%s20280_s1 + $0xf0] sm:$0xf] }
 0x4b1   : > { %v3381_v7 = vpop.f32.mrf.mxu2  ;;  %v3619_v13 = vadd.f32 %v16359_v52, %v3588_v43 }
 0x4b2   : > { %v3522_v8 = vadd.f32 %v3381_v7, %v3167_v20  ;;  %v3460_v34 = vpop.f32.mrf.mxu3  ;;  %v3029_v17 = vpop.f32.mrf.mxu0  ;;  %v13617_v7 = vld [vmem:[%s20280_s1 + $0xf4] sm:$0xf] }
 0x4b3   : > { %v3523_v32 = vadd.f32 %v3460_v34, %v3168_v18  ;;  %v3108_v33 = vpop.f32.mrf.mxu1  ;;  %v3169_v14 = vadd.f32 %v3029_v17, %v16188_v5  ;;  %v3647_v38 = vmax.f32 %v3619_v13, 0.0  ;;  %v13575_v5 = vld [vmem:[%s14554_s29 + $0x170] sm:$0xff]  ;;  %v16648_v18 = vor.u32 %v13643_v11, %v12003_v59 }
 0x4b4   : > { %v3170_v36 = vadd.f32 %v3108_v33, %v16190_v0  ;;  %v12001_v0 = vld [vmem:[%s20280_s1 + $0x150] sm:$0xf] }
 0x4b5   : > { %v3561_v42 = vmax.f32 %v3522_v8, %v3523_v32  ;;  %11550 = vmatmul.msk.bf16.gmra.mxu0 %vm602_vm0, %v13574_v27  ;;  %v16636_v51 = vor.u32 %v13644_v24, %v12001_v0  ;;  %5176 = vmatpush.bf16.msra.mxu3 %v16648_v18  ;;  %v13576_v24 = vld [vmem:[%s14554_s29 + $0x178] sm:$0xff] }
 0x4b6   : > { %11564 = vmatmul.msk.bf16.gmra.mxu1 %vm602_vm0, %v13574_v27  ;;  %11682 = vmatmul.msk.bf16.gmra.mxu2 %vm602_vm0, %v13548_v30  ;;  %v11831_v27 = vld [vmem:[%s20280_s1 + $0xf8] sm:$0xf0] }
 0x4b7   : > { %v3589_v2 = vmax.f32 %v20864_v26, %v3561_v42  ;;  %11696 = vmatmul.msk.bf16.gmra.mxu3 %vm602_vm0, %v13548_v30  ;;  %v13549_v30 = vld [vmem:[%s14554_s29 + $0x100] sm:$0xff]  ;;  %5097 = vmatpush.bf16.msra.mxu2 %v16636_v51  ;;  %v16663_v32 = vor.u32 %v13617_v7, %v11831_v27 }
 0x4b8   : > { %v20869_v26 = vld [vmem:[#allocation54_spill] sm:$0xff] }
 0x4b9   : > { %v3620_v47 = vadd.f32 %v16359_v52, %v3589_v2  ;;  %v3384_v6 = vpop.f32.mrf.mxu2  ;;  %4750 = vmatpush.bf16.msra.mxu1 %v16663_v32  ;;  %v20870_v2 = vmax.f32 %v20868_v49, %v20869_v26  ;;  %v20875_v27 = vld [vmem:[#allocation6_spill] sm:$0xff] }
 0x4ba   : > { %v3524_v48 = vadd.f32 %v3384_v6, %v3169_v14  ;;  %v3463_v19 = vpop.f32.mrf.mxu3  ;;  %v3031_v29 = vpop.f32.mrf.mxu0 }
 0x4bb   : > { %v3648_v16 = vmax.f32 %v3620_v47, 0.0  ;;  %v3525_v39 = vadd.f32 %v3463_v19, %v3170_v36  ;;  %v3110_v57 = vpop.f32.mrf.mxu1  ;;  %v3171_v55 = vadd.f32 %v3031_v29, %v16194_v63  ;;  %v13618_v63 = vld [vmem:[%s20280_s1 + $0xf4] sm:$0xf0] }
 0x4bc   : > { %v3172_v43 = vadd.f32 %v3110_v57, %v16197_v50  ;;  %v16661_v50 = vor.u32 %v13618_v63, %v11829_v62  ;;  %v13550_v62 = vld [vmem:[%s14554_s29 + $0x108] sm:$0xff] }
 0x4bd   : > { %v13938_v25 = vpack.c.bf16 %v3648_v16, %v3647_v38  ;;  %v3562_v60 = vmax.f32 %v3524_v48, %v3525_v39 }
 0x4be   : > { %4671 = vmatpush.bf16.msra.mxu0 %v16661_v50 }
 0x4bf   : > { %14092 = vst [vmem:[#allocation2 + $0x80] sm:$0xff] %v13938_v25   ;;  %v3590_v54 = vmax.f32 %v20867_v35, %v3562_v60  ;;  %v20872_v35 = vld [vmem:[#allocation4_spill] sm:$0xff] }
 0x4c1   : > { %v3386_v20 = vpop.f32.mrf.mxu2  ;;  %v3621_v12 = vadd.f32 %v16359_v52, %v3590_v54 }
 0x4c2   : > { %v3526_v8 = vadd.f32 %v3386_v20, %v3171_v55  ;;  %v3465_v34 = vpop.f32.mrf.mxu3  ;;  %v3034_v17 = vpop.f32.mrf.mxu0 }
 0x4c3   : > { %v3527_v33 = vadd.f32 %v3465_v34, %v3172_v43  ;;  %v3113_v42 = vpop.f32.mrf.mxu1  ;;  %v3173_v47 = vadd.f32 %v3034_v17, %v16206_v40  ;;  %v3649_v16 = vmax.f32 %v3621_v12, 0.0  ;;  %v20873_v40 = vmax.f32 %v20871_v23, %v20872_v35 }
 0x4c4   : > { %v3174_v6 = vadd.f32 %v3113_v42, %v16208_v58 }
 0x4c5   : > { %v3563_v13 = vmax.f32 %v3526_v8, %v3527_v33  ;;  %11551 = vmatmul.msk.bf16.gmra.mxu0 %vm602_vm0, %v13575_v5 }
 0x4c6   : > { %11565 = vmatmul.msk.bf16.gmra.mxu1 %vm602_vm0, %v13575_v5  ;;  %11683 = vmatmul.msk.bf16.gmra.mxu2 %vm602_vm0, %v13549_v30 }
 0x4c7   : > { %v3591_v14 = vmax.f32 %v20870_v2, %v3563_v13  ;;  %11697 = vmatmul.msk.bf16.gmra.mxu3 %vm602_vm0, %v13549_v30  ;;  %v20877_v30 = vld [vmem:[#allocation81_spill] sm:$0xff] }
 0x4c9   : > { %v3622_v36 = vadd.f32 %v16359_v52, %v3591_v14  ;;  %v3389_v48 = vpop.f32.mrf.mxu2 }
 0x4ca   : > { %v3528_v19 = vadd.f32 %v3389_v48, %v3173_v47  ;;  %v3468_v29 = vpop.f32.mrf.mxu3  ;;  %v3036_v38 = vpop.f32.mrf.mxu0  ;;  %v20878_v48 = vld [vmem:[#allocation26_spill] sm:$0xff] }
 0x4cb   : > { %v3650_v39 = vmax.f32 %v3622_v36, 0.0  ;;  %v3529_v57 = vadd.f32 %v3468_v29, %v3174_v6  ;;  %v3115_v25 = vpop.f32.mrf.mxu1  ;;  %v3175_v5 = vadd.f32 %v3036_v38, %v16212_v1  ;;  %v20874_v1 = vld [vmem:[#allocation5_spill] sm:$0xff]  ;;  %v11993_v38 = vld [vmem:[%s20280_s1 + $0x140] sm:$0xf] }
 0x4cc   : > { %v3176_v58 = vadd.f32 %v3115_v25, %v16215_v46  ;;  %v20876_v46 = vmax.f32 %v20874_v1, %v20875_v27  ;;  %v13641_v25 = vld [vmem:[%s20280_s1 + $0x144] sm:$0xf]  ;;  %v20884_v27 = vld [vmem:[#allocation8_spill] sm:$0xff] }
 0x4cd   : > { %v13943_v60 = vpack.c.bf16 %v3650_v39, %v3649_v16  ;;  %v3564_v15 = vmax.f32 %v3528_v19, %v3529_v57  ;;  %v20879_v19 = vld [vmem:[#allocation7_spill] sm:$0xff] }
 0x4ce   : > { %v13642_v16 = vld [vmem:[%s20280_s1 + $0x144] sm:$0xf0] }
 0x4cf   : > { %14093 = vst [vmem:[#allocation2 + $0x88] sm:$0xff] %v13943_v60   ;;  %v3592_v54 = vmax.f32 %v20873_v40, %v3564_v15  ;;  %v16707_v57 = vor.u32 %v13642_v16, %v11993_v38  ;;  %v11995_v60 = vld [vmem:[%s20280_s1 + $0x148] sm:$0xf0]  ;;  %v20882_v15 = vld [vmem:[#allocation84_spill] sm:$0xff]  ;;  %v13577_v40 = vld [vmem:[%s14554_s29 + $0x180] sm:$0xff] }
 0x4d1   : > { %v3391_v0 = vpop.f32.mrf.mxu2  ;;  %v3623_v7 = vadd.f32 %v16359_v52, %v3592_v54  ;;  %20881 = vst [vmem:[#allocation10_spill] sm:$0xff] %v16707_v57  ;;  %v16717_v54 = vor.u32 %v13641_v25, %v11995_v60  ;;  %5098 = vmatpush.bf16.msra.mxu2 %v16707_v57  ;;  %v20893_v60 = vld [vmem:[#allocation86_spill] sm:$0xff] }
 0x4d2   : > { %v3530_v55 = vadd.f32 %v3391_v0, %v3175_v5  ;;  %v3470_v11 = vpop.f32.mrf.mxu3  ;;  %v3039_v59 = vpop.f32.mrf.mxu0 }
 0x4d3   : > { %v3531_v43 = vadd.f32 %v3470_v11, %v3176_v58  ;;  %v3118_v20 = vpop.f32.mrf.mxu1  ;;  %v3177_v34 = vadd.f32 %v3039_v59, %v16240_v3  ;;  %v3651_v26 = vmax.f32 %v3623_v7, 0.0  ;;  %v20880_v3 = vmax.f32 %v20878_v48, %v20879_v19  ;;  %20883 = vst [vmem:[#allocation15_spill] sm:$0xff] %v16717_v54  ;;  %5177 = vmatpush.bf16.msra.mxu3 %v16717_v54  ;;  %v11821_v11 = vld [vmem:[%s20280_s1 + $0xe0] sm:$0xf]  ;;  %v13616_v59 = vld [vmem:[%s20280_s1 + $0xe4] sm:$0xf0] }
 0x4d4   : > { %v3178_v33 = vadd.f32 %v3118_v20, %v20877_v30  ;;  %v11823_v20 = vld [vmem:[%s20280_s1 + $0xe8] sm:$0xf0] }
 0x4d5   : > { %v3565_v63 = vmax.f32 %v3530_v55, %v3531_v43  ;;  %11552 = vmatmul.msk.bf16.gmra.mxu0 %vm602_vm0, %v13576_v24  ;;  %v13615_v43 = vld [vmem:[%s20280_s1 + $0xe4] sm:$0xf] }
 0x4d6   : > { %11566 = vmatmul.msk.bf16.gmra.mxu1 %vm602_vm0, %v13576_v24  ;;  %11684 = vmatmul.msk.bf16.gmra.mxu2 %vm602_vm0, %v13550_v62  ;;  %v16737_v7 = vor.u32 %v13615_v43, %v11823_v20  ;;  %v20895_v43 = vld [vmem:[#allocation9_spill] sm:$0xff] }
 0x4d7   : > { %v3593_v8 = vmax.f32 %v20876_v46, %v3565_v63  ;;  %11698 = vmatmul.msk.bf16.gmra.mxu3 %vm602_vm0, %v13550_v62  ;;  %v16728_v62 = vor.u32 %v13616_v59, %v11821_v11  ;;  %v20885_v46 = vld [vmem:[#allocation16_spill] sm:$0xff] }
 0x4d8   : > { %4751 = vmatpush.bf16.msra.mxu1 %v16737_v7  ;;  %v20894_v59 = vld [vmem:[#allocation40_spill] sm:$0xff] }
 0x4d9   : > { %v3624_v17 = vadd.f32 %v16359_v52, %v3593_v8  ;;  %v3394_v42 = vpop.f32.mrf.mxu2  ;;  %v20886_v8 = vmax.f32 %v20884_v27, %v20885_v46  ;;  %4672 = vmatpush.bf16.msra.mxu0 %v16728_v62  ;;  %v20896_v20 = vmax.f32 %v20894_v59, %v20895_v43  ;;  %v20897_v46 = vld [vmem:[#allocation61_spill] sm:$0xff] }
 0x4da   : > { %v3532_v13 = vadd.f32 %v3394_v42, %v3177_v34  ;;  %v3473_v12 = vpop.f32.mrf.mxu3  ;;  %v3041_v49 = vpop.f32.mrf.mxu0  ;;  %v20888_v42 = vld [vmem:[#allocation58_spill] sm:$0xff] }
 0x4db   : > { %v3652_v2 = vmax.f32 %v3624_v17, 0.0  ;;  %v3533_v14 = vadd.f32 %v3473_v12, %v3178_v33  ;;  %v3120_v47 = vpop.f32.mrf.mxu1  ;;  %v3179_v39 = vadd.f32 %v3041_v49, %v16266_v45  ;;  %v13551_v45 = vld [vmem:[%s14554_s29 + $0x110] sm:$0xff]  ;;  %v20887_v17 = vld [vmem:[#allocation57_spill] sm:$0xff] }
 0x4dc   : > { %v3180_v23 = vadd.f32 %v3120_v47, %v20882_v15 }
 0x4dd   : > { %v13948_v36 = vpack.c.bf16 %v3652_v2, %v3651_v26  ;;  %v3566_v6 = vmax.f32 %v3532_v13, %v3533_v14 }
 0x4df   : > { %14094 = vst [vmem:[#allocation2 + $0x8] sm:$0xff] %v13948_v36   ;;  %v3594_v29 = vmax.f32 %v20880_v3, %v3566_v6  ;;  %v20889_v3 = vld [vmem:[#allocation39_spill] sm:$0xff] }
 0x4e1   : > { %v3396_v35 = vpop.f32.mrf.mxu2  ;;  %v3625_v1 = vadd.f32 %v16359_v52, %v3594_v29  ;;  %v20890_v29 = vld [vmem:[#allocation17_spill] sm:$0xff] }
 0x4e2   : > { %v3534_v5 = vadd.f32 %v3396_v35, %v3179_v39  ;;  %v3475_v58 = vpop.f32.mrf.mxu3  ;;  %v3044_v0 = vpop.f32.mrf.mxu0  ;;  %v20891_v38 = vmax.f32 %v20889_v3, %v20890_v29  ;;  %v20892_v39 = vld [vmem:[#allocation85_spill] sm:$0xff]  ;;  %v13578_v35 = vld [vmem:[%s14554_s29 + $0x188] sm:$0xff]  ;;  %v13613_v3 = vld [vmem:[%s20280_s1 + $0xd4] sm:$0xf] }
 0x4e3   : > { %v3535_v24 = vadd.f32 %v3475_v58, %v3180_v23  ;;  %v3123_v55 = vpop.f32.mrf.mxu1  ;;  %v3181_v30 = vadd.f32 %v3044_v0, %v20887_v17  ;;  %v3653_v14 = vmax.f32 %v3625_v1, 0.0  ;;  %v13552_v0 = vld [vmem:[%s14554_s29 + $0x118] sm:$0xff] }
 0x4e4   : > { %v3182_v13 = vadd.f32 %v3123_v55, %v20888_v42  ;;  %v11815_v29 = vld [vmem:[%s20280_s1 + $0xd8] sm:$0xf0] }
 0x4e5   : > { %v3567_v63 = vmax.f32 %v3534_v5, %v3535_v24  ;;  %11553 = vmatmul.msk.bf16.gmra.mxu0 %vm602_vm0, %v13577_v40 }
 0x4e6   : > { %11567 = vmatmul.msk.bf16.gmra.mxu1 %vm602_vm0, %v13577_v40  ;;  %11685 = vmatmul.msk.bf16.gmra.mxu2 %vm602_vm0, %v13551_v45 }
 0x4e7   : > { %v3595_v34 = vmax.f32 %v20886_v8, %v3567_v63  ;;  %11699 = vmatmul.msk.bf16.gmra.mxu3 %vm602_vm0, %v13551_v45 }
 0x4e9   : > { %v3626_v33 = vadd.f32 %v16359_v52, %v3595_v34  ;;  %v3399_v12 = vpop.f32.mrf.mxu2 }
 0x4ea   : > { %v3536_v49 = vadd.f32 %v3399_v12, %v3181_v30  ;;  %v3478_v26 = vpop.f32.mrf.mxu3  ;;  %v3046_v2 = vpop.f32.mrf.mxu0 }
 0x4eb   : > { %v3654_v47 = vmax.f32 %v3626_v33, 0.0  ;;  %v3537_v36 = vadd.f32 %v3478_v26, %v3182_v13  ;;  %v3125_v6 = vpop.f32.mrf.mxu1  ;;  %v3183_v25 = vadd.f32 %v3046_v2, %v20892_v39  ;;  %v11985_v26 = vld [vmem:[%s20280_s1 + $0x130] sm:$0xf]  ;;  %v20900_v39 = vld [vmem:[#allocation59_spill] sm:$0xff] }
 0x4ec   : > { %v3184_v15 = vadd.f32 %v3125_v6, %v20893_v60 }
 0x4ed   : > { %v13953_v48 = vpack.c.bf16 %v3654_v47, %v3653_v14  ;;  %v3568_v19 = vmax.f32 %v3536_v49, %v3537_v36  ;;  %v11987_v14 = vld [vmem:[%s20280_s1 + $0x138] sm:$0xf0]  ;;  %v11813_v47 = vld [vmem:[%s20280_s1 + $0xd0] sm:$0xf] }
 0x4ef   : > { %14095 = vst [vmem:[#allocation2 + $0x58] sm:$0xff] %v13953_v48   ;;  %v3596_v16 = vmax.f32 %v20891_v38, %v3568_v19  ;;  %v13614_v19 = vld [vmem:[%s20280_s1 + $0xd4] sm:$0xf0] }
 0x4f0   : > { %v16798_v38 = vor.u32 %v13614_v19, %v11813_v47  ;;  %v13580_v47 = vld [vmem:[%s14554_s29 + $0x198] sm:$0xff] }
 0x4f1   : > { %v3401_v23 = vpop.f32.mrf.mxu2  ;;  %v3627_v11 = vadd.f32 %v16359_v52, %v3596_v16  ;;  %v16800_v16 = vor.u32 %v13613_v3, %v11815_v29  ;;  %v13554_v3 = vld [vmem:[%s14554_s29 + $0x128] sm:$0xff] }
 0x4f2   : > { %v3538_v40 = vadd.f32 %v3401_v23, %v3183_v25  ;;  %v3480_v5 = vpop.f32.mrf.mxu3  ;;  %v3049_v58 = vpop.f32.mrf.mxu0  ;;  %v20901_v25 = vld [vmem:[#allocation60_spill] sm:$0xff]  ;;  %v20903_v23 = vld [vmem:[#allocation62_spill] sm:$0xff]  ;;  %4673 = vmatpush.bf16.msra.mxu0 %v16798_v38 }
 0x4f3   : > { %v3539_v45 = vadd.f32 %v3480_v5, %v3184_v15  ;;  %v3128_v24 = vpop.f32.mrf.mxu1  ;;  %v3185_v1 = vadd.f32 %v3049_v58, %v16296_v37  ;;  %v3655_v42 = vmax.f32 %v3627_v11, 0.0  ;;  %v13640_v37 = vld [vmem:[%s20280_s1 + $0x134] sm:$0xf0]  ;;  %v20902_v60 = vmax.f32 %v20900_v39, %v20901_v25  ;;  %4752 = vmatpush.bf16.msra.mxu1 %v16800_v16  ;;  %v13553_v11 = vld [vmem:[%s14554_s29 + $0x120] sm:$0xff] }
 0x4f4   : > { %v3186_v8 = vadd.f32 %v3128_v24, %v20897_v46  ;;  %v16775_v2 = vor.u32 %v13640_v37, %v11985_v26  ;;  %v20906_v46 = vld [vmem:[#allocation64_spill] sm:$0xff] }
 0x4f5   : > { %v3569_v55 = vmax.f32 %v3538_v40, %v3539_v45  ;;  %11554 = vmatmul.msk.bf16.gmra.mxu0 %vm602_vm0, %v13578_v35  ;;  %v20904_v40 = vld [vmem:[#allocation65_spill] sm:$0xff] }
 0x4f6   : > { %11568 = vmatmul.msk.bf16.gmra.mxu1 %vm602_vm0, %v13578_v35  ;;  %11686 = vmatmul.msk.bf16.gmra.mxu2 %vm602_vm0, %v13552_v0  ;;  %20898 = vst [vmem:[#allocation11_spill] sm:$0xff] %v16775_v2 }
 0x4f7   : > { %v3597_v63 = vmax.f32 %v20896_v20, %v3569_v55  ;;  %11700 = vmatmul.msk.bf16.gmra.mxu3 %vm602_vm0, %v13552_v0  ;;  %5099 = vmatpush.bf16.msra.mxu2 %v16775_v2  ;;  %v13579_v0 = vld [vmem:[%s14554_s29 + $0x190] sm:$0xff] }
 0x4f9   : > { %v3628_v27 = vadd.f32 %v16359_v52, %v3597_v63  ;;  %v3404_v34 = vpop.f32.mrf.mxu2  ;;  %v13639_v52 = vld [vmem:[%s20280_s1 + $0x134] sm:$0xf]  ;;  %v14184_v63 = vld [vmem:[%s20281_s2] ss:$0 sm:$0xff] }
 0x4fa   : > { %v3540_v17 = vadd.f32 %v3404_v34, %v3185_v1  ;;  %v3483_v30 = vpop.f32.mrf.mxu3  ;;  %v3051_v33 = vpop.f32.mrf.mxu0  ;;  %v16786_v48 = vor.u32 %v13639_v52, %v11987_v14 }
 0x4fb   : > { %v3656_v13 = vmax.f32 %v3628_v27, 0.0  ;;  %v3541_v12 = vadd.f32 %v3483_v30, %v3186_v8  ;;  %v3130_v49 = vpop.f32.mrf.mxu1  ;;  %v3187_v35 = vadd.f32 %v3051_v33, %v20903_v23  ;;  %v20905_v27 = vld [vmem:[#allocation63_spill] sm:$0xff] }
 0x4fc   : > { %20899 = vst [vmem:[#allocation12_spill] sm:$0xff] %v16786_v48  ;;  %5178 = vmatpush.bf16.msra.mxu3 %v16786_v48  ;;  %v3188_v5 = vadd.f32 %v3130_v49, %v20904_v40  ;;  %v20907_v8 = vmax.f32 %v20905_v27, %v20906_v46  ;;  %v11979_v27 = vld [vmem:[%s20280_s1 + $0x128] sm:$0xf0]  ;;  %v11805_v46 = vld [vmem:[%s20280_s1 + $0xc0] sm:$0xf] }
 0x4fd   : > { %v13958_v36 = vpack.c.bf16 %v3656_v13, %v3655_v42  ;;  %v3570_v6 = vmax.f32 %v3540_v17, %v3541_v12 }
 0x4ff   : > { %14096 = vst [vmem:[#allocation2 + $0x38] sm:$0xff] %v13958_v36   ;;  %v3598_v15 = vmax.f32 %v20902_v60, %v3570_v6 }
 0x501   : > { %v3406_v58 = vpop.f32.mrf.mxu2  ;;  %v3629_v1 = vadd.f32 %v14184_v63, %v3598_v15 }
 0x502   : > { %v3542_v45 = vadd.f32 %v3406_v58, %v3187_v35  ;;  %v3485_v24 = vpop.f32.mrf.mxu3  ;;  %v3976_v55 = vpop.f32.mrf.mxu0  ;;  %v13581_v58 = vld [vmem:[%s14554_s29 + $0x1a0] sm:$0xff] }
 0x503   : > { %v3543_v59 = vadd.f32 %v3485_v24, %v3188_v5  ;;  %v4055_v43 = vpop.f32.mrf.mxu1  ;;  %v3657_v12 = vmax.f32 %v3629_v1, 0.0 }
 0x505   : > { %v3571_v20 = vmax.f32 %v3542_v45, %v3543_v59  ;;  %11555 = vmatmul.msk.bf16.gmra.mxu0 %vm602_vm0, %v13579_v0 }
 0x506   : > { %11569 = vmatmul.msk.bf16.gmra.mxu1 %vm602_vm0, %v13579_v0  ;;  %11687 = vmatmul.msk.bf16.gmra.mxu2 %vm602_vm0, %v13553_v11 }
 0x507   : > { %v3599_v34 = vmax.f32 %v20907_v8, %v3571_v20  ;;  %11701 = vmatmul.msk.bf16.gmra.mxu3 %vm602_vm0, %v13553_v11  ;;  %v13638_v20 = vld [vmem:[%s20280_s1 + $0x124] sm:$0xf0] }
 0x508   : > { %v13612_v8 = vld [vmem:[%s20280_s1 + $0xc4] sm:$0xf0] }
 0x509   : > { %v3630_v17 = vadd.f32 %v14184_v63, %v3599_v34  ;;  %v4306_v30 = vpop.f32.mrf.mxu2  ;;  %v13637_v63 = vld [vmem:[%s20280_s1 + $0x124] sm:$0xf] }
 0x50a   : > { %v16822_v33 = vadd.f32 %v4306_v30, %v3976_v55  ;;  %v4385_v42 = vpop.f32.mrf.mxu3  ;;  %v3978_v13 = vpop.f32.mrf.mxu0  ;;  %v13555_v55 = vld [vmem:[%s14554_s29 + $0x130] sm:$0xff]  ;;  %v16867_v34 = vor.u32 %v13637_v63, %v11979_v27  ;;  %v13611_v30 = vld [vmem:[%s20280_s1 + $0xc4] sm:$0xf] }
 0x50b   : > { %v3658_v49 = vmax.f32 %v3630_v17, 0.0  ;;  %v16824_v26 = vadd.f32 %v4385_v42, %v4055_v43  ;;  %v4057_v37 = vpop.f32.mrf.mxu1  ;;  %v11977_v43 = vld [vmem:[%s20280_s1 + $0x120] sm:$0xf]  ;;  %v16869_v17 = vor.u32 %v13612_v8, %v11805_v46  ;;  %v11807_v42 = vld [vmem:[%s20280_s1 + $0xc8] sm:$0xf0]  ;;  %v20918_v27 = vld [vmem:[#allocation88_spill] sm:$0xff] }
 0x50c   : > { %v16855_v1 = vor.u32 %v13638_v20, %v11977_v43  ;;  %20909 = vst [vmem:[#allocation20_spill] sm:$0xff] %v16867_v34  ;;  %5179 = vmatpush.bf16.msra.mxu3 %v16867_v34  ;;  %v20916_v43 = vld [vmem:[#allocation82_spill] sm:$0xff]  ;;  %v20917_v20 = vld [vmem:[#allocation83_spill] sm:$0xff] }
 0x50d   : > { %v13963_v52 = vpack.c.bf16 %v3658_v49, %v3657_v12  ;;  %4674 = vmatpush.bf16.msra.mxu0 %v16869_v17  ;;  %v20910_v49 = vld [vmem:[#allocation69_spill] sm:$0xff] }
 0x50e   : > { %20908 = vst [vmem:[#allocation19_spill] sm:$0xff] %v16855_v1  ;;  %5100 = vmatpush.bf16.msra.mxu2 %v16855_v1 }
 0x50f   : > { %14097 = vst [vmem:[#allocation2 + $0x90] sm:$0xff] %v13963_v52  }
 0x511   : > { %v4308_v14 = vpop.f32.mrf.mxu2 }
 0x512   : > { %v16827_v36 = vadd.f32 %v4308_v14, %v3978_v13  ;;  %v4387_v6 = vpop.f32.mrf.mxu3  ;;  %v3981_v19 = vpop.f32.mrf.mxu0  ;;  %v16879_v13 = vor.u32 %v13611_v30, %v11807_v42  ;;  %5764 = vmatpush.bf16.msrb.mxu2 %v20910_v49  ;;  %v20919_v49 = vld [vmem:[#allocation89_spill] sm:$0xff] }
 0x513   : > { %v16830_v29 = vadd.f32 %v4387_v6, %v4057_v37  ;;  %v4060_v39 = vpop.f32.mrf.mxu1 }
 0x514   : > { %4753 = vmatpush.bf16.msra.mxu1 %v16879_v13 }
 0x515   : > { %11556 = vmatmul.msk.bf16.gmra.mxu0 %vm602_vm0, %v13580_v47 }
 0x516   : > { %11570 = vmatmul.msk.bf16.gmra.mxu1 %vm602_vm0, %v13580_v47  ;;  %11688 = vmatmul.msk.bf16.gmra.mxu2 %vm602_vm0, %v13554_v3  ;;  %v20911_v47 = vld [vmem:[#allocation70_spill] sm:$0xff] }
 0x517   : > { %11702 = vmatmul.msk.bf16.gmra.mxu3 %vm602_vm0, %v13554_v3  ;;  %v20912_v3 = vld [vmem:[#allocation74_spill] sm:$0xff] }
 0x518   : > { %5843 = vmatpush.bf16.msrb.mxu3 %v20911_v47  ;;  %5765 = vmatpush.bf16.msrb.mxu2 %v20912_v3 }
 0x519   : > { %v4311_v25 = vpop.f32.mrf.mxu2 }
 0x51a   : > { %v16836_v60 = vadd.f32 %v4311_v25, %v3981_v19  ;;  %v4390_v15 = vpop.f32.mrf.mxu3  ;;  %v3983_v23 = vpop.f32.mrf.mxu0 }
 0x51b   : > { %v16838_v35 = vadd.f32 %v4390_v15, %v4060_v39  ;;  %v4062_v40 = vpop.f32.mrf.mxu1  ;;  %v20913_v39 = vld [vmem:[#allocation75_spill] sm:$0xff] }
 0x51c   : > { %5844 = vmatpush.bf16.msrb.mxu3 %v20913_v39  ;;  %v13582_v15 = vld [vmem:[%s14554_s29 + $0x1a8] sm:$0xff]  ;;  %v13557_v39 = vld [vmem:[%s14554_s29 + $0x140] sm:$0xff] }
 0x521   : > { %v4313_v5 = vpop.f32.mrf.mxu2 }
 0x522   : > { %v16841_v0 = vadd.f32 %v4313_v5, %v3983_v23  ;;  %v4392_v45 = vpop.f32.mrf.mxu3  ;;  %v3986_v24 = vpop.f32.mrf.mxu0  ;;  %v20914_v23 = vld [vmem:[#allocation78_spill] sm:$0xff] }
 0x523   : > { %v16844_v11 = vadd.f32 %v4392_v45, %v4062_v40  ;;  %v4065_v59 = vpop.f32.mrf.mxu1  ;;  %5766 = vmatpush.bf16.msrb.mxu2 %v20914_v23  ;;  %v13556_v45 = vld [vmem:[%s14554_s29 + $0x138] sm:$0xff] }
 0x525   : > { %11557 = vmatmul.msk.bf16.gmra.mxu0 %vm602_vm0, %v13581_v58 }
 0x526   : > { %11571 = vmatmul.msk.bf16.gmra.mxu1 %vm602_vm0, %v13581_v58  ;;  %11689 = vmatmul.msk.bf16.gmra.mxu2 %vm602_vm0, %v13555_v55 }
 0x527   : > { %11703 = vmatmul.msk.bf16.gmra.mxu3 %vm602_vm0, %v13555_v55  ;;  %5767 = vmatpush.bf16.msrb.mxu2 %v20916_v43  ;;  %v13673_v43 = vld [vmem:[%s20280_s1 + $0x1d4] sm:$0xf] }
 0x529   : > { %v4316_v12 = vpop.f32.mrf.mxu2 }
 0x52a   : > { %v16887_v37 = vadd.f32 %v4316_v12, %v3986_v24  ;;  %v4395_v52 = vpop.f32.mrf.mxu3  ;;  %v3988_v14 = vpop.f32.mrf.mxu0  ;;  %v20915_v24 = vld [vmem:[#allocation79_spill] sm:$0xff] }
 0x52b   : > { %v16890_v6 = vadd.f32 %v4395_v52, %v4065_v59  ;;  %v4067_v19 = vpop.f32.mrf.mxu1  ;;  %5845 = vmatpush.bf16.msrb.mxu3 %v20915_v24  ;;  %5768 = vmatpush.bf16.msrb.mxu2 %v20918_v27  ;;  %v12189_v24 = vld [vmem:[%s20280_s1 + $0x1d0] sm:$0xf] }
 0x52f   : > { %5846 = vmatpush.bf16.msrb.mxu3 %v20917_v20  ;;  %5769 = vmatpush.bf16.msrb.mxu2 %v16426_v21 }
 0x531   : > { %v4318_v25 = vpop.f32.mrf.mxu2 }
 0x532   : > { %v16896_v40 = vadd.f32 %v4318_v25, %v3988_v14  ;;  %v4397_v5 = vpop.f32.mrf.mxu3  ;;  %v3991_v58 = vpop.f32.mrf.mxu0  ;;  %v13583_v14 = vld [vmem:[%s14554_s29 + $0x1b0] sm:$0xff] }
 0x533   : > { %v16900_v55 = vadd.f32 %v4397_v5, %v4067_v19  ;;  %v4070_v59 = vpop.f32.mrf.mxu1  ;;  %5847 = vmatpush.bf16.msrb.mxu3 %v20919_v49 }
 0x535   : > { %11558 = vmatmul.msk.bf16.gmra.mxu0 %vm602_vm0, %v13582_v15 }
 0x536   : > { %11572 = vmatmul.msk.bf16.gmra.mxu1 %vm602_vm0, %v13582_v15  ;;  %11690 = vmatmul.msk.bf16.gmra.mxu2 %vm602_vm0, %v13556_v45 }
 0x537   : > { %11704 = vmatmul.msk.bf16.gmra.mxu3 %vm602_vm0, %v13556_v45 }
 0x538   : > { %5848 = vmatpush.bf16.msrb.mxu3 %v16428_v4 }
 0x539   : > { %v4321_v63 = vpop.f32.mrf.mxu2 }
 0x53a   : > { %v16909_v46 = vadd.f32 %v4321_v63, %v3991_v58  ;;  %v4400_v8 = vpop.f32.mrf.mxu3  ;;  %v3993_v30 = vpop.f32.mrf.mxu0  ;;  %v12191_v63 = vld [vmem:[%s20280_s1 + $0x1d8] sm:$0xf0] }
 0x53b   : > { %v16911_v42 = vadd.f32 %v4400_v8, %v4070_v59  ;;  %v4072_v12 = vpop.f32.mrf.mxu1  ;;  %v13674_v59 = vld [vmem:[%s20280_s1 + $0x1d4] sm:$0xf0]  ;;  %v16944_v27 = vor.u32 %v13673_v43, %v12191_v63 }
 0x53c   : > { %v16939_v20 = vor.u32 %v13674_v59, %v12189_v24  ;;  %v16963_v59 = vld [vmem:[%s14554_s29 + $0x1c0] sm:$0xff] }
 0x53d   : > { %5601 = vmatpush.bf16.msrb.mxu1 %v16944_v27 }
 0x53e   : > { %5522 = vmatpush.bf16.msrb.mxu0 %v16939_v20 }
 0x541   : > { %v4323_v52 = vpop.f32.mrf.mxu2 }
 0x542   : > { %v16917_v47 = vadd.f32 %v4323_v52, %v3993_v30  ;;  %v4402_v19 = vpop.f32.mrf.mxu3  ;;  %v3996_v3 = vpop.f32.mrf.mxu0  ;;  %v13584_v30 = vld [vmem:[%s14554_s29 + $0x1b8] sm:$0xff] }
 0x543   : > { %v16920_v25 = vadd.f32 %v4402_v19, %v4072_v12  ;;  %v4075_v15 = vpop.f32.mrf.mxu1 }
 0x545   : > { %11559 = vmatmul.msk.bf16.gmra.mxu0 %vm602_vm0, %v13583_v14 }
 0x546   : > { %11573 = vmatmul.msk.bf16.gmra.mxu1 %vm602_vm0, %v13583_v14  ;;  %11691 = vmatmul.msk.bf16.gmra.mxu2 %vm602_vm0, %v13557_v39  ;;  %v13558_v14 = vld [vmem:[%s14554_s29 + $0x148] sm:$0xff] }
 0x547   : > { %11705 = vmatmul.msk.bf16.gmra.mxu3 %vm602_vm0, %v13557_v39 }
 0x549   : > { %v4326_v21 = vpop.f32.mrf.mxu2 }
 0x54a   : > { %v16926_v4 = vadd.f32 %v4326_v21, %v3996_v3  ;;  %v4405_v23 = vpop.f32.mrf.mxu3  ;;  %v3998_v5 = vpop.f32.mrf.mxu0 }
 0x54b   : > { %v16928_v58 = vadd.f32 %v4405_v23, %v4075_v15  ;;  %v4077_v45 = vpop.f32.mrf.mxu1 }
 0x551   : > { %v4328_v8 = vpop.f32.mrf.mxu2 }
 0x552   : > { %v16949_v12 = vadd.f32 %v4328_v8, %v3998_v5  ;;  %v4407_v49 = vpop.f32.mrf.mxu3  ;;  %v4001_v52 = vpop.f32.mrf.mxu0 }
 0x553   : > { %v16952_v19 = vadd.f32 %v4407_v49, %v4077_v45  ;;  %v4080_v3 = vpop.f32.mrf.mxu1 }
 0x555   : > { %11560 = vmatmul.msk.bf16.gmra.mxu0 %vm602_vm0, %v13584_v30 }
 0x556   : > { %11574 = vmatmul.msk.bf16.gmra.mxu1 %vm602_vm0, %v13584_v30  ;;  %11692 = vmatmul.msk.bf16.gmra.mxu2 %vm602_vm0, %v13558_v14  ;;  %v13623_v30 = vld [vmem:[%s14554_s29 + $0x230] sm:$0xff] }
 0x557   : > { %11706 = vmatmul.msk.bf16.gmra.mxu3 %vm602_vm0, %v13558_v14 }
 0x559   : > { %v4331_v39 = vpop.f32.mrf.mxu2 }
 0x55a   : > { %v16958_v15 = vadd.f32 %v4331_v39, %v4001_v52  ;;  %v4410_v21 = vpop.f32.mrf.mxu3  ;;  %v4003_v23 = vpop.f32.mrf.mxu0 }
 0x55b   : > { %v16960_v5 = vadd.f32 %v4410_v21, %v4080_v3  ;;  %v4082_v24 = vpop.f32.mrf.mxu1 }
 0x561   : > { %v4333_v45 = vpop.f32.mrf.mxu2 }
 0x562   : > { %v16965_v43 = vadd.f32 %v4333_v45, %v4003_v23  ;;  %v4412_v63 = vpop.f32.mrf.mxu3  ;;  %v4006_v8 = vpop.f32.mrf.mxu0  ;;  %v13672_v45 = vld [vmem:[%s20280_s1 + $0x1c4] sm:$0xf0] }
 0x563   : > { %v16968_v49 = vadd.f32 %v4412_v63, %v4082_v24  ;;  %v4085_v34 = vpop.f32.mrf.mxu1  ;;  %v12181_v24 = vld [vmem:[%s20280_s1 + $0x1c0] sm:$0xf] }
 0x565   : > { %11851 = vmatmul.msk.bf16.vlgmr.msra.gmra.mxu0 %vm602_vm0, %v16963_v59 }
 0x566   : > { %11865 = vmatmul.msk.bf16.vlgmr.msra.gmra.mxu1 %vm602_vm0, %v16963_v59  ;;  %12023 = vmatmul.msk.bf16.vlgmr.msra.gmra.mxu2 %vm602_vm0, %v13623_v30 }
 0x567   : > { %12037 = vmatmul.msk.bf16.vlgmr.msra.gmra.mxu3 %vm602_vm0, %v13623_v30  ;;  %6080 = vmatpush.bf16.msra.mxu2 %v16493_v56  ;;  %v13671_v56 = vld [vmem:[%s20280_s1 + $0x1c4] sm:$0xf] }
 0x568   : > { %6159 = vmatpush.bf16.msra.mxu3 %v16503_v9  ;;  %v16992_v9 = vor.u32 %v13672_v45, %v12181_v24  ;;  %v13624_v24 = vld [vmem:[%s14554_s29 + $0x238] sm:$0xff] }
 0x569   : > { %v4336_v52 = vpop.f32.mrf.mxu2 }
 0x56a   : > { %v16978_v14 = vadd.f32 %v4336_v52, %v4006_v8  ;;  %v4415_v3 = vpop.f32.mrf.mxu3  ;;  %v4008_v39 = vpop.f32.mrf.mxu0  ;;  %5523 = vmatpush.bf16.msrb.mxu0 %v16992_v9 }
 0x56b   : > { %v16980_v21 = vadd.f32 %v4415_v3, %v4085_v34  ;;  %v4087_v23 = vpop.f32.mrf.mxu1  ;;  %6081 = vmatpush.bf16.msra.mxu2 %v16573_v31  ;;  %v12183_v34 = vld [vmem:[%s20280_s1 + $0x1c8] sm:$0xf0] }
 0x56c   : > { %6160 = vmatpush.bf16.msra.mxu3 %v16575_v61  ;;  %v16998_v63 = vor.u32 %v13671_v56, %v12183_v34  ;;  %v17005_v31 = vld [vmem:[%s14554_s29 + $0x1c8] sm:$0xff]  ;;  %v17029_v34 = vld [vmem:[%s14554_s29 + $0x1d0] sm:$0xff] }
 0x56d   : > { %20920 = vst [vmem:[#allocation13_spill] sm:$0xff] %v17005_v31 }
 0x56e   : > { %5602 = vmatpush.bf16.msrb.mxu1 %v16998_v63  ;;  %20921 = vst [vmem:[#allocation14_spill] sm:$0xff] %v17029_v34 }
 0x56f   : > { %6082 = vmatpush.bf16.msra.mxu2 %v16661_v50 }
 0x570   : > { %6161 = vmatpush.bf16.msra.mxu3 %v16663_v32 }
 0x571   : > { %v4338_v8 = vpop.f32.mrf.mxu2 }
 0x572   : > { %v17007_v30 = vadd.f32 %v4338_v8, %v4008_v39  ;;  %v4417_v52 = vpop.f32.mrf.mxu3  ;;  %v4011_v3 = vpop.f32.mrf.mxu0 }
 0x573   : > { %v17010_v45 = vadd.f32 %v4417_v52, %v4087_v23  ;;  %v4090_v61 = vpop.f32.mrf.mxu1  ;;  %6083 = vmatpush.bf16.msra.mxu2 %v16728_v62  ;;  %v13625_v52 = vld [vmem:[%s14554_s29 + $0x240] sm:$0xff] }
 0x574   : > { %6162 = vmatpush.bf16.msra.mxu3 %v16737_v7 }
 0x575   : > { %11852 = vmatmul.msk.bf16.gmra.mxu0 %vm602_vm0, %v17005_v31 }
 0x576   : > { %11866 = vmatmul.msk.bf16.gmra.mxu1 %vm602_vm0, %v17005_v31  ;;  %12024 = vmatmul.msk.bf16.gmra.mxu2 %vm602_vm0, %v13624_v24 }
 0x577   : > { %12038 = vmatmul.msk.bf16.gmra.mxu3 %vm602_vm0, %v13624_v24  ;;  %6084 = vmatpush.bf16.msra.mxu2 %v16798_v38 }
 0x578   : > { %6163 = vmatpush.bf16.msra.mxu3 %v16800_v16 }
 0x579   : > { %v4341_v50 = vpop.f32.mrf.mxu2 }
 0x57a   : > { %v17022_v32 = vadd.f32 %v4341_v50, %v4011_v3  ;;  %v4420_v62 = vpop.f32.mrf.mxu3  ;;  %v4013_v7 = vpop.f32.mrf.mxu0 }
 0x57b   : > { %v17024_v39 = vadd.f32 %v4420_v62, %v4090_v61  ;;  %v4092_v23 = vpop.f32.mrf.mxu1  ;;  %6085 = vmatpush.bf16.msra.mxu2 %v16869_v17 }
 0x57c   : > { %6164 = vmatpush.bf16.msra.mxu3 %v16879_v13 }
 0x581   : > { %v4343_v56 = vpop.f32.mrf.mxu2 }
 0x582   : > { %v17031_v8 = vadd.f32 %v4343_v56, %v4013_v7  ;;  %v4422_v38 = vpop.f32.mrf.mxu3  ;;  %v4016_v16 = vpop.f32.mrf.mxu0  ;;  %v17047_v56 = vld [vmem:[%s14554_s29 + $0x1d8] sm:$0xff] }
 0x583   : > { %v17034_v3 = vadd.f32 %v4422_v38, %v4092_v23  ;;  %v4095_v24 = vpop.f32.mrf.mxu1  ;;  %20926 = vst [vmem:[#allocation25_spill] sm:$0xff] %v17047_v56 }
 0x584   : > { %20922 = vst [vmem:[#allocation21_spill] sm:$0xff] %v17031_v8 }
 0x585   : > { %20923 = vst [vmem:[#allocation22_spill] sm:$0xff] %v17034_v3  ;;  %11853 = vmatmul.msk.bf16.gmra.mxu0 %vm602_vm0, %v17029_v34 }
 0x586   : > { %11867 = vmatmul.msk.bf16.gmra.mxu1 %vm602_vm0, %v17029_v34  ;;  %12025 = vmatmul.msk.bf16.gmra.mxu2 %vm602_vm0, %v13625_v52  ;;  %v13626_v34 = vld [vmem:[%s14554_s29 + $0x248] sm:$0xff] }
 0x587   : > { %12039 = vmatmul.msk.bf16.gmra.mxu3 %vm602_vm0, %v13625_v52  ;;  %v13670_v52 = vld [vmem:[%s20280_s1 + $0x1b4] sm:$0xf0] }
 0x589   : > { %v4346_v17 = vpop.f32.mrf.mxu2 }
 0x58a   : > { %v17042_v13 = vadd.f32 %v4346_v17, %v4016_v16  ;;  %v4425_v61 = vpop.f32.mrf.mxu3  ;;  %v4018_v50 = vpop.f32.mrf.mxu0  ;;  %v12173_v16 = vld [vmem:[%s20280_s1 + $0x1b0] sm:$0xf] }
 0x58b   : > { %v17044_v62 = vadd.f32 %v4425_v61, %v4095_v24  ;;  %v4097_v7 = vpop.f32.mrf.mxu1  ;;  %v13669_v24 = vld [vmem:[%s20280_s1 + $0x1b4] sm:$0xf]  ;;  %v17063_v17 = vor.u32 %v13670_v52, %v12173_v16 }
 0x58c   : > { %20924 = vst [vmem:[#allocation18_spill] sm:$0xff] %v17042_v13 }
 0x58d   : > { %20925 = vst [vmem:[#allocation24_spill] sm:$0xff] %v17044_v62  ;;  %5524 = vmatpush.bf16.msrb.mxu0 %v17063_v17  ;;  %v13627_v62 = vld [vmem:[%s14554_s29 + $0x250] sm:$0xff] }
 0x591   : > { %v4348_v23 = vpop.f32.mrf.mxu2 }
 0x592   : > { %v17049_v38 = vadd.f32 %v4348_v23, %v4018_v50  ;;  %v4427_v1 = vpop.f32.mrf.mxu3  ;;  %v4021_v3 = vpop.f32.mrf.mxu0 }
 0x593   : > { %v17052_v8 = vadd.f32 %v4427_v1, %v4097_v7  ;;  %v4100_v48 = vpop.f32.mrf.mxu1  ;;  %v12175_v1 = vld [vmem:[%s20280_s1 + $0x1b8] sm:$0xf0] }
 0x594   : > { %20927 = vst [vmem:[#allocation27_spill] sm:$0xff] %v17049_v38  ;;  %v17070_v61 = vor.u32 %v13669_v24, %v12175_v1 }
 0x595   : > { %20928 = vst [vmem:[#allocation28_spill] sm:$0xff] %v17052_v8  ;;  %11854 = vmatmul.msk.bf16.gmra.mxu0 %vm602_vm0, %v17047_v56  ;;  %v17083_v8 = vld [vmem:[%s14554_s29 + $0x1e0] sm:$0xff] }
 0x596   : > { %11868 = vmatmul.msk.bf16.gmra.mxu1 %vm602_vm0, %v17047_v56  ;;  %12026 = vmatmul.msk.bf16.gmra.mxu2 %vm602_vm0, %v13626_v34  ;;  %20931 = vst [vmem:[#allocation31_spill] sm:$0xff] %v17083_v8 }
 0x597   : > { %12040 = vmatmul.msk.bf16.gmra.mxu3 %vm602_vm0, %v13626_v34  ;;  %5603 = vmatpush.bf16.msrb.mxu1 %v17070_v61 }
 0x599   : > { %v4351_v50 = vpop.f32.mrf.mxu2 }
 0x59a   : > { %v17078_v7 = vadd.f32 %v4351_v50, %v4021_v3  ;;  %v4430_v23 = vpop.f32.mrf.mxu3  ;;  %v4023_v16 = vpop.f32.mrf.mxu0 }
 0x59b   : > { %v17080_v52 = vadd.f32 %v4430_v23, %v4100_v48  ;;  %v4102_v24 = vpop.f32.mrf.mxu1 }
 0x59c   : > { %20929 = vst [vmem:[#allocation23_spill] sm:$0xff] %v17078_v7 }
 0x59d   : > { %20930 = vst [vmem:[#allocation30_spill] sm:$0xff] %v17080_v52 }
 0x5a1   : > { %v4353_v1 = vpop.f32.mrf.mxu2 }
 0x5a2   : > { %v17085_v56 = vadd.f32 %v4353_v1, %v4023_v16  ;;  %v4432_v38 = vpop.f32.mrf.mxu3  ;;  %v4026_v34 = vpop.f32.mrf.mxu0  ;;  %v17101_v1 = vld [vmem:[%s14554_s29 + $0x1e8] sm:$0xff] }
 0x5a3   : > { %v17088_v13 = vadd.f32 %v4432_v38, %v4102_v24  ;;  %v4105_v2 = vpop.f32.mrf.mxu1  ;;  %20936 = vst [vmem:[#allocation36_spill] sm:$0xff] %v17101_v1 }
 0x5a4   : > { %20932 = vst [vmem:[#allocation32_spill] sm:$0xff] %v17085_v56 }
 0x5a5   : > { %20933 = vst [vmem:[#allocation33_spill] sm:$0xff] %v17088_v13  ;;  %11855 = vmatmul.msk.bf16.gmra.mxu0 %vm602_vm0, %v17083_v8 }
 0x5a6   : > { %11869 = vmatmul.msk.bf16.gmra.mxu1 %vm602_vm0, %v17083_v8  ;;  %12027 = vmatmul.msk.bf16.gmra.mxu2 %vm602_vm0, %v13627_v62  ;;  %v13628_v8 = vld [vmem:[%s14554_s29 + $0x258] sm:$0xff] }
 0x5a7   : > { %12041 = vmatmul.msk.bf16.gmra.mxu3 %vm602_vm0, %v13627_v62 }
 0x5a9   : > { %v4356_v48 = vpop.f32.mrf.mxu2 }
 0x5aa   : > { %v17096_v3 = vadd.f32 %v4356_v48, %v4026_v34  ;;  %v4435_v50 = vpop.f32.mrf.mxu3  ;;  %v4028_v23 = vpop.f32.mrf.mxu0 }
 0x5ab   : > { %v17098_v16 = vadd.f32 %v4435_v50, %v4105_v2  ;;  %v4107_v38 = vpop.f32.mrf.mxu1 }
 0x5ac   : > { %20934 = vst [vmem:[#allocation29_spill] sm:$0xff] %v17096_v3 }
 0x5ad   : > { %20935 = vst [vmem:[#allocation35_spill] sm:$0xff] %v17098_v16 }
 0x5b1   : > { %v4358_v24 = vpop.f32.mrf.mxu2 }
 0x5b2   : > { %v17103_v13 = vadd.f32 %v4358_v24, %v4028_v23  ;;  %v4437_v56 = vpop.f32.mrf.mxu3  ;;  %v4031_v52 = vpop.f32.mrf.mxu0  ;;  %v12165_v23 = vld [vmem:[%s20280_s1 + $0x1a0] sm:$0xf] }
 0x5b3   : > { %v17106_v7 = vadd.f32 %v4437_v56, %v4107_v38  ;;  %v4110_v31 = vpop.f32.mrf.mxu1  ;;  %v13668_v38 = vld [vmem:[%s20280_s1 + $0x1a4] sm:$0xf0] }
 0x5b4   : > { %20937 = vst [vmem:[#allocation37_spill] sm:$0xff] %v17103_v13 }
 0x5b5   : > { %20938 = vst [vmem:[#allocation71_spill] sm:$0xff] %v17106_v7  ;;  %11856 = vmatmul.msk.bf16.gmra.mxu0 %vm602_vm0, %v17101_v1 }
 0x5b6   : > { %11870 = vmatmul.msk.bf16.gmra.mxu1 %vm602_vm0, %v17101_v1  ;;  %12028 = vmatmul.msk.bf16.gmra.mxu2 %vm602_vm0, %v13628_v8 }
 0x5b7   : > { %12042 = vmatmul.msk.bf16.gmra.mxu3 %vm602_vm0, %v13628_v8  ;;  %v13667_v8 = vld [vmem:[%s20280_s1 + $0x1a4] sm:$0xf] }
 0x5b9   : > { %v4361_v2 = vpop.f32.mrf.mxu2 }
 0x5ba   : > { %v17114_v62 = vadd.f32 %v4361_v2, %v4031_v52  ;;  %v4440_v34 = vpop.f32.mrf.mxu3  ;;  %v4033_v48 = vpop.f32.mrf.mxu0  ;;  %v17127_v52 = vor.u32 %v13668_v38, %v12165_v23  ;;  %v13629_v23 = vld [vmem:[%s14554_s29 + $0x260] sm:$0xff] }
 0x5bb   : > { %v17116_v56 = vadd.f32 %v4440_v34, %v4110_v31  ;;  %v4112_v50 = vpop.f32.mrf.mxu1  ;;  %v12167_v31 = vld [vmem:[%s20280_s1 + $0x1a8] sm:$0xf0]  ;;  %v17137_v34 = vld [vmem:[%s14554_s29 + $0x1f0] sm:$0xff] }
 0x5bc   : > { %20939 = vst [vmem:[#allocation38_spill] sm:$0xff] %v17114_v62  ;;  %v17132_v24 = vor.u32 %v13667_v8, %v12167_v31  ;;  %5525 = vmatpush.bf16.msrb.mxu0 %v17127_v52 }
 0x5bd   : > { %20940 = vst [vmem:[#allocation34_spill] sm:$0xff] %v17116_v56 }
 0x5be   : > { %5604 = vmatpush.bf16.msrb.mxu1 %v17132_v24  ;;  %20941 = vst [vmem:[#allocation42_spill] sm:$0xff] %v17137_v34 }
 0x5c1   : > { %v4363_v2 = vpop.f32.mrf.mxu2 }
 0x5c2   : > { %v17139_v1 = vadd.f32 %v4363_v2, %v4033_v48  ;;  %v4442_v56 = vpop.f32.mrf.mxu3  ;;  %v4036_v62 = vpop.f32.mrf.mxu0 }
 0x5c3   : > { %v17142_v38 = vadd.f32 %v4442_v56, %v4112_v50  ;;  %v4115_v7 = vpop.f32.mrf.mxu1 }
 0x5c4   : > { %20942 = vst [vmem:[#allocation43_spill] sm:$0xff] %v17139_v1 }
 0x5c5   : > { %20943 = vst [vmem:[#allocation44_spill] sm:$0xff] %v17142_v38  ;;  %11857 = vmatmul.msk.bf16.gmra.mxu0 %vm602_vm0, %v17137_v34  ;;  %v17155_v38 = vld [vmem:[%s14554_s29 + $0x1f8] sm:$0xff] }
 0x5c6   : > { %11871 = vmatmul.msk.bf16.gmra.mxu1 %vm602_vm0, %v17137_v34  ;;  %12029 = vmatmul.msk.bf16.gmra.mxu2 %vm602_vm0, %v13629_v23  ;;  %20946 = vst [vmem:[#allocation47_spill] sm:$0xff] %v17155_v38  ;;  %v13630_v34 = vld [vmem:[%s14554_s29 + $0x268] sm:$0xff] }
 0x5c7   : > { %12043 = vmatmul.msk.bf16.gmra.mxu3 %vm602_vm0, %v13629_v23 }
 0x5c9   : > { %v4366_v48 = vpop.f32.mrf.mxu2 }
 0x5ca   : > { %v17150_v8 = vadd.f32 %v4366_v48, %v4036_v62  ;;  %v4445_v31 = vpop.f32.mrf.mxu3  ;;  %v4038_v2 = vpop.f32.mrf.mxu0 }
 0x5cb   : > { %v17152_v1 = vadd.f32 %v4445_v31, %v4115_v7  ;;  %v4117_v56 = vpop.f32.mrf.mxu1 }
 0x5cc   : > { %20944 = vst [vmem:[#allocation45_spill] sm:$0xff] %v17150_v8 }
 0x5cd   : > { %20945 = vst [vmem:[#allocation41_spill] sm:$0xff] %v17152_v1 }
 0x5d1   : > { %v4368_v50 = vpop.f32.mrf.mxu2 }
 0x5d2   : > { %v17157_v13 = vadd.f32 %v4368_v50, %v4038_v2  ;;  %v4447_v16 = vpop.f32.mrf.mxu3  ;;  %v4041_v3 = vpop.f32.mrf.mxu0  ;;  %v12157_v2 = vld [vmem:[%s20280_s1 + $0x190] sm:$0xf] }
 0x5d3   : > { %v17160_v54 = vadd.f32 %v4447_v16, %v4117_v56  ;;  %v4120_v57 = vpop.f32.mrf.mxu1  ;;  %v13666_v56 = vld [vmem:[%s20280_s1 + $0x194] sm:$0xf0] }
 0x5d4   : > { %20947 = vst [vmem:[#allocation48_spill] sm:$0xff] %v17157_v13 }
 0x5d5   : > { %20948 = vst [vmem:[#allocation49_spill] sm:$0xff] %v17160_v54  ;;  %11858 = vmatmul.msk.bf16.gmra.mxu0 %vm602_vm0, %v17155_v38  ;;  %v13631_v54 = vld [vmem:[%s14554_s29 + $0x270] sm:$0xff] }
 0x5d6   : > { %11872 = vmatmul.msk.bf16.gmra.mxu1 %vm602_vm0, %v17155_v38  ;;  %12030 = vmatmul.msk.bf16.gmra.mxu2 %vm602_vm0, %v13630_v34 }
 0x5d7   : > { %12044 = vmatmul.msk.bf16.gmra.mxu3 %vm602_vm0, %v13630_v34  ;;  %v13665_v34 = vld [vmem:[%s20280_s1 + $0x194] sm:$0xf] }
 0x5d9   : > { %v4371_v7 = vpop.f32.mrf.mxu2 }
 0x5da   : > { %v17168_v62 = vadd.f32 %v4371_v7, %v4041_v3  ;;  %v4450_v23 = vpop.f32.mrf.mxu3  ;;  %v4043_v48 = vpop.f32.mrf.mxu0  ;;  %v17181_v3 = vor.u32 %v13666_v56, %v12157_v2 }
 0x5db   : > { %v17170_v16 = vadd.f32 %v4450_v23, %v4120_v57  ;;  %v4122_v31 = vpop.f32.mrf.mxu1  ;;  %v12159_v57 = vld [vmem:[%s20280_s1 + $0x198] sm:$0xf0]  ;;  %v17191_v23 = vld [vmem:[%s14554_s29 + $0x200] sm:$0xff] }
 0x5dc   : > { %20949 = vst [vmem:[#allocation50_spill] sm:$0xff] %v17168_v62  ;;  %v17186_v50 = vor.u32 %v13665_v34, %v12159_v57  ;;  %5526 = vmatpush.bf16.msrb.mxu0 %v17181_v3 }
 0x5dd   : > { %20950 = vst [vmem:[#allocation46_spill] sm:$0xff] %v17170_v16 }
 0x5de   : > { %5605 = vmatpush.bf16.msrb.mxu1 %v17186_v50  ;;  %20951 = vst [vmem:[#allocation52_spill] sm:$0xff] %v17191_v23 }
 0x5e1   : > { %v4373_v7 = vpop.f32.mrf.mxu2 }
 0x5e2   : > { %v17193_v38 = vadd.f32 %v4373_v7, %v4043_v48  ;;  %v4452_v16 = vpop.f32.mrf.mxu3  ;;  %v4676_v62 = vpop.f32.mrf.mxu0 }
 0x5e3   : > { %v17196_v2 = vadd.f32 %v4452_v16, %v4122_v31  ;;  %v4825_v56 = vadd.f32 %v4676_v62, %v16822_v33  ;;  %v4755_v13 = vpop.f32.mrf.mxu1 }
 0x5e4   : > { %20952 = vst [vmem:[#allocation53_spill] sm:$0xff] %v17193_v38  ;;  %v4826_v34 = vadd.f32 %v4755_v13, %v16824_v26 }
 0x5e5   : > { %20953 = vst [vmem:[#allocation51_spill] sm:$0xff] %v17196_v2  ;;  %11859 = vmatmul.msk.bf16.gmra.mxu0 %vm602_vm0, %v17191_v23  ;;  %v17213_v2 = vld [vmem:[%s14554_s29 + $0x208] sm:$0xff] }
 0x5e6   : > { %11873 = vmatmul.msk.bf16.gmra.mxu1 %vm602_vm0, %v17191_v23  ;;  %12031 = vmatmul.msk.bf16.gmra.mxu2 %vm602_vm0, %v13631_v54  ;;  %20954 = vst [vmem:[#allocation54_spill] sm:$0xff] %v17213_v2 }
 0x5e7   : > { %12045 = vmatmul.msk.bf16.gmra.mxu3 %vm602_vm0, %v13631_v54  ;;  %v13632_v54 = vld [vmem:[%s14554_s29 + $0x278] sm:$0xff] }
 0x5e9   : > { %v5102_v48 = vpop.f32.mrf.mxu2 }
 0x5ea   : > { %v17206_v16 = vadd.f32 %v5102_v48, %v4825_v56  ;;  %v5181_v31 = vpop.f32.mrf.mxu3  ;;  %v4678_v33 = vpop.f32.mrf.mxu0 }
 0x5eb   : > { %v17208_v62 = vadd.f32 %v5181_v31, %v4826_v34  ;;  %v4827_v26 = vadd.f32 %v4678_v33, %v16827_v36  ;;  %v4757_v13 = vpop.f32.mrf.mxu1 }
 0x5ec   : > { %v4828_v57 = vadd.f32 %v4757_v13, %v16830_v29  ;;  %v17235_v13 = vld [vmem:[%s14554_s29 + $0x210] sm:$0xff] }
 0x5ed   : > { %20955 = vst [vmem:[#allocation55_spill] sm:$0xff] %v17235_v13 }
 0x5f1   : > { %v5104_v7 = vpop.f32.mrf.mxu2 }
 0x5f2   : > { %v17215_v23 = vadd.f32 %v5104_v7, %v4827_v26  ;;  %v5183_v38 = vpop.f32.mrf.mxu3  ;;  %v4681_v1 = vpop.f32.mrf.mxu0 }
 0x5f3   : > { %v17218_v8 = vadd.f32 %v5183_v38, %v4828_v57  ;;  %v4829_v56 = vadd.f32 %v4681_v1, %v16836_v60  ;;  %v4760_v34 = vpop.f32.mrf.mxu1 }
 0x5f4   : > { %v4830_v48 = vadd.f32 %v4760_v34, %v16838_v35 }
 0x5f5   : > { %11860 = vmatmul.msk.bf16.gmra.mxu0 %vm602_vm0, %v17213_v2 }
 0x5f6   : > { %11874 = vmatmul.msk.bf16.gmra.mxu1 %vm602_vm0, %v17213_v2  ;;  %12032 = vmatmul.msk.bf16.gmra.mxu2 %vm602_vm0, %v13632_v54 }
 0x5f7   : > { %12046 = vmatmul.msk.bf16.gmra.mxu3 %vm602_vm0, %v13632_v54  ;;  %v13633_v54 = vld [vmem:[%s14554_s29 + $0x280] sm:$0xff] }
 0x5f9   : > { %v5107_v36 = vpop.f32.mrf.mxu2 }
 0x5fa   : > { %v17228_v29 = vadd.f32 %v5107_v36, %v4829_v56  ;;  %v5186_v38 = vpop.f32.mrf.mxu3  ;;  %v4683_v60 = vpop.f32.mrf.mxu0 }
 0x5fb   : > { %v17230_v1 = vadd.f32 %v5186_v38, %v4830_v48  ;;  %v4831_v35 = vadd.f32 %v4683_v60, %v16841_v0  ;;  %v4762_v31 = vpop.f32.mrf.mxu1  ;;  %v12149_v0 = vld [vmem:[%s20280_s1 + $0x180] sm:$0xf]  ;;  %v13663_v38 = vld [vmem:[%s20280_s1 + $0x184] sm:$0xf] }
 0x5fc   : > { %v4832_v33 = vadd.f32 %v4762_v31, %v16844_v11  ;;  %v13664_v11 = vld [vmem:[%s20280_s1 + $0x184] sm:$0xf0] }
 0x5fd   : > { %v17255_v60 = vor.u32 %v13664_v11, %v12149_v0 }
 0x5ff   : > { %5527 = vmatpush.bf16.msrb.mxu0 %v17255_v60 }
 0x601   : > { %v5109_v26 = vpop.f32.mrf.mxu2 }
 0x602   : > { %v17237_v57 = vadd.f32 %v5109_v26, %v4831_v35  ;;  %v5188_v7 = vpop.f32.mrf.mxu3  ;;  %v4686_v34 = vpop.f32.mrf.mxu0  ;;  %v20956_v35 = vld [vmem:[#allocation67_spill] sm:$0xff] }
 0x603   : > { %v17240_v2 = vadd.f32 %v5188_v7, %v4832_v33  ;;  %v4833_v56 = vadd.f32 %v4686_v34, %v16887_v37  ;;  %v4765_v36 = vpop.f32.mrf.mxu1  ;;  %v12151_v37 = vld [vmem:[%s20280_s1 + $0x188] sm:$0xf0]  ;;  %5922 = vmatpush.bf16.msra.mxu0 %v20956_v35  ;;  %v20957_v33 = vld [vmem:[#allocation68_spill] sm:$0xff] }
 0x604   : > { %v4834_v48 = vadd.f32 %v4765_v36, %v16890_v6  ;;  %v17263_v6 = vor.u32 %v13663_v38, %v12151_v37  ;;  %v20959_v38 = vld [vmem:[#allocation72_spill] sm:$0xff]  ;;  %v20960_v37 = vld [vmem:[#allocation73_spill] sm:$0xff] }
 0x605   : > { %11861 = vmatmul.msk.bf16.gmra.mxu0 %vm602_vm0, %v17235_v13  ;;  %v20961_v35 = vld [vmem:[#allocation76_spill] sm:$0xff] }
 0x606   : > { %11875 = vmatmul.msk.bf16.gmra.mxu1 %vm602_vm0, %v17235_v13  ;;  %12033 = vmatmul.msk.bf16.gmra.mxu2 %vm602_vm0, %v13633_v54 }
 0x607   : > { %12047 = vmatmul.msk.bf16.gmra.mxu3 %vm602_vm0, %v13633_v54  ;;  %5606 = vmatpush.bf16.msrb.mxu1 %v17263_v6 }
 0x608   : > { %5923 = vmatpush.bf16.msra.mxu0 %v20959_v38  ;;  %v20963_v38 = vld [vmem:[#allocation80_spill] sm:$0xff] }
 0x609   : > { %v5112_v31 = vpop.f32.mrf.mxu2 }
 0x60a   : > { %v17270_v26 = vadd.f32 %v5112_v31, %v4833_v56  ;;  %v5191_v7 = vpop.f32.mrf.mxu3  ;;  %v4688_v34 = vpop.f32.mrf.mxu0  ;;  %v20962_v56 = vld [vmem:[#allocation77_spill] sm:$0xff] }
 0x60b   : > { %6001 = vmatpush.bf16.msra.mxu1 %v20957_v33  ;;  %v17272_v36 = vadd.f32 %v5191_v7, %v4834_v48  ;;  %v4835_v0 = vadd.f32 %v4688_v34, %v16896_v40  ;;  %v4767_v54 = vpop.f32.mrf.mxu1  ;;  %v17280_v33 = vld [vmem:[%s14554_s29 + $0x218] sm:$0xff] }
 0x60c   : > { %v4836_v11 = vadd.f32 %v4767_v54, %v16900_v55  ;;  %5924 = vmatpush.bf16.msra.mxu0 %v20961_v35 }
 0x60d   : > { %20958 = vst [vmem:[#allocation4_spill] sm:$0xff] %v17272_v36  ;;  %v13634_v36 = vld [vmem:[%s14554_s29 + $0x288] sm:$0xff] }
 0x60f   : > { %6002 = vmatpush.bf16.msra.mxu1 %v20960_v37  ;;  %v20964_v37 = vld [vmem:[#allocation56_spill] sm:$0xff] }
 0x610   : > { %5925 = vmatpush.bf16.msra.mxu0 %v20963_v38  ;;  %v17309_v38 = vld [vmem:[%s14554_s29 + $0x220] sm:$0xff] }
 0x611   : > { %v5114_v13 = vpop.f32.mrf.mxu2  ;;  %20967 = vst [vmem:[#allocation5_spill] sm:$0xff] %v17309_v38 }
 0x612   : > { %v17283_v31 = vadd.f32 %v5114_v13, %v4835_v0  ;;  %v5193_v48 = vpop.f32.mrf.mxu3  ;;  %v4691_v7 = vpop.f32.mrf.mxu0  ;;  %v20965_v13 = vld [vmem:[#allocation66_spill] sm:$0xff]  ;;  %v20966_v0 = vld [vmem:[#allocation87_spill] sm:$0xff] }
 0x613   : > { %6003 = vmatpush.bf16.msra.mxu1 %v20962_v56  ;;  %v17286_v40 = vadd.f32 %v5193_v48, %v4836_v11  ;;  %v4837_v55 = vadd.f32 %v4691_v7, %v16909_v46  ;;  %v4770_v34 = vpop.f32.mrf.mxu1 }
 0x614   : > { %v4838_v54 = vadd.f32 %v4770_v34, %v16911_v42  ;;  %5926 = vmatpush.bf16.msra.mxu0 %v20965_v13 }
 0x615   : > { %11862 = vmatmul.msk.bf16.gmra.mxu0 %vm602_vm0, %v17280_v33 }
 0x616   : > { %11876 = vmatmul.msk.bf16.gmra.mxu1 %vm602_vm0, %v17280_v33  ;;  %12034 = vmatmul.msk.bf16.gmra.mxu2 %vm602_vm0, %v13634_v36 }
 0x617   : > { %6004 = vmatpush.bf16.msra.mxu1 %v20964_v37  ;;  %12048 = vmatmul.msk.bf16.gmra.mxu3 %vm602_vm0, %v13634_v36 }
 0x618   : > { %5927 = vmatpush.bf16.msra.mxu0 %v16401_v53 }
 0x619   : > { %v5117_v46 = vpop.f32.mrf.mxu2 }
 0x61a   : > { %v17300_v42 = vadd.f32 %v5117_v46, %v4837_v55  ;;  %v5196_v11 = vpop.f32.mrf.mxu3  ;;  %v4693_v35 = vpop.f32.mrf.mxu0  ;;  %v13635_v46 = vld [vmem:[%s14554_s29 + $0x290] sm:$0xff] }
 0x61b   : > { %6005 = vmatpush.bf16.msra.mxu1 %v20966_v0  ;;  %v17302_v56 = vadd.f32 %v5196_v11, %v4838_v54  ;;  %v4839_v48 = vadd.f32 %v4693_v35, %v16917_v47  ;;  %v4772_v7 = vpop.f32.mrf.mxu1 }
 0x61c   : > { %v4840_v34 = vadd.f32 %v4772_v7, %v16920_v25 }
 0x61f   : > { %6006 = vmatpush.bf16.msra.mxu1 %v16413_v44 }
 0x621   : > { %v5119_v36 = vpop.f32.mrf.mxu2 }
 0x622   : > { %v17311_v37 = vadd.f32 %v5119_v36, %v4839_v48  ;;  %v5198_v55 = vpop.f32.mrf.mxu3  ;;  %v4696_v13 = vpop.f32.mrf.mxu0  ;;  %v17331_v36 = vld [vmem:[%s14554_s29 + $0x228] sm:$0xff] }
 0x623   : > { %v17314_v0 = vadd.f32 %v5198_v55, %v4840_v34  ;;  %v4841_v54 = vadd.f32 %v4696_v13, %v16926_v4  ;;  %v4775_v47 = vpop.f32.mrf.mxu1  ;;  %20968 = vst [vmem:[#allocation6_spill] sm:$0xff] %v17331_v36 }
 0x624   : > { %v4842_v25 = vadd.f32 %v4775_v47, %v16928_v58 }
 0x625   : > { %11863 = vmatmul.msk.bf16.gmra.mxu0 %vm602_vm0, %v17309_v38 }
 0x626   : > { %11877 = vmatmul.msk.bf16.gmra.mxu1 %vm602_vm0, %v17309_v38  ;;  %12035 = vmatmul.msk.bf16.gmra.mxu2 %vm602_vm0, %v13635_v46 }
 0x627   : > { %12049 = vmatmul.msk.bf16.gmra.mxu3 %vm602_vm0, %v13635_v46  ;;  %v13636_v46 = vld [vmem:[%s14554_s29 + $0x298] sm:$0xff] }
 0x629   : > { %v5122_v53 = vpop.f32.mrf.mxu2 }
 0x62a   : > { %v17324_v44 = vadd.f32 %v5122_v53, %v4841_v54  ;;  %v5201_v11 = vpop.f32.mrf.mxu3  ;;  %v4698_v4 = vpop.f32.mrf.mxu0 }
 0x62b   : > { %v17326_v35 = vadd.f32 %v5201_v11, %v4842_v25  ;;  %v4843_v58 = vadd.f32 %v4698_v4, %v16949_v12  ;;  %v4777_v48 = vpop.f32.mrf.mxu1 }
 0x62c   : > { %v4844_v7 = vadd.f32 %v4777_v48, %v16952_v19 }
 0x631   : > { %v5124_v34 = vpop.f32.mrf.mxu2 }
 0x632   : > { %v17333_v55 = vadd.f32 %v5124_v34, %v4843_v58  ;;  %v5203_v13 = vpop.f32.mrf.mxu3  ;;  %v4701_v47 = vpop.f32.mrf.mxu0  ;;  %v13649_v34 = vld [vmem:[%s14554_s29 + $0x2a0] sm:$0xff] }
 0x633   : > { %v17336_v38 = vadd.f32 %v5203_v13, %v4844_v7  ;;  %v4845_v54 = vadd.f32 %v4701_v47, %v16958_v15  ;;  %v4780_v25 = vpop.f32.mrf.mxu1 }
 0x634   : > { %v4846_v53 = vadd.f32 %v4780_v25, %v16960_v5 }
 0x635   : > { %11864 = vmatmul.msk.bf16.gmra.mxu0 %vm602_vm0, %v17331_v36 }
 0x636   : > { %11878 = vmatmul.msk.bf16.gmra.mxu1 %vm602_vm0, %v17331_v36  ;;  %12036 = vmatmul.msk.bf16.gmra.mxu2 %vm602_vm0, %v13636_v46 }
 0x637   : > { %12050 = vmatmul.msk.bf16.gmra.mxu3 %vm602_vm0, %v13636_v46 }
 0x639   : > { %v5127_v12 = vpop.f32.mrf.mxu2 }
 0x63a   : > { %v17346_v19 = vadd.f32 %v5127_v12, %v4845_v54  ;;  %v5206_v11 = vpop.f32.mrf.mxu3  ;;  %v4703_v4 = vpop.f32.mrf.mxu0 }
 0x63b   : > { %v17348_v15 = vadd.f32 %v5206_v11, %v4846_v53  ;;  %v4847_v58 = vadd.f32 %v4703_v4, %v16965_v43  ;;  %v4782_v5 = vpop.f32.mrf.mxu1 }
 0x63c   : > { %v4848_v48 = vadd.f32 %v4782_v5, %v16968_v49  ;;  %v20974_v5 = vld [vmem:[#allocation21_spill] sm:$0xff] }
 0x641   : > { %v5129_v7 = vpop.f32.mrf.mxu2 }
 0x642   : > { %v17353_v13 = vadd.f32 %v5129_v7, %v4847_v58  ;;  %v5208_v47 = vpop.f32.mrf.mxu3  ;;  %v4706_v25 = vpop.f32.mrf.mxu0 }
 0x643   : > { %v17355_v36 = vadd.f32 %v5208_v47, %v4848_v48  ;;  %v4849_v46 = vadd.f32 %v4706_v25, %v16978_v14  ;;  %v4785_v54 = vpop.f32.mrf.mxu1  ;;  %v20977_v47 = vld [vmem:[#allocation20_spill] sm:$0xff] }
 0x644   : > { %v4850_v12 = vadd.f32 %v4785_v54, %v16980_v21 }
 0x645   : > { %12195 = vmatmul.msk.bf16.vlgmr.msrb.gmra.mxu0 %vm602_vm0, %v13649_v34 }
 0x646   : > { %12209 = vmatmul.msk.bf16.vlgmr.msrb.gmra.mxu1 %vm602_vm0, %v13649_v34  ;;  %12223 = vmatmul.msk.bf16.vlgmr.msrb.gmra.mxu2 %vm602_vm0, %v16963_v59 }
 0x647   : > { %12237 = vmatmul.msk.bf16.vlgmr.msrb.gmra.mxu3 %vm602_vm0, %v16963_v59  ;;  %6649 = vmatpush.bf16.msrb.mxu2 %v16939_v20 }
 0x648   : > { %6728 = vmatpush.bf16.msrb.mxu3 %v16944_v27  ;;  %6294 = vmatpush.bf16.msrb.mxu0 %v16473_v22 }
 0x649   : > { %v5132_v43 = vpop.f32.mrf.mxu2  ;;  %6373 = vmatpush.bf16.msrb.mxu1 %v16482_v10  ;;  %v13650_v10 = vld [vmem:[%s14554_s29 + $0x2a8] sm:$0xff] }
 0x64a   : > { %v17369_v49 = vadd.f32 %v5132_v43, %v4849_v46  ;;  %v5211_v14 = vpop.f32.mrf.mxu3  ;;  %v4708_v21 = vpop.f32.mrf.mxu0  ;;  %v13651_v46 = vld [vmem:[%s14554_s29 + $0x2b0] sm:$0xff] }
 0x64b   : > { %v17371_v53 = vadd.f32 %v5211_v14, %v4850_v12  ;;  %v4851_v11 = vadd.f32 %v4708_v21, %v17007_v30  ;;  %v4787_v4 = vpop.f32.mrf.mxu1  ;;  %6650 = vmatpush.bf16.msrb.mxu2 %v16992_v9  ;;  %v20978_v21 = vld [vmem:[#allocation18_spill] sm:$0xff] }
 0x64c   : > { %v4852_v20 = vadd.f32 %v4787_v4, %v17010_v45  ;;  %6729 = vmatpush.bf16.msrb.mxu3 %v16998_v63  ;;  %6295 = vmatpush.bf16.msrb.mxu0 %v16548_v28  ;;  %v20971_v45 = vld [vmem:[#allocation13_spill] sm:$0xff]  ;;  %v20979_v4 = vld [vmem:[#allocation24_spill] sm:$0xff] }
 0x64d   : > { %6374 = vmatpush.bf16.msrb.mxu1 %v16560_v41 }
 0x64f   : > { %6651 = vmatpush.bf16.msrb.mxu2 %v17063_v17  ;;  %v20973_v17 = vld [vmem:[#allocation12_spill] sm:$0xff] }
 0x650   : > { %6730 = vmatpush.bf16.msrb.mxu3 %v17070_v61  ;;  %6296 = vmatpush.bf16.msrb.mxu0 %v16636_v51  ;;  %v20969_v51 = vld [vmem:[#allocation10_spill] sm:$0xff] }
 0x651   : > { %v5134_v22 = vpop.f32.mrf.mxu2  ;;  %6375 = vmatpush.bf16.msrb.mxu1 %v16648_v18  ;;  %v20970_v18 = vld [vmem:[#allocation15_spill] sm:$0xff] }
 0x652   : > { %v17384_v27 = vadd.f32 %v5134_v22, %v4851_v11  ;;  %v5213_v59 = vpop.f32.mrf.mxu3  ;;  %v4711_v9 = vpop.f32.mrf.mxu0 }
 0x653   : > { %v17386_v30 = vadd.f32 %v5213_v59, %v4852_v20  ;;  %v4853_v28 = vadd.f32 %v4711_v9, %v17022_v32  ;;  %v4790_v63 = vpop.f32.mrf.mxu1  ;;  %6652 = vmatpush.bf16.msrb.mxu2 %v17127_v52  ;;  %v20972_v32 = vld [vmem:[#allocation11_spill] sm:$0xff] }
 0x654   : > { %v4854_v41 = vadd.f32 %v4790_v63, %v17024_v39  ;;  %6731 = vmatpush.bf16.msrb.mxu3 %v17132_v24  ;;  %6297 = vmatpush.bf16.msrb.mxu0 %v20969_v51  ;;  %v20981_v63 = vld [vmem:[#allocation27_spill] sm:$0xff] }
 0x655   : > { %12196 = vmatmul.msk.bf16.gmra.mxu0 %vm602_vm0, %v13650_v10  ;;  %6376 = vmatpush.bf16.msrb.mxu1 %v20970_v18  ;;  %v20982_v18 = vld [vmem:[#allocation28_spill] sm:$0xff] }
 0x656   : > { %12210 = vmatmul.msk.bf16.gmra.mxu1 %vm602_vm0, %v13650_v10  ;;  %12224 = vmatmul.msk.bf16.gmra.mxu2 %vm602_vm0, %v20971_v45 }
 0x657   : > { %12238 = vmatmul.msk.bf16.gmra.mxu3 %vm602_vm0, %v20971_v45  ;;  %6653 = vmatpush.bf16.msrb.mxu2 %v17181_v3  ;;  %v20975_v3 = vld [vmem:[#allocation22_spill] sm:$0xff] }
 0x658   : > { %6732 = vmatpush.bf16.msrb.mxu3 %v17186_v50  ;;  %6298 = vmatpush.bf16.msrb.mxu0 %v20972_v32  ;;  %v20976_v50 = vld [vmem:[#allocation19_spill] sm:$0xff] }
 0x659   : > { %v5137_v39 = vpop.f32.mrf.mxu2  ;;  %6377 = vmatpush.bf16.msrb.mxu1 %v20973_v17 }
 0x65a   : > { %v17404_v61 = vadd.f32 %v5137_v39, %v4853_v28  ;;  %v5216_v52 = vpop.f32.mrf.mxu3  ;;  %v4713_v24 = vpop.f32.mrf.mxu0  ;;  %v13652_v39 = vld [vmem:[%s14554_s29 + $0x2b8] sm:$0xff] }
 0x65b   : > { %v17406_v58 = vadd.f32 %v5216_v52, %v4854_v41  ;;  %v4855_v48 = vadd.f32 %v4713_v24, %v20974_v5  ;;  %v4792_v7 = vpop.f32.mrf.mxu1  ;;  %6654 = vmatpush.bf16.msrb.mxu2 %v17255_v60 }
 0x65c   : > { %v4856_v34 = vadd.f32 %v4792_v7, %v20975_v3  ;;  %6733 = vmatpush.bf16.msrb.mxu3 %v17263_v6  ;;  %6299 = vmatpush.bf16.msrb.mxu0 %v20976_v50  ;;  %v20980_v6 = vld [vmem:[#allocation14_spill] sm:$0xff] }
 0x65d   : > { %6378 = vmatpush.bf16.msrb.mxu1 %v20977_v47  ;;  %v20985_v47 = vld [vmem:[#allocation25_spill] sm:$0xff] }
 0x661   : > { %v5139_v25 = vpop.f32.mrf.mxu2 }
 0x662   : > { %v17415_v54 = vadd.f32 %v5139_v25, %v4855_v48  ;;  %v5218_v12 = vpop.f32.mrf.mxu3  ;;  %v4716_v43 = vpop.f32.mrf.mxu0  ;;  %v20983_v48 = vld [vmem:[#allocation23_spill] sm:$0xff] }
 0x663   : > { %v17417_v14 = vadd.f32 %v5218_v12, %v4856_v34  ;;  %v4857_v11 = vadd.f32 %v4716_v43, %v20978_v21  ;;  %v4795_v60 = vpop.f32.mrf.mxu1  ;;  %v20984_v34 = vld [vmem:[#allocation30_spill] sm:$0xff] }
 0x664   : > { %v4858_v20 = vadd.f32 %v4795_v60, %v20979_v4 }
 0x665   : > { %12197 = vmatmul.msk.bf16.gmra.mxu0 %vm602_vm0, %v13651_v46 }
 0x666   : > { %12211 = vmatmul.msk.bf16.gmra.mxu1 %vm602_vm0, %v13651_v46  ;;  %12225 = vmatmul.msk.bf16.gmra.mxu2 %vm602_vm0, %v20980_v6 }
 0x667   : > { %12239 = vmatmul.msk.bf16.gmra.mxu3 %vm602_vm0, %v20980_v6 }
 0x669   : > { %v5142_v22 = vpop.f32.mrf.mxu2 }
 0x66a   : > { %v17427_v10 = vadd.f32 %v5142_v22, %v4857_v11  ;;  %v5221_v59 = vpop.f32.mrf.mxu3  ;;  %v4718_v9 = vpop.f32.mrf.mxu0  ;;  %v20986_v11 = vld [vmem:[#allocation32_spill] sm:$0xff] }
 0x66b   : > { %v17429_v28 = vadd.f32 %v5221_v59, %v4858_v20  ;;  %v4859_v41 = vadd.f32 %v4718_v9, %v20981_v63  ;;  %v4797_v51 = vpop.f32.mrf.mxu1  ;;  %v20987_v20 = vld [vmem:[#allocation33_spill] sm:$0xff]  ;;  %v13653_v59 = vld [vmem:[%s14554_s29 + $0x2c0] sm:$0xff] }
 0x66c   : > { %v4860_v45 = vadd.f32 %v4797_v51, %v20982_v18  ;;  %v20988_v18 = vld [vmem:[#allocation29_spill] sm:$0xff] }
 0x671   : > { %v5144_v32 = vpop.f32.mrf.mxu2 }
 0x672   : > { %v17434_v17 = vadd.f32 %v5144_v32, %v4859_v41  ;;  %v5223_v52 = vpop.f32.mrf.mxu3  ;;  %v4721_v24 = vpop.f32.mrf.mxu0 }
 0x673   : > { %v17436_v5 = vadd.f32 %v5223_v52, %v4860_v45  ;;  %v4861_v7 = vadd.f32 %v4721_v24, %v20983_v48  ;;  %v4800_v3 = vpop.f32.mrf.mxu1  ;;  %v20990_v24 = vld [vmem:[#allocation31_spill] sm:$0xff] }
 0x674   : > { %v4862_v50 = vadd.f32 %v4800_v3, %v20984_v34 }
 0x675   : > { %12198 = vmatmul.msk.bf16.gmra.mxu0 %vm602_vm0, %v13652_v39 }
 0x676   : > { %12212 = vmatmul.msk.bf16.gmra.mxu1 %vm602_vm0, %v13652_v39  ;;  %12226 = vmatmul.msk.bf16.gmra.mxu2 %vm602_vm0, %v20985_v47  ;;  %v20989_v39 = vld [vmem:[#allocation35_spill] sm:$0xff] }
 0x677   : > { %12240 = vmatmul.msk.bf16.gmra.mxu3 %vm602_vm0, %v20985_v47  ;;  %v20991_v47 = vld [vmem:[#allocation37_spill] sm:$0xff] }
 0x679   : > { %v5147_v25 = vpop.f32.mrf.mxu2 }
 0x67a   : > { %v17446_v46 = vadd.f32 %v5147_v25, %v4861_v7  ;;  %v5226_v12 = vpop.f32.mrf.mxu3  ;;  %v4723_v43 = vpop.f32.mrf.mxu0 }
 0x67b   : > { %v17448_v21 = vadd.f32 %v5226_v12, %v4862_v50  ;;  %v4863_v60 = vadd.f32 %v4723_v43, %v20986_v11  ;;  %v4802_v4 = vpop.f32.mrf.mxu1  ;;  %v20992_v43 = vld [vmem:[#allocation71_spill] sm:$0xff] }
 0x67c   : > { %v4864_v6 = vadd.f32 %v4802_v4, %v20987_v20  ;;  %v13654_v4 = vld [vmem:[%s14554_s29 + $0x2c8] sm:$0xff] }
 0x681   : > { %v5149_v22 = vpop.f32.mrf.mxu2 }
 0x682   : > { %v17453_v9 = vadd.f32 %v5149_v22, %v4863_v60  ;;  %v5228_v63 = vpop.f32.mrf.mxu3  ;;  %v4726_v41 = vpop.f32.mrf.mxu0 }
 0x683   : > { %v17455_v51 = vadd.f32 %v5228_v63, %v4864_v6  ;;  %v4865_v45 = vadd.f32 %v4726_v41, %v20988_v18  ;;  %v4805_v32 = vpop.f32.mrf.mxu1  ;;  %v20993_v63 = vld [vmem:[#allocation38_spill] sm:$0xff] }
 0x684   : > { %v4866_v52 = vadd.f32 %v4805_v32, %v20989_v39  ;;  %v20995_v39 = vld [vmem:[#allocation36_spill] sm:$0xff] }
 0x685   : > { %12199 = vmatmul.msk.bf16.gmra.mxu0 %vm602_vm0, %v13653_v59 }
 0x686   : > { %12213 = vmatmul.msk.bf16.gmra.mxu1 %vm602_vm0, %v13653_v59  ;;  %12227 = vmatmul.msk.bf16.gmra.mxu2 %vm602_vm0, %v20990_v24 }
 0x687   : > { %12241 = vmatmul.msk.bf16.gmra.mxu3 %vm602_vm0, %v20990_v24 }
 0x689   : > { %v5152_v48 = vpop.f32.mrf.mxu2 }
 0x68a   : > { %v17465_v7 = vadd.f32 %v5152_v48, %v4865_v45  ;;  %v5231_v3 = vpop.f32.mrf.mxu3  ;;  %v4728_v34 = vpop.f32.mrf.mxu0  ;;  %v20994_v45 = vld [vmem:[#allocation34_spill] sm:$0xff] }
 0x68b   : > { %v17467_v50 = vadd.f32 %v5231_v3, %v4866_v52  ;;  %v4867_v25 = vadd.f32 %v4728_v34, %v20991_v47  ;;  %v4807_v12 = vpop.f32.mrf.mxu1  ;;  %v20997_v47 = vld [vmem:[#allocation43_spill] sm:$0xff] }
 0x68c   : > { %v4868_v11 = vadd.f32 %v4807_v12, %v20992_v43  ;;  %v20998_v43 = vld [vmem:[#allocation44_spill] sm:$0xff] }
 0x691   : > { %v5154_v60 = vpop.f32.mrf.mxu2 }
 0x692   : > { %v17472_v20 = vadd.f32 %v5154_v60, %v4867_v25  ;;  %v5233_v6 = vpop.f32.mrf.mxu3  ;;  %v4731_v22 = vpop.f32.mrf.mxu0 }
 0x693   : > { %v17474_v59 = vadd.f32 %v5233_v6, %v4868_v11  ;;  %v4869_v41 = vadd.f32 %v4731_v22, %v20993_v63  ;;  %v4810_v18 = vpop.f32.mrf.mxu1 }
 0x694   : > { %v4870_v32 = vadd.f32 %v4810_v18, %v20994_v45  ;;  %v21001_v45 = vld [vmem:[#allocation45_spill] sm:$0xff] }
 0x695   : > { %12200 = vmatmul.msk.bf16.gmra.mxu0 %vm602_vm0, %v13654_v4 }
 0x696   : > { %12214 = vmatmul.msk.bf16.gmra.mxu1 %vm602_vm0, %v13654_v4  ;;  %12228 = vmatmul.msk.bf16.gmra.mxu2 %vm602_vm0, %v20995_v39  ;;  %v13655_v4 = vld [vmem:[%s14554_s29 + $0x2d0] sm:$0xff] }
 0x697   : > { %12242 = vmatmul.msk.bf16.gmra.mxu3 %vm602_vm0, %v20995_v39 }
 0x699   : > { %v5157_v52 = vpop.f32.mrf.mxu2 }
 0x69a   : > { %v17484_v24 = vadd.f32 %v5157_v52, %v4869_v41  ;;  %v5236_v48 = vpop.f32.mrf.mxu3  ;;  %v4733_v3 = vpop.f32.mrf.mxu0  ;;  %v21002_v52 = vld [vmem:[#allocation41_spill] sm:$0xff] }
 0x69b   : > { %v17486_v34 = vadd.f32 %v5236_v48, %v4870_v32  ;;  %v4871_v25 = vadd.f32 %v4733_v3, %v20997_v47  ;;  %v4812_v12 = vpop.f32.mrf.mxu1  ;;  %v21003_v48 = vld [vmem:[#allocation42_spill] sm:$0xff] }
 0x69c   : > { %v4872_v11 = vadd.f32 %v4812_v12, %v20998_v43 }
 0x69d   : > { %20996 = vst [vmem:[#allocation81_spill] sm:$0xff] %v17486_v34 }
 0x6a1   : > { %v5159_v60 = vpop.f32.mrf.mxu2 }
 0x6a2   : > { %v17491_v6 = vadd.f32 %v5159_v60, %v4871_v25  ;;  %v5238_v22 = vpop.f32.mrf.mxu3  ;;  %v4736_v63 = vpop.f32.mrf.mxu0 }
 0x6a3   : > { %v17493_v18 = vadd.f32 %v5238_v22, %v4872_v11  ;;  %v4873_v41 = vadd.f32 %v4736_v63, %v21001_v45  ;;  %v4815_v39 = vpop.f32.mrf.mxu1  ;;  %v21006_v11 = vld [vmem:[#allocation48_spill] sm:$0xff]  ;;  %v21007_v63 = vld [vmem:[#allocation49_spill] sm:$0xff] }
 0x6a4   : > { %20999 = vst [vmem:[#allocation26_spill] sm:$0xff] %v17491_v6  ;;  %v4874_v32 = vadd.f32 %v4815_v39, %v21002_v52 }
 0x6a5   : > { %21000 = vst [vmem:[#allocation7_spill] sm:$0xff] %v17493_v18  ;;  %12201 = vmatmul.msk.bf16.gmra.mxu0 %vm602_vm0, %v13655_v4 }
 0x6a6   : > { %12215 = vmatmul.msk.bf16.gmra.mxu1 %vm602_vm0, %v13655_v4  ;;  %12229 = vmatmul.msk.bf16.gmra.mxu2 %vm602_vm0, %v21003_v48  ;;  %v13656_v4 = vld [vmem:[%s14554_s29 + $0x2d8] sm:$0xff] }
 0x6a7   : > { %12243 = vmatmul.msk.bf16.gmra.mxu3 %vm602_vm0, %v21003_v48  ;;  %v21010_v48 = vld [vmem:[#allocation50_spill] sm:$0xff] }
 0x6a9   : > { %v5162_v3 = vpop.f32.mrf.mxu2 }
 0x6aa   : > { %v17503_v47 = vadd.f32 %v5162_v3, %v4873_v41  ;;  %v5241_v25 = vpop.f32.mrf.mxu3  ;;  %v4738_v12 = vpop.f32.mrf.mxu0 }
 0x6ab   : > { %v17505_v43 = vadd.f32 %v5241_v25, %v4874_v32  ;;  %v4875_v60 = vadd.f32 %v4738_v12, %v21006_v11  ;;  %v4817_v22 = vpop.f32.mrf.mxu1  ;;  %v21012_v25 = vld [vmem:[#allocation47_spill] sm:$0xff] }
 0x6ac   : > { %21004 = vst [vmem:[#allocation84_spill] sm:$0xff] %v17503_v47  ;;  %v4876_v45 = vadd.f32 %v4817_v22, %v21007_v63  ;;  %v21011_v47 = vld [vmem:[#allocation46_spill] sm:$0xff]  ;;  %v21013_v22 = vld [vmem:[#allocation53_spill] sm:$0xff] }
 0x6ad   : > { %21005 = vst [vmem:[#allocation8_spill] sm:$0xff] %v17505_v43 }
 0x6b1   : > { %v5164_v39 = vpop.f32.mrf.mxu2 }
 0x6b2   : > { %v17510_v52 = vadd.f32 %v5164_v39, %v4875_v60  ;;  %v5243_v18 = vpop.f32.mrf.mxu3  ;;  %v4741_v6 = vpop.f32.mrf.mxu0 }
 0x6b3   : > { %v17512_v34 = vadd.f32 %v5243_v18, %v4876_v45  ;;  %v4877_v41 = vadd.f32 %v4741_v6, %v21010_v48  ;;  %v4820_v3 = vpop.f32.mrf.mxu1  ;;  %v21014_v45 = vld [vmem:[#allocation51_spill] sm:$0xff] }
 0x6b4   : > { %21008 = vst [vmem:[#allocation16_spill] sm:$0xff] %v17510_v52  ;;  %v4878_v32 = vadd.f32 %v4820_v3, %v21011_v47 }
 0x6b5   : > { %21009 = vst [vmem:[#allocation57_spill] sm:$0xff] %v17512_v34  ;;  %12202 = vmatmul.msk.bf16.gmra.mxu0 %vm602_vm0, %v13656_v4 }
 0x6b6   : > { %12216 = vmatmul.msk.bf16.gmra.mxu1 %vm602_vm0, %v13656_v4  ;;  %12230 = vmatmul.msk.bf16.gmra.mxu2 %vm602_vm0, %v21012_v25  ;;  %v13657_v4 = vld [vmem:[%s14554_s29 + $0x2e0] sm:$0xff] }
 0x6b7   : > { %12244 = vmatmul.msk.bf16.gmra.mxu3 %vm602_vm0, %v21012_v25 }
 0x6b9   : > { %v5167_v12 = vpop.f32.mrf.mxu2 }
 0x6ba   : > { %v17522_v11 = vadd.f32 %v5167_v12, %v4877_v41  ;;  %v5246_v18 = vpop.f32.mrf.mxu3  ;;  %v4743_v60 = vpop.f32.mrf.mxu0 }
 0x6bb   : > { %v17524_v6 = vadd.f32 %v5246_v18, %v4878_v32  ;;  %v4879_v63 = vadd.f32 %v4743_v60, %v21013_v22  ;;  %v4822_v47 = vpop.f32.mrf.mxu1  ;;  %v21017_v18 = vld [vmem:[#allocation52_spill] sm:$0xff] }
 0x6bc   : > { %v4880_v39 = vadd.f32 %v4822_v47, %v21014_v45  ;;  %v13658_v45 = vld [vmem:[%s14554_s29 + $0x2e8] sm:$0xff] }
 0x6c1   : > { %v5169_v48 = vpop.f32.mrf.mxu2 }
 0x6c2   : > { %v17529_v3 = vadd.f32 %v5169_v48, %v4879_v63  ;;  %v5248_v34 = vpop.f32.mrf.mxu3  ;;  %v5529_v52 = vpop.f32.mrf.mxu0  ;;  %v13659_v63 = vld [vmem:[%s14554_s29 + $0x2f0] sm:$0xff] }
 0x6c3   : > { %v17531_v43 = vadd.f32 %v5248_v34, %v4880_v39  ;;  %v17534_v41 = vadd.f32 %v5529_v52, %v17206_v16  ;;  %v5608_v25 = vpop.f32.mrf.mxu1 }
 0x6c4   : > { %v17537_v32 = vadd.f32 %v5608_v25, %v17208_v62 }
 0x6c5   : > { %21015 = vst [vmem:[#allocation58_spill] sm:$0xff] %v17534_v41  ;;  %12203 = vmatmul.msk.bf16.gmra.mxu0 %vm602_vm0, %v13657_v4  ;;  %v21075_v41 = vld [vmem:[#allocation8_spill] sm:$0xff] }
 0x6c6   : > { %21016 = vst [vmem:[#allocation39_spill] sm:$0xff] %v17537_v32  ;;  %12217 = vmatmul.msk.bf16.gmra.mxu1 %vm602_vm0, %v13657_v4  ;;  %12231 = vmatmul.msk.bf16.gmra.mxu2 %vm602_vm0, %v21017_v18 }
 0x6c7   : > { %12245 = vmatmul.msk.bf16.gmra.mxu3 %vm602_vm0, %v21017_v18  ;;  %v21022_v18 = vld [vmem:[#allocation54_spill] sm:$0xff] }
 0x6c9   : > { %v17547_v16 = vpop.f32.mrf.mxu2 }
 0x6ca   : > { %v17549_v34 = vpop.f32.mrf.mxu3  ;;  %v5531_v52 = vpop.f32.mrf.mxu0 }
 0x6cb   : > { %v17552_v62 = vadd.f32 %v5531_v52, %v17215_v23  ;;  %v5610_v60 = vpop.f32.mrf.mxu1 }
 0x6cc   : > { %v17555_v22 = vadd.f32 %v5610_v60, %v17218_v8 }
 0x6cd   : > { %21018 = vst [vmem:[#allocation17_spill] sm:$0xff] %v17552_v62 }
 0x6ce   : > { %21019 = vst [vmem:[#allocation85_spill] sm:$0xff] %v17555_v22 }
 0x6d1   : > { %v17559_v47 = vpop.f32.mrf.mxu2 }
 0x6d2   : > { %v17562_v39 = vpop.f32.mrf.mxu3  ;;  %v5534_v48 = vpop.f32.mrf.mxu0 }
 0x6d3   : > { %v17565_v4 = vadd.f32 %v5534_v48, %v17228_v29  ;;  %v5613_v25 = vpop.f32.mrf.mxu1 }
 0x6d4   : > { %v17568_v23 = vadd.f32 %v5613_v25, %v17230_v1 }
 0x6d5   : > { %21020 = vst [vmem:[#allocation86_spill] sm:$0xff] %v17565_v4  ;;  %12204 = vmatmul.msk.bf16.gmra.mxu0 %vm602_vm0, %v13658_v45 }
 0x6d6   : > { %21021 = vst [vmem:[#allocation40_spill] sm:$0xff] %v17568_v23  ;;  %12218 = vmatmul.msk.bf16.gmra.mxu1 %vm602_vm0, %v13658_v45  ;;  %12232 = vmatmul.msk.bf16.gmra.mxu2 %vm602_vm0, %v21022_v18 }
 0x6d7   : > { %12246 = vmatmul.msk.bf16.gmra.mxu3 %vm602_vm0, %v21022_v18 }
 0x6d9   : > { %v17578_v29 = vpop.f32.mrf.mxu2 }
 0x6da   : > { %v17580_v52 = vpop.f32.mrf.mxu3  ;;  %v5536_v60 = vpop.f32.mrf.mxu0 }
 0x6db   : > { %v17583_v1 = vadd.f32 %v5536_v60, %v17237_v57  ;;  %v5615_v48 = vpop.f32.mrf.mxu1  ;;  %v21026_v57 = vld [vmem:[#allocation4_spill] sm:$0xff] }
 0x6dc   : > { %v17586_v25 = vadd.f32 %v5615_v48, %v17240_v2  ;;  %v21028_v48 = vld [vmem:[#allocation55_spill] sm:$0xff] }
 0x6dd   : > { %21023 = vst [vmem:[#allocation9_spill] sm:$0xff] %v17583_v1 }
 0x6de   : > { %21024 = vst [vmem:[#allocation61_spill] sm:$0xff] %v17586_v25 }
 0x6e1   : > { %v17590_v8 = vpop.f32.mrf.mxu2 }
 0x6e2   : > { %v17593_v12 = vpop.f32.mrf.mxu3  ;;  %v5539_v18 = vpop.f32.mrf.mxu0 }
 0x6e3   : > { %v17596_v23 = vadd.f32 %v5539_v18, %v17270_v26  ;;  %v5618_v4 = vpop.f32.mrf.mxu1 }
 0x6e4   : > { %v17599_v60 = vadd.f32 %v5618_v4, %v21026_v57 }
 0x6e5   : > { %21025 = vst [vmem:[#allocation59_spill] sm:$0xff] %v17596_v23  ;;  %12205 = vmatmul.msk.bf16.gmra.mxu0 %vm602_vm0, %v13659_v63 }
 0x6e6   : > { %21027 = vst [vmem:[#allocation60_spill] sm:$0xff] %v17599_v60  ;;  %12219 = vmatmul.msk.bf16.gmra.mxu1 %vm602_vm0, %v13659_v63  ;;  %12233 = vmatmul.msk.bf16.gmra.mxu2 %vm602_vm0, %v21028_v48  ;;  %v13660_v60 = vld [vmem:[%s14554_s29 + $0x2f8] sm:$0xff]  ;;  %v13661_v63 = vld [vmem:[%s14554_s29 + $0x300] sm:$0xff] }
 0x6e7   : > { %12247 = vmatmul.msk.bf16.gmra.mxu3 %vm602_vm0, %v21028_v48 }
 0x6e9   : > { %v17609_v26 = vpop.f32.mrf.mxu2 }
 0x6ea   : > { %v17611_v18 = vpop.f32.mrf.mxu3  ;;  %v5541_v45 = vpop.f32.mrf.mxu0 }
 0x6eb   : > { %v17614_v4 = vadd.f32 %v5541_v45, %v17283_v31  ;;  %v5620_v57 = vpop.f32.mrf.mxu1 }
 0x6ec   : > { %v17617_v25 = vadd.f32 %v5620_v57, %v17286_v40 }
 0x6ed   : > { %21029 = vst [vmem:[#allocation62_spill] sm:$0xff] %v17614_v4 }
 0x6ee   : > { %21030 = vst [vmem:[#allocation65_spill] sm:$0xff] %v17617_v25 }
 0x6f1   : > { %v17621_v2 = vpop.f32.mrf.mxu2 }
 0x6f2   : > { %v17624_v23 = vpop.f32.mrf.mxu3  ;;  %v5544_v48 = vpop.f32.mrf.mxu0 }
 0x6f3   : > { %v17627_v1 = vadd.f32 %v5544_v48, %v17300_v42  ;;  %v5623_v22 = vpop.f32.mrf.mxu1 }
 0x6f4   : > { %v17630_v31 = vadd.f32 %v5623_v22, %v17302_v56 }
 0x6f5   : > { %21031 = vst [vmem:[#allocation63_spill] sm:$0xff] %v17627_v1  ;;  %12206 = vmatmul.msk.bf16.gmra.mxu0 %vm602_vm0, %v13660_v60 }
 0x6f6   : > { %21032 = vst [vmem:[#allocation64_spill] sm:$0xff] %v17630_v31  ;;  %12220 = vmatmul.msk.bf16.gmra.mxu1 %vm602_vm0, %v13660_v60  ;;  %12234 = vmatmul.msk.bf16.gmra.mxu2 %vm602_vm0, %v17280_v33 }
 0x6f7   : > { %12248 = vmatmul.msk.bf16.gmra.mxu3 %vm602_vm0, %v17280_v33 }
 0x6f9   : > { %v17640_v42 = vpop.f32.mrf.mxu2 }
 0x6fa   : > { %v17642_v45 = vpop.f32.mrf.mxu3  ;;  %v5546_v57 = vpop.f32.mrf.mxu0 }
 0x6fb   : > { %v17645_v56 = vadd.f32 %v5546_v57, %v17311_v37  ;;  %v5625_v22 = vpop.f32.mrf.mxu1  ;;  %v21037_v57 = vld [vmem:[#allocation5_spill] sm:$0xff] }
 0x6fc   : > { %v17648_v48 = vadd.f32 %v5625_v22, %v17314_v0 }
 0x6fd   : > { %21033 = vst [vmem:[#allocation69_spill] sm:$0xff] %v17645_v56 }
 0x6fe   : > { %21034 = vst [vmem:[#allocation70_spill] sm:$0xff] %v17648_v48 }
 0x701   : > { %v17652_v40 = vpop.f32.mrf.mxu2 }
 0x702   : > { %v17655_v31 = vpop.f32.mrf.mxu3  ;;  %v5549_v33 = vpop.f32.mrf.mxu0 }
 0x703   : > { %v17658_v1 = vadd.f32 %v5549_v33, %v17324_v44  ;;  %v5628_v25 = vpop.f32.mrf.mxu1 }
 0x704   : > { %v17661_v37 = vadd.f32 %v5628_v25, %v17326_v35 }
 0x705   : > { %21035 = vst [vmem:[#allocation74_spill] sm:$0xff] %v17658_v1  ;;  %12207 = vmatmul.msk.bf16.gmra.mxu0 %vm602_vm0, %v13661_v63 }
 0x706   : > { %21036 = vst [vmem:[#allocation75_spill] sm:$0xff] %v17661_v37  ;;  %12221 = vmatmul.msk.bf16.gmra.mxu1 %vm602_vm0, %v13661_v63  ;;  %12235 = vmatmul.msk.bf16.gmra.mxu2 %vm602_vm0, %v21037_v57  ;;  %v13662_v37 = vld [vmem:[%s14554_s29 + $0x308] sm:$0xff] }
 0x707   : > { %12249 = vmatmul.msk.bf16.gmra.mxu3 %vm602_vm0, %v21037_v57 }
 0x709   : > { %v17671_v44 = vpop.f32.mrf.mxu2 }
 0x70a   : > { %v17673_v22 = vpop.f32.mrf.mxu3  ;;  %v5551_v33 = vpop.f32.mrf.mxu0 }
 0x70b   : > { %v17676_v35 = vadd.f32 %v5551_v33, %v17333_v55  ;;  %v5630_v25 = vpop.f32.mrf.mxu1  ;;  %v21042_v33 = vld [vmem:[#allocation6_spill] sm:$0xff] }
 0x70c   : > { %v17679_v60 = vadd.f32 %v5630_v25, %v17336_v38 }
 0x70d   : > { %21038 = vst [vmem:[#allocation78_spill] sm:$0xff] %v17676_v35 }
 0x70e   : > { %21039 = vst [vmem:[#allocation79_spill] sm:$0xff] %v17679_v60 }
 0x711   : > { %v17683_v0 = vpop.f32.mrf.mxu2 }
 0x712   : > { %v17686_v1 = vpop.f32.mrf.mxu3  ;;  %v5554_v57 = vpop.f32.mrf.mxu0 }
 0x713   : > { %v17689_v48 = vadd.f32 %v5554_v57, %v17346_v19  ;;  %v5633_v56 = vpop.f32.mrf.mxu1 }
 0x714   : > { %v17692_v55 = vadd.f32 %v5633_v56, %v17348_v15 }
 0x715   : > { %21040 = vst [vmem:[#allocation82_spill] sm:$0xff] %v17689_v48  ;;  %12208 = vmatmul.msk.bf16.gmra.mxu0 %vm602_vm0, %v13662_v37 }
 0x716   : > { %21041 = vst [vmem:[#allocation83_spill] sm:$0xff] %v17692_v55  ;;  %12222 = vmatmul.msk.bf16.gmra.mxu1 %vm602_vm0, %v13662_v37  ;;  %12236 = vmatmul.msk.bf16.gmra.mxu2 %vm602_vm0, %v21042_v33 }
 0x717   : > { %12250 = vmatmul.msk.bf16.gmra.mxu3 %vm602_vm0, %v21042_v33 }
 0x719   : > { %v17702_v19 = vpop.f32.mrf.mxu2 }
 0x71a   : > { %v17704_v25 = vpop.f32.mrf.mxu3  ;;  %v5556_v15 = vpop.f32.mrf.mxu0 }
 0x71b   : > { %v17707_v56 = vadd.f32 %v5556_v15, %v17353_v13  ;;  %v5635_v57 = vpop.f32.mrf.mxu1  ;;  %v14185_v13 = vld [vmem:[%s14554_s29 + $0x150] sm:$0xff] }
 0x71c   : > { %v17710_v38 = vadd.f32 %v5635_v57, %v17355_v36  ;;  %v14186_v15 = vld [vmem:[%s14554_s29 + $0x230] sm:$0xff] }
 0x71d   : > { %21043 = vst [vmem:[#allocation88_spill] sm:$0xff] %v17707_v56 }
 0x71e   : > { %21044 = vst [vmem:[#allocation89_spill] sm:$0xff] %v17710_v38 }
 0x721   : > { %v17714_v63 = vpop.f32.mrf.mxu2 }
 0x722   : > { %v17716_v55 = vpop.f32.mrf.mxu3  ;;  %v5559_v33 = vpop.f32.mrf.mxu0 }
 0x723   : > { %v17719_v48 = vadd.f32 %v5559_v33, %v17369_v49  ;;  %v5638_v60 = vpop.f32.mrf.mxu1 }
 0x724   : > { %v17722_v35 = vadd.f32 %v5638_v60, %v17371_v53 }
 0x725   : > { %21045 = vst [vmem:[#allocation67_spill] sm:$0xff] %v17719_v48  ;;  %12251 = vmatmul.msk.bf16.vlgmr.msra.gmra.mxu0 %vm602_vm0, %v14185_v13 }
 0x726   : > { %21046 = vst [vmem:[#allocation68_spill] sm:$0xff] %v17722_v35  ;;  %12265 = vmatmul.msk.bf16.vlgmr.msra.gmra.mxu1 %vm602_vm0, %v14185_v13  ;;  %12279 = vmatmul.msk.bf16.vlgmr.msra.gmra.mxu2 %vm602_vm0, %v14186_v15 }
 0x727   : > { %12293 = vmatmul.msk.bf16.vlgmr.msra.gmra.mxu3 %vm602_vm0, %v14186_v15 }
 0x729   : > { %v17732_v49 = vpop.f32.mrf.mxu2 }
 0x72a   : > { %v17734_v57 = vpop.f32.mrf.mxu3  ;;  %v5561_v53 = vpop.f32.mrf.mxu0 }
 0x72b   : > { %v17737_v60 = vadd.f32 %v5561_v53, %v17384_v27  ;;  %v5640_v33 = vpop.f32.mrf.mxu1  ;;  %v14187_v27 = vld [vmem:[%s14554_s29 + $0x158] sm:$0xff] }
 0x72c   : > { %v17740_v36 = vadd.f32 %v5640_v33, %v17386_v30  ;;  %v14188_v53 = vld [vmem:[%s14554_s29 + $0x238] sm:$0xff] }
 0x72d   : > { %21047 = vst [vmem:[#allocation72_spill] sm:$0xff] %v17737_v60 }
 0x72e   : > { %21048 = vst [vmem:[#allocation73_spill] sm:$0xff] %v17740_v36 }
 0x731   : > { %v17744_v37 = vpop.f32.mrf.mxu2 }
 0x732   : > { %v17746_v35 = vpop.f32.mrf.mxu3  ;;  %v5564_v15 = vpop.f32.mrf.mxu0 }
 0x733   : > { %v17749_v48 = vadd.f32 %v5564_v15, %v17404_v61  ;;  %v5643_v38 = vpop.f32.mrf.mxu1 }
 0x734   : > { %v17752_v56 = vadd.f32 %v5643_v38, %v17406_v58 }
 0x735   : > { %21049 = vst [vmem:[#allocation76_spill] sm:$0xff] %v17749_v48  ;;  %12252 = vmatmul.msk.bf16.gmra.mxu0 %vm602_vm0, %v14187_v27 }
 0x736   : > { %21050 = vst [vmem:[#allocation77_spill] sm:$0xff] %v17752_v56  ;;  %12266 = vmatmul.msk.bf16.gmra.mxu1 %vm602_vm0, %v14187_v27  ;;  %12280 = vmatmul.msk.bf16.gmra.mxu2 %vm602_vm0, %v14188_v53 }
 0x737   : > { %12294 = vmatmul.msk.bf16.gmra.mxu3 %vm602_vm0, %v14188_v53 }
 0x739   : > { %v17762_v61 = vpop.f32.mrf.mxu2 }
 0x73a   : > { %v17764_v33 = vpop.f32.mrf.mxu3  ;;  %v5566_v58 = vpop.f32.mrf.mxu0 }
 0x73b   : > { %v17767_v38 = vadd.f32 %v5566_v58, %v17415_v54  ;;  %v5645_v15 = vpop.f32.mrf.mxu1  ;;  %v14189_v54 = vld [vmem:[%s14554_s29 + $0x160] sm:$0xff] }
 0x73c   : > { %v17770_v30 = vadd.f32 %v5645_v15, %v17417_v14  ;;  %v14190_v58 = vld [vmem:[%s14554_s29 + $0x240] sm:$0xff] }
 0x73d   : > { %21051 = vst [vmem:[#allocation80_spill] sm:$0xff] %v17767_v38 }
 0x73e   : > { %21052 = vst [vmem:[#allocation56_spill] sm:$0xff] %v17770_v30 }
 0x741   : > { %v17774_v13 = vpop.f32.mrf.mxu2 }
 0x742   : > { %v17776_v56 = vpop.f32.mrf.mxu3  ;;  %v5569_v53 = vpop.f32.mrf.mxu0 }
 0x743   : > { %v17779_v48 = vadd.f32 %v5569_v53, %v17427_v10  ;;  %v5648_v36 = vpop.f32.mrf.mxu1 }
 0x744   : > { %v17782_v60 = vadd.f32 %v5648_v36, %v17429_v28 }
 0x745   : > { %21053 = vst [vmem:[#allocation66_spill] sm:$0xff] %v17779_v48  ;;  %12253 = vmatmul.msk.bf16.gmra.mxu0 %vm602_vm0, %v14189_v54 }
 0x746   : > { %21054 = vst [vmem:[#allocation87_spill] sm:$0xff] %v17782_v60  ;;  %12267 = vmatmul.msk.bf16.gmra.mxu1 %vm602_vm0, %v14189_v54  ;;  %12281 = vmatmul.msk.bf16.gmra.mxu2 %vm602_vm0, %v14190_v58 }
 0x747   : > { %12295 = vmatmul.msk.bf16.gmra.mxu3 %vm602_vm0, %v14190_v58 }
 0x749   : > { %v17792_v10 = vpop.f32.mrf.mxu2 }
 0x74a   : > { %v17794_v15 = vpop.f32.mrf.mxu3  ;;  %v5571_v28 = vpop.f32.mrf.mxu0 }
 0x74b   : > { %v17797_v36 = vadd.f32 %v5571_v28, %v17434_v17  ;;  %v5650_v53 = vpop.f32.mrf.mxu1  ;;  %v14191_v17 = vld [vmem:[%s14554_s29 + $0x168] sm:$0xff] }
 0x74c   : > { %v17800_v14 = vadd.f32 %v5650_v53, %v17436_v5  ;;  %v14192_v28 = vld [vmem:[%s14554_s29 + $0x248] sm:$0xff] }
 0x74d   : > { %21055 = vst [vmem:[#allocation10_spill] sm:$0xff] %v17797_v36 }
 0x74e   : > { %21056 = vst [vmem:[#allocation15_spill] sm:$0xff] %v17800_v14 }
 0x751   : > { %v17804_v27 = vpop.f32.mrf.mxu2 }
 0x752   : > { %v17806_v60 = vpop.f32.mrf.mxu3  ;;  %v5574_v58 = vpop.f32.mrf.mxu0 }
 0x753   : > { %v17809_v48 = vadd.f32 %v5574_v58, %v17446_v46  ;;  %v5653_v30 = vpop.f32.mrf.mxu1 }
 0x754   : > { %v17812_v38 = vadd.f32 %v5653_v30, %v17448_v21 }
 0x755   : > { %21057 = vst [vmem:[#allocation13_spill] sm:$0xff] %v17809_v48  ;;  %12254 = vmatmul.msk.bf16.gmra.mxu0 %vm602_vm0, %v14191_v17 }
 0x756   : > { %21058 = vst [vmem:[#allocation11_spill] sm:$0xff] %v17812_v38  ;;  %12268 = vmatmul.msk.bf16.gmra.mxu1 %vm602_vm0, %v14191_v17  ;;  %12282 = vmatmul.msk.bf16.gmra.mxu2 %vm602_vm0, %v14192_v28 }
 0x757   : > { %12296 = vmatmul.msk.bf16.gmra.mxu3 %vm602_vm0, %v14192_v28 }
 0x759   : > { %v17822_v46 = vpop.f32.mrf.mxu2 }
 0x75a   : > { %v17824_v53 = vpop.f32.mrf.mxu3  ;;  %v5576_v21 = vpop.f32.mrf.mxu0 }
 0x75b   : > { %v17827_v30 = vadd.f32 %v5576_v21, %v17453_v9  ;;  %v5655_v58 = vpop.f32.mrf.mxu1  ;;  %v14193_v9 = vld [vmem:[%s14554_s29 + $0x170] sm:$0xff] }
 0x75c   : > { %v17830_v5 = vadd.f32 %v5655_v58, %v17455_v51  ;;  %v14194_v21 = vld [vmem:[%s14554_s29 + $0x250] sm:$0xff] }
 0x75d   : > { %21059 = vst [vmem:[#allocation12_spill] sm:$0xff] %v17827_v30  ;;  %v21066_v30 = vld [vmem:[#allocation81_spill] sm:$0xff] }
 0x75e   : > { %21060 = vst [vmem:[#allocation21_spill] sm:$0xff] %v17830_v5 }
 0x761   : > { %v17834_v54 = vpop.f32.mrf.mxu2 }
 0x762   : > { %v17836_v38 = vpop.f32.mrf.mxu3  ;;  %v5579_v28 = vpop.f32.mrf.mxu0 }
 0x763   : > { %v17839_v48 = vadd.f32 %v5579_v28, %v17465_v7  ;;  %v5658_v14 = vpop.f32.mrf.mxu1 }
 0x764   : > { %v17842_v36 = vadd.f32 %v5658_v14, %v17467_v50 }
 0x765   : > { %21061 = vst [vmem:[#allocation22_spill] sm:$0xff] %v17839_v48  ;;  %12255 = vmatmul.msk.bf16.gmra.mxu0 %vm602_vm0, %v14193_v9 }
 0x766   : > { %21062 = vst [vmem:[#allocation19_spill] sm:$0xff] %v17842_v36  ;;  %12269 = vmatmul.msk.bf16.gmra.mxu1 %vm602_vm0, %v14193_v9  ;;  %12283 = vmatmul.msk.bf16.gmra.mxu2 %vm602_vm0, %v14194_v21 }
 0x767   : > { %12297 = vmatmul.msk.bf16.gmra.mxu3 %vm602_vm0, %v14194_v21 }
 0x769   : > { %v17852_v7 = vpop.f32.mrf.mxu2 }
 0x76a   : > { %v17854_v58 = vpop.f32.mrf.mxu3  ;;  %v5581_v50 = vpop.f32.mrf.mxu0 }
 0x76b   : > { %v17857_v14 = vadd.f32 %v5581_v50, %v17472_v20  ;;  %v5660_v28 = vpop.f32.mrf.mxu1  ;;  %v14195_v20 = vld [vmem:[%s14554_s29 + $0x178] sm:$0xff] }
 0x76c   : > { %v17860_v51 = vadd.f32 %v5660_v28, %v17474_v59  ;;  %v14196_v50 = vld [vmem:[%s14554_s29 + $0x258] sm:$0xff] }
 0x76d   : > { %21063 = vst [vmem:[#allocation20_spill] sm:$0xff] %v17857_v14  ;;  %v21073_v14 = vld [vmem:[#allocation84_spill] sm:$0xff] }
 0x76e   : > { %21064 = vst [vmem:[#allocation18_spill] sm:$0xff] %v17860_v51  ;;  %v21071_v51 = vld [vmem:[#allocation7_spill] sm:$0xff] }
 0x771   : > { %v17864_v17 = vpop.f32.mrf.mxu2 }
 0x772   : > { %v17866_v36 = vpop.f32.mrf.mxu3  ;;  %v5584_v21 = vpop.f32.mrf.mxu0 }
 0x773   : > { %v17869_v48 = vadd.f32 %v5584_v21, %v17484_v24  ;;  %v5663_v5 = vpop.f32.mrf.mxu1 }
 0x774   : > { %v17872_v4 = vadd.f32 %v5663_v5, %v21066_v30  ;;  %v21069_v30 = vld [vmem:[#allocation26_spill] sm:$0xff] }
 0x775   : > { %21065 = vst [vmem:[#allocation24_spill] sm:$0xff] %v17869_v48  ;;  %12256 = vmatmul.msk.bf16.gmra.mxu0 %vm602_vm0, %v14195_v20 }
 0x776   : > { %21067 = vst [vmem:[#allocation14_spill] sm:$0xff] %v17872_v4  ;;  %12270 = vmatmul.msk.bf16.gmra.mxu1 %vm602_vm0, %v14195_v20  ;;  %12284 = vmatmul.msk.bf16.gmra.mxu2 %vm602_vm0, %v14196_v50 }
 0x777   : > { %12298 = vmatmul.msk.bf16.gmra.mxu3 %vm602_vm0, %v14196_v50 }
 0x779   : > { %v17882_v24 = vpop.f32.mrf.mxu2 }
 0x77a   : > { %v17884_v28 = vpop.f32.mrf.mxu3  ;;  %v5586_v5 = vpop.f32.mrf.mxu0 }
 0x77b   : > { %21068 = vst [vmem:[#allocation27_spill] sm:$0xff] %v17884_v28  ;;  %v17887_v21 = vadd.f32 %v5586_v5, %v21069_v30  ;;  %v5665_v9 = vpop.f32.mrf.mxu1  ;;  %v14197_v5 = vld [vmem:[%s14554_s29 + $0x180] sm:$0xff] }
 0x77c   : > { %v17890_v59 = vadd.f32 %v5665_v9, %v21071_v51  ;;  %v14198_v9 = vld [vmem:[%s14554_s29 + $0x260] sm:$0xff] }
 0x77d   : > { %21070 = vst [vmem:[#allocation28_spill] sm:$0xff] %v17887_v21 }
 0x77e   : > { %21072 = vst [vmem:[#allocation23_spill] sm:$0xff] %v17890_v59  ;;  %v21081_v59 = vld [vmem:[#allocation57_spill] sm:$0xff] }
 0x781   : > { %v17894_v4 = vpop.f32.mrf.mxu2 }
 0x782   : > { %v17896_v48 = vpop.f32.mrf.mxu3  ;;  %v5589_v50 = vpop.f32.mrf.mxu0 }
 0x783   : > { %v17899_v62 = vadd.f32 %v5589_v50, %v21073_v14  ;;  %v5668_v32 = vpop.f32.mrf.mxu1 }
 0x784   : > { %v17902_v28 = vadd.f32 %v5668_v32, %v21075_v41  ;;  %v21079_v32 = vld [vmem:[#allocation16_spill] sm:$0xff] }
 0x785   : > { %21074 = vst [vmem:[#allocation30_spill] sm:$0xff] %v17899_v62  ;;  %12257 = vmatmul.msk.bf16.gmra.mxu0 %vm602_vm0, %v14197_v5 }
 0x786   : > { %21076 = vst [vmem:[#allocation25_spill] sm:$0xff] %v17902_v28  ;;  %12271 = vmatmul.msk.bf16.gmra.mxu1 %vm602_vm0, %v14197_v5  ;;  %12285 = vmatmul.msk.bf16.gmra.mxu2 %vm602_vm0, %v14198_v9 }
 0x787   : > { %12299 = vmatmul.msk.bf16.gmra.mxu3 %vm602_vm0, %v14198_v9 }
 0x789   : > { %v17912_v14 = vpop.f32.mrf.mxu2 }
 0x78a   : > { %21077 = vst [vmem:[#allocation32_spill] sm:$0xff] %v17912_v14  ;;  %v17914_v30 = vpop.f32.mrf.mxu3  ;;  %v5591_v41 = vpop.f32.mrf.mxu0 }
 0x78b   : > { %21078 = vst [vmem:[#allocation33_spill] sm:$0xff] %v17914_v30  ;;  %v17917_v50 = vadd.f32 %v5591_v41, %v21079_v32  ;;  %v5670_v20 = vpop.f32.mrf.mxu1  ;;  %v14199_v41 = vld [vmem:[%s14554_s29 + $0x188] sm:$0xff] }
 0x78c   : > { %v17920_v51 = vadd.f32 %v5670_v20, %v21081_v59  ;;  %v14200_v20 = vld [vmem:[%s14554_s29 + $0x268] sm:$0xff] }
 0x78d   : > { %21080 = vst [vmem:[#allocation29_spill] sm:$0xff] %v17917_v50 }
 0x78e   : > { %21082 = vst [vmem:[#allocation35_spill] sm:$0xff] %v17920_v51  ;;  %v14201_v51 = vld [vmem:[%s14554_s29 + $0x190] sm:$0xff] }
 0x791   : > { %v17924_v28 = vpop.f32.mrf.mxu2 }
 0x792   : > { %v17926_v62 = vpop.f32.mrf.mxu3  ;;  %v5594_v9 = vpop.f32.mrf.mxu0 }
 0x793   : > { %v17929_v21 = vadd.f32 %v5594_v9, %v17522_v11  ;;  %v5673_v30 = vpop.f32.mrf.mxu1 }
 0x794   : > { %v17932_v14 = vadd.f32 %v5673_v30, %v17524_v6 }
 0x795   : > { %21083 = vst [vmem:[#allocation31_spill] sm:$0xff] %v17929_v21  ;;  %12258 = vmatmul.msk.bf16.gmra.mxu0 %vm602_vm0, %v14199_v41 }
 0x796   : > { %21084 = vst [vmem:[#allocation37_spill] sm:$0xff] %v17932_v14  ;;  %12272 = vmatmul.msk.bf16.gmra.mxu1 %vm602_vm0, %v14199_v41  ;;  %12286 = vmatmul.msk.bf16.gmra.mxu2 %vm602_vm0, %v14200_v20 }
 0x797   : > { %12300 = vmatmul.msk.bf16.gmra.mxu3 %vm602_vm0, %v14200_v20 }
 0x799   : > { %v17942_v11 = vpop.f32.mrf.mxu2 }
 0x79a   : > { %21085 = vst [vmem:[#allocation71_spill] sm:$0xff] %v17942_v11  ;;  %v17944_v32 = vpop.f32.mrf.mxu3  ;;  %v5596_v6 = vpop.f32.mrf.mxu0 }
 0x79b   : > { %21086 = vst [vmem:[#allocation38_spill] sm:$0xff] %v17944_v32  ;;  %v17947_v30 = vadd.f32 %v5596_v6, %v17529_v3  ;;  %v5675_v9 = vpop.f32.mrf.mxu1  ;;  %v14202_v3 = vld [vmem:[%s14554_s29 + $0x270] sm:$0xff] }
 0x79c   : > { %v17950_v59 = vadd.f32 %v5675_v9, %v17531_v43 }
 0x79d   : > { %21087 = vst [vmem:[#allocation34_spill] sm:$0xff] %v17947_v30 }
 0x79e   : > { %21088 = vst [vmem:[#allocation36_spill] sm:$0xff] %v17950_v59 }
 0x7a1   : > { %v17954_v5 = vpop.f32.mrf.mxu2 }
 0x7a2   : > { %21089 = vst [vmem:[#allocation43_spill] sm:$0xff] %v17954_v5  ;;  %v17956_v14 = vpop.f32.mrf.mxu3  ;;  %v5929_v20 = vpop.f32.mrf.mxu0 }
 0x7a3   : > { %21090 = vst [vmem:[#allocation44_spill] sm:$0xff] %v17956_v14  ;;  %v6008_v21 = vpop.f32.mrf.mxu1  ;;  %v5930_v43 = vadd.f32 %v5929_v20, %v17547_v16 }
 0x7a4   : > { %v6009_v6 = vadd.f32 %v6008_v21, %v17549_v34  ;;  %v14203_v21 = vld [vmem:[%s14554_s29 + $0x198] sm:$0xff] }
 0x7a5   : > { %12259 = vmatmul.msk.bf16.gmra.mxu0 %vm602_vm0, %v14201_v51 }
 0x7a6   : > { %12273 = vmatmul.msk.bf16.gmra.mxu1 %vm602_vm0, %v14201_v51  ;;  %12287 = vmatmul.msk.bf16.gmra.mxu2 %vm602_vm0, %v14202_v3 }
 0x7a7   : > { %12301 = vmatmul.msk.bf16.gmra.mxu3 %vm602_vm0, %v14202_v3 }
 0x7a9   : > { %v6087_v9 = vpop.f32.mrf.mxu2 }
 0x7aa   : > { %v17966_v41 = vadd.f32 %v6087_v9, %v5930_v43  ;;  %v6166_v59 = vpop.f32.mrf.mxu3  ;;  %v5931_v30 = vpop.f32.mrf.mxu0 }
 0x7ab   : > { %v17968_v50 = vadd.f32 %v6166_v59, %v6009_v6  ;;  %v6010_v14 = vpop.f32.mrf.mxu1  ;;  %v5932_v51 = vadd.f32 %v5931_v30, %v17559_v47  ;;  %v14204_v59 = vld [vmem:[%s14554_s29 + $0x278] sm:$0xff] }
 0x7ac   : > { %v6011_v5 = vadd.f32 %v6010_v14, %v17562_v39 }
 0x7b1   : > { %v6089_v32 = vpop.f32.mrf.mxu2 }
 0x7b2   : > { %v17972_v3 = vadd.f32 %v6089_v32, %v5932_v51  ;;  %v6168_v16 = vpop.f32.mrf.mxu3  ;;  %v5934_v20 = vpop.f32.mrf.mxu0 }
 0x7b3   : > { %v17974_v11 = vadd.f32 %v6168_v16, %v6011_v5  ;;  %v6013_v34 = vpop.f32.mrf.mxu1  ;;  %v5935_v47 = vadd.f32 %v5934_v20, %v17578_v29 }
 0x7b4   : > { %v6014_v39 = vadd.f32 %v6013_v34, %v17580_v52  ;;  %v14205_v34 = vld [vmem:[%s14554_s29 + $0x1a0] sm:$0xff] }
 0x7b5   : > { %12260 = vmatmul.msk.bf16.gmra.mxu0 %vm602_vm0, %v14203_v21 }
 0x7b6   : > { %12274 = vmatmul.msk.bf16.gmra.mxu1 %vm602_vm0, %v14203_v21  ;;  %12288 = vmatmul.msk.bf16.gmra.mxu2 %vm602_vm0, %v14204_v59 }
 0x7b7   : > { %12302 = vmatmul.msk.bf16.gmra.mxu3 %vm602_vm0, %v14204_v59 }
 0x7b9   : > { %v6092_v14 = vpop.f32.mrf.mxu2 }
 0x7ba   : > { %v17984_v32 = vadd.f32 %v6092_v14, %v5935_v47  ;;  %v6171_v5 = vpop.f32.mrf.mxu3  ;;  %v5936_v30 = vpop.f32.mrf.mxu0  ;;  %v14206_v47 = vld [vmem:[%s14554_s29 + $0x280] sm:$0xff] }
 0x7bb   : > { %v17986_v43 = vadd.f32 %v6171_v5, %v6014_v39  ;;  %v6015_v6 = vpop.f32.mrf.mxu1  ;;  %v5937_v9 = vadd.f32 %v5936_v30, %v17590_v8 }
 0x7bc   : > { %v6016_v51 = vadd.f32 %v6015_v6, %v17593_v12 }
 0x7c1   : > { %v6094_v16 = vpop.f32.mrf.mxu2 }
 0x7c2   : > { %v17990_v21 = vadd.f32 %v6094_v16, %v5937_v9  ;;  %v6173_v29 = vpop.f32.mrf.mxu3  ;;  %v5939_v20 = vpop.f32.mrf.mxu0 }
 0x7c3   : > { %v17992_v59 = vadd.f32 %v6173_v29, %v6016_v51  ;;  %v6018_v52 = vpop.f32.mrf.mxu1  ;;  %v5940_v12 = vadd.f32 %v5939_v20, %v17609_v26 }
 0x7c4   : > { %v6019_v8 = vadd.f32 %v6018_v52, %v17611_v18  ;;  %v14207_v52 = vld [vmem:[%s14554_s29 + $0x1a8] sm:$0xff] }
 0x7c5   : > { %12261 = vmatmul.msk.bf16.gmra.mxu0 %vm602_vm0, %v14205_v34 }
 0x7c6   : > { %12275 = vmatmul.msk.bf16.gmra.mxu1 %vm602_vm0, %v14205_v34  ;;  %12289 = vmatmul.msk.bf16.gmra.mxu2 %vm602_vm0, %v14206_v47 }
 0x7c7   : > { %12303 = vmatmul.msk.bf16.gmra.mxu3 %vm602_vm0, %v14206_v47 }
 0x7c9   : > { %v6097_v39 = vpop.f32.mrf.mxu2 }
 0x7ca   : > { %v18002_v14 = vadd.f32 %v6097_v39, %v5940_v12  ;;  %v6176_v5 = vpop.f32.mrf.mxu3  ;;  %v5941_v30 = vpop.f32.mrf.mxu0  ;;  %v14208_v12 = vld [vmem:[%s14554_s29 + $0x288] sm:$0xff] }
 0x7cb   : > { %v18004_v6 = vadd.f32 %v6176_v5, %v6019_v8  ;;  %v6020_v9 = vpop.f32.mrf.mxu1  ;;  %v5942_v51 = vadd.f32 %v5941_v30, %v17621_v2 }
 0x7cc   : > { %v6021_v16 = vadd.f32 %v6020_v9, %v17624_v23 }
 0x7d1   : > { %v6099_v29 = vpop.f32.mrf.mxu2 }
 0x7d2   : > { %v18008_v34 = vadd.f32 %v6099_v29, %v5942_v51  ;;  %v6178_v26 = vpop.f32.mrf.mxu3  ;;  %v5944_v20 = vpop.f32.mrf.mxu0 }
 0x7d3   : > { %v18010_v47 = vadd.f32 %v6178_v26, %v6021_v16  ;;  %v6023_v18 = vpop.f32.mrf.mxu1  ;;  %v5945_v23 = vadd.f32 %v5944_v20, %v17640_v42 }
 0x7d4   : > { %v6024_v2 = vadd.f32 %v6023_v18, %v17642_v45  ;;  %v14209_v18 = vld [vmem:[%s14554_s29 + $0x1b0] sm:$0xff] }
 0x7d5   : > { %12262 = vmatmul.msk.bf16.gmra.mxu0 %vm602_vm0, %v14207_v52 }
 0x7d6   : > { %12276 = vmatmul.msk.bf16.gmra.mxu1 %vm602_vm0, %v14207_v52  ;;  %12290 = vmatmul.msk.bf16.gmra.mxu2 %vm602_vm0, %v14208_v12 }
 0x7d7   : > { %12304 = vmatmul.msk.bf16.gmra.mxu3 %vm602_vm0, %v14208_v12 }
 0x7d9   : > { %v6102_v8 = vpop.f32.mrf.mxu2 }
 0x7da   : > { %v18020_v39 = vadd.f32 %v6102_v8, %v5945_v23  ;;  %v6181_v5 = vpop.f32.mrf.mxu3  ;;  %v5946_v30 = vpop.f32.mrf.mxu0  ;;  %v14210_v23 = vld [vmem:[%s14554_s29 + $0x290] sm:$0xff] }
 0x7db   : > { %v18022_v9 = vadd.f32 %v6181_v5, %v6024_v2  ;;  %v6025_v51 = vpop.f32.mrf.mxu1  ;;  %v5947_v16 = vadd.f32 %v5946_v30, %v17652_v40  ;;  %v13714_v40 = vld [vmem:[%s20282_s3 + $0x74] sm:$0xf0]  ;;  %v13713_v2 = vld [vmem:[%s20282_s3 + $0x74] sm:$0xf]  ;;  %v12667_v30 = vld [vmem:[%s20282_s3 + $0x78] sm:$0xf0] }
 0x7dc   : > { %v6026_v29 = vadd.f32 %v6025_v51, %v17655_v31  ;;  %v12665_v31 = vld [vmem:[%s20282_s3 + $0x70] sm:$0xf] }
 0x7dd   : > { %v18046_v5 = vor.u32 %v13714_v40, %v12665_v31  ;;  %v12563_v40 = vld [vmem:[%s20282_s3 + $0xf8] sm:$0xf0] }
 0x7df   : > { %21091 = vst [vmem:[#allocation45_spill] sm:$0xff] %v18046_v5  ;;  %7501 = vmatpush.bf16.msra.mxu2 %v18046_v5  ;;  %v14211_v5 = vld [vmem:[%s14554_s29 + $0x1b8] sm:$0xff] }
 0x7e1   : > { %v6104_v26 = vpop.f32.mrf.mxu2 }
 0x7e2   : > { %v18026_v52 = vadd.f32 %v6104_v26, %v5947_v16  ;;  %v6183_v42 = vpop.f32.mrf.mxu3  ;;  %v5949_v20 = vpop.f32.mrf.mxu0 }
 0x7e3   : > { %v18028_v12 = vadd.f32 %v6183_v42, %v6026_v29  ;;  %v6028_v45 = vpop.f32.mrf.mxu1  ;;  %v5950_v8 = vadd.f32 %v5949_v20, %v17671_v44  ;;  %v18052_v29 = vor.u32 %v13713_v2, %v12667_v30  ;;  %v12561_v20 = vld [vmem:[%s20282_s3 + $0xf0] sm:$0xf] }
 0x7e4   : > { %v6029_v51 = vadd.f32 %v6028_v45, %v17673_v22  ;;  %v13740_v22 = vld [vmem:[%s20282_s3 + $0xf4] sm:$0xf0]  ;;  %v13739_v45 = vld [vmem:[%s20282_s3 + $0xf4] sm:$0xf] }
 0x7e5   : > { %12263 = vmatmul.msk.bf16.gmra.mxu0 %vm602_vm0, %v14209_v18  ;;  %21092 = vst [vmem:[#allocation41_spill] sm:$0xff] %v18052_v29  ;;  %7560 = vmatpush.bf16.msra.mxu3 %v18052_v29  ;;  %v18069_v31 = vor.u32 %v13740_v22, %v12561_v20  ;;  %v18074_v2 = vor.u32 %v13739_v45, %v12563_v40  ;;  %v14212_v45 = vld [vmem:[%s14554_s29 + $0x298] sm:$0xff] }
 0x7e6   : > { %12277 = vmatmul.msk.bf16.gmra.mxu1 %vm602_vm0, %v14209_v18  ;;  %12291 = vmatmul.msk.bf16.gmra.mxu2 %vm602_vm0, %v14210_v23 }
 0x7e7   : > { %12305 = vmatmul.msk.bf16.gmra.mxu3 %vm602_vm0, %v14210_v23  ;;  %21093 = vst [vmem:[#allocation42_spill] sm:$0xff] %v18069_v31  ;;  %7243 = vmatpush.bf16.msra.mxu0 %v18069_v31 }
 0x7e8   : > { %21094 = vst [vmem:[#allocation48_spill] sm:$0xff] %v18074_v2  ;;  %7302 = vmatpush.bf16.msra.mxu1 %v18074_v2 }
 0x7e9   : > { %v6107_v16 = vpop.f32.mrf.mxu2 }
 0x7ea   : > { %v18054_v26 = vadd.f32 %v6107_v16, %v5950_v8  ;;  %v6186_v42 = vpop.f32.mrf.mxu3  ;;  %v5951_v18 = vpop.f32.mrf.mxu0 }
 0x7eb   : > { %v18057_v23 = vadd.f32 %v6186_v42, %v6029_v51  ;;  %v6030_v44 = vpop.f32.mrf.mxu1  ;;  %v5952_v8 = vadd.f32 %v5951_v18, %v17683_v0 }
 0x7ec   : > { %v6031_v30 = vadd.f32 %v6030_v44, %v17686_v1 }
 0x7f1   : > { %v6109_v51 = vpop.f32.mrf.mxu2 }
 0x7f2   : > { %v18080_v16 = vadd.f32 %v6109_v51, %v5952_v8  ;;  %v6188_v42 = vpop.f32.mrf.mxu3  ;;  %v5954_v20 = vpop.f32.mrf.mxu0 }
 0x7f3   : > { %v18082_v22 = vadd.f32 %v6188_v42, %v6031_v30  ;;  %v6033_v29 = vpop.f32.mrf.mxu1  ;;  %v5955_v1 = vadd.f32 %v5954_v20, %v17702_v19  ;;  %v13675_v20 = vld [vmem:[%s14554_s29 + $0x310] sm:$0xff] }
 0x7f4   : > { %v6034_v0 = vadd.f32 %v6033_v29, %v17704_v25 }
 0x7f5   : > { %12264 = vmatmul.msk.bf16.gmra.mxu0 %vm602_vm0, %v14211_v5 }
 0x7f6   : > { %12278 = vmatmul.msk.bf16.gmra.mxu1 %vm602_vm0, %v14211_v5  ;;  %12292 = vmatmul.msk.bf16.gmra.mxu2 %vm602_vm0, %v14212_v45 }
 0x7f7   : > { %12306 = vmatmul.msk.bf16.gmra.mxu3 %vm602_vm0, %v14212_v45 }
 0x7f9   : > { %v6112_v18 = vpop.f32.mrf.mxu2 }
 0x7fa   : > { %v18092_v44 = vadd.f32 %v6112_v18, %v5955_v1  ;;  %v6191_v40 = vpop.f32.mrf.mxu3  ;;  %v5956_v8 = vpop.f32.mrf.mxu0  ;;  %v12657_v1 = vld [vmem:[%s20282_s3 + $0x60] sm:$0xf] }
 0x7fb   : > { %v18094_v30 = vadd.f32 %v6191_v40, %v6034_v0  ;;  %v6035_v51 = vpop.f32.mrf.mxu1  ;;  %v5957_v5 = vadd.f32 %v5956_v8, %v17714_v63  ;;  %v13712_v0 = vld [vmem:[%s20282_s3 + $0x64] sm:$0xf0]  ;;  %v13711_v63 = vld [vmem:[%s20282_s3 + $0x64] sm:$0xf]  ;;  %v12553_v8 = vld [vmem:[%s20282_s3 + $0xe0] sm:$0xf] }
 0x7fc   : > { %v6036_v42 = vadd.f32 %v6035_v51, %v17716_v55  ;;  %v18112_v55 = vor.u32 %v13712_v0, %v12657_v1  ;;  %v14213_v18 = vld [vmem:[%s14554_s29 + $0x2a0] sm:$0xff]  ;;  %v13738_v51 = vld [vmem:[%s20282_s3 + $0xe4] sm:$0xf0] }
 0x7fe   : > { %21095 = vst [vmem:[#allocation49_spill] sm:$0xff] %v18112_v55  ;;  %7502 = vmatpush.bf16.msra.mxu2 %v18112_v55 }
 0x801   : > { %v6114_v2 = vpop.f32.mrf.mxu2 }
 0x802   : > { %v18098_v31 = vadd.f32 %v6114_v2, %v5957_v5  ;;  %v6193_v45 = vpop.f32.mrf.mxu3  ;;  %v5959_v19 = vpop.f32.mrf.mxu0  ;;  %v12659_v2 = vld [vmem:[%s20282_s3 + $0x68] sm:$0xf0]  ;;  %v13737_v5 = vld [vmem:[%s20282_s3 + $0xe4] sm:$0xf] }
 0x803   : > { %v18101_v25 = vadd.f32 %v6193_v45, %v6036_v42  ;;  %v6038_v29 = vpop.f32.mrf.mxu1  ;;  %v18119_v40 = vor.u32 %v13711_v63, %v12659_v2  ;;  %v5960_v42 = vadd.f32 %v5959_v19, %v17732_v49  ;;  %v18136_v45 = vor.u32 %v13738_v51, %v12553_v8 }
 0x804   : > { %v6039_v1 = vadd.f32 %v6038_v29, %v17734_v57 }
 0x805   : > { %12307 = vmatmul.msk.bf16.vlgmr.msrb.gmra.mxu0 %vm602_vm0, %v14213_v18  ;;  %21096 = vst [vmem:[#allocation50_spill] sm:$0xff] %v18119_v40  ;;  %7561 = vmatpush.bf16.msra.mxu3 %v18119_v40 }
 0x806   : > { %12321 = vmatmul.msk.bf16.vlgmr.msrb.gmra.mxu1 %vm602_vm0, %v14213_v18  ;;  %12419 = vmatmul.msk.bf16.vlgmr.msrb.gmra.mxu2 %vm602_vm0, %v13675_v20  ;;  %21097 = vst [vmem:[#allocation46_spill] sm:$0xff] %v18136_v45 }
 0x807   : > { %12433 = vmatmul.msk.bf16.vlgmr.msrb.gmra.mxu3 %vm602_vm0, %v13675_v20  ;;  %v12555_v20 = vld [vmem:[%s20282_s3 + $0xe8] sm:$0xf0]  ;;  %7244 = vmatpush.bf16.msra.mxu0 %v18136_v45 }
 0x808   : > { %v18142_v63 = vor.u32 %v13737_v5, %v12555_v20  ;;  %v13676_v20 = vld [vmem:[%s14554_s29 + $0x318] sm:$0xff] }
 0x809   : > { %v6117_v0 = vpop.f32.mrf.mxu2 }
 0x80a   : > { %21098 = vst [vmem:[#allocation47_spill] sm:$0xff] %v18142_v63  ;;  %v18144_v2 = vadd.f32 %v6117_v0, %v5960_v42  ;;  %v6196_v18 = vpop.f32.mrf.mxu3  ;;  %v5961_v55 = vpop.f32.mrf.mxu0  ;;  %7303 = vmatpush.bf16.msra.mxu1 %v18142_v63 }
 0x80b   : > { %v18147_v49 = vadd.f32 %v6196_v18, %v6039_v1  ;;  %v6040_v19 = vpop.f32.mrf.mxu1  ;;  %v5962_v8 = vadd.f32 %v5961_v55, %v17744_v37 }
 0x80c   : > { %21099 = vst [vmem:[#allocation53_spill] sm:$0xff] %v18144_v2  ;;  %v6041_v57 = vadd.f32 %v6040_v19, %v17746_v35  ;;  %v14214_v2 = vld [vmem:[%s14554_s29 + $0x2a8] sm:$0xff] }
 0x811   : > { %v6119_v29 = vpop.f32.mrf.mxu2 }
 0x812   : > { %v18152_v51 = vadd.f32 %v6119_v29, %v5962_v8  ;;  %v6198_v5 = vpop.f32.mrf.mxu3  ;;  %v5964_v42 = vpop.f32.mrf.mxu0  ;;  %v13710_v29 = vld [vmem:[%s20282_s3 + $0x54] sm:$0xf0] }
 0x813   : > { %v18155_v0 = vadd.f32 %v6198_v5, %v6041_v57  ;;  %v6043_v40 = vpop.f32.mrf.mxu1  ;;  %v5965_v35 = vadd.f32 %v5964_v42, %v17762_v61  ;;  %v13709_v61 = vld [vmem:[%s20282_s3 + $0x54] sm:$0xf] }
 0x814   : > { %v6044_v37 = vadd.f32 %v6043_v40, %v17764_v33  ;;  %v12651_v40 = vld [vmem:[%s20282_s3 + $0x58] sm:$0xf0] }
 0x815   : > { %12308 = vmatmul.msk.bf16.gmra.mxu0 %vm602_vm0, %v14214_v2  ;;  %v18182_v5 = vor.u32 %v13709_v61, %v12651_v40  ;;  %v12545_v61 = vld [vmem:[%s20282_s3 + $0xd0] sm:$0xf] }
 0x816   : > { %12322 = vmatmul.msk.bf16.gmra.mxu1 %vm602_vm0, %v14214_v2  ;;  %12420 = vmatmul.msk.bf16.gmra.mxu2 %vm602_vm0, %v13676_v20  ;;  %v12649_v2 = vld [vmem:[%s20282_s3 + $0x50] sm:$0xf] }
 0x817   : > { %12434 = vmatmul.msk.bf16.gmra.mxu3 %vm602_vm0, %v13676_v20  ;;  %v18177_v33 = vor.u32 %v13710_v29, %v12649_v2  ;;  %21101 = vst [vmem:[#allocation52_spill] sm:$0xff] %v18182_v5  ;;  %v13677_v2 = vld [vmem:[%s14554_s29 + $0x320] sm:$0xff]  ;;  %v14215_v40 = vld [vmem:[%s14554_s29 + $0x2b0] sm:$0xff] }
 0x818   : > { %7562 = vmatpush.bf16.msra.mxu3 %v18182_v5 }
 0x819   : > { %v6122_v55 = vpop.f32.mrf.mxu2  ;;  %21100 = vst [vmem:[#allocation51_spill] sm:$0xff] %v18177_v33  ;;  %7503 = vmatpush.bf16.msra.mxu2 %v18177_v33 }
 0x81a   : > { %v18164_v1 = vadd.f32 %v6122_v55, %v5965_v35  ;;  %v6201_v18 = vpop.f32.mrf.mxu3  ;;  %v5966_v19 = vpop.f32.mrf.mxu0 }
 0x81b   : > { %v18166_v8 = vadd.f32 %v6201_v18, %v6044_v37  ;;  %v6045_v57 = vpop.f32.mrf.mxu1  ;;  %v5967_v42 = vadd.f32 %v5966_v19, %v17774_v13  ;;  %v13736_v13 = vld [vmem:[%s20282_s3 + $0xd4] sm:$0xf0] }
 0x81c   : > { %v6046_v20 = vadd.f32 %v6045_v57, %v17776_v56  ;;  %v13735_v56 = vld [vmem:[%s20282_s3 + $0xd4] sm:$0xf]  ;;  %v18202_v19 = vor.u32 %v13736_v13, %v12545_v61  ;;  %v12547_v57 = vld [vmem:[%s20282_s3 + $0xd8] sm:$0xf0] }
 0x81e   : > { %21102 = vst [vmem:[#allocation54_spill] sm:$0xff] %v18202_v19  ;;  %7245 = vmatpush.bf16.msra.mxu0 %v18202_v19 }
 0x821   : > { %v6124_v35 = vpop.f32.mrf.mxu2 }
 0x822   : > { %v18188_v37 = vadd.f32 %v6124_v35, %v5967_v42  ;;  %v6203_v55 = vpop.f32.mrf.mxu3  ;;  %v5969_v18 = vpop.f32.mrf.mxu0  ;;  %v18209_v42 = vor.u32 %v13735_v56, %v12547_v57 }
 0x823   : > { %v18191_v29 = vadd.f32 %v6203_v55, %v6046_v20  ;;  %v6048_v63 = vpop.f32.mrf.mxu1  ;;  %v5970_v20 = vadd.f32 %v5969_v18, %v17792_v10 }
 0x824   : > { %21103 = vst [vmem:[#allocation4_spill] sm:$0xff] %v18209_v42  ;;  %7304 = vmatpush.bf16.msra.mxu1 %v18209_v42  ;;  %v6049_v35 = vadd.f32 %v6048_v63, %v17794_v15  ;;  %v13678_v42 = vld [vmem:[%s14554_s29 + $0x328] sm:$0xff] }
 0x825   : > { %12309 = vmatmul.msk.bf16.gmra.mxu0 %vm602_vm0, %v14215_v40 }
 0x826   : > { %12323 = vmatmul.msk.bf16.gmra.mxu1 %vm602_vm0, %v14215_v40  ;;  %12421 = vmatmul.msk.bf16.gmra.mxu2 %vm602_vm0, %v13677_v2 }
 0x827   : > { %12435 = vmatmul.msk.bf16.gmra.mxu3 %vm602_vm0, %v13677_v2 }
 0x829   : > { %v6127_v55 = vpop.f32.mrf.mxu2 }
 0x82a   : > { %v18218_v61 = vadd.f32 %v6127_v55, %v5970_v20  ;;  %v6206_v13 = vpop.f32.mrf.mxu3  ;;  %v5971_v56 = vpop.f32.mrf.mxu0  ;;  %v14216_v20 = vld [vmem:[%s14554_s29 + $0x2b8] sm:$0xff] }
 0x82b   : > { %v18220_v57 = vadd.f32 %v6206_v13, %v6049_v35  ;;  %v6050_v40 = vpop.f32.mrf.mxu1  ;;  %v5972_v2 = vadd.f32 %v5971_v56, %v17804_v27 }
 0x82c   : > { %v6051_v5 = vadd.f32 %v6050_v40, %v17806_v60  ;;  %v12641_v40 = vld [vmem:[%s20282_s3 + $0x40] sm:$0xf] }
 0x831   : > { %v6129_v33 = vpop.f32.mrf.mxu2 }
 0x832   : > { %v18224_v19 = vadd.f32 %v6129_v33, %v5972_v2  ;;  %v6208_v10 = vpop.f32.mrf.mxu3  ;;  %v5974_v18 = vpop.f32.mrf.mxu0  ;;  %v12643_v2 = vld [vmem:[%s20282_s3 + $0x48] sm:$0xf0] }
 0x833   : > { %v18227_v15 = vadd.f32 %v6208_v10, %v6051_v5  ;;  %v6053_v63 = vpop.f32.mrf.mxu1  ;;  %v5975_v60 = vadd.f32 %v5974_v18, %v17822_v46  ;;  %v13707_v46 = vld [vmem:[%s20282_s3 + $0x44] sm:$0xf]  ;;  %v12537_v10 = vld [vmem:[%s20282_s3 + $0xc0] sm:$0xf]  ;;  %v13734_v18 = vld [vmem:[%s20282_s3 + $0xc4] sm:$0xf0] }
 0x834   : > { %v6054_v27 = vadd.f32 %v6053_v63, %v17824_v53  ;;  %v18260_v63 = vor.u32 %v13707_v46, %v12643_v2 }
 0x835   : > { %12310 = vmatmul.msk.bf16.gmra.mxu0 %vm602_vm0, %v14216_v20 }
 0x836   : > { %12324 = vmatmul.msk.bf16.gmra.mxu1 %vm602_vm0, %v14216_v20  ;;  %12422 = vmatmul.msk.bf16.gmra.mxu2 %vm602_vm0, %v13678_v42  ;;  %21105 = vst [vmem:[#allocation5_spill] sm:$0xff] %v18260_v63  ;;  %v18262_v20 = vor.u32 %v13734_v18, %v12537_v10  ;;  %v13679_v18 = vld [vmem:[%s14554_s29 + $0x330] sm:$0xff] }
 0x837   : > { %12436 = vmatmul.msk.bf16.gmra.mxu3 %vm602_vm0, %v13678_v42  ;;  %v13708_v42 = vld [vmem:[%s20282_s3 + $0x44] sm:$0xf0] }
 0x838   : > { %v18249_v53 = vor.u32 %v13708_v42, %v12641_v40  ;;  %21106 = vst [vmem:[#allocation6_spill] sm:$0xff] %v18262_v20  ;;  %7563 = vmatpush.bf16.msra.mxu3 %v18260_v63  ;;  %7246 = vmatpush.bf16.msra.mxu0 %v18262_v20 }
 0x839   : > { %v6132_v33 = vpop.f32.mrf.mxu2 }
 0x83a   : > { %v18236_v35 = vadd.f32 %v6132_v33, %v5975_v60  ;;  %v6211_v55 = vpop.f32.mrf.mxu3  ;;  %v5976_v5 = vpop.f32.mrf.mxu0  ;;  %21104 = vst [vmem:[#allocation55_spill] sm:$0xff] %v18249_v53  ;;  %v13733_v60 = vld [vmem:[%s20282_s3 + $0xc4] sm:$0xf]  ;;  %7504 = vmatpush.bf16.msra.mxu2 %v18249_v53 }
 0x83b   : > { %v18238_v13 = vadd.f32 %v6211_v55, %v6054_v27  ;;  %v6055_v56 = vpop.f32.mrf.mxu1  ;;  %v12539_v27 = vld [vmem:[%s20282_s3 + $0xc8] sm:$0xf0]  ;;  %v5977_v55 = vadd.f32 %v5976_v5, %v17834_v54 }
 0x83c   : > { %v18271_v33 = vor.u32 %v13733_v60, %v12539_v27  ;;  %v6056_v40 = vadd.f32 %v6055_v56, %v17836_v38  ;;  %v14217_v27 = vld [vmem:[%s14554_s29 + $0x2c0] sm:$0xff] }
 0x83e   : > { %21107 = vst [vmem:[#allocation81_spill] sm:$0xff] %v18271_v33  ;;  %7305 = vmatpush.bf16.msra.mxu1 %v18271_v33 }
 0x841   : > { %v6134_v42 = vpop.f32.mrf.mxu2 }
 0x842   : > { %v18278_v46 = vadd.f32 %v6134_v42, %v5977_v55  ;;  %v6213_v2 = vpop.f32.mrf.mxu3  ;;  %v5979_v10 = vpop.f32.mrf.mxu0 }
 0x843   : > { %v18281_v45 = vadd.f32 %v6213_v2, %v6056_v40  ;;  %v6058_v60 = vpop.f32.mrf.mxu1  ;;  %v5980_v38 = vadd.f32 %v5979_v10, %v17852_v7  ;;  %v13680_v10 = vld [vmem:[%s14554_s29 + $0x338] sm:$0xff] }
 0x844   : > { %v6059_v54 = vadd.f32 %v6058_v60, %v17854_v58 }
 0x845   : > { %12311 = vmatmul.msk.bf16.gmra.mxu0 %vm602_vm0, %v14217_v27 }
 0x846   : > { %12325 = vmatmul.msk.bf16.gmra.mxu1 %vm602_vm0, %v14217_v27  ;;  %12423 = vmatmul.msk.bf16.gmra.mxu2 %vm602_vm0, %v13679_v18 }
 0x847   : > { %12437 = vmatmul.msk.bf16.gmra.mxu3 %vm602_vm0, %v13679_v18 }
 0x849   : > { %v6137_v5 = vpop.f32.mrf.mxu2 }
 0x84a   : > { %v18290_v56 = vadd.f32 %v6137_v5, %v5980_v38  ;;  %v6216_v55 = vpop.f32.mrf.mxu3  ;;  %v5981_v40 = vpop.f32.mrf.mxu0  ;;  %v14218_v38 = vld [vmem:[%s14554_s29 + $0x2c8] sm:$0xff]  ;;  %v12635_v5 = vld [vmem:[%s20282_s3 + $0x38] sm:$0xf0] }
 0x84b   : > { %v18292_v42 = vadd.f32 %v6216_v55, %v6059_v54  ;;  %v6060_v2 = vpop.f32.mrf.mxu1  ;;  %v5982_v27 = vadd.f32 %v5981_v40, %v17864_v17  ;;  %v13706_v17 = vld [vmem:[%s20282_s3 + $0x34] sm:$0xf0]  ;;  %v21109_v55 = vld [vmem:[#allocation27_spill] sm:$0xff] }
 0x84c   : > { %v6061_v63 = vadd.f32 %v6060_v2, %v17866_v36  ;;  %v12633_v36 = vld [vmem:[%s20282_s3 + $0x30] sm:$0xf] }
 0x84d   : > { %v18316_v54 = vor.u32 %v13706_v17, %v12633_v36  ;;  %v13731_v36 = vld [vmem:[%s20282_s3 + $0xb4] sm:$0xf] }
 0x84f   : > { %21108 = vst [vmem:[#allocation26_spill] sm:$0xff] %v18316_v54  ;;  %7505 = vmatpush.bf16.msra.mxu2 %v18316_v54 }
 0x851   : > { %v6139_v53 = vpop.f32.mrf.mxu2 }
 0x852   : > { %v18296_v33 = vadd.f32 %v6139_v53, %v5982_v27  ;;  %v6218_v18 = vpop.f32.mrf.mxu3  ;;  %v5984_v7 = vpop.f32.mrf.mxu0  ;;  %v13705_v53 = vld [vmem:[%s20282_s3 + $0x34] sm:$0xf] }
 0x853   : > { %v18299_v58 = vadd.f32 %v6218_v18, %v6061_v63  ;;  %v6063_v60 = vpop.f32.mrf.mxu1  ;;  %v5985_v63 = vadd.f32 %v5984_v7, %v17882_v24  ;;  %v18322_v27 = vor.u32 %v13705_v53, %v12635_v5  ;;  %v12529_v7 = vld [vmem:[%s20282_s3 + $0xb0] sm:$0xf]  ;;  %v12531_v53 = vld [vmem:[%s20282_s3 + $0xb8] sm:$0xf0] }
 0x854   : > { %v6064_v40 = vadd.f32 %v6063_v60, %v21109_v55  ;;  %v13732_v60 = vld [vmem:[%s20282_s3 + $0xb4] sm:$0xf0] }
 0x855   : > { %12312 = vmatmul.msk.bf16.gmra.mxu0 %vm602_vm0, %v14218_v38  ;;  %21110 = vst [vmem:[#allocation7_spill] sm:$0xff] %v18322_v27  ;;  %7564 = vmatpush.bf16.msra.mxu3 %v18322_v27  ;;  %v18339_v17 = vor.u32 %v13732_v60, %v12529_v7  ;;  %v13681_v60 = vld [vmem:[%s14554_s29 + $0x340] sm:$0xff] }
 0x856   : > { %12326 = vmatmul.msk.bf16.gmra.mxu1 %vm602_vm0, %v14218_v38  ;;  %12424 = vmatmul.msk.bf16.gmra.mxu2 %vm602_vm0, %v13680_v10 }
 0x857   : > { %12438 = vmatmul.msk.bf16.gmra.mxu3 %vm602_vm0, %v13680_v10  ;;  %21112 = vst [vmem:[#allocation8_spill] sm:$0xff] %v18339_v17  ;;  %7247 = vmatpush.bf16.msra.mxu0 %v18339_v17 }
 0x859   : > { %v6142_v2 = vpop.f32.mrf.mxu2 }
 0x85a   : > { %v18324_v18 = vadd.f32 %v6142_v2, %v5985_v63  ;;  %v6221_v10 = vpop.f32.mrf.mxu3  ;;  %v5986_v38 = vpop.f32.mrf.mxu0  ;;  %v18344_v63 = vor.u32 %v13731_v36, %v12531_v53 }
 0x85b   : > { %v18327_v20 = vadd.f32 %v6221_v10, %v6064_v40  ;;  %v6065_v24 = vpop.f32.mrf.mxu1  ;;  %v5987_v5 = vadd.f32 %v5986_v38, %v17894_v4  ;;  %v21115_v4 = vld [vmem:[#allocation32_spill] sm:$0xff]  ;;  %v21116_v38 = vld [vmem:[#allocation33_spill] sm:$0xff] }
 0x85c   : > { %21113 = vst [vmem:[#allocation16_spill] sm:$0xff] %v18344_v63  ;;  %7306 = vmatpush.bf16.msra.mxu1 %v18344_v63  ;;  %v6066_v55 = vadd.f32 %v6065_v24, %v17896_v48 }
 0x85d   : > { %21111 = vst [vmem:[#allocation84_spill] sm:$0xff] %v18327_v20  ;;  %v14219_v20 = vld [vmem:[%s14554_s29 + $0x2d0] sm:$0xff] }
 0x861   : > { %v6144_v40 = vpop.f32.mrf.mxu2 }
 0x862   : > { %v18350_v2 = vadd.f32 %v6144_v40, %v5987_v5  ;;  %v6223_v10 = vpop.f32.mrf.mxu3  ;;  %v5989_v7 = vpop.f32.mrf.mxu0 }
 0x863   : > { %v18353_v27 = vadd.f32 %v6223_v10, %v6066_v55  ;;  %v6068_v54 = vpop.f32.mrf.mxu1  ;;  %v5990_v48 = vadd.f32 %v5989_v7, %v21115_v4  ;;  %v13682_v4 = vld [vmem:[%s14554_s29 + $0x348] sm:$0xff] }
 0x864   : > { %v6069_v24 = vadd.f32 %v6068_v54, %v21116_v38 }
 0x865   : > { %21114 = vst [vmem:[#allocation57_spill] sm:$0xff] %v18353_v27  ;;  %12313 = vmatmul.msk.bf16.gmra.mxu0 %vm602_vm0, %v14219_v20 }
 0x866   : > { %12327 = vmatmul.msk.bf16.gmra.mxu1 %vm602_vm0, %v14219_v20  ;;  %12425 = vmatmul.msk.bf16.gmra.mxu2 %vm602_vm0, %v13681_v60 }
 0x867   : > { %12439 = vmatmul.msk.bf16.gmra.mxu3 %vm602_vm0, %v13681_v60 }
 0x869   : > { %v6147_v36 = vpop.f32.mrf.mxu2 }
 0x86a   : > { %v18362_v53 = vadd.f32 %v6147_v36, %v5990_v48  ;;  %v6226_v5 = vpop.f32.mrf.mxu3  ;;  %v5991_v55 = vpop.f32.mrf.mxu0  ;;  %v14220_v48 = vld [vmem:[%s14554_s29 + $0x2d8] sm:$0xff] }
 0x86b   : > { %v18364_v40 = vadd.f32 %v6226_v5, %v6069_v24  ;;  %v6070_v10 = vpop.f32.mrf.mxu1  ;;  %v5992_v20 = vadd.f32 %v5991_v55, %v17924_v28  ;;  %v21120_v28 = vld [vmem:[#allocation71_spill] sm:$0xff]  ;;  %v21121_v24 = vld [vmem:[#allocation38_spill] sm:$0xff] }
 0x86c   : > { %v6071_v63 = vadd.f32 %v6070_v10, %v17926_v62 }
 0x86d   : > { %21117 = vst [vmem:[#allocation27_spill] sm:$0xff] %v18364_v40  ;;  %v13683_v40 = vld [vmem:[%s14554_s29 + $0x350] sm:$0xff] }
 0x871   : > { %v6149_v17 = vpop.f32.mrf.mxu2 }
 0x872   : > { %v18368_v27 = vadd.f32 %v6149_v17, %v5992_v20  ;;  %v6228_v60 = vpop.f32.mrf.mxu3  ;;  %v5994_v7 = vpop.f32.mrf.mxu0 }
 0x873   : > { %v18371_v54 = vadd.f32 %v6228_v60, %v6071_v63  ;;  %v6073_v38 = vpop.f32.mrf.mxu1  ;;  %v5995_v62 = vadd.f32 %v5994_v7, %v21120_v28  ;;  %v12625_v60 = vld [vmem:[%s20282_s3 + $0x20] sm:$0xf]  ;;  %v13703_v7 = vld [vmem:[%s20282_s3 + $0x24] sm:$0xf] }
 0x874   : > { %21118 = vst [vmem:[#allocation32_spill] sm:$0xff] %v18368_v27  ;;  %v6074_v17 = vadd.f32 %v6073_v38, %v21121_v24  ;;  %v21124_v38 = vld [vmem:[#allocation43_spill] sm:$0xff]  ;;  %v12521_v24 = vld [vmem:[%s20282_s3 + $0xa0] sm:$0xf] }
 0x875   : > { %21119 = vst [vmem:[#allocation33_spill] sm:$0xff] %v18371_v54  ;;  %12314 = vmatmul.msk.bf16.gmra.mxu0 %vm602_vm0, %v14220_v48 }
 0x876   : > { %12328 = vmatmul.msk.bf16.gmra.mxu1 %vm602_vm0, %v14220_v48  ;;  %12426 = vmatmul.msk.bf16.gmra.mxu2 %vm602_vm0, %v13682_v4 }
 0x877   : > { %12440 = vmatmul.msk.bf16.gmra.mxu3 %vm602_vm0, %v13682_v4  ;;  %v13704_v4 = vld [vmem:[%s20282_s3 + $0x24] sm:$0xf0] }
 0x878   : > { %v18394_v28 = vor.u32 %v13704_v4, %v12625_v60  ;;  %v13729_v60 = vld [vmem:[%s20282_s3 + $0xa4] sm:$0xf]  ;;  %v12523_v4 = vld [vmem:[%s20282_s3 + $0xa8] sm:$0xf0] }
 0x879   : > { %v6152_v36 = vpop.f32.mrf.mxu2 }
 0x87a   : > { %v18380_v5 = vadd.f32 %v6152_v36, %v5995_v62  ;;  %v6231_v55 = vpop.f32.mrf.mxu3  ;;  %v5996_v63 = vpop.f32.mrf.mxu0  ;;  %21125 = vst [vmem:[#allocation43_spill] sm:$0xff] %v18394_v28  ;;  %v12627_v62 = vld [vmem:[%s20282_s3 + $0x28] sm:$0xf0]  ;;  %v21126_v36 = vld [vmem:[#allocation44_spill] sm:$0xff]  ;;  %7506 = vmatpush.bf16.msra.mxu2 %v18394_v28  ;;  %v21132_v28 = vld [vmem:[#allocation58_spill] sm:$0xff] }
 0x87b   : > { %v18382_v10 = vadd.f32 %v6231_v55, %v6074_v17  ;;  %v6075_v20 = vpop.f32.mrf.mxu1  ;;  %v5997_v48 = vadd.f32 %v5996_v63, %v21124_v38  ;;  %v13730_v17 = vld [vmem:[%s20282_s3 + $0xa4] sm:$0xf0] }
 0x87c   : > { %21122 = vst [vmem:[#allocation71_spill] sm:$0xff] %v18380_v5  ;;  %v6076_v55 = vadd.f32 %v6075_v20, %v21126_v36  ;;  %v18406_v5 = vor.u32 %v13703_v7, %v12627_v62  ;;  %v18408_v63 = vor.u32 %v13730_v17, %v12521_v24  ;;  %v18420_v20 = vor.u32 %v13729_v60, %v12523_v4  ;;  %v14221_v24 = vld [vmem:[%s14554_s29 + $0x2e0] sm:$0xff] }
 0x87d   : > { %21123 = vst [vmem:[#allocation38_spill] sm:$0xff] %v18382_v10 }
 0x87e   : > { %21127 = vst [vmem:[#allocation44_spill] sm:$0xff] %v18406_v5  ;;  %7565 = vmatpush.bf16.msra.mxu3 %v18406_v5  ;;  %7248 = vmatpush.bf16.msra.mxu0 %v18408_v63 }
 0x87f   : > { %21128 = vst [vmem:[#allocation90_spill] sm:$0xff] %v18408_v63  ;;  %7307 = vmatpush.bf16.msra.mxu1 %v18420_v20 }
 0x880   : > { %21130 = vst [vmem:[#allocation92_spill] sm:$0xff] %v18420_v20  ;;  %v21133_v20 = vld [vmem:[#allocation39_spill] sm:$0xff] }
 0x881   : > { %v6154_v10 = vpop.f32.mrf.mxu2  ;;  %v21134_v63 = vmax.f32 %v21132_v28, %v21133_v20 }
 0x882   : > { %v18416_v38 = vadd.f32 %v6154_v10, %v5997_v48  ;;  %v6233_v54 = vpop.f32.mrf.mxu3  ;;  %v6301_v27 = vpop.f32.mrf.mxu0 }
 0x883   : > { %v18422_v7 = vadd.f32 %v6233_v54, %v6076_v55  ;;  %v6380_v62 = vpop.f32.mrf.mxu1  ;;  %v6450_v10 = vadd.f32 %v6301_v27, %v17966_v41 }
 0x884   : > { %21129 = vst [vmem:[#allocation91_spill] sm:$0xff] %v18416_v38  ;;  %v6451_v54 = vadd.f32 %v6380_v62, %v17968_v50  ;;  %v13684_v62 = vld [vmem:[%s14554_s29 + $0x358] sm:$0xff] }
 0x885   : > { %21131 = vst [vmem:[#allocation93_spill] sm:$0xff] %v18422_v7  ;;  %12315 = vmatmul.msk.bf16.gmra.mxu0 %vm602_vm0, %v14221_v24 }
 0x886   : > { %12329 = vmatmul.msk.bf16.gmra.mxu1 %vm602_vm0, %v14221_v24  ;;  %12427 = vmatmul.msk.bf16.gmra.mxu2 %vm602_vm0, %v13683_v40 }
 0x887   : > { %12441 = vmatmul.msk.bf16.gmra.mxu3 %vm602_vm0, %v13683_v40 }
 0x889   : > { %v6656_v48 = vpop.f32.mrf.mxu2 }
 0x88a   : > { %v6805_v17 = vadd.f32 %v6656_v48, %v6450_v10  ;;  %v6735_v36 = vpop.f32.mrf.mxu3  ;;  %v6303_v55 = vpop.f32.mrf.mxu0 }
 0x88b   : > { %v6806_v60 = vadd.f32 %v6735_v36, %v6451_v54  ;;  %v6382_v4 = vpop.f32.mrf.mxu1  ;;  %v6452_v7 = vadd.f32 %v6303_v55, %v17972_v3  ;;  %v12617_v54 = vld [vmem:[%s20282_s3 + $0x10] sm:$0xf]  ;;  %v12619_v3 = vld [vmem:[%s20282_s3 + $0x18] sm:$0xf0] }
 0x88c   : > { %v6453_v40 = vadd.f32 %v6382_v4, %v17974_v11  ;;  %v13701_v11 = vld [vmem:[%s20282_s3 + $0x14] sm:$0xf]  ;;  %v21135_v36 = vld [vmem:[#allocation17_spill] sm:$0xff] }
 0x88d   : > { %v6861_v5 = vmax.f32 %v6805_v17, %v6806_v60  ;;  %v18456_v20 = vor.u32 %v13701_v11, %v12619_v3  ;;  %v21136_v55 = vld [vmem:[#allocation85_spill] sm:$0xff] }
 0x88e   : > { %v21137_v60 = vmax.f32 %v21135_v36, %v21136_v55  ;;  %v21138_v55 = vld [vmem:[#allocation86_spill] sm:$0xff] }
 0x88f   : > { %v6889_v24 = vmax.f32 %v21134_v63, %v6861_v5  ;;  %v13702_v5 = vld [vmem:[%s20282_s3 + $0x14] sm:$0xf0]  ;;  %7566 = vmatpush.bf16.msra.mxu3 %v18456_v20 }
 0x890   : > { %v18446_v28 = vor.u32 %v13702_v5, %v12617_v54 }
 0x891   : > { %v6658_v41 = vpop.f32.mrf.mxu2 }
 0x892   : > { %v6807_v27 = vadd.f32 %v6658_v41, %v6452_v7  ;;  %v6737_v38 = vpop.f32.mrf.mxu3  ;;  %v6306_v50 = vpop.f32.mrf.mxu0  ;;  %v18463_v7 = vld [vmem:[%s20281_s2] ss:$0 sm:$0xff]  ;;  %7507 = vmatpush.bf16.msra.mxu2 %v18446_v28 }
 0x893   : > { %v6808_v10 = vadd.f32 %v6737_v38, %v6453_v40  ;;  %v6385_v48 = vpop.f32.mrf.mxu1  ;;  %v14222_v38 = vld [vmem:[%s14554_s29 + $0x2e8] sm:$0xff]  ;;  %v6917_v17 = vadd.f32 %v18463_v7, %v6889_v24  ;;  %v6454_v40 = vadd.f32 %v6306_v50, %v17984_v32  ;;  %v21139_v32 = vld [vmem:[#allocation40_spill] sm:$0xff] }
 0x894   : > { %v21140_v50 = vmax.f32 %v21138_v55, %v21139_v32  ;;  %v21142_v55 = vld [vmem:[#allocation61_spill] sm:$0xff] }
 0x895   : > { %v6862_v63 = vmax.f32 %v6807_v27, %v6808_v10  ;;  %12316 = vmatmul.msk.bf16.gmra.mxu0 %vm602_vm0, %v14222_v38  ;;  %v6455_v27 = vadd.f32 %v6385_v48, %v17986_v43  ;;  %v6945_v11 = vmax.f32 %v6917_v17, 0.0  ;;  %v12513_v43 = vld [vmem:[%s20282_s3 + $0x90] sm:$0xf]  ;;  %v13728_v48 = vld [vmem:[%s20282_s3 + $0x94] sm:$0xf0] }
 0x896   : > { %12330 = vmatmul.msk.bf16.gmra.mxu1 %vm602_vm0, %v14222_v38  ;;  %12428 = vmatmul.msk.bf16.gmra.mxu2 %vm602_vm0, %v13684_v62 }
 0x897   : > { %v6890_v4 = vmax.f32 %v21137_v60, %v6862_v63  ;;  %12442 = vmatmul.msk.bf16.gmra.mxu3 %vm602_vm0, %v13684_v62 }
 0x899   : > { %v6918_v41 = vadd.f32 %v18463_v7, %v6890_v4  ;;  %v6661_v10 = vpop.f32.mrf.mxu2  ;;  %v18485_v4 = vor.u32 %v13728_v48, %v12513_v43 }
 0x89a   : > { %v6809_v54 = vadd.f32 %v6661_v10, %v6454_v40  ;;  %v6740_v5 = vpop.f32.mrf.mxu3  ;;  %v6308_v24 = vpop.f32.mrf.mxu0  ;;  %v13727_v40 = vld [vmem:[%s20282_s3 + $0x94] sm:$0xf] }
 0x89b   : > { %v6946_v3 = vmax.f32 %v6918_v41, 0.0  ;;  %v6810_v38 = vadd.f32 %v6740_v5, %v6455_v27  ;;  %v6387_v63 = vpop.f32.mrf.mxu1  ;;  %v6456_v17 = vadd.f32 %v6308_v24, %v17990_v21  ;;  %v12515_v41 = vld [vmem:[%s20282_s3 + $0x98] sm:$0xf0]  ;;  %v13685_v21 = vld [vmem:[%s14554_s29 + $0x360] sm:$0xff]  ;;  %7249 = vmatpush.bf16.msra.mxu0 %v18485_v4 }
 0x89c   : > { %v6457_v27 = vadd.f32 %v6387_v63, %v17992_v59  ;;  %v21141_v63 = vld [vmem:[#allocation9_spill] sm:$0xff] }
 0x89d   : > { %v13968_v36 = vpack.c.bf16 %v6946_v3, %v6945_v11  ;;  %v6863_v62 = vmax.f32 %v6809_v54, %v6810_v38  ;;  %v18494_v54 = vor.u32 %v13727_v40, %v12515_v41  ;;  %v21143_v32 = vmax.f32 %v21141_v63, %v21142_v55 }
 0x89f   : > { %13969 = vst [vmem:[#allocation2 + $0x78] sm:$0xff] %v13968_v36   ;;  %v6891_v60 = vmax.f32 %v21140_v50, %v6863_v62  ;;  %7308 = vmatpush.bf16.msra.mxu1 %v18494_v54  ;;  %v14224_v62 = vld [vmem:[%s14554_s29 + $0x2f0] sm:$0xff] }
 0x8a1   : > { %v6663_v10 = vpop.f32.mrf.mxu2  ;;  %v6919_v59 = vadd.f32 %v18463_v7, %v6891_v60 }
 0x8a2   : > { %v6811_v5 = vadd.f32 %v6663_v10, %v6456_v17  ;;  %v6742_v11 = vpop.f32.mrf.mxu3  ;;  %v6311_v3 = vpop.f32.mrf.mxu0 }
 0x8a3   : > { %v6812_v24 = vadd.f32 %v6742_v11, %v6457_v27  ;;  %v6390_v38 = vpop.f32.mrf.mxu1  ;;  %v6458_v43 = vadd.f32 %v6311_v3, %v18002_v14 }
 0x8a4   : > { %v6459_v17 = vadd.f32 %v6390_v38, %v18004_v6 }
 0x8a5   : > { %v6864_v36 = vmax.f32 %v6811_v5, %v6812_v24  ;;  %12317 = vmatmul.msk.bf16.gmra.mxu0 %vm602_vm0, %v14224_v62  ;;  %v6947_v5 = vmax.f32 %v6919_v59, 0.0  ;;  %v13686_v59 = vld [vmem:[%s14554_s29 + $0x368] sm:$0xff] }
 0x8a6   : > { %12331 = vmatmul.msk.bf16.gmra.mxu1 %vm602_vm0, %v14224_v62  ;;  %12429 = vmatmul.msk.bf16.gmra.mxu2 %vm602_vm0, %v13685_v21 }
 0x8a7   : > { %v6892_v50 = vmax.f32 %v21143_v32, %v6864_v36  ;;  %12443 = vmatmul.msk.bf16.gmra.mxu3 %vm602_vm0, %v13685_v21  ;;  %v21144_v36 = vld [vmem:[#allocation59_spill] sm:$0xff]  ;;  %v21145_v21 = vld [vmem:[#allocation60_spill] sm:$0xff] }
 0x8a8   : > { %v21146_v55 = vmax.f32 %v21144_v36, %v21145_v21 }
 0x8a9   : > { %v6920_v48 = vadd.f32 %v18463_v7, %v6892_v50  ;;  %v6666_v40 = vpop.f32.mrf.mxu2 }
 0x8aa   : > { %v6813_v41 = vadd.f32 %v6666_v40, %v6458_v43  ;;  %v6745_v27 = vpop.f32.mrf.mxu3  ;;  %v6313_v10 = vpop.f32.mrf.mxu0  ;;  %v12609_v40 = vld [vmem:[%s20282_s3] sm:$0xf] }
 0x8ab   : > { %v6948_v11 = vmax.f32 %v6920_v48, 0.0  ;;  %v6814_v60 = vadd.f32 %v6745_v27, %v6459_v17  ;;  %v6392_v24 = vpop.f32.mrf.mxu1  ;;  %v6460_v3 = vadd.f32 %v6313_v10, %v18008_v34  ;;  %v13699_v34 = vld [vmem:[%s20282_s3 + $0x4] sm:$0xf]  ;;  %v12505_v10 = vld [vmem:[%s20282_s3 + $0x80] sm:$0xf] }
 0x8ac   : > { %v6461_v6 = vadd.f32 %v6392_v24, %v18010_v47  ;;  %v12611_v47 = vld [vmem:[%s20282_s3 + $0x8] sm:$0xf0]  ;;  %v13726_v24 = vld [vmem:[%s20282_s3 + $0x84] sm:$0xf0] }
 0x8ad   : > { %v13973_v62 = vpack.c.bf16 %v6948_v11, %v6947_v5  ;;  %v6865_v63 = vmax.f32 %v6813_v41, %v6814_v60  ;;  %v13700_v41 = vld [vmem:[%s20282_s3 + $0x4] sm:$0xf0]  ;;  %v14225_v11 = vld [vmem:[%s14554_s29 + $0x2f8] sm:$0xff]  ;;  %v18536_v60 = vor.u32 %v13699_v34, %v12611_v47  ;;  %v18549_v36 = vor.u32 %v13726_v24, %v12505_v10 }
 0x8ae   : > { %v18523_v27 = vor.u32 %v13700_v41, %v12609_v40  ;;  %v21150_v24 = vld [vmem:[#allocation63_spill] sm:$0xff] }
 0x8af   : > { %14098 = vst [vmem:[#allocation2 + $0xb8] sm:$0xff] %v13973_v62   ;;  %v6893_v14 = vmax.f32 %v21146_v55, %v6865_v63  ;;  %v13725_v62 = vld [vmem:[%s20282_s3 + $0x84] sm:$0xf]  ;;  %v12507_v63 = vld [vmem:[%s20282_s3 + $0x88] sm:$0xf0]  ;;  %7567 = vmatpush.bf16.msra.mxu3 %v18536_v60  ;;  %7250 = vmatpush.bf16.msra.mxu0 %v18549_v36 }
 0x8b0   : > { %v18551_v21 = vor.u32 %v13725_v62, %v12507_v63  ;;  %7508 = vmatpush.bf16.msra.mxu2 %v18523_v27  ;;  %v21151_v62 = vld [vmem:[#allocation64_spill] sm:$0xff] }
 0x8b1   : > { %v6668_v38 = vpop.f32.mrf.mxu2  ;;  %v6921_v55 = vadd.f32 %v18463_v7, %v6893_v14  ;;  %v21152_v63 = vmax.f32 %v21150_v24, %v21151_v62 }
 0x8b2   : > { %v6815_v32 = vadd.f32 %v6668_v38, %v6460_v3  ;;  %v6747_v50 = vpop.f32.mrf.mxu3  ;;  %v6316_v43 = vpop.f32.mrf.mxu0  ;;  %v21147_v3 = vld [vmem:[#allocation62_spill] sm:$0xff]  ;;  %7309 = vmatpush.bf16.msra.mxu1 %v18551_v21 }
 0x8b3   : > { %v6816_v48 = vadd.f32 %v6747_v50, %v6461_v6  ;;  %v6395_v17 = vpop.f32.mrf.mxu1  ;;  %v21148_v6 = vld [vmem:[#allocation65_spill] sm:$0xff]  ;;  %v6462_v50 = vadd.f32 %v6316_v43, %v18020_v39 }
 0x8b4   : > { %v21149_v38 = vmax.f32 %v21147_v3, %v21148_v6  ;;  %v6463_v40 = vadd.f32 %v6395_v17, %v18022_v9 }
 0x8b5   : > { %v6866_v5 = vmax.f32 %v6815_v32, %v6816_v48  ;;  %12318 = vmatmul.msk.bf16.gmra.mxu0 %vm602_vm0, %v14225_v11 }
 0x8b6   : > { %12332 = vmatmul.msk.bf16.gmra.mxu1 %vm602_vm0, %v14225_v11  ;;  %12430 = vmatmul.msk.bf16.gmra.mxu2 %vm602_vm0, %v13686_v59 }
 0x8b7   : > { %v6894_v32 = vmax.f32 %v21149_v38, %v6866_v5  ;;  %12444 = vmatmul.msk.bf16.gmra.mxu3 %vm602_vm0, %v13686_v59  ;;  %v6949_v59 = vmax.f32 %v6921_v55, 0.0  ;;  %v13687_v55 = vld [vmem:[%s14554_s29 + $0x370] sm:$0xff] }
 0x8b9   : > { %v6922_v48 = vadd.f32 %v18463_v7, %v6894_v32  ;;  %v6671_v41 = vpop.f32.mrf.mxu2 }
 0x8ba   : > { %v6817_v14 = vadd.f32 %v6671_v41, %v6462_v50  ;;  %v6750_v34 = vpop.f32.mrf.mxu3  ;;  %v6318_v47 = vpop.f32.mrf.mxu0 }
 0x8bb   : > { %v6950_v10 = vmax.f32 %v6922_v48, 0.0  ;;  %v6818_v5 = vadd.f32 %v6750_v34, %v6463_v40  ;;  %v6397_v39 = vpop.f32.mrf.mxu1  ;;  %v6464_v9 = vadd.f32 %v6318_v47, %v18026_v52  ;;  %v14226_v34 = vld [vmem:[%s14554_s29 + $0x300] sm:$0xff]  ;;  %v21153_v52 = vld [vmem:[#allocation69_spill] sm:$0xff] }
 0x8bc   : > { %v6465_v17 = vadd.f32 %v6397_v39, %v18028_v12  ;;  %v21154_v47 = vld [vmem:[#allocation70_spill] sm:$0xff] }
 0x8bd   : > { %v13978_v43 = vpack.c.bf16 %v6950_v10, %v6949_v59  ;;  %v6867_v11 = vmax.f32 %v6817_v14, %v6818_v5  ;;  %v21155_v12 = vmax.f32 %v21153_v52, %v21154_v47 }
 0x8bf   : > { %14099 = vst [vmem:[#allocation2 + $0x40] sm:$0xff] %v13978_v43   ;;  %v6895_v3 = vmax.f32 %v21152_v63, %v6867_v11 }
 0x8c1   : > { %v6673_v6 = vpop.f32.mrf.mxu2  ;;  %v6923_v14 = vadd.f32 %v18463_v7, %v6895_v3 }
 0x8c2   : > { %v6819_v38 = vadd.f32 %v6673_v6, %v6464_v9  ;;  %v6752_v32 = vpop.f32.mrf.mxu3  ;;  %v6321_v50 = vpop.f32.mrf.mxu0 }
 0x8c3   : > { %v6820_v48 = vadd.f32 %v6752_v32, %v6465_v17  ;;  %v6400_v40 = vpop.f32.mrf.mxu1  ;;  %v6466_v10 = vadd.f32 %v6321_v50, %v18054_v26  ;;  %v6951_v63 = vmax.f32 %v6923_v14, 0.0  ;;  %v21156_v32 = vld [vmem:[#allocation74_spill] sm:$0xff]  ;;  %v13792_v50 = vld [vmem:[%s20282_s3 + $0x1f4] sm:$0xf0]  ;;  %v12907_v14 = vld [vmem:[%s20282_s3 + $0x1f8] sm:$0xf0] }
 0x8c4   : > { %v6467_v39 = vadd.f32 %v6400_v40, %v18057_v23  ;;  %v12905_v23 = vld [vmem:[%s20282_s3 + $0x1f0] sm:$0xf] }
 0x8c5   : > { %v6868_v41 = vmax.f32 %v6819_v38, %v6820_v48  ;;  %12319 = vmatmul.msk.bf16.gmra.mxu0 %vm602_vm0, %v14226_v34 }
 0x8c6   : > { %12333 = vmatmul.msk.bf16.gmra.mxu1 %vm602_vm0, %v14226_v34  ;;  %12431 = vmatmul.msk.bf16.gmra.mxu2 %vm602_vm0, %v13687_v55  ;;  %v13791_v34 = vld [vmem:[%s20282_s3 + $0x1f4] sm:$0xf] }
 0x8c7   : > { %v6896_v59 = vmax.f32 %v21155_v12, %v6868_v41  ;;  %12445 = vmatmul.msk.bf16.gmra.mxu3 %vm602_vm0, %v13687_v55  ;;  %v21157_v55 = vld [vmem:[#allocation75_spill] sm:$0xff]  ;;  %v18593_v41 = vor.u32 %v13792_v50, %v12905_v23  ;;  %v18602_v12 = vor.u32 %v13791_v34, %v12907_v14 }
 0x8c8   : > { %v21158_v48 = vmax.f32 %v21156_v32, %v21157_v55  ;;  %v21160_v32 = vld [vmem:[#allocation79_spill] sm:$0xff] }
 0x8c9   : > { %v6924_v5 = vadd.f32 %v18463_v7, %v6896_v59  ;;  %v6676_v43 = vpop.f32.mrf.mxu2  ;;  %8131 = vmatpush.bf16.msrb.mxu2 %v18593_v41  ;;  %8190 = vmatpush.bf16.msrb.mxu3 %v18602_v12 }
 0x8ca   : > { %v6821_v11 = vadd.f32 %v6676_v43, %v6466_v10  ;;  %v6755_v24 = vpop.f32.mrf.mxu3  ;;  %v6323_v62 = vpop.f32.mrf.mxu0 }
 0x8cb   : > { %v6952_v9 = vmax.f32 %v6924_v5, 0.0  ;;  %v6822_v17 = vadd.f32 %v6755_v24, %v6467_v39  ;;  %v6402_v3 = vpop.f32.mrf.mxu1  ;;  %v6468_v40 = vadd.f32 %v6323_v62, %v18080_v16  ;;  %v13688_v16 = vld [vmem:[%s14554_s29 + $0x378] sm:$0xff]  ;;  %v13765_v62 = vld [vmem:[%s20282_s3 + $0x174] sm:$0xf] }
 0x8cc   : > { %v6469_v52 = vadd.f32 %v6402_v3, %v18082_v22  ;;  %v13766_v22 = vld [vmem:[%s20282_s3 + $0x174] sm:$0xf0] }
 0x8cd   : > { %v13983_v6 = vpack.c.bf16 %v6952_v9, %v6951_v63  ;;  %v6869_v38 = vmax.f32 %v6821_v11, %v6822_v17  ;;  %v12785_v11 = vld [vmem:[%s20282_s3 + $0x170] sm:$0xf]  ;;  %v12787_v63 = vld [vmem:[%s20282_s3 + $0x178] sm:$0xf0]  ;;  %v14227_v17 = vld [vmem:[%s14554_s29 + $0x308] sm:$0xff] }
 0x8ce   : > { %v18613_v24 = vor.u32 %v13766_v22, %v12785_v11  ;;  %v18623_v3 = vor.u32 %v13765_v62, %v12787_v63  ;;  %v21162_v22 = vld [vmem:[#allocation82_spill] sm:$0xff]  ;;  %v21163_v62 = vld [vmem:[#allocation83_spill] sm:$0xff] }
 0x8cf   : > { %14100 = vst [vmem:[#allocation2 + $0x28] sm:$0xff] %v13983_v6   ;;  %v6897_v26 = vmax.f32 %v21158_v48, %v6869_v38  ;;  %v21159_v38 = vld [vmem:[#allocation78_spill] sm:$0xff] }
 0x8d0   : > { %v21161_v55 = vmax.f32 %v21159_v38, %v21160_v32  ;;  %7796 = vmatpush.bf16.msrb.mxu0 %v18613_v24  ;;  %7855 = vmatpush.bf16.msrb.mxu1 %v18623_v3  ;;  %v13689_v32 = vld [vmem:[#allocation2 + $0xb0] sm:$0xff] }
 0x8d1   : > { %v6678_v47 = vpop.f32.mrf.mxu2  ;;  %v6925_v6 = vadd.f32 %v18463_v7, %v6897_v26 }
 0x8d2   : > { %v6823_v59 = vadd.f32 %v6678_v47, %v6468_v40  ;;  %v6757_v10 = vpop.f32.mrf.mxu3  ;;  %v6326_v5 = vpop.f32.mrf.mxu0 }
 0x8d3   : > { %v6824_v39 = vadd.f32 %v6757_v10, %v6469_v52  ;;  %v6405_v43 = vpop.f32.mrf.mxu1  ;;  %v6470_v23 = vadd.f32 %v6326_v5, %v18092_v44  ;;  %v6953_v47 = vmax.f32 %v6925_v6, 0.0  ;;  %v21164_v44 = vmax.f32 %v21162_v22, %v21163_v62  ;;  %v21166_v22 = vld [vmem:[#allocation89_spill] sm:$0xff] }
 0x8d4   : > { %v6471_v40 = vadd.f32 %v6405_v43, %v18094_v30 }
 0x8d5   : > { %v6870_v9 = vmax.f32 %v6823_v59, %v6824_v39  ;;  %12320 = vmatmul.msk.bf16.gmra.mxu0 %vm602_vm0, %v14227_v17 }
 0x8d6   : > { %12334 = vmatmul.msk.bf16.gmra.mxu1 %vm602_vm0, %v14227_v17  ;;  %12432 = vmatmul.msk.bf16.gmra.mxu2 %vm602_vm0, %v13688_v16 }
 0x8d7   : > { %v6898_v48 = vmax.f32 %v21161_v55, %v6870_v9  ;;  %12446 = vmatmul.msk.bf16.gmra.mxu3 %vm602_vm0, %v13688_v16 }
 0x8d9   : > { %v6926_v50 = vadd.f32 %v18463_v7, %v6898_v48  ;;  %v6681_v34 = vpop.f32.mrf.mxu2  ;;  %v13715_v48 = vld [vmem:[#allocation2 + $0x78] sm:$0xff] }
 0x8da   : > { %v6825_v14 = vadd.f32 %v6681_v34, %v6470_v23  ;;  %v6760_v52 = vpop.f32.mrf.mxu3  ;;  %v6328_v26 = vpop.f32.mrf.mxu0  ;;  %v12897_v23 = vld [vmem:[%s20282_s3 + $0x1e0] sm:$0xf] }
 0x8db   : > { %v6954_v59 = vmax.f32 %v6926_v50, 0.0  ;;  %v6826_v10 = vadd.f32 %v6760_v52, %v6471_v40  ;;  %v6407_v39 = vpop.f32.mrf.mxu1  ;;  %v6472_v63 = vadd.f32 %v6328_v26, %v18098_v31  ;;  %v13790_v50 = vld [vmem:[%s20282_s3 + $0x1e4] sm:$0xf0]  ;;  %v13789_v31 = vld [vmem:[%s20282_s3 + $0x1e4] sm:$0xf] }
 0x8dc   : > { %v6473_v9 = vadd.f32 %v6407_v39, %v18101_v25  ;;  %v18648_v40 = vor.u32 %v13790_v50, %v12897_v23  ;;  %v12899_v25 = vld [vmem:[%s20282_s3 + $0x1e8] sm:$0xf0]  ;;  %v12777_v34 = vld [vmem:[%s20282_s3 + $0x160] sm:$0xf]  ;;  %v13764_v26 = vld [vmem:[%s20282_s3 + $0x164] sm:$0xf0] }
 0x8dd   : > { %v13988_v11 = vpack.c.bf16 %v6954_v59, %v6953_v47  ;;  %v6871_v16 = vmax.f32 %v6825_v14, %v6826_v10  ;;  %v18659_v52 = vor.u32 %v13789_v31, %v12899_v25  ;;  %v13763_v47 = vld [vmem:[%s20282_s3 + $0x164] sm:$0xf]  ;;  %v12779_v59 = vld [vmem:[%s20282_s3 + $0x168] sm:$0xf0]  ;;  %v18670_v10 = vor.u32 %v13764_v26, %v12777_v34 }
 0x8de   : > { %v18672_v39 = vor.u32 %v13763_v47, %v12779_v59  ;;  %8132 = vmatpush.bf16.msrb.mxu2 %v18648_v40  ;;  %v21169_v34 = vld [vmem:[#allocation67_spill] sm:$0xff] }
 0x8df   : > { %14101 = vst [vmem:[#allocation2 + $0xc0] sm:$0xff] %v13988_v11   ;;  %v6899_v5 = vmax.f32 %v21164_v44, %v6871_v16  ;;  %v21165_v16 = vld [vmem:[#allocation88_spill] sm:$0xff]  ;;  %8191 = vmatpush.bf16.msrb.mxu3 %v18659_v52  ;;  %7797 = vmatpush.bf16.msrb.mxu0 %v18670_v10 }
 0x8e0   : > { %v21167_v62 = vmax.f32 %v21165_v16, %v21166_v22  ;;  %7856 = vmatpush.bf16.msrb.mxu1 %v18672_v39 }
 0x8e1   : > { %v6683_v30 = vpop.f32.mrf.mxu2  ;;  %v6927_v11 = vadd.f32 %v18463_v7, %v6899_v5 }
 0x8e2   : > { %v6827_v43 = vadd.f32 %v6683_v30, %v6472_v63  ;;  %v6762_v17 = vpop.f32.mrf.mxu3  ;;  %v6331_v38 = vpop.f32.mrf.mxu0  ;;  %v21168_v63 = vld [vmem:[#allocation53_spill] sm:$0xff] }
 0x8e3   : > { %v6828_v6 = vadd.f32 %v6762_v17, %v6473_v9  ;;  %v6410_v55 = vpop.f32.mrf.mxu1  ;;  %v6474_v9 = vadd.f32 %v6331_v38, %v21168_v63  ;;  %v6955_v23 = vmax.f32 %v6927_v11, 0.0  ;;  %v13716_v63 = vld [vmem:[#allocation2 + $0xb8] sm:$0xff] }
 0x8e5   : > { %v6872_v14 = vmax.f32 %v6827_v43, %v6828_v6  ;;  %7251 = vmatmul.bf16.vlgmr.msra.gmra.mxu0 %v13715_v48  ;;  %v6475_v43 = vadd.f32 %v6410_v55, %v18147_v49 }
 0x8e6   : > { %7310 = vmatmul.bf16.vlgmr.msra.gmra.mxu1 %v13715_v48  ;;  %7509 = vmatmul.bf16.vlgmr.msra.gmra.mxu2 %v13689_v32 }
 0x8e7   : > { %v6900_v44 = vmax.f32 %v21167_v62, %v6872_v14  ;;  %7568 = vmatmul.bf16.vlgmr.msra.gmra.mxu3 %v13689_v32  ;;  %v21170_v14 = vld [vmem:[#allocation68_spill] sm:$0xff] }
 0x8e8   : > { %v21171_v26 = vmax.f32 %v21169_v34, %v21170_v14 }
 0x8e9   : > { %v6928_v30 = vadd.f32 %v18463_v7, %v6900_v44  ;;  %v6686_v17 = vpop.f32.mrf.mxu2 }
 0x8ea   : > { %v6829_v5 = vadd.f32 %v6686_v17, %v6474_v9  ;;  %v6765_v6 = vpop.f32.mrf.mxu3  ;;  %v6333_v48 = vpop.f32.mrf.mxu0  ;;  %v12889_v9 = vld [vmem:[%s20282_s3 + $0x1d0] sm:$0xf] }
 0x8eb   : > { %v6956_v32 = vmax.f32 %v6928_v30, 0.0  ;;  %v6830_v50 = vadd.f32 %v6765_v6, %v6475_v43  ;;  %v6412_v31 = vpop.f32.mrf.mxu1  ;;  %v6476_v59 = vadd.f32 %v6333_v48, %v18152_v51  ;;  %v13788_v30 = vld [vmem:[%s20282_s3 + $0x1d4] sm:$0xf0]  ;;  %v13690_v43 = vld [vmem:[#allocation2] sm:$0xff]  ;;  %v13787_v51 = vld [vmem:[%s20282_s3 + $0x1d4] sm:$0xf] }
 0x8ec   : > { %v6477_v49 = vadd.f32 %v6412_v31, %v18155_v0  ;;  %v18696_v17 = vor.u32 %v13788_v30, %v12889_v9  ;;  %v12891_v0 = vld [vmem:[%s20282_s3 + $0x1d8] sm:$0xf0]  ;;  %v21175_v9 = vld [vmem:[#allocation76_spill] sm:$0xff] }
 0x8ed   : > { %v13993_v25 = vpack.c.bf16 %v6956_v32, %v6955_v23  ;;  %v6873_v38 = vmax.f32 %v6829_v5, %v6830_v50  ;;  %v18704_v6 = vor.u32 %v13787_v51, %v12891_v0  ;;  %v21172_v23 = vld [vmem:[#allocation72_spill] sm:$0xff]  ;;  %v21173_v32 = vld [vmem:[#allocation73_spill] sm:$0xff] }
 0x8ee   : > { %v21174_v50 = vmax.f32 %v21172_v23, %v21173_v32  ;;  %8133 = vmatpush.bf16.msrb.mxu2 %v18696_v17  ;;  %v21176_v30 = vld [vmem:[#allocation77_spill] sm:$0xff]  ;;  %v13761_v0 = vld [vmem:[%s20282_s3 + $0x154] sm:$0xf] }
 0x8ef   : > { %14102 = vst [vmem:[#allocation2 + $0x60] sm:$0xff] %v13993_v25   ;;  %v6901_v47 = vmax.f32 %v21171_v26, %v6873_v38  ;;  %8192 = vmatpush.bf16.msrb.mxu3 %v18704_v6 }
 0x8f1   : > { %v6688_v55 = vpop.f32.mrf.mxu2  ;;  %v6929_v48 = vadd.f32 %v18463_v7, %v6901_v47 }
 0x8f2   : > { %v6831_v16 = vadd.f32 %v6688_v55, %v6476_v59  ;;  %v6767_v22 = vpop.f32.mrf.mxu3  ;;  %v6336_v62 = vpop.f32.mrf.mxu0 }
 0x8f3   : > { %v6832_v44 = vadd.f32 %v6767_v22, %v6477_v49  ;;  %v6415_v11 = vpop.f32.mrf.mxu1  ;;  %v6478_v25 = vadd.f32 %v6336_v62, %v18164_v1  ;;  %v6957_v47 = vmax.f32 %v6929_v48, 0.0  ;;  %v21177_v1 = vmax.f32 %v21175_v9, %v21176_v30 }
 0x8f4   : > { %v6479_v34 = vadd.f32 %v6415_v11, %v18166_v8  ;;  %v13762_v8 = vld [vmem:[%s20282_s3 + $0x154] sm:$0xf0] }
 0x8f5   : > { %v6874_v5 = vmax.f32 %v6831_v16, %v6832_v44  ;;  %7256 = vmatmul.bf16.gmra.mxu0 %v13716_v63 }
 0x8f6   : > { %7315 = vmatmul.bf16.gmra.mxu1 %v13716_v63  ;;  %7514 = vmatmul.bf16.gmra.mxu2 %v13690_v43 }
 0x8f7   : > { %v6902_v31 = vmax.f32 %v21174_v50, %v6874_v5  ;;  %7573 = vmatmul.bf16.gmra.mxu3 %v13690_v43  ;;  %v12769_v43 = vld [vmem:[%s20282_s3 + $0x150] sm:$0xf]  ;;  %v12771_v5 = vld [vmem:[%s20282_s3 + $0x158] sm:$0xf0] }
 0x8f8   : > { %v18725_v51 = vor.u32 %v13762_v8, %v12769_v43  ;;  %v18734_v32 = vor.u32 %v13761_v0, %v12771_v5 }
 0x8f9   : > { %v6930_v38 = vadd.f32 %v18463_v7, %v6902_v31  ;;  %v6691_v14 = vpop.f32.mrf.mxu2 }
 0x8fa   : > { %v6833_v26 = vadd.f32 %v6691_v14, %v6478_v25  ;;  %v6770_v59 = vpop.f32.mrf.mxu3  ;;  %v6338_v49 = vpop.f32.mrf.mxu0  ;;  %7798 = vmatpush.bf16.msrb.mxu0 %v18725_v51  ;;  %7857 = vmatpush.bf16.msrb.mxu1 %v18734_v32  ;;  %v13691_v14 = vld [vmem:[#allocation2 + $0xd8] sm:$0xff] }
 0x8fb   : > { %v6958_v55 = vmax.f32 %v6930_v38, 0.0  ;;  %v6834_v16 = vadd.f32 %v6770_v59, %v6479_v34  ;;  %v6417_v22 = vpop.f32.mrf.mxu1  ;;  %v6480_v11 = vadd.f32 %v6338_v49, %v18188_v37  ;;  %v13717_v34 = vld [vmem:[#allocation2 + $0x40] sm:$0xff]  ;;  %v21178_v59 = vld [vmem:[#allocation80_spill] sm:$0xff] }
 0x8fc   : > { %v6481_v48 = vadd.f32 %v6417_v22, %v18191_v29  ;;  %v21179_v49 = vld [vmem:[#allocation56_spill] sm:$0xff] }
 0x8fd   : > { %v13998_v44 = vpack.c.bf16 %v6958_v55, %v6957_v47  ;;  %v6875_v63 = vmax.f32 %v6833_v26, %v6834_v16  ;;  %v21180_v47 = vmax.f32 %v21178_v59, %v21179_v49  ;;  %v13759_v49 = vld [vmem:[%s20282_s3 + $0x144] sm:$0xf] }
 0x8ff   : > { %14103 = vst [vmem:[#allocation2 + $0xd0] sm:$0xff] %v13998_v44   ;;  %v6903_v62 = vmax.f32 %v21177_v1, %v6875_v63 }
 0x901   : > { %v6693_v23 = vpop.f32.mrf.mxu2  ;;  %v6931_v29 = vadd.f32 %v18463_v7, %v6903_v62 }
 0x902   : > { %v6835_v50 = vadd.f32 %v6693_v23, %v6480_v11  ;;  %v6772_v31 = vpop.f32.mrf.mxu3  ;;  %v6341_v25 = vpop.f32.mrf.mxu0  ;;  %v21182_v23 = vld [vmem:[#allocation87_spill] sm:$0xff] }
 0x903   : > { %v6836_v37 = vadd.f32 %v6772_v31, %v6481_v48  ;;  %v6420_v38 = vpop.f32.mrf.mxu1  ;;  %v6482_v16 = vadd.f32 %v6341_v25, %v18218_v61  ;;  %v6959_v43 = vmax.f32 %v6931_v29, 0.0  ;;  %v21181_v48 = vld [vmem:[#allocation66_spill] sm:$0xff] }
 0x904   : > { %v6483_v44 = vadd.f32 %v6420_v38, %v18220_v57  ;;  %v12881_v61 = vld [vmem:[%s20282_s3 + $0x1c0] sm:$0xf]  ;;  %v13786_v57 = vld [vmem:[%s20282_s3 + $0x1c4] sm:$0xf0]  ;;  %v13785_v38 = vld [vmem:[%s20282_s3 + $0x1c4] sm:$0xf] }
 0x905   : > { %v6876_v26 = vmax.f32 %v6835_v50, %v6836_v37  ;;  %7261 = vmatmul.bf16.gmra.mxu0 %v13717_v34  ;;  %v21183_v50 = vmax.f32 %v21181_v48, %v21182_v23  ;;  %v18755_v37 = vor.u32 %v13786_v57, %v12881_v61 }
 0x906   : > { %7320 = vmatmul.bf16.gmra.mxu1 %v13717_v34  ;;  %7519 = vmatmul.bf16.gmra.mxu2 %v13691_v14  ;;  %v12883_v34 = vld [vmem:[%s20282_s3 + $0x1c8] sm:$0xf0] }
 0x907   : > { %v6904_v55 = vmax.f32 %v21180_v47, %v6876_v26  ;;  %7578 = vmatmul.bf16.gmra.mxu3 %v13691_v14  ;;  %v12761_v14 = vld [vmem:[%s20282_s3 + $0x140] sm:$0xf]  ;;  %v18767_v59 = vor.u32 %v13785_v38, %v12883_v34  ;;  %v12763_v47 = vld [vmem:[%s20282_s3 + $0x148] sm:$0xf0]  ;;  %8134 = vmatpush.bf16.msrb.mxu2 %v18755_v37 }
 0x909   : > { %v6932_v22 = vadd.f32 %v18463_v7, %v6904_v55  ;;  %v6696_v63 = vpop.f32.mrf.mxu2  ;;  %8193 = vmatpush.bf16.msrb.mxu3 %v18767_v59 }
 0x90a   : > { %v6837_v9 = vadd.f32 %v6696_v63, %v6482_v16  ;;  %v6775_v30 = vpop.f32.mrf.mxu3  ;;  %v6343_v1 = vpop.f32.mrf.mxu0 }
 0x90b   : > { %v6960_v8 = vmax.f32 %v6932_v22, 0.0  ;;  %v6838_v11 = vadd.f32 %v6775_v30, %v6483_v44  ;;  %v6422_v0 = vpop.f32.mrf.mxu1  ;;  %v6484_v25 = vadd.f32 %v6343_v1, %v18224_v19  ;;  %v13760_v19 = vld [vmem:[%s20282_s3 + $0x144] sm:$0xf0]  ;;  %v18781_v44 = vor.u32 %v13759_v49, %v12763_v47  ;;  %v13692_v1 = vld [vmem:[#allocation2 + $0x18] sm:$0xff] }
 0x90c   : > { %v6485_v26 = vadd.f32 %v6422_v0, %v18227_v15  ;;  %v18779_v15 = vor.u32 %v13760_v19, %v12761_v14  ;;  %v13718_v30 = vld [vmem:[#allocation2 + $0x28] sm:$0xff]  ;;  %v21187_v49 = vld [vmem:[#allocation13_spill] sm:$0xff] }
 0x90d   : > { %v14003_v62 = vpack.c.bf16 %v6960_v8, %v6959_v43  ;;  %v6877_v5 = vmax.f32 %v6837_v9, %v6838_v11  ;;  %7858 = vmatpush.bf16.msrb.mxu1 %v18781_v44  ;;  %v21184_v11 = vld [vmem:[#allocation10_spill] sm:$0xff]  ;;  %v21185_v0 = vld [vmem:[#allocation15_spill] sm:$0xff] }
 0x90e   : > { %7799 = vmatpush.bf16.msrb.mxu0 %v18779_v15  ;;  %v21188_v47 = vld [vmem:[#allocation11_spill] sm:$0xff] }
 0x90f   : > { %14104 = vst [vmem:[#allocation2 + $0xa8] sm:$0xff] %v14003_v62   ;;  %v6905_v31 = vmax.f32 %v21183_v50, %v6877_v5  ;;  %v21186_v62 = vmax.f32 %v21184_v11, %v21185_v0 }
 0x911   : > { %v6698_v29 = vpop.f32.mrf.mxu2  ;;  %v6933_v8 = vadd.f32 %v18463_v7, %v6905_v31 }
 0x912   : > { %v6839_v55 = vadd.f32 %v6698_v29, %v6484_v25  ;;  %v6777_v16 = vpop.f32.mrf.mxu3  ;;  %v6346_v22 = vpop.f32.mrf.mxu0 }
 0x913   : > { %v6840_v63 = vadd.f32 %v6777_v16, %v6485_v26  ;;  %v6425_v9 = vpop.f32.mrf.mxu1  ;;  %v6486_v48 = vadd.f32 %v6346_v22, %v18236_v35  ;;  %v6961_v34 = vmax.f32 %v6933_v8, 0.0  ;;  %v12873_v35 = vld [vmem:[%s20282_s3 + $0x1b0] sm:$0xf] }
 0x914   : > { %v6487_v50 = vadd.f32 %v6425_v9, %v18238_v13  ;;  %v13784_v13 = vld [vmem:[%s20282_s3 + $0x1b4] sm:$0xf0]  ;;  %v13783_v9 = vld [vmem:[%s20282_s3 + $0x1b4] sm:$0xf] }
 0x915   : > { %v6878_v43 = vmax.f32 %v6839_v55, %v6840_v63  ;;  %7266 = vmatmul.bf16.gmra.mxu0 %v13718_v30  ;;  %v21189_v55 = vmax.f32 %v21187_v49, %v21188_v47  ;;  %v18803_v63 = vor.u32 %v13784_v13, %v12873_v35 }
 0x916   : > { %7325 = vmatmul.bf16.gmra.mxu1 %v13718_v30  ;;  %7524 = vmatmul.bf16.gmra.mxu2 %v13692_v1  ;;  %v12875_v30 = vld [vmem:[%s20282_s3 + $0x1b8] sm:$0xf0] }
 0x917   : > { %v6906_v5 = vmax.f32 %v21186_v62, %v6878_v43  ;;  %7583 = vmatmul.bf16.gmra.mxu3 %v13692_v1  ;;  %v18812_v8 = vor.u32 %v13783_v9, %v12875_v30  ;;  %8135 = vmatpush.bf16.msrb.mxu2 %v18803_v63 }
 0x919   : > { %v6934_v23 = vadd.f32 %v18463_v7, %v6906_v5  ;;  %v6701_v61 = vpop.f32.mrf.mxu2  ;;  %8194 = vmatpush.bf16.msrb.mxu3 %v18812_v8 }
 0x91a   : > { %v6841_v57 = vadd.f32 %v6701_v61, %v6486_v48  ;;  %v6780_v25 = vpop.f32.mrf.mxu3  ;;  %v6348_v38 = vpop.f32.mrf.mxu0  ;;  %v13719_v48 = vld [vmem:[#allocation2 + $0xc0] sm:$0xff] }
 0x91b   : > { %v6962_v14 = vmax.f32 %v6934_v23, 0.0  ;;  %v6842_v26 = vadd.f32 %v6780_v25, %v6487_v50  ;;  %v6427_v29 = vpop.f32.mrf.mxu1  ;;  %v6488_v22 = vadd.f32 %v6348_v38, %v18278_v46  ;;  %v12753_v23 = vld [vmem:[%s20282_s3 + $0x130] sm:$0xf]  ;;  %v12755_v25 = vld [vmem:[%s20282_s3 + $0x138] sm:$0xf0] }
 0x91c   : > { %v6489_v1 = vadd.f32 %v6427_v29, %v18281_v45  ;;  %v13758_v45 = vld [vmem:[%s20282_s3 + $0x134] sm:$0xf0]  ;;  %v13693_v50 = vld [vmem:[#allocation2 + $0x50] sm:$0xff] }
 0x91d   : > { %v14008_v31 = vpack.c.bf16 %v6962_v14, %v6961_v34  ;;  %v6879_v19 = vmax.f32 %v6841_v57, %v6842_v26  ;;  %v18822_v61 = vor.u32 %v13758_v45, %v12753_v23  ;;  %v13757_v57 = vld [vmem:[%s20282_s3 + $0x134] sm:$0xf]  ;;  %v21191_v29 = vld [vmem:[#allocation21_spill] sm:$0xff] }
 0x91e   : > { %v18830_v34 = vor.u32 %v13757_v57, %v12755_v25  ;;  %v21190_v26 = vld [vmem:[#allocation12_spill] sm:$0xff]  ;;  %v13694_v25 = vld [vmem:[#allocation2 + $0x68] sm:$0xff] }
 0x91f   : > { %14105 = vst [vmem:[#allocation2 + $0x98] sm:$0xff] %v14008_v31   ;;  %v6907_v16 = vmax.f32 %v21189_v55, %v6879_v19  ;;  %v21192_v31 = vmax.f32 %v21190_v26, %v21191_v29  ;;  %7800 = vmatpush.bf16.msrb.mxu0 %v18822_v61  ;;  %v13720_v26 = vld [vmem:[#allocation2 + $0x60] sm:$0xff] }
 0x920   : > { %7859 = vmatpush.bf16.msrb.mxu1 %v18830_v34  ;;  %v12865_v29 = vld [vmem:[%s20282_s3 + $0x1a0] sm:$0xf] }
 0x921   : > { %v6703_v43 = vpop.f32.mrf.mxu2  ;;  %v6935_v14 = vadd.f32 %v18463_v7, %v6907_v16 }
 0x922   : > { %v6843_v11 = vadd.f32 %v6703_v43, %v6488_v22  ;;  %v6782_v0 = vpop.f32.mrf.mxu3  ;;  %v6351_v62 = vpop.f32.mrf.mxu0 }
 0x923   : > { %v6844_v46 = vadd.f32 %v6782_v0, %v6489_v1  ;;  %v6430_v5 = vpop.f32.mrf.mxu1  ;;  %v6490_v49 = vadd.f32 %v6351_v62, %v18290_v56  ;;  %v6963_v16 = vmax.f32 %v6935_v14, 0.0 }
 0x924   : > { %v6491_v55 = vadd.f32 %v6430_v5, %v18292_v42 }
 0x925   : > { %v6880_v38 = vmax.f32 %v6843_v11, %v6844_v46  ;;  %7271 = vmatmul.bf16.gmra.mxu0 %v13719_v48  ;;  %v21193_v46 = vld [vmem:[#allocation22_spill] sm:$0xff] }
 0x926   : > { %7330 = vmatmul.bf16.gmra.mxu1 %v13719_v48  ;;  %7529 = vmatmul.bf16.gmra.mxu2 %v13693_v50  ;;  %v21194_v48 = vld [vmem:[#allocation19_spill] sm:$0xff] }
 0x927   : > { %v6908_v19 = vmax.f32 %v21192_v31, %v6880_v38  ;;  %7588 = vmatmul.bf16.gmra.mxu3 %v13693_v50  ;;  %v21195_v56 = vmax.f32 %v21193_v46, %v21194_v48  ;;  %v13782_v31 = vld [vmem:[%s20282_s3 + $0x1a4] sm:$0xf0] }
 0x929   : > { %v6936_v47 = vadd.f32 %v18463_v7, %v6908_v19  ;;  %v6706_v35 = vpop.f32.mrf.mxu2  ;;  %v18852_v19 = vor.u32 %v13782_v31, %v12865_v29  ;;  %v21201_v31 = vld [vmem:[#allocation14_spill] sm:$0xff] }
 0x92a   : > { %v6845_v13 = vadd.f32 %v6706_v35, %v6490_v49  ;;  %v6785_v22 = vpop.f32.mrf.mxu3  ;;  %v6353_v9 = vpop.f32.mrf.mxu0  ;;  %v12745_v49 = vld [vmem:[%s20282_s3 + $0x120] sm:$0xf]  ;;  %v13756_v35 = vld [vmem:[%s20282_s3 + $0x124] sm:$0xf0] }
 0x92b   : > { %v6964_v30 = vmax.f32 %v6936_v47, 0.0  ;;  %v6846_v1 = vadd.f32 %v6785_v22, %v6491_v55  ;;  %v6432_v43 = vpop.f32.mrf.mxu1  ;;  %v6492_v23 = vadd.f32 %v6353_v9, %v18296_v33  ;;  %v13781_v33 = vld [vmem:[%s20282_s3 + $0x1a4] sm:$0xf]  ;;  %v12747_v22 = vld [vmem:[%s20282_s3 + $0x128] sm:$0xf0]  ;;  %v18874_v9 = vor.u32 %v13756_v35, %v12745_v49  ;;  %8136 = vmatpush.bf16.msrb.mxu2 %v18852_v19 }
 0x92c   : > { %v6493_v45 = vadd.f32 %v6432_v43, %v18299_v58  ;;  %v12867_v58 = vld [vmem:[%s20282_s3 + $0x1a8] sm:$0xf0]  ;;  %v21197_v43 = vld [vmem:[#allocation18_spill] sm:$0xff] }
 0x92d   : > { %v14013_v11 = vpack.c.bf16 %v6964_v30, %v6963_v16  ;;  %v6881_v0 = vmax.f32 %v6845_v13, %v6846_v1  ;;  %v18863_v55 = vor.u32 %v13781_v33, %v12867_v58  ;;  %v13755_v13 = vld [vmem:[%s20282_s3 + $0x124] sm:$0xf]  ;;  %v21196_v1 = vld [vmem:[#allocation20_spill] sm:$0xff]  ;;  %7801 = vmatpush.bf16.msrb.mxu0 %v18874_v9 }
 0x92e   : > { %v18876_v16 = vor.u32 %v13755_v13, %v12747_v22 }
 0x92f   : > { %14106 = vst [vmem:[#allocation2 + $0xa0] sm:$0xff] %v14013_v11   ;;  %v6909_v62 = vmax.f32 %v21195_v56, %v6881_v0  ;;  %v21198_v11 = vmax.f32 %v21196_v1, %v21197_v43  ;;  %8195 = vmatpush.bf16.msrb.mxu3 %v18863_v55  ;;  %v21199_v56 = vld [vmem:[#allocation84_spill] sm:$0xff] }
 0x930   : > { %7860 = vmatpush.bf16.msrb.mxu1 %v18876_v16 }
 0x931   : > { %v6708_v42 = vpop.f32.mrf.mxu2  ;;  %v6937_v30 = vadd.f32 %v18463_v7, %v6909_v62 }
 0x932   : > { %v6847_v5 = vadd.f32 %v6708_v42, %v6492_v23  ;;  %v6787_v50 = vpop.f32.mrf.mxu3  ;;  %v6356_v57 = vpop.f32.mrf.mxu0 }
 0x933   : > { %v6848_v38 = vadd.f32 %v6787_v50, %v6493_v45  ;;  %v6435_v14 = vpop.f32.mrf.mxu1  ;;  %v6494_v46 = vadd.f32 %v6356_v57, %v18324_v18  ;;  %v6965_v50 = vmax.f32 %v6937_v30, 0.0  ;;  %v21200_v57 = vld [vmem:[#allocation24_spill] sm:$0xff] }
 0x934   : > { %v6495_v23 = vadd.f32 %v6435_v14, %v21199_v56  ;;  %v21202_v33 = vmax.f32 %v21200_v57, %v21201_v31  ;;  %v21203_v14 = vld [vmem:[#allocation57_spill] sm:$0xff] }
 0x935   : > { %v6882_v47 = vmax.f32 %v6847_v5, %v6848_v38  ;;  %7276 = vmatmul.bf16.gmra.mxu0 %v13720_v26 }
 0x936   : > { %7335 = vmatmul.bf16.gmra.mxu1 %v13720_v26  ;;  %7534 = vmatmul.bf16.gmra.mxu2 %v13694_v25 }
 0x937   : > { %v6910_v0 = vmax.f32 %v21198_v11, %v6882_v47  ;;  %7593 = vmatmul.bf16.gmra.mxu3 %v13694_v25  ;;  %v13721_v11 = vld [vmem:[#allocation2 + $0xd0] sm:$0xff] }
 0x939   : > { %v6938_v48 = vadd.f32 %v18463_v7, %v6910_v0  ;;  %v6711_v45 = vpop.f32.mrf.mxu2  ;;  %v12857_v0 = vld [vmem:[%s20282_s3 + $0x190] sm:$0xf] }
 0x93a   : > { %v6849_v62 = vadd.f32 %v6711_v45, %v6494_v46  ;;  %v6790_v42 = vpop.f32.mrf.mxu3  ;;  %v6358_v5 = vpop.f32.mrf.mxu0  ;;  %v13780_v46 = vld [vmem:[%s20282_s3 + $0x194] sm:$0xf0] }
 0x93b   : > { %v6966_v25 = vmax.f32 %v6938_v48, 0.0  ;;  %v6850_v38 = vadd.f32 %v6790_v42, %v6495_v23  ;;  %v6437_v26 = vpop.f32.mrf.mxu1  ;;  %v6496_v49 = vadd.f32 %v6358_v5, %v18350_v2  ;;  %v13695_v48 = vld [vmem:[#allocation2 + $0x30] sm:$0xff]  ;;  %v18900_v56 = vor.u32 %v13780_v46, %v12857_v0  ;;  %v12859_v23 = vld [vmem:[%s20282_s3 + $0x198] sm:$0xf0] }
 0x93c   : > { %v6497_v47 = vadd.f32 %v6437_v26, %v21203_v14  ;;  %v13779_v2 = vld [vmem:[%s20282_s3 + $0x194] sm:$0xf]  ;;  %v21211_v0 = vld [vmem:[#allocation25_spill] sm:$0xff] }
 0x93d   : > { %v14018_v29 = vpack.c.bf16 %v6966_v25, %v6965_v50  ;;  %v6883_v18 = vmax.f32 %v6849_v62, %v6850_v38  ;;  %21204 = vst [vmem:[#allocation58_spill] sm:$0xff] %v18900_v56  ;;  %v18908_v62 = vor.u32 %v13779_v2, %v12859_v23  ;;  %v21206_v5 = vld [vmem:[#allocation28_spill] sm:$0xff]  ;;  %v21207_v50 = vld [vmem:[#allocation23_spill] sm:$0xff]  ;;  %8137 = vmatpush.bf16.msrb.mxu2 %v18900_v56  ;;  %v19282_v56 = vld [vmem:[#allocation2 + $0xa0] sm:$0xff] }
 0x93e   : > { %v21208_v25 = vmax.f32 %v21206_v5, %v21207_v50  ;;  %v21213_v46 = vld [vmem:[#allocation32_spill] sm:$0xff]  ;;  %21275 = vst [vmem:[#allocation13_spill] sm:$0xff] %v19282_v56 }
 0x93f   : > { %14107 = vst [vmem:[#allocation2 + $0x20] sm:$0xff] %v14018_v29   ;;  %v6911_v58 = vmax.f32 %v21202_v33, %v6883_v18  ;;  %8196 = vmatpush.bf16.msrb.mxu3 %v18908_v62  ;;  %v21209_v18 = vld [vmem:[#allocation27_spill] sm:$0xff]  ;;  %v13753_v23 = vld [vmem:[%s20282_s3 + $0x114] sm:$0xf] }
 0x940   : > { %21205 = vst [vmem:[#allocation39_spill] sm:$0xff] %v18908_v62  ;;  %v19280_v62 = vld [vmem:[#allocation2 + $0x88] sm:$0xff] }
 0x941   : > { %v6713_v35 = vpop.f32.mrf.mxu2  ;;  %v6939_v42 = vadd.f32 %v18463_v7, %v6911_v58  ;;  %21274 = vst [vmem:[#allocation15_spill] sm:$0xff] %v19280_v62 }
 0x942   : > { %v6851_v13 = vadd.f32 %v6713_v35, %v6496_v49  ;;  %v6792_v22 = vpop.f32.mrf.mxu3  ;;  %v6361_v1 = vpop.f32.mrf.mxu0 }
 0x943   : > { %v6852_v43 = vadd.f32 %v6792_v22, %v6497_v47  ;;  %v6440_v30 = vpop.f32.mrf.mxu1  ;;  %v6498_v26 = vadd.f32 %v6361_v1, %v18362_v53  ;;  %v6967_v58 = vmax.f32 %v6939_v42, 0.0  ;;  %v21214_v42 = vld [vmem:[#allocation33_spill] sm:$0xff] }
 0x944   : > { %v6499_v57 = vadd.f32 %v6440_v30, %v21209_v18  ;;  %v13754_v30 = vld [vmem:[%s20282_s3 + $0x114] sm:$0xf0] }
 0x945   : > { %v6884_v45 = vmax.f32 %v6851_v13, %v6852_v43  ;;  %7281 = vmatmul.bf16.gmra.mxu0 %v13721_v11 }
 0x946   : > { %7340 = vmatmul.bf16.gmra.mxu1 %v13721_v11  ;;  %7539 = vmatmul.bf16.gmra.mxu2 %v13695_v48  ;;  %v21210_v11 = vld [vmem:[#allocation30_spill] sm:$0xff] }
 0x947   : > { %v6912_v38 = vmax.f32 %v21208_v25, %v6884_v45  ;;  %7598 = vmatmul.bf16.gmra.mxu3 %v13695_v48  ;;  %v21212_v53 = vmax.f32 %v21210_v11, %v21211_v0  ;;  %v12739_v45 = vld [vmem:[%s20282_s3 + $0x118] sm:$0xf0] }
 0x948   : > { %v18938_v25 = vor.u32 %v13753_v23, %v12739_v45  ;;  %v21217_v0 = vld [vmem:[#allocation29_spill] sm:$0xff]  ;;  %v13751_v23 = vld [vmem:[%s20282_s3 + $0x104] sm:$0xf] }
 0x949   : > { %v6940_v29 = vadd.f32 %v18463_v7, %v6912_v38  ;;  %v6716_v31 = vpop.f32.mrf.mxu2  ;;  %v12737_v7 = vld [vmem:[%s20282_s3 + $0x110] sm:$0xf] }
 0x94a   : > { %v6853_v33 = vadd.f32 %v6716_v31, %v6498_v26  ;;  %v6795_v49 = vpop.f32.mrf.mxu3  ;;  %v6363_v14 = vpop.f32.mrf.mxu0  ;;  %v18929_v2 = vor.u32 %v13754_v30, %v12737_v7  ;;  %v13722_v31 = vld [vmem:[#allocation2 + $0xa8] sm:$0xff]  ;;  %7861 = vmatpush.bf16.msrb.mxu1 %v18938_v25 }
 0x94b   : > { %v6968_v47 = vmax.f32 %v6940_v29, 0.0  ;;  %v6854_v35 = vadd.f32 %v6795_v49, %v6499_v57  ;;  %v6442_v13 = vpop.f32.mrf.mxu1  ;;  %v6500_v48 = vadd.f32 %v6363_v14, %v21213_v46  ;;  %v13778_v49 = vld [vmem:[%s20282_s3 + $0x184] sm:$0xf0]  ;;  %v12729_v46 = vld [vmem:[%s20282_s3 + $0x100] sm:$0xf] }
 0x94c   : > { %v6501_v5 = vadd.f32 %v6442_v13, %v21214_v42  ;;  %7802 = vmatpush.bf16.msrb.mxu0 %v18929_v2  ;;  %v13696_v14 = vld [vmem:[#allocation2 + $0x48] sm:$0xff] }
 0x94d   : > { %v14023_v22 = vpack.c.bf16 %v6968_v47, %v6967_v58  ;;  %v6885_v43 = vmax.f32 %v6853_v33, %v6854_v35  ;;  %v12849_v33 = vld [vmem:[%s20282_s3 + $0x180] sm:$0xf]  ;;  %v13777_v47 = vld [vmem:[%s20282_s3 + $0x184] sm:$0xf]  ;;  %v12851_v35 = vld [vmem:[%s20282_s3 + $0x188] sm:$0xf0] }
 0x94e   : > { %v18948_v58 = vor.u32 %v13778_v49, %v12849_v33  ;;  %v21223_v49 = vld [vmem:[#allocation48_spill] sm:$0xff] }
 0x94f   : > { %14108 = vst [vmem:[#allocation2 + $0x10] sm:$0xff] %v14023_v22   ;;  %v6913_v1 = vmax.f32 %v21212_v53, %v6885_v43  ;;  %v18956_v22 = vor.u32 %v13777_v47, %v12851_v35  ;;  %v14228_v43 = vld [vmem:[%s20281_s2] ss:$0 sm:$0xff]  ;;  %v21218_v53 = vld [vmem:[#allocation35_spill] sm:$0xff] }
 0x950   : > { %21215 = vst [vmem:[#allocation17_spill] sm:$0xff] %v18948_v58  ;;  %v21219_v7 = vmax.f32 %v21217_v0, %v21218_v53  ;;  %8138 = vmatpush.bf16.msrb.mxu2 %v18948_v58 }
 0x951   : > { %v6718_v50 = vpop.f32.mrf.mxu2  ;;  %21216 = vst [vmem:[#allocation85_spill] sm:$0xff] %v18956_v22  ;;  %v6941_v11 = vadd.f32 %v14228_v43, %v6913_v1  ;;  %v21220_v1 = vld [vmem:[#allocation71_spill] sm:$0xff]  ;;  %8197 = vmatpush.bf16.msrb.mxu3 %v18956_v22 }
 0x952   : > { %v6855_v38 = vadd.f32 %v6718_v50, %v6500_v48  ;;  %v6797_v26 = vpop.f32.mrf.mxu3  ;;  %v6366_v29 = vpop.f32.mrf.mxu0  ;;  %v13752_v48 = vld [vmem:[%s20282_s3 + $0x104] sm:$0xf0]  ;;  %v21221_v50 = vld [vmem:[#allocation42_spill] sm:$0xff] }
 0x953   : > { %v6856_v18 = vadd.f32 %v6797_v26, %v6501_v5  ;;  %v6445_v57 = vpop.f32.mrf.mxu1  ;;  %v6502_v45 = vadd.f32 %v6366_v29, %v21220_v1  ;;  %v18976_v42 = vor.u32 %v13752_v48, %v12729_v46  ;;  %v12731_v5 = vld [vmem:[%s20282_s3 + $0x108] sm:$0xf0]  ;;  %v21222_v26 = vld [vmem:[#allocation38_spill] sm:$0xff]  ;;  %v6969_v35 = vmax.f32 %v6941_v11, 0.0  ;;  %v21231_v11 = vld [vmem:[#allocation93_spill] sm:$0xff] }
 0x954   : > { %8644 = vmatpush.bf16.msra.mxu2 %v21221_v50  ;;  %v18983_v33 = vor.u32 %v13751_v23, %v12731_v5  ;;  %v21225_v46 = vld [vmem:[#allocation47_spill] sm:$0xff]  ;;  %v21227_v23 = vld [vmem:[#allocation37_spill] sm:$0xff] }
 0x955   : > { %v6886_v13 = vmax.f32 %v6855_v38, %v6856_v18  ;;  %7286 = vmatmul.bf16.gmra.mxu0 %v13722_v31  ;;  %v6503_v18 = vadd.f32 %v6445_v57, %v21222_v26  ;;  %8703 = vmatpush.bf16.msra.mxu3 %v21223_v49  ;;  %v21226_v48 = vld [vmem:[#allocation31_spill] sm:$0xff]  ;;  %v21230_v26 = vld [vmem:[#allocation54_spill] sm:$0xff] }
 0x956   : > { %7345 = vmatmul.bf16.gmra.mxu1 %v13722_v31  ;;  %7544 = vmatmul.bf16.gmra.mxu2 %v13696_v14  ;;  %v21228_v1 = vmax.f32 %v21226_v48, %v21227_v23  ;;  %v21229_v5 = vld [vmem:[#allocation91_spill] sm:$0xff]  ;;  %v21236_v48 = vld [vmem:[#allocation36_spill] sm:$0xff] }
 0x957   : > { %v6914_v30 = vmax.f32 %v21219_v7, %v6886_v13  ;;  %7603 = vmatmul.bf16.gmra.mxu3 %v13696_v14  ;;  %7803 = vmatpush.bf16.msrb.mxu0 %v18976_v42  ;;  %v21224_v7 = vld [vmem:[#allocation46_spill] sm:$0xff] }
 0x958   : > { %7862 = vmatpush.bf16.msrb.mxu1 %v18983_v33  ;;  %8645 = vmatpush.bf16.msra.mxu2 %v21224_v7  ;;  %v13697_v7 = vld [vmem:[#allocation2 + $0x80] sm:$0xff] }
 0x959   : > { %v6942_v38 = vadd.f32 %v14228_v43, %v6914_v30  ;;  %v6721_v31 = vpop.f32.mrf.mxu2  ;;  %8704 = vmatpush.bf16.msra.mxu3 %v21225_v46 }
 0x95a   : > { %v6857_v14 = vadd.f32 %v6721_v31, %v6502_v45  ;;  %v6800_v29 = vpop.f32.mrf.mxu3  ;;  %v6368_v47 = vpop.f32.mrf.mxu0  ;;  %v21232_v31 = vld [vmem:[#allocation4_spill] sm:$0xff] }
 0x95b   : > { %v6970_v13 = vmax.f32 %v6942_v38, 0.0  ;;  %v6858_v0 = vadd.f32 %v6800_v29, %v6503_v18  ;;  %v6447_v53 = vpop.f32.mrf.mxu1  ;;  %v6504_v50 = vadd.f32 %v6368_v47, %v21229_v5  ;;  %v21238_v5 = vld [vmem:[#allocation8_spill] sm:$0xff] }
 0x95c   : > { %8646 = vmatpush.bf16.msra.mxu2 %v21230_v26  ;;  %v6505_v38 = vadd.f32 %v6447_v53, %v21231_v11  ;;  %v21235_v53 = vld [vmem:[#allocation34_spill] sm:$0xff]  ;;  %v21239_v11 = vld [vmem:[#allocation16_spill] sm:$0xff] }
 0x95d   : > { %v14028_v30 = vpack.c.bf16 %v6970_v13, %v6969_v35  ;;  %v6887_v57 = vmax.f32 %v6857_v14, %v6858_v0  ;;  %8705 = vmatpush.bf16.msra.mxu3 %v21232_v31  ;;  %v13723_v0 = vld [vmem:[#allocation2 + $0x98] sm:$0xff]  ;;  %v21237_v23 = vmax.f32 %v21235_v53, %v21236_v48 }
 0x95f   : > { %14109 = vst [vmem:[#allocation2 + $0xc8] sm:$0xff] %v14028_v30   ;;  %v6915_v45 = vmax.f32 %v21228_v1, %v6887_v57  ;;  %v21233_v30 = vld [vmem:[#allocation6_spill] sm:$0xff]  ;;  %v21234_v57 = vld [vmem:[#allocation81_spill] sm:$0xff] }
 0x960   : > { %8647 = vmatpush.bf16.msra.mxu2 %v21233_v30  ;;  %v21240_v30 = vld [vmem:[#allocation90_spill] sm:$0xff] }
 0x961   : > { %v6723_v18 = vpop.f32.mrf.mxu2  ;;  %8706 = vmatpush.bf16.msra.mxu3 %v21234_v57  ;;  %v6943_v47 = vadd.f32 %v14228_v43, %v6915_v45 }
 0x962   : > { %v6859_v49 = vadd.f32 %v6723_v18, %v6504_v50  ;;  %v6802_v29 = vpop.f32.mrf.mxu3  ;;  %v7252_v35 = vpop.f32.mrf.mxu0 }
 0x963   : > { %v6860_v14 = vadd.f32 %v6802_v29, %v6505_v38  ;;  %v7311_v13 = vpop.f32.mrf.mxu1 }
 0x964   : > { %8648 = vmatpush.bf16.msra.mxu2 %v21238_v5 }
 0x965   : > { %v6888_v46 = vmax.f32 %v6859_v49, %v6860_v14  ;;  %7291 = vmatmul.bf16.gmra.mxu0 %v13723_v0  ;;  %8707 = vmatpush.bf16.msra.mxu3 %v21239_v11  ;;  %v6971_v49 = vmax.f32 %v6943_v47, 0.0  ;;  %v21241_v47 = vld [vmem:[#allocation92_spill] sm:$0xff]  ;;  %v13698_v11 = vld [vmem:[#allocation2 + $0x88] sm:$0xff] }
 0x966   : > { %7350 = vmatmul.bf16.gmra.mxu1 %v13723_v0  ;;  %7549 = vmatmul.bf16.gmra.mxu2 %v13697_v7  ;;  %v13025_v0 = vld [vmem:[%s20282_s3 + $0x270] sm:$0xf] }
 0x967   : > { %v6916_v1 = vmax.f32 %v21237_v23, %v6888_v46  ;;  %7608 = vmatmul.bf16.gmra.mxu3 %v13697_v7 }
 0x968   : > { %8649 = vmatpush.bf16.msra.mxu2 %v21240_v30 }
 0x969   : > { %v6944_v50 = vadd.f32 %v14228_v43, %v6916_v1  ;;  %v7510_v26 = vpop.f32.mrf.mxu2  ;;  %v13818_v43 = vld [vmem:[%s20282_s3 + $0x274] sm:$0xf0]  ;;  %8708 = vmatpush.bf16.msra.mxu3 %v21241_v47 }
 0x96a   : > { %v19004_v38 = vadd.f32 %v7510_v26, %v7252_v35  ;;  %v7569_v18 = vpop.f32.mrf.mxu3  ;;  %v7254_v31 = vpop.f32.mrf.mxu0  ;;  %v19014_v7 = vor.u32 %v13818_v43, %v13025_v0  ;;  %v13817_v35 = vld [vmem:[%s20282_s3 + $0x274] sm:$0xf]  ;;  %v13724_v26 = vld [vmem:[#allocation2 + $0xa0] sm:$0xff]  ;;  %v13019_v43 = vld [vmem:[%s20282_s3 + $0x268] sm:$0xf0] }
 0x96b   : > { %v6972_v29 = vmax.f32 %v6944_v50, 0.0  ;;  %v19006_v14 = vadd.f32 %v7569_v18, %v7311_v13  ;;  %v7313_v45 = vpop.f32.mrf.mxu1  ;;  %v13027_v13 = vld [vmem:[%s20282_s3 + $0x278] sm:$0xf0] }
 0x96c   : > { %v19023_v57 = vor.u32 %v13817_v35, %v13027_v13  ;;  %8466 = vmatpush.bf16.msra.mxu0 %v19014_v7  ;;  %8650 = vmatpush.bf16.msra.mxu2 %v18485_v4 }
 0x96d   : > { %v14033_v46 = vpack.c.bf16 %v6972_v29, %v6971_v49  ;;  %8709 = vmatpush.bf16.msra.mxu3 %v18494_v54 }
 0x96e   : > { %8525 = vmatpush.bf16.msra.mxu1 %v19023_v57 }
 0x96f   : > { %14110 = vst [vmem:[#allocation2 + $0x70] sm:$0xff] %v14033_v46  }
 0x970   : > { %8651 = vmatpush.bf16.msra.mxu2 %v18549_v36  ;;  %v13816_v36 = vld [vmem:[%s20282_s3 + $0x264] sm:$0xf0] }
 0x971   : > { %v7512_v53 = vpop.f32.mrf.mxu2  ;;  %8710 = vmatpush.bf16.msra.mxu3 %v18551_v21  ;;  %v13815_v21 = vld [vmem:[%s20282_s3 + $0x264] sm:$0xf] }
 0x972   : > { %v19030_v48 = vadd.f32 %v7512_v53, %v7254_v31  ;;  %v7571_v23 = vpop.f32.mrf.mxu3  ;;  %v7257_v1 = vpop.f32.mrf.mxu0  ;;  %v19054_v35 = vor.u32 %v13815_v21, %v13019_v43  ;;  %v19082_v21 = vld [vmem:[#allocation2 + $0x18] sm:$0xff] }
 0x973   : > { %v19032_v5 = vadd.f32 %v7571_v23, %v7313_v45  ;;  %v7316_v50 = vpop.f32.mrf.mxu1  ;;  %v13017_v45 = vld [vmem:[%s20282_s3 + $0x260] sm:$0xf] }
 0x974   : > { %v19049_v0 = vor.u32 %v13816_v36, %v13017_v45  ;;  %8526 = vmatpush.bf16.msra.mxu1 %v19054_v35 }
 0x975   : > { %7296 = vmatmul.bf16.gmra.mxu0 %v13724_v26 }
 0x976   : > { %7355 = vmatmul.bf16.gmra.mxu1 %v13724_v26  ;;  %7554 = vmatmul.bf16.gmra.mxu2 %v13698_v11 }
 0x977   : > { %7613 = vmatmul.bf16.gmra.mxu3 %v13698_v11  ;;  %8467 = vmatpush.bf16.msra.mxu0 %v19049_v0 }
 0x979   : > { %v7515_v4 = vpop.f32.mrf.mxu2 }
 0x97a   : > { %v19036_v18 = vadd.f32 %v7515_v4, %v7257_v1  ;;  %v7574_v54 = vpop.f32.mrf.mxu3  ;;  %v7259_v31 = vpop.f32.mrf.mxu0  ;;  %v19062_v1 = vld [vmem:[#allocation2 + $0xd8] sm:$0xff] }
 0x97b   : > { %v19038_v49 = vadd.f32 %v7574_v54, %v7316_v50  ;;  %v7318_v29 = vpop.f32.mrf.mxu1  ;;  %v19064_v50 = vld [vmem:[#allocation2 + $0x40] sm:$0xff] }
 0x97c   : > { %21242 = vst [vmem:[#allocation86_spill] sm:$0xff] %v19064_v50 }
 0x981   : > { %v7517_v13 = vpop.f32.mrf.mxu2 }
 0x982   : > { %v19058_v30 = vadd.f32 %v7517_v13, %v7259_v31  ;;  %v7576_v46 = vpop.f32.mrf.mxu3  ;;  %v7262_v47 = vpop.f32.mrf.mxu0 }
 0x983   : > { %v19060_v53 = vadd.f32 %v7576_v46, %v7318_v29  ;;  %v7321_v23 = vpop.f32.mrf.mxu1 }
 0x985   : > { %7804 = vmatmul.bf16.vlgmr.msrb.gmra.mxu0 %v19062_v1 }
 0x986   : > { %7863 = vmatmul.bf16.vlgmr.msrb.gmra.mxu1 %v19062_v1  ;;  %8139 = vmatmul.bf16.vlgmr.msrb.gmra.mxu2 %v19064_v50 }
 0x987   : > { %8198 = vmatmul.bf16.vlgmr.msrb.gmra.mxu3 %v19064_v50  ;;  %8880 = vmatpush.bf16.msrb.mxu2 %v18613_v24 }
 0x988   : > { %8939 = vmatpush.bf16.msrb.mxu3 %v18623_v3 }
 0x989   : > { %v7520_v26 = vpop.f32.mrf.mxu2 }
 0x98a   : > { %v19072_v11 = vadd.f32 %v7520_v26, %v7262_v47  ;;  %v7579_v4 = vpop.f32.mrf.mxu3  ;;  %v7264_v54 = vpop.f32.mrf.mxu0  ;;  %v13011_v47 = vld [vmem:[%s20282_s3 + $0x258] sm:$0xf0] }
 0x98b   : > { %v19074_v31 = vadd.f32 %v7579_v4, %v7321_v23  ;;  %v7323_v29 = vpop.f32.mrf.mxu1  ;;  %8881 = vmatpush.bf16.msrb.mxu2 %v18670_v10  ;;  %v13009_v10 = vld [vmem:[%s20282_s3 + $0x250] sm:$0xf] }
 0x98c   : > { %8940 = vmatpush.bf16.msrb.mxu3 %v18672_v39  ;;  %v13814_v39 = vld [vmem:[%s20282_s3 + $0x254] sm:$0xf0] }
 0x98d   : > { %v19098_v46 = vor.u32 %v13814_v39, %v13009_v10  ;;  %v19126_v39 = vld [vmem:[#allocation2 + $0x50] sm:$0xff] }
 0x98e   : > { %21244 = vst [vmem:[#allocation9_spill] sm:$0xff] %v19126_v39 }
 0x98f   : > { %8882 = vmatpush.bf16.msrb.mxu2 %v18725_v51  ;;  %v13813_v51 = vld [vmem:[%s20282_s3 + $0x254] sm:$0xf]  ;;  %8468 = vmatpush.bf16.msra.mxu0 %v19098_v46 }
 0x990   : > { %8941 = vmatpush.bf16.msrb.mxu3 %v18734_v32  ;;  %v19096_v32 = vld [vmem:[#allocation2 + $0x28] sm:$0xff]  ;;  %v19105_v23 = vor.u32 %v13813_v51, %v13011_v47 }
 0x991   : > { %v7522_v45 = vpop.f32.mrf.mxu2  ;;  %21243 = vst [vmem:[#allocation40_spill] sm:$0xff] %v19096_v32 }
 0x992   : > { %v19080_v24 = vadd.f32 %v7522_v45, %v7264_v54  ;;  %v7581_v3 = vpop.f32.mrf.mxu3  ;;  %v7267_v36 = vpop.f32.mrf.mxu0  ;;  %8527 = vmatpush.bf16.msra.mxu1 %v19105_v23 }
 0x993   : > { %v19084_v43 = vadd.f32 %v7581_v3, %v7323_v29  ;;  %v7326_v13 = vpop.f32.mrf.mxu1  ;;  %8883 = vmatpush.bf16.msrb.mxu2 %v18779_v15 }
 0x994   : > { %8942 = vmatpush.bf16.msrb.mxu3 %v18781_v44 }
 0x995   : > { %7809 = vmatmul.bf16.gmra.mxu0 %v19082_v21 }
 0x996   : > { %7868 = vmatmul.bf16.gmra.mxu1 %v19082_v21  ;;  %8144 = vmatmul.bf16.gmra.mxu2 %v19096_v32 }
 0x997   : > { %8203 = vmatmul.bf16.gmra.mxu3 %v19096_v32  ;;  %8884 = vmatpush.bf16.msrb.mxu2 %v18822_v61  ;;  %v13810_v32 = vld [vmem:[%s20282_s3 + $0x234] sm:$0xf0] }
 0x998   : > { %8943 = vmatpush.bf16.msrb.mxu3 %v18830_v34 }
 0x999   : > { %v7525_v15 = vpop.f32.mrf.mxu2 }
 0x99a   : > { %v19114_v44 = vadd.f32 %v7525_v15, %v7267_v36  ;;  %v7584_v26 = vpop.f32.mrf.mxu3  ;;  %v7269_v4 = vpop.f32.mrf.mxu0 }
 0x99b   : > { %v19116_v54 = vadd.f32 %v7584_v26, %v7326_v13  ;;  %v7328_v29 = vpop.f32.mrf.mxu1  ;;  %8885 = vmatpush.bf16.msrb.mxu2 %v18874_v9  ;;  %v19128_v13 = vld [vmem:[#allocation2 + $0xc0] sm:$0xff] }
 0x99c   : > { %8944 = vmatpush.bf16.msrb.mxu3 %v18876_v16  ;;  %21245 = vst [vmem:[#allocation61_spill] sm:$0xff] %v19128_v13  ;;  %v13001_v9 = vld [vmem:[%s20282_s3 + $0x240] sm:$0xf]  ;;  %v13812_v16 = vld [vmem:[%s20282_s3 + $0x244] sm:$0xf0] }
 0x99f   : > { %8886 = vmatpush.bf16.msrb.mxu2 %v18929_v2  ;;  %v13811_v2 = vld [vmem:[%s20282_s3 + $0x244] sm:$0xf] }
 0x9a0   : > { %8945 = vmatpush.bf16.msrb.mxu3 %v18938_v25  ;;  %v19145_v25 = vor.u32 %v13812_v16, %v13001_v9 }
 0x9a1   : > { %v7527_v45 = vpop.f32.mrf.mxu2 }
 0x9a2   : > { %v19122_v61 = vadd.f32 %v7527_v45, %v7269_v4  ;;  %v7586_v3 = vpop.f32.mrf.mxu3  ;;  %v7272_v34 = vpop.f32.mrf.mxu0  ;;  %8469 = vmatpush.bf16.msra.mxu0 %v19145_v25 }
 0x9a3   : > { %v19124_v36 = vadd.f32 %v7586_v3, %v7328_v29  ;;  %v7331_v10 = vpop.f32.mrf.mxu1  ;;  %8887 = vmatpush.bf16.msrb.mxu2 %v18976_v42  ;;  %v13003_v42 = vld [vmem:[%s20282_s3 + $0x248] sm:$0xf0] }
 0x9a4   : > { %8946 = vmatpush.bf16.msrb.mxu3 %v18983_v33  ;;  %v19150_v51 = vor.u32 %v13811_v2, %v13003_v42  ;;  %v19162_v42 = vld [vmem:[#allocation2 + $0x68] sm:$0xff] }
 0x9a5   : > { %7814 = vmatmul.bf16.gmra.mxu0 %v19126_v39  ;;  %21250 = vst [vmem:[#allocation63_spill] sm:$0xff] %v19162_v42 }
 0x9a6   : > { %7873 = vmatmul.bf16.gmra.mxu1 %v19126_v39  ;;  %8149 = vmatmul.bf16.gmra.mxu2 %v19128_v13 }
 0x9a7   : > { %8208 = vmatmul.bf16.gmra.mxu3 %v19128_v13  ;;  %8528 = vmatpush.bf16.msra.mxu1 %v19150_v51 }
 0x9a9   : > { %v7530_v33 = vpop.f32.mrf.mxu2 }
 0x9aa   : > { %v19152_v47 = vadd.f32 %v7530_v33, %v7272_v34  ;;  %v7589_v15 = vpop.f32.mrf.mxu3  ;;  %v7274_v26 = vpop.f32.mrf.mxu0  ;;  %v19164_v34 = vld [vmem:[#allocation2 + $0x60] sm:$0xff] }
 0x9ab   : > { %v19155_v4 = vadd.f32 %v7589_v15, %v7331_v10  ;;  %v7333_v29 = vpop.f32.mrf.mxu1  ;;  %21251 = vst [vmem:[#allocation64_spill] sm:$0xff] %v19164_v34 }
 0x9ac   : > { %21246 = vst [vmem:[#allocation59_spill] sm:$0xff] %v19152_v47 }
 0x9ad   : > { %21247 = vst [vmem:[#allocation60_spill] sm:$0xff] %v19155_v4  ;;  %v19244_v4 = vld [vmem:[#allocation2 + $0x80] sm:$0xff] }
 0x9ae   : > { %21267 = vst [vmem:[#allocation76_spill] sm:$0xff] %v19244_v4 }
 0x9b1   : > { %v7532_v45 = vpop.f32.mrf.mxu2 }
 0x9b2   : > { %v19158_v3 = vadd.f32 %v7532_v45, %v7274_v26  ;;  %v7591_v9 = vpop.f32.mrf.mxu3  ;;  %v7277_v16 = vpop.f32.mrf.mxu0 }
 0x9b3   : > { %v19160_v13 = vadd.f32 %v7591_v9, %v7333_v29  ;;  %v7336_v2 = vpop.f32.mrf.mxu1  ;;  %v12993_v9 = vld [vmem:[%s20282_s3 + $0x230] sm:$0xf] }
 0x9b4   : > { %21248 = vst [vmem:[#allocation62_spill] sm:$0xff] %v19158_v3  ;;  %v19183_v50 = vor.u32 %v13810_v32, %v12993_v9  ;;  %v19196_v32 = vld [vmem:[#allocation2 + $0x30] sm:$0xff] }
 0x9b5   : > { %21249 = vst [vmem:[#allocation65_spill] sm:$0xff] %v19160_v13  ;;  %7819 = vmatmul.bf16.gmra.mxu0 %v19162_v42  ;;  %v19198_v9 = vld [vmem:[#allocation2 + $0xd0] sm:$0xff] }
 0x9b6   : > { %7878 = vmatmul.bf16.gmra.mxu1 %v19162_v42  ;;  %8154 = vmatmul.bf16.gmra.mxu2 %v19164_v34  ;;  %21256 = vst [vmem:[#allocation78_spill] sm:$0xff] %v19196_v32 }
 0x9b7   : > { %8213 = vmatmul.bf16.gmra.mxu3 %v19164_v34  ;;  %v13809_v34 = vld [vmem:[%s20282_s3 + $0x234] sm:$0xf]  ;;  %8470 = vmatpush.bf16.msra.mxu0 %v19183_v50  ;;  %21257 = vst [vmem:[#allocation79_spill] sm:$0xff] %v19198_v9 }
 0x9b9   : > { %v7535_v10 = vpop.f32.mrf.mxu2 }
 0x9ba   : > { %v19170_v33 = vadd.f32 %v7535_v10, %v7277_v16  ;;  %v7594_v15 = vpop.f32.mrf.mxu3  ;;  %v7279_v26 = vpop.f32.mrf.mxu0  ;;  %v12995_v16 = vld [vmem:[%s20282_s3 + $0x238] sm:$0xf0] }
 0x9bb   : > { %v19172_v29 = vadd.f32 %v7594_v15, %v7336_v2  ;;  %v7338_v45 = vpop.f32.mrf.mxu1  ;;  %v19188_v2 = vor.u32 %v13809_v34, %v12995_v16 }
 0x9bc   : > { %21252 = vst [vmem:[#allocation69_spill] sm:$0xff] %v19170_v33 }
 0x9bd   : > { %21253 = vst [vmem:[#allocation70_spill] sm:$0xff] %v19172_v29  ;;  %8529 = vmatpush.bf16.msra.mxu1 %v19188_v2 }
 0x9c1   : > { %v7537_v10 = vpop.f32.mrf.mxu2 }
 0x9c2   : > { %v19192_v15 = vadd.f32 %v7537_v10, %v7279_v26  ;;  %v7596_v42 = vpop.f32.mrf.mxu3  ;;  %v7282_v29 = vpop.f32.mrf.mxu0 }
 0x9c3   : > { %v19194_v33 = vadd.f32 %v7596_v42, %v7338_v45  ;;  %v7341_v13 = vpop.f32.mrf.mxu1 }
 0x9c4   : > { %21254 = vst [vmem:[#allocation74_spill] sm:$0xff] %v19192_v15 }
 0x9c5   : > { %21255 = vst [vmem:[#allocation75_spill] sm:$0xff] %v19194_v33  ;;  %7824 = vmatmul.bf16.gmra.mxu0 %v19196_v32  ;;  %v12985_v33 = vld [vmem:[%s20282_s3 + $0x220] sm:$0xf] }
 0x9c6   : > { %7883 = vmatmul.bf16.gmra.mxu1 %v19196_v32  ;;  %8159 = vmatmul.bf16.gmra.mxu2 %v19198_v9  ;;  %v13808_v32 = vld [vmem:[%s20282_s3 + $0x224] sm:$0xf0] }
 0x9c7   : > { %8218 = vmatmul.bf16.gmra.mxu3 %v19198_v9  ;;  %v13807_v9 = vld [vmem:[%s20282_s3 + $0x224] sm:$0xf]  ;;  %v19217_v15 = vor.u32 %v13808_v32, %v12985_v33  ;;  %v19230_v33 = vld [vmem:[#allocation2 + $0x48] sm:$0xff] }
 0x9c8   : > { %21262 = vst [vmem:[#allocation53_spill] sm:$0xff] %v19230_v33  ;;  %v19232_v32 = vld [vmem:[#allocation2 + $0xa8] sm:$0xff] }
 0x9c9   : > { %v7540_v34 = vpop.f32.mrf.mxu2  ;;  %8471 = vmatpush.bf16.msra.mxu0 %v19217_v15  ;;  %21263 = vst [vmem:[#allocation67_spill] sm:$0xff] %v19232_v32 }
 0x9ca   : > { %v19204_v26 = vadd.f32 %v7540_v34, %v7282_v29  ;;  %v7599_v16 = vpop.f32.mrf.mxu3  ;;  %v7284_v10 = vpop.f32.mrf.mxu0 }
 0x9cb   : > { %v19206_v42 = vadd.f32 %v7599_v16, %v7341_v13  ;;  %v7343_v45 = vpop.f32.mrf.mxu1  ;;  %v12987_v13 = vld [vmem:[%s20282_s3 + $0x228] sm:$0xf0] }
 0x9cc   : > { %21258 = vst [vmem:[#allocation82_spill] sm:$0xff] %v19204_v26  ;;  %v19222_v29 = vor.u32 %v13807_v9, %v12987_v13 }
 0x9cd   : > { %21259 = vst [vmem:[#allocation83_spill] sm:$0xff] %v19206_v42 }
 0x9ce   : > { %8530 = vmatpush.bf16.msra.mxu1 %v19222_v29 }
 0x9d1   : > { %v7542_v34 = vpop.f32.mrf.mxu2 }
 0x9d2   : > { %v19226_v16 = vadd.f32 %v7542_v34, %v7284_v10  ;;  %v7601_v42 = vpop.f32.mrf.mxu3  ;;  %v7287_v26 = vpop.f32.mrf.mxu0 }
 0x9d3   : > { %v19228_v3 = vadd.f32 %v7601_v42, %v7343_v45  ;;  %v7346_v39 = vpop.f32.mrf.mxu1 }
 0x9d4   : > { %21260 = vst [vmem:[#allocation88_spill] sm:$0xff] %v19226_v16 }
 0x9d5   : > { %21261 = vst [vmem:[#allocation89_spill] sm:$0xff] %v19228_v3  ;;  %7829 = vmatmul.bf16.gmra.mxu0 %v19230_v33 }
 0x9d6   : > { %7888 = vmatmul.bf16.gmra.mxu1 %v19230_v33  ;;  %8164 = vmatmul.bf16.gmra.mxu2 %v19232_v32 }
 0x9d7   : > { %8223 = vmatmul.bf16.gmra.mxu3 %v19232_v32 }
 0x9d9   : > { %v7545_v9 = vpop.f32.mrf.mxu2 }
 0x9da   : > { %v19238_v10 = vadd.f32 %v7545_v9, %v7287_v26  ;;  %v7604_v13 = vpop.f32.mrf.mxu3  ;;  %v7289_v34 = vpop.f32.mrf.mxu0  ;;  %v12977_v26 = vld [vmem:[%s20282_s3 + $0x210] sm:$0xf]  ;;  %v19257_v9 = vld [vmem:[#allocation2 + $0x98] sm:$0xff] }
 0x9db   : > { %v19240_v42 = vadd.f32 %v7604_v13, %v7346_v39  ;;  %v7348_v45 = vpop.f32.mrf.mxu1  ;;  %v13806_v39 = vld [vmem:[%s20282_s3 + $0x214] sm:$0xf0]  ;;  %21269 = vst [vmem:[#allocation80_spill] sm:$0xff] %v19257_v9 }
 0x9dc   : > { %21264 = vst [vmem:[#allocation68_spill] sm:$0xff] %v19238_v10  ;;  %v19259_v13 = vor.u32 %v13806_v39, %v12977_v26 }
 0x9dd   : > { %21265 = vst [vmem:[#allocation72_spill] sm:$0xff] %v19240_v42 }
 0x9de   : > { %8472 = vmatpush.bf16.msra.mxu0 %v19259_v13 }
 0x9e1   : > { %v7547_v3 = vpop.f32.mrf.mxu2 }
 0x9e2   : > { %v19242_v16 = vadd.f32 %v7547_v3, %v7289_v34  ;;  %v7606_v22 = vpop.f32.mrf.mxu3  ;;  %v7292_v58 = vpop.f32.mrf.mxu0  ;;  %v13805_v3 = vld [vmem:[%s20282_s3 + $0x214] sm:$0xf] }
 0x9e3   : > { %v19246_v33 = vadd.f32 %v7606_v22, %v7348_v45  ;;  %v7351_v47 = vpop.f32.mrf.mxu1  ;;  %v12979_v22 = vld [vmem:[%s20282_s3 + $0x218] sm:$0xf0] }
 0x9e4   : > { %21266 = vst [vmem:[#allocation73_spill] sm:$0xff] %v19242_v16  ;;  %v19265_v34 = vor.u32 %v13805_v3, %v12979_v22 }
 0x9e5   : > { %21268 = vst [vmem:[#allocation77_spill] sm:$0xff] %v19246_v33  ;;  %7834 = vmatmul.bf16.gmra.mxu0 %v19244_v4 }
 0x9e6   : > { %7893 = vmatmul.bf16.gmra.mxu1 %v19244_v4  ;;  %8169 = vmatmul.bf16.gmra.mxu2 %v19257_v9 }
 0x9e7   : > { %8228 = vmatmul.bf16.gmra.mxu3 %v19257_v9  ;;  %8531 = vmatpush.bf16.msra.mxu1 %v19265_v34 }
 0x9e9   : > { %v7550_v45 = vpop.f32.mrf.mxu2 }
 0x9ea   : > { %v19272_v26 = vadd.f32 %v7550_v45, %v7292_v58  ;;  %v7609_v39 = vpop.f32.mrf.mxu3  ;;  %v7294_v32 = vpop.f32.mrf.mxu0  ;;  %v12969_v58 = vld [vmem:[%s20282_s3 + $0x200] sm:$0xf] }
 0x9eb   : > { %v19274_v33 = vadd.f32 %v7609_v39, %v7351_v47  ;;  %v7353_v16 = vpop.f32.mrf.mxu1  ;;  %v13804_v47 = vld [vmem:[%s20282_s3 + $0x204] sm:$0xf0] }
 0x9ec   : > { %21270 = vst [vmem:[#allocation56_spill] sm:$0xff] %v19272_v26  ;;  %v21282_v26 = vld [vmem:[#allocation50_spill] sm:$0xff] }
 0x9ed   : > { %21271 = vst [vmem:[#allocation66_spill] sm:$0xff] %v19274_v33  ;;  %v21281_v33 = vld [vmem:[#allocation49_spill] sm:$0xff] }
 0x9f1   : > { %v7552_v3 = vpop.f32.mrf.mxu2 }
 0x9f2   : > { %v19276_v22 = vadd.f32 %v7552_v3, %v7294_v32  ;;  %v7611_v4 = vpop.f32.mrf.mxu3  ;;  %v7297_v42 = vpop.f32.mrf.mxu0  ;;  %v12971_v32 = vld [vmem:[%s20282_s3 + $0x208] sm:$0xf0] }
 0x9f3   : > { %v19278_v10 = vadd.f32 %v7611_v4, %v7353_v16  ;;  %v7356_v9 = vpop.f32.mrf.mxu1  ;;  %v13803_v4 = vld [vmem:[%s20282_s3 + $0x204] sm:$0xf]  ;;  %v19297_v16 = vor.u32 %v13804_v47, %v12969_v58  ;;  %v21279_v58 = vld [vmem:[#allocation45_spill] sm:$0xff] }
 0x9f4   : > { %21272 = vst [vmem:[#allocation87_spill] sm:$0xff] %v19276_v22  ;;  %v19302_v39 = vor.u32 %v13803_v4, %v12971_v32  ;;  %v21280_v47 = vld [vmem:[#allocation41_spill] sm:$0xff] }
 0x9f5   : > { %21273 = vst [vmem:[#allocation10_spill] sm:$0xff] %v19278_v10  ;;  %7839 = vmatmul.bf16.gmra.mxu0 %v19280_v62 }
 0x9f6   : > { %7898 = vmatmul.bf16.gmra.mxu1 %v19280_v62  ;;  %8174 = vmatmul.bf16.gmra.mxu2 %v19282_v56  ;;  %21276 = vst [vmem:[#allocation11_spill] sm:$0xff] %v19302_v39 }
 0x9f7   : > { %8233 = vmatmul.bf16.gmra.mxu3 %v19282_v56  ;;  %8473 = vmatpush.bf16.msra.mxu0 %v19297_v16 }
 0x9f8   : > { %8532 = vmatpush.bf16.msra.mxu1 %v19302_v39  ;;  %v21284_v39 = vld [vmem:[#allocation51_spill] sm:$0xff] }
 0x9f9   : > { %v7555_v45 = vpop.f32.mrf.mxu2 }
 0x9fa   : > { %v19304_v3 = vadd.f32 %v7555_v45, %v7297_v42  ;;  %v7614_v56 = vpop.f32.mrf.mxu3  ;;  %v7299_v62 = vpop.f32.mrf.mxu0 }
 0x9fb   : > { %v19307_v10 = vadd.f32 %v7614_v56, %v7356_v9  ;;  %v7358_v22 = vpop.f32.mrf.mxu1  ;;  %8762 = vmatpush.bf16.msrb.mxu0 %v21279_v58 }
 0x9fc   : > { %21277 = vst [vmem:[#allocation12_spill] sm:$0xff] %v19304_v3  ;;  %8821 = vmatpush.bf16.msrb.mxu1 %v21280_v47  ;;  %v19323_v47 = vld [vmem:[#allocation2 + $0x20] sm:$0xff] }
 0x9fd   : > { %21278 = vst [vmem:[#allocation21_spill] sm:$0xff] %v19307_v10  ;;  %v19319_v10 = vld [vmem:[#allocation2 + $0x8] sm:$0xff] }
 0x9fe   : > { %21283 = vst [vmem:[#allocation22_spill] sm:$0xff] %v19319_v10 }
 0x9ff   : > { %8763 = vmatpush.bf16.msrb.mxu0 %v21281_v33  ;;  %21285 = vst [vmem:[#allocation19_spill] sm:$0xff] %v19323_v47  ;;  %v21286_v33 = vld [vmem:[#allocation52_spill] sm:$0xff] }
 0xa00   : > { %8822 = vmatpush.bf16.msrb.mxu1 %v21282_v26 }
 0xa01   : > { %v7557_v4 = vpop.f32.mrf.mxu2 }
 0xa02   : > { %v19314_v42 = vadd.f32 %v7557_v4, %v7299_v62  ;;  %v7616_v32 = vpop.f32.mrf.mxu3  ;;  %v7805_v45 = vpop.f32.mrf.mxu0  ;;  %v21287_v62 = vld [vmem:[#allocation55_spill] sm:$0xff] }
 0xa03   : > { %v19316_v3 = vadd.f32 %v7616_v32, %v7358_v22  ;;  %v7914_v56 = vadd.f32 %v7805_v45, %v19004_v38  ;;  %v7864_v9 = vpop.f32.mrf.mxu1  ;;  %8764 = vmatpush.bf16.msrb.mxu0 %v21284_v39  ;;  %v21288_v38 = vld [vmem:[#allocation5_spill] sm:$0xff] }
 0xa04   : > { %v7915_v58 = vadd.f32 %v7864_v9, %v19006_v14  ;;  %8823 = vmatpush.bf16.msrb.mxu1 %v21286_v33  ;;  %v21290_v9 = vld [vmem:[#allocation26_spill] sm:$0xff] }
 0xa05   : > { %7844 = vmatmul.bf16.gmra.mxu0 %v19319_v10 }
 0xa06   : > { %7903 = vmatmul.bf16.gmra.mxu1 %v19319_v10  ;;  %8179 = vmatmul.bf16.gmra.mxu2 %v19323_v47  ;;  %v21291_v10 = vld [vmem:[#allocation7_spill] sm:$0xff] }
 0xa07   : > { %8238 = vmatmul.bf16.gmra.mxu3 %v19323_v47  ;;  %8765 = vmatpush.bf16.msrb.mxu0 %v21287_v62  ;;  %v21292_v47 = vld [vmem:[#allocation43_spill] sm:$0xff]  ;;  %v21293_v62 = vld [vmem:[#allocation44_spill] sm:$0xff] }
 0xa08   : > { %8824 = vmatpush.bf16.msrb.mxu1 %v21288_v38 }
 0xa09   : > { %v8140_v26 = vpop.f32.mrf.mxu2 }
 0xa0a   : > { %v19332_v22 = vadd.f32 %v8140_v26, %v7914_v56  ;;  %v8199_v14 = vpop.f32.mrf.mxu3  ;;  %v7807_v39 = vpop.f32.mrf.mxu0 }
 0xa0b   : > { %v19334_v4 = vadd.f32 %v8199_v14, %v7915_v58  ;;  %v7916_v32 = vadd.f32 %v7807_v39, %v19030_v48  ;;  %v7866_v45 = vpop.f32.mrf.mxu1  ;;  %8766 = vmatpush.bf16.msrb.mxu0 %v21290_v9  ;;  %v19347_v39 = vld [vmem:[#allocation2 + $0x58] sm:$0xff] }
 0xa0c   : > { %21289 = vst [vmem:[#allocation20_spill] sm:$0xff] %v19332_v22  ;;  %v7917_v33 = vadd.f32 %v7866_v45, %v19032_v5  ;;  %8825 = vmatpush.bf16.msrb.mxu1 %v21291_v10  ;;  %v19351_v10 = vld [vmem:[#allocation2 + $0x10] sm:$0xff] }
 0xa0f   : > { %8767 = vmatpush.bf16.msrb.mxu0 %v21292_v47 }
 0xa10   : > { %8826 = vmatpush.bf16.msrb.mxu1 %v21293_v62 }
 0xa11   : > { %v8142_v38 = vpop.f32.mrf.mxu2 }
 0xa12   : > { %v19342_v56 = vadd.f32 %v8142_v38, %v7916_v32  ;;  %v8201_v26 = vpop.f32.mrf.mxu3  ;;  %v7810_v22 = vpop.f32.mrf.mxu0 }
 0xa13   : > { %v19344_v58 = vadd.f32 %v8201_v26, %v7917_v33  ;;  %v7918_v48 = vadd.f32 %v7810_v22, %v19036_v18  ;;  %v7869_v14 = vpop.f32.mrf.mxu1  ;;  %8768 = vmatpush.bf16.msrb.mxu0 %v18446_v28 }
 0xa14   : > { %v7919_v5 = vadd.f32 %v7869_v14, %v19038_v49  ;;  %8827 = vmatpush.bf16.msrb.mxu1 %v18456_v20 }
 0xa15   : > { %7849 = vmatmul.bf16.gmra.mxu0 %v19347_v39 }
 0xa16   : > { %7908 = vmatmul.bf16.gmra.mxu1 %v19347_v39  ;;  %8184 = vmatmul.bf16.gmra.mxu2 %v19351_v10 }
 0xa17   : > { %8243 = vmatmul.bf16.gmra.mxu3 %v19351_v10  ;;  %8769 = vmatpush.bf16.msrb.mxu0 %v18523_v27 }
 0xa18   : > { %8828 = vmatpush.bf16.msrb.mxu1 %v18536_v60 }
 0xa19   : > { %v8145_v18 = vpop.f32.mrf.mxu2 }
 0xa1a   : > { %v19360_v28 = vadd.f32 %v8145_v18, %v7918_v48  ;;  %v8204_v49 = vpop.f32.mrf.mxu3  ;;  %v7812_v47 = vpop.f32.mrf.mxu0  ;;  %v19371_v48 = vld [vmem:[#allocation2 + $0x50] sm:$0xff] }
 0xa1b   : > { %v19362_v22 = vadd.f32 %v8204_v49, %v7919_v5  ;;  %v7920_v20 = vadd.f32 %v7812_v47, %v19058_v30  ;;  %v7871_v32 = vpop.f32.mrf.mxu1  ;;  %v21301_v47 = vld [vmem:[#allocation9_spill] sm:$0xff] }
 0xa1c   : > { %v7921_v45 = vadd.f32 %v7871_v32, %v19060_v53 }
 0xa21   : > { %v8147_v9 = vpop.f32.mrf.mxu2 }
 0xa22   : > { %v19366_v33 = vadd.f32 %v8147_v9, %v7920_v20  ;;  %v8206_v62 = vpop.f32.mrf.mxu3  ;;  %v7815_v38 = vpop.f32.mrf.mxu0 }
 0xa23   : > { %v19368_v27 = vadd.f32 %v8206_v62, %v7921_v45  ;;  %v7922_v60 = vadd.f32 %v7815_v38, %v19072_v11  ;;  %v7874_v26 = vpop.f32.mrf.mxu1  ;;  %v21302_v62 = vld [vmem:[#allocation62_spill] sm:$0xff] }
 0xa24   : > { %v7923_v14 = vadd.f32 %v7874_v26, %v19074_v31  ;;  %v21303_v26 = vld [vmem:[#allocation65_spill] sm:$0xff] }
 0xa25   : > { %8474 = vmatmul.bf16.vlgmr.msra.gmra.mxu0 %v19371_v48 }
 0xa26   : > { %8533 = vmatmul.bf16.vlgmr.msra.gmra.mxu1 %v19371_v48  ;;  %8652 = vmatmul.bf16.vlgmr.msra.gmra.mxu2 %v19062_v1 }
 0xa27   : > { %8711 = vmatmul.bf16.vlgmr.msra.gmra.mxu3 %v19062_v1  ;;  %9276 = vmatpush.bf16.msra.mxu2 %v19014_v7 }
 0xa28   : > { %9335 = vmatpush.bf16.msra.mxu3 %v19023_v57  ;;  %9038 = vmatpush.bf16.msra.mxu0 %v18593_v41 }
 0xa29   : > { %v8150_v30 = vpop.f32.mrf.mxu2  ;;  %9097 = vmatpush.bf16.msra.mxu1 %v18602_v12 }
 0xa2a   : > { %v19382_v53 = vadd.f32 %v8150_v30, %v7922_v60  ;;  %v8209_v11 = vpop.f32.mrf.mxu3  ;;  %v7817_v31 = vpop.f32.mrf.mxu0 }
 0xa2b   : > { %v19384_v5 = vadd.f32 %v8209_v11, %v7923_v14  ;;  %v7924_v18 = vadd.f32 %v7817_v31, %v19080_v24  ;;  %v7876_v49 = vpop.f32.mrf.mxu1  ;;  %9277 = vmatpush.bf16.msra.mxu2 %v19049_v0  ;;  %v19401_v24 = vld [vmem:[#allocation2 + $0x68] sm:$0xff] }
 0xa2c   : > { %v7925_v7 = vadd.f32 %v7876_v49, %v19084_v43  ;;  %9336 = vmatpush.bf16.msra.mxu3 %v19054_v35  ;;  %9039 = vmatpush.bf16.msra.mxu0 %v18648_v40 }
 0xa2d   : > { %9098 = vmatpush.bf16.msra.mxu1 %v18659_v52 }
 0xa2f   : > { %9278 = vmatpush.bf16.msra.mxu2 %v19098_v46 }
 0xa30   : > { %9337 = vmatpush.bf16.msra.mxu3 %v19105_v23  ;;  %9040 = vmatpush.bf16.msra.mxu0 %v18696_v17 }
 0xa31   : > { %v8152_v41 = vpop.f32.mrf.mxu2  ;;  %9099 = vmatpush.bf16.msra.mxu1 %v18704_v6 }
 0xa32   : > { %v19396_v12 = vadd.f32 %v8152_v41, %v7924_v18  ;;  %v8211_v57 = vpop.f32.mrf.mxu3  ;;  %v7820_v0 = vpop.f32.mrf.mxu0 }
 0xa33   : > { %v19398_v1 = vadd.f32 %v8211_v57, %v7925_v7  ;;  %v7926_v35 = vadd.f32 %v7820_v0, %v19114_v44  ;;  %v7879_v40 = vpop.f32.mrf.mxu1  ;;  %9279 = vmatpush.bf16.msra.mxu2 %v19145_v25  ;;  %v21296_v25 = vld [vmem:[#allocation59_spill] sm:$0xff]  ;;  %v21304_v7 = vld [vmem:[#allocation69_spill] sm:$0xff] }
 0xa34   : > { %v7927_v52 = vadd.f32 %v7879_v40, %v19116_v54  ;;  %9338 = vmatpush.bf16.msra.mxu3 %v19150_v51  ;;  %9041 = vmatpush.bf16.msra.mxu0 %v18755_v37  ;;  %v19457_v0 = vld [vmem:[#allocation2 + $0x48] sm:$0xff] }
 0xa35   : > { %8479 = vmatmul.bf16.gmra.mxu0 %v19401_v24  ;;  %9100 = vmatpush.bf16.msra.mxu1 %v18767_v59 }
 0xa36   : > { %8538 = vmatmul.bf16.gmra.mxu1 %v19401_v24  ;;  %8657 = vmatmul.bf16.gmra.mxu2 %v19082_v21 }
 0xa37   : > { %8716 = vmatmul.bf16.gmra.mxu3 %v19082_v21  ;;  %9280 = vmatpush.bf16.msra.mxu2 %v19183_v50  ;;  %v21295_v21 = vld [vmem:[#allocation39_spill] sm:$0xff] }
 0xa38   : > { %9339 = vmatpush.bf16.msra.mxu3 %v19188_v2  ;;  %9042 = vmatpush.bf16.msra.mxu0 %v18803_v63  ;;  %v21294_v63 = vld [vmem:[#allocation58_spill] sm:$0xff]  ;;  %v19435_v2 = vld [vmem:[#allocation2 + $0x30] sm:$0xff] }
 0xa39   : > { %v8155_v17 = vpop.f32.mrf.mxu2  ;;  %9101 = vmatpush.bf16.msra.mxu1 %v18812_v8 }
 0xa3a   : > { %v19416_v6 = vadd.f32 %v8155_v17, %v7926_v35  ;;  %v8214_v37 = vpop.f32.mrf.mxu3  ;;  %v7822_v43 = vpop.f32.mrf.mxu0  ;;  %v21305_v35 = vld [vmem:[#allocation70_spill] sm:$0xff] }
 0xa3b   : > { %v19418_v59 = vadd.f32 %v8214_v37, %v7927_v52  ;;  %v7928_v46 = vadd.f32 %v7822_v43, %v19122_v61  ;;  %v7881_v23 = vpop.f32.mrf.mxu1  ;;  %9281 = vmatpush.bf16.msra.mxu2 %v19217_v15  ;;  %v21306_v52 = vld [vmem:[#allocation63_spill] sm:$0xff] }
 0xa3c   : > { %v7929_v50 = vadd.f32 %v7881_v23, %v19124_v36  ;;  %9340 = vmatpush.bf16.msra.mxu3 %v19222_v29  ;;  %9043 = vmatpush.bf16.msra.mxu0 %v18852_v19  ;;  %v21298_v29 = vld [vmem:[#allocation11_spill] sm:$0xff] }
 0xa3d   : > { %9102 = vmatpush.bf16.msra.mxu1 %v18863_v55  ;;  %v21297_v55 = vld [vmem:[#allocation60_spill] sm:$0xff] }
 0xa3f   : > { %9282 = vmatpush.bf16.msra.mxu2 %v19259_v13  ;;  %v21299_v13 = vld [vmem:[#allocation17_spill] sm:$0xff] }
 0xa40   : > { %9341 = vmatpush.bf16.msra.mxu3 %v19265_v34  ;;  %9044 = vmatpush.bf16.msra.mxu0 %v21294_v63  ;;  %v21300_v34 = vld [vmem:[#allocation85_spill] sm:$0xff] }
 0xa41   : > { %v8157_v8 = vpop.f32.mrf.mxu2  ;;  %9103 = vmatpush.bf16.msra.mxu1 %v21295_v21  ;;  %v21308_v21 = vld [vmem:[#allocation75_spill] sm:$0xff] }
 0xa42   : > { %v19430_v44 = vadd.f32 %v8157_v8, %v7928_v46  ;;  %v8216_v54 = vpop.f32.mrf.mxu3  ;;  %v7825_v61 = vpop.f32.mrf.mxu0 }
 0xa43   : > { %v19432_v36 = vadd.f32 %v8216_v54, %v7929_v50  ;;  %v7930_v51 = vadd.f32 %v7825_v61, %v21296_v25  ;;  %v7884_v19 = vpop.f32.mrf.mxu1  ;;  %9283 = vmatpush.bf16.msra.mxu2 %v19297_v16  ;;  %v21307_v50 = vld [vmem:[#allocation74_spill] sm:$0xff] }
 0xa44   : > { %v7931_v15 = vadd.f32 %v7884_v19, %v21297_v55  ;;  %9342 = vmatpush.bf16.msra.mxu3 %v21298_v29  ;;  %9045 = vmatpush.bf16.msra.mxu0 %v21299_v13 }
 0xa45   : > { %8484 = vmatmul.bf16.gmra.mxu0 %v19435_v2  ;;  %9104 = vmatpush.bf16.msra.mxu1 %v21300_v34  ;;  %v19475_v34 = vld [vmem:[#allocation2 + $0x80] sm:$0xff] }
 0xa46   : > { %8543 = vmatmul.bf16.gmra.mxu1 %v19435_v2  ;;  %8662 = vmatmul.bf16.gmra.mxu2 %v21301_v47 }
 0xa47   : > { %8721 = vmatmul.bf16.gmra.mxu3 %v21301_v47  ;;  %v21310_v47 = vld [vmem:[#allocation83_spill] sm:$0xff] }
 0xa49   : > { %v8160_v20 = vpop.f32.mrf.mxu2 }
 0xa4a   : > { %v19446_v32 = vadd.f32 %v8160_v20, %v7930_v51  ;;  %v8219_v16 = vpop.f32.mrf.mxu3  ;;  %v7827_v45 = vpop.f32.mrf.mxu0 }
 0xa4b   : > { %v19448_v9 = vadd.f32 %v8219_v16, %v7931_v15  ;;  %v7932_v38 = vadd.f32 %v7827_v45, %v21302_v62  ;;  %v7886_v60 = vpop.f32.mrf.mxu1  ;;  %v21309_v15 = vld [vmem:[#allocation82_spill] sm:$0xff] }
 0xa4c   : > { %v7933_v14 = vadd.f32 %v7886_v60, %v21303_v26  ;;  %v21311_v16 = vld [vmem:[#allocation78_spill] sm:$0xff] }
 0xa51   : > { %v8162_v30 = vpop.f32.mrf.mxu2 }
 0xa52   : > { %v19452_v11 = vadd.f32 %v8162_v30, %v7932_v38  ;;  %v8221_v31 = vpop.f32.mrf.mxu3  ;;  %v7830_v18 = vpop.f32.mrf.mxu0 }
 0xa53   : > { %v19454_v49 = vadd.f32 %v8221_v31, %v7933_v14  ;;  %v7934_v41 = vadd.f32 %v7830_v18, %v21304_v7  ;;  %v7889_v57 = vpop.f32.mrf.mxu1  ;;  %v21312_v14 = vld [vmem:[#allocation88_spill] sm:$0xff]  ;;  %v21313_v18 = vld [vmem:[#allocation89_spill] sm:$0xff] }
 0xa54   : > { %v7935_v40 = vadd.f32 %v7889_v57, %v21305_v35 }
 0xa55   : > { %8489 = vmatmul.bf16.gmra.mxu0 %v19457_v0 }
 0xa56   : > { %8548 = vmatmul.bf16.gmra.mxu1 %v19457_v0  ;;  %8667 = vmatmul.bf16.gmra.mxu2 %v21306_v52 }
 0xa57   : > { %8726 = vmatmul.bf16.gmra.mxu3 %v21306_v52 }
 0xa59   : > { %v8165_v17 = vpop.f32.mrf.mxu2 }
 0xa5a   : > { %v19464_v37 = vadd.f32 %v8165_v17, %v7934_v41  ;;  %v8224_v43 = vpop.f32.mrf.mxu3  ;;  %v7832_v46 = vpop.f32.mrf.mxu0  ;;  %v21314_v17 = vld [vmem:[#allocation68_spill] sm:$0xff] }
 0xa5b   : > { %v19466_v23 = vadd.f32 %v8224_v43, %v7935_v40  ;;  %v7936_v63 = vadd.f32 %v7832_v46, %v21307_v50  ;;  %v7891_v8 = vpop.f32.mrf.mxu1  ;;  %v19493_v50 = vld [vmem:[#allocation2 + $0x88] sm:$0xff] }
 0xa5c   : > { %v7937_v54 = vadd.f32 %v7891_v8, %v21308_v21  ;;  %v21316_v21 = vld [vmem:[#allocation53_spill] sm:$0xff] }
 0xa61   : > { %v8167_v61 = vpop.f32.mrf.mxu2 }
 0xa62   : > { %v19470_v25 = vadd.f32 %v8167_v61, %v7936_v63  ;;  %v8226_v51 = vpop.f32.mrf.mxu3  ;;  %v7835_v19 = vpop.f32.mrf.mxu0  ;;  %v21315_v63 = vld [vmem:[#allocation72_spill] sm:$0xff] }
 0xa63   : > { %v19472_v55 = vadd.f32 %v8226_v51, %v7937_v54  ;;  %v7938_v29 = vadd.f32 %v7835_v19, %v21309_v15  ;;  %v7894_v13 = vpop.f32.mrf.mxu1 }
 0xa64   : > { %v7939_v20 = vadd.f32 %v7894_v13, %v21310_v47 }
 0xa65   : > { %8494 = vmatmul.bf16.gmra.mxu0 %v19475_v34 }
 0xa66   : > { %8553 = vmatmul.bf16.gmra.mxu1 %v19475_v34  ;;  %8672 = vmatmul.bf16.gmra.mxu2 %v21311_v16 }
 0xa67   : > { %8731 = vmatmul.bf16.gmra.mxu3 %v21311_v16 }
 0xa69   : > { %v8170_v45 = vpop.f32.mrf.mxu2 }
 0xa6a   : > { %v19482_v62 = vadd.f32 %v8170_v45, %v7938_v29  ;;  %v8229_v38 = vpop.f32.mrf.mxu3  ;;  %v7837_v60 = vpop.f32.mrf.mxu0  ;;  %v21317_v29 = vld [vmem:[#allocation73_spill] sm:$0xff] }
 0xa6b   : > { %v19484_v26 = vadd.f32 %v8229_v38, %v7939_v20  ;;  %v7940_v30 = vadd.f32 %v7837_v60, %v21312_v14  ;;  %v7896_v31 = vpop.f32.mrf.mxu1  ;;  %v21318_v20 = vld [vmem:[#allocation77_spill] sm:$0xff] }
 0xa6c   : > { %v7941_v7 = vadd.f32 %v7896_v31, %v21313_v18  ;;  %v21319_v31 = vld [vmem:[#allocation56_spill] sm:$0xff] }
 0xa71   : > { %v8172_v41 = vpop.f32.mrf.mxu2 }
 0xa72   : > { %v19488_v57 = vadd.f32 %v8172_v41, %v7940_v30  ;;  %v8231_v35 = vpop.f32.mrf.mxu3  ;;  %v7840_v40 = vpop.f32.mrf.mxu0  ;;  %v19511_v41 = vld [vmem:[#allocation2 + $0x8] sm:$0xff] }
 0xa73   : > { %v19490_v52 = vadd.f32 %v8231_v35, %v7941_v7  ;;  %v7942_v43 = vadd.f32 %v7840_v40, %v21314_v17  ;;  %v7899_v46 = vpop.f32.mrf.mxu1  ;;  %v21320_v35 = vld [vmem:[#allocation66_spill] sm:$0xff]  ;;  %v21321_v17 = vld [vmem:[#allocation76_spill] sm:$0xff] }
 0xa74   : > { %v7943_v8 = vadd.f32 %v7899_v46, %v21315_v63 }
 0xa75   : > { %8499 = vmatmul.bf16.gmra.mxu0 %v19493_v50 }
 0xa76   : > { %8558 = vmatmul.bf16.gmra.mxu1 %v19493_v50  ;;  %8677 = vmatmul.bf16.gmra.mxu2 %v21316_v21 }
 0xa77   : > { %8736 = vmatmul.bf16.gmra.mxu3 %v21316_v21 }
 0xa79   : > { %v8175_v54 = vpop.f32.mrf.mxu2 }
 0xa7a   : > { %v19500_v61 = vadd.f32 %v8175_v54, %v7942_v43  ;;  %v8234_v51 = vpop.f32.mrf.mxu3  ;;  %v7842_v19 = vpop.f32.mrf.mxu0  ;;  %v21322_v54 = vld [vmem:[#allocation87_spill] sm:$0xff] }
 0xa7b   : > { %v19502_v15 = vadd.f32 %v8234_v51, %v7943_v8  ;;  %v7944_v13 = vadd.f32 %v7842_v19, %v21317_v29  ;;  %v7901_v47 = vpop.f32.mrf.mxu1  ;;  %v21323_v29 = vld [vmem:[#allocation10_spill] sm:$0xff] }
 0xa7c   : > { %v7945_v16 = vadd.f32 %v7901_v47, %v21318_v20 }
 0xa81   : > { %v8177_v45 = vpop.f32.mrf.mxu2 }
 0xa82   : > { %v19506_v38 = vadd.f32 %v8177_v45, %v7944_v13  ;;  %v8236_v60 = vpop.f32.mrf.mxu3  ;;  %v7845_v14 = vpop.f32.mrf.mxu0 }
 0xa83   : > { %v19508_v30 = vadd.f32 %v8236_v60, %v7945_v16  ;;  %v7946_v18 = vadd.f32 %v7845_v14, %v21319_v31  ;;  %v7904_v7 = vpop.f32.mrf.mxu1  ;;  %v21324_v14 = vld [vmem:[#allocation12_spill] sm:$0xff] }
 0xa84   : > { %v7947_v40 = vadd.f32 %v7904_v7, %v21320_v35  ;;  %v19529_v7 = vld [vmem:[#allocation2 + $0x58] sm:$0xff] }
 0xa85   : > { %8504 = vmatmul.bf16.gmra.mxu0 %v19511_v41  ;;  %v21325_v35 = vld [vmem:[#allocation21_spill] sm:$0xff] }
 0xa86   : > { %8563 = vmatmul.bf16.gmra.mxu1 %v19511_v41  ;;  %8682 = vmatmul.bf16.gmra.mxu2 %v21321_v17 }
 0xa87   : > { %8741 = vmatmul.bf16.gmra.mxu3 %v21321_v17  ;;  %v21326_v17 = vld [vmem:[#allocation15_spill] sm:$0xff] }
 0xa89   : > { %v8180_v43 = vpop.f32.mrf.mxu2 }
 0xa8a   : > { %v19518_v46 = vadd.f32 %v8180_v43, %v7946_v18  ;;  %v8239_v63 = vpop.f32.mrf.mxu3  ;;  %v7847_v8 = vpop.f32.mrf.mxu0 }
 0xa8b   : > { %v19520_v21 = vadd.f32 %v8239_v63, %v7947_v40  ;;  %v7948_v51 = vadd.f32 %v7847_v8, %v21322_v54  ;;  %v7906_v19 = vpop.f32.mrf.mxu1 }
 0xa8c   : > { %v7949_v13 = vadd.f32 %v7906_v19, %v21323_v29 }
 0xa91   : > { %v8182_v47 = vpop.f32.mrf.mxu2 }
 0xa92   : > { %v19524_v20 = vadd.f32 %v8182_v47, %v7948_v51  ;;  %v8241_v16 = vpop.f32.mrf.mxu3  ;;  %v7850_v45 = vpop.f32.mrf.mxu0 }
 0xa93   : > { %v19526_v60 = vadd.f32 %v8241_v16, %v7949_v13  ;;  %v7950_v31 = vadd.f32 %v7850_v45, %v21324_v14  ;;  %v7909_v18 = vpop.f32.mrf.mxu1 }
 0xa94   : > { %v7951_v40 = vadd.f32 %v7909_v18, %v21325_v35  ;;  %v21327_v35 = vld [vmem:[#allocation20_spill] sm:$0xff] }
 0xa95   : > { %8509 = vmatmul.bf16.gmra.mxu0 %v19529_v7 }
 0xa96   : > { %8568 = vmatmul.bf16.gmra.mxu1 %v19529_v7  ;;  %8687 = vmatmul.bf16.gmra.mxu2 %v21326_v17 }
 0xa97   : > { %8746 = vmatmul.bf16.gmra.mxu3 %v21326_v17 }
 0xa99   : > { %v8185_v43 = vpop.f32.mrf.mxu2 }
 0xa9a   : > { %v19536_v63 = vadd.f32 %v8185_v43, %v7950_v31  ;;  %v8244_v8 = vpop.f32.mrf.mxu3  ;;  %v7852_v54 = vpop.f32.mrf.mxu0  ;;  %v19549_v43 = vld [vmem:[#allocation2 + $0x38] sm:$0xff] }
 0xa9b   : > { %v19538_v51 = vadd.f32 %v8244_v8, %v7951_v40  ;;  %v7952_v19 = vadd.f32 %v7852_v54, %v19314_v42  ;;  %v7911_v29 = vpop.f32.mrf.mxu1  ;;  %v21328_v42 = vld [vmem:[#allocation22_spill] sm:$0xff] }
 0xa9c   : > { %v7953_v13 = vadd.f32 %v7911_v29, %v19316_v3  ;;  %v19579_v3 = vld [vmem:[#allocation2 + $0x90] sm:$0xff] }
 0xa9d   : > { %21332 = vst [vmem:[#allocation14_spill] sm:$0xff] %v19579_v3 }
 0xaa1   : > { %v8187_v47 = vpop.f32.mrf.mxu2 }
 0xaa2   : > { %v19542_v16 = vadd.f32 %v8187_v47, %v7952_v19  ;;  %v8246_v45 = vpop.f32.mrf.mxu3  ;;  %v8475_v14 = vpop.f32.mrf.mxu0 }
 0xaa3   : > { %v19544_v18 = vadd.f32 %v8246_v45, %v7953_v13  ;;  %v19547_v17 = vadd.f32 %v8475_v14, %v21327_v35  ;;  %v8534_v31 = vpop.f32.mrf.mxu1 }
 0xaa4   : > { %v19552_v40 = vadd.f32 %v8534_v31, %v19334_v4 }
 0xaa5   : > { %8514 = vmatmul.bf16.gmra.mxu0 %v19549_v43 }
 0xaa6   : > { %8573 = vmatmul.bf16.gmra.mxu1 %v19549_v43  ;;  %8692 = vmatmul.bf16.gmra.mxu2 %v21328_v42 }
 0xaa7   : > { %8751 = vmatmul.bf16.gmra.mxu3 %v21328_v42 }
 0xaa9   : > { %v19560_v8 = vpop.f32.mrf.mxu2 }
 0xaaa   : > { %v19562_v54 = vpop.f32.mrf.mxu3  ;;  %v8477_v19 = vpop.f32.mrf.mxu0 }
 0xaab   : > { %v19565_v29 = vadd.f32 %v8477_v19, %v19342_v56  ;;  %v8536_v4 = vpop.f32.mrf.mxu1 }
 0xaac   : > { %v19568_v13 = vadd.f32 %v8536_v4, %v19344_v58 }
 0xaad   : > { %21329 = vst [vmem:[#allocation18_spill] sm:$0xff] %v19565_v29 }
 0xaae   : > { %21330 = vst [vmem:[#allocation84_spill] sm:$0xff] %v19568_v13 }
 0xab1   : > { %v19572_v45 = vpop.f32.mrf.mxu2 }
 0xab2   : > { %v19574_v14 = vpop.f32.mrf.mxu3  ;;  %v8480_v35 = vpop.f32.mrf.mxu0 }
 0xab3   : > { %v19577_v31 = vadd.f32 %v8480_v35, %v19360_v28  ;;  %v8539_v42 = vpop.f32.mrf.mxu1 }
 0xab4   : > { %v19582_v56 = vadd.f32 %v8539_v42, %v19362_v22 }
 0xab5   : > { %21331 = vst [vmem:[#allocation24_spill] sm:$0xff] %v19577_v31  ;;  %8519 = vmatmul.bf16.gmra.mxu0 %v19579_v3 }
 0xab6   : > { %21333 = vst [vmem:[#allocation57_spill] sm:$0xff] %v19582_v56  ;;  %8578 = vmatmul.bf16.gmra.mxu1 %v19579_v3  ;;  %8697 = vmatmul.bf16.gmra.mxu2 %v19347_v39 }
 0xab7   : > { %8756 = vmatmul.bf16.gmra.mxu3 %v19347_v39 }
 0xab9   : > { %v19590_v19 = vpop.f32.mrf.mxu2 }
 0xaba   : > { %v19592_v28 = vpop.f32.mrf.mxu3  ;;  %v8482_v4 = vpop.f32.mrf.mxu0 }
 0xabb   : > { %v19595_v35 = vadd.f32 %v8482_v4, %v19366_v33  ;;  %v8541_v22 = vpop.f32.mrf.mxu1  ;;  %v14229_v33 = vld [vmem:[#allocation2 + $0x78] sm:$0xff]  ;;  %v21338_v4 = vld [vmem:[#allocation86_spill] sm:$0xff] }
 0xabc   : > { %v19598_v42 = vadd.f32 %v8541_v22, %v19368_v27 }
 0xabd   : > { %21334 = vst [vmem:[#allocation28_spill] sm:$0xff] %v19595_v35 }
 0xabe   : > { %21335 = vst [vmem:[#allocation23_spill] sm:$0xff] %v19598_v42 }
 0xac1   : > { %v19602_v47 = vpop.f32.mrf.mxu2 }
 0xac2   : > { %v19604_v56 = vpop.f32.mrf.mxu3  ;;  %v8485_v39 = vpop.f32.mrf.mxu0 }
 0xac3   : > { %v19607_v31 = vadd.f32 %v8485_v39, %v19382_v53  ;;  %v8544_v13 = vpop.f32.mrf.mxu1 }
 0xac4   : > { %v19610_v29 = vadd.f32 %v8544_v13, %v19384_v5 }
 0xac5   : > { %21336 = vst [vmem:[#allocation27_spill] sm:$0xff] %v19607_v31  ;;  %8770 = vmatmul.bf16.vlgmr.msrb.gmra.mxu0 %v14229_v33 }
 0xac6   : > { %21337 = vst [vmem:[#allocation30_spill] sm:$0xff] %v19610_v29  ;;  %8829 = vmatmul.bf16.vlgmr.msrb.gmra.mxu1 %v14229_v33  ;;  %8888 = vmatmul.bf16.vlgmr.msrb.gmra.mxu2 %v21338_v4 }
 0xac7   : > { %8947 = vmatmul.bf16.vlgmr.msrb.gmra.mxu3 %v21338_v4 }
 0xac9   : > { %v19616_v22 = vpop.f32.mrf.mxu2 }
 0xaca   : > { %v19618_v58 = vpop.f32.mrf.mxu3  ;;  %v8487_v53 = vpop.f32.mrf.mxu0 }
 0xacb   : > { %v19621_v39 = vadd.f32 %v8487_v53, %v19396_v12  ;;  %v8546_v5 = vpop.f32.mrf.mxu1  ;;  %v14230_v12 = vld [vmem:[#allocation2 + $0xb8] sm:$0xff]  ;;  %v21343_v53 = vld [vmem:[#allocation40_spill] sm:$0xff] }
 0xacc   : > { %v19624_v13 = vadd.f32 %v8546_v5, %v19398_v1 }
 0xacd   : > { %21339 = vst [vmem:[#allocation25_spill] sm:$0xff] %v19621_v39 }
 0xace   : > { %21340 = vst [vmem:[#allocation32_spill] sm:$0xff] %v19624_v13 }
 0xad1   : > { %v19628_v33 = vpop.f32.mrf.mxu2 }
 0xad2   : > { %v19630_v29 = vpop.f32.mrf.mxu3  ;;  %v8490_v4 = vpop.f32.mrf.mxu0 }
 0xad3   : > { %v19633_v31 = vadd.f32 %v8490_v4, %v19416_v6  ;;  %v8549_v42 = vpop.f32.mrf.mxu1 }
 0xad4   : > { %v19636_v35 = vadd.f32 %v8549_v42, %v19418_v59 }
 0xad5   : > { %21341 = vst [vmem:[#allocation33_spill] sm:$0xff] %v19633_v31  ;;  %8775 = vmatmul.bf16.gmra.mxu0 %v14230_v12 }
 0xad6   : > { %21342 = vst [vmem:[#allocation29_spill] sm:$0xff] %v19636_v35  ;;  %8834 = vmatmul.bf16.gmra.mxu1 %v14230_v12  ;;  %8893 = vmatmul.bf16.gmra.mxu2 %v21343_v53 }
 0xad7   : > { %8952 = vmatmul.bf16.gmra.mxu3 %v21343_v53 }
 0xad9   : > { %v19642_v5 = vpop.f32.mrf.mxu2 }
 0xada   : > { %v19644_v27 = vpop.f32.mrf.mxu3  ;;  %v8492_v6 = vpop.f32.mrf.mxu0 }
 0xadb   : > { %v19647_v4 = vadd.f32 %v8492_v6, %v19430_v44  ;;  %v8551_v59 = vpop.f32.mrf.mxu1  ;;  %v14231_v44 = vld [vmem:[#allocation2 + $0x40] sm:$0xff]  ;;  %v21348_v6 = vld [vmem:[#allocation61_spill] sm:$0xff] }
 0xadc   : > { %v19650_v42 = vadd.f32 %v8551_v59, %v19432_v36 }
 0xadd   : > { %21344 = vst [vmem:[#allocation35_spill] sm:$0xff] %v19647_v4 }
 0xade   : > { %21345 = vst [vmem:[#allocation71_spill] sm:$0xff] %v19650_v42 }
 0xae1   : > { %v19654_v12 = vpop.f32.mrf.mxu2 }
 0xae2   : > { %v19656_v35 = vpop.f32.mrf.mxu3  ;;  %v8495_v53 = vpop.f32.mrf.mxu0 }
 0xae3   : > { %v19659_v31 = vadd.f32 %v8495_v53, %v19446_v32  ;;  %v8554_v13 = vpop.f32.mrf.mxu1 }
 0xae4   : > { %v19662_v39 = vadd.f32 %v8554_v13, %v19448_v9 }
 0xae5   : > { %21346 = vst [vmem:[#allocation42_spill] sm:$0xff] %v19659_v31  ;;  %8780 = vmatmul.bf16.gmra.mxu0 %v14231_v44 }
 0xae6   : > { %21347 = vst [vmem:[#allocation38_spill] sm:$0xff] %v19662_v39  ;;  %8839 = vmatmul.bf16.gmra.mxu1 %v14231_v44  ;;  %8898 = vmatmul.bf16.gmra.mxu2 %v21348_v6 }
 0xae7   : > { %8957 = vmatmul.bf16.gmra.mxu3 %v21348_v6 }
 0xae9   : > { %v19668_v59 = vpop.f32.mrf.mxu2 }
 0xaea   : > { %v19670_v1 = vpop.f32.mrf.mxu3  ;;  %v8497_v32 = vpop.f32.mrf.mxu0 }
 0xaeb   : > { %v19673_v53 = vadd.f32 %v8497_v32, %v19452_v11  ;;  %v8556_v9 = vpop.f32.mrf.mxu1  ;;  %v14232_v11 = vld [vmem:[#allocation2 + $0x28] sm:$0xff]  ;;  %v21353_v32 = vld [vmem:[#allocation64_spill] sm:$0xff] }
 0xaec   : > { %v19676_v13 = vadd.f32 %v8556_v9, %v19454_v49 }
 0xaed   : > { %21349 = vst [vmem:[#allocation48_spill] sm:$0xff] %v19673_v53 }
 0xaee   : > { %21350 = vst [vmem:[#allocation46_spill] sm:$0xff] %v19676_v13 }
 0xaf1   : > { %v19680_v44 = vpop.f32.mrf.mxu2 }
 0xaf2   : > { %v19682_v39 = vpop.f32.mrf.mxu3  ;;  %v8500_v6 = vpop.f32.mrf.mxu0 }
 0xaf3   : > { %v19685_v31 = vadd.f32 %v8500_v6, %v19464_v37  ;;  %v8559_v42 = vpop.f32.mrf.mxu1 }
 0xaf4   : > { %v19688_v4 = vadd.f32 %v8559_v42, %v19466_v23 }
 0xaf5   : > { %21351 = vst [vmem:[#allocation47_spill] sm:$0xff] %v19685_v31  ;;  %8785 = vmatmul.bf16.gmra.mxu0 %v14232_v11 }
 0xaf6   : > { %21352 = vst [vmem:[#allocation31_spill] sm:$0xff] %v19688_v4  ;;  %8844 = vmatmul.bf16.gmra.mxu1 %v14232_v11  ;;  %8903 = vmatmul.bf16.gmra.mxu2 %v21353_v32 }
 0xaf7   : > { %8962 = vmatmul.bf16.gmra.mxu3 %v21353_v32 }
 0xaf9   : > { %v19694_v9 = vpop.f32.mrf.mxu2 }
 0xafa   : > { %v19696_v36 = vpop.f32.mrf.mxu3  ;;  %v8502_v37 = vpop.f32.mrf.mxu0 }
 0xafb   : > { %v19699_v6 = vadd.f32 %v8502_v37, %v19470_v25  ;;  %v8561_v23 = vpop.f32.mrf.mxu1  ;;  %v14233_v25 = vld [vmem:[#allocation2 + $0xc0] sm:$0xff]  ;;  %v21358_v37 = vld [vmem:[#allocation79_spill] sm:$0xff] }
 0xafc   : > { %v19702_v42 = vadd.f32 %v8561_v23, %v19472_v55 }
 0xafd   : > { %21354 = vst [vmem:[#allocation37_spill] sm:$0xff] %v19699_v6 }
 0xafe   : > { %21355 = vst [vmem:[#allocation91_spill] sm:$0xff] %v19702_v42 }
 0xb01   : > { %v19706_v11 = vpop.f32.mrf.mxu2 }
 0xb02   : > { %v19708_v4 = vpop.f32.mrf.mxu3  ;;  %v8505_v32 = vpop.f32.mrf.mxu0 }
 0xb03   : > { %v19711_v31 = vadd.f32 %v8505_v32, %v19482_v62  ;;  %v8564_v13 = vpop.f32.mrf.mxu1 }
 0xb04   : > { %v19714_v53 = vadd.f32 %v8564_v13, %v19484_v26 }
 0xb05   : > { %21356 = vst [vmem:[#allocation54_spill] sm:$0xff] %v19711_v31  ;;  %8790 = vmatmul.bf16.gmra.mxu0 %v14233_v25 }
 0xb06   : > { %21357 = vst [vmem:[#allocation93_spill] sm:$0xff] %v19714_v53  ;;  %8849 = vmatmul.bf16.gmra.mxu1 %v14233_v25  ;;  %8908 = vmatmul.bf16.gmra.mxu2 %v21358_v37 }
 0xb07   : > { %8967 = vmatmul.bf16.gmra.mxu3 %v21358_v37 }
 0xb09   : > { %v19720_v23 = vpop.f32.mrf.mxu2 }
 0xb0a   : > { %v19722_v49 = vpop.f32.mrf.mxu3  ;;  %v8507_v62 = vpop.f32.mrf.mxu0 }
 0xb0b   : > { %v19725_v32 = vadd.f32 %v8507_v62, %v19488_v57  ;;  %v8566_v26 = vpop.f32.mrf.mxu1  ;;  %v14234_v57 = vld [vmem:[#allocation2 + $0x60] sm:$0xff]  ;;  %v21363_v62 = vld [vmem:[#allocation67_spill] sm:$0xff] }
 0xb0c   : > { %v19728_v13 = vadd.f32 %v8566_v26, %v19490_v52 }
 0xb0d   : > { %21359 = vst [vmem:[#allocation4_spill] sm:$0xff] %v19725_v32 }
 0xb0e   : > { %21360 = vst [vmem:[#allocation6_spill] sm:$0xff] %v19728_v13 }
 0xb11   : > { %v19732_v25 = vpop.f32.mrf.mxu2 }
 0xb12   : > { %v19734_v53 = vpop.f32.mrf.mxu3  ;;  %v8510_v37 = vpop.f32.mrf.mxu0 }
 0xb13   : > { %v19737_v31 = vadd.f32 %v8510_v37, %v19500_v61  ;;  %v8569_v42 = vpop.f32.mrf.mxu1 }
 0xb14   : > { %v19740_v6 = vadd.f32 %v8569_v42, %v19502_v15 }
 0xb15   : > { %21361 = vst [vmem:[#allocation81_spill] sm:$0xff] %v19737_v31  ;;  %8795 = vmatmul.bf16.gmra.mxu0 %v14234_v57 }
 0xb16   : > { %21362 = vst [vmem:[#allocation34_spill] sm:$0xff] %v19740_v6  ;;  %8854 = vmatmul.bf16.gmra.mxu1 %v14234_v57  ;;  %8913 = vmatmul.bf16.gmra.mxu2 %v21363_v62 }
 0xb17   : > { %8972 = vmatmul.bf16.gmra.mxu3 %v21363_v62 }
 0xb19   : > { %v19746_v26 = vpop.f32.mrf.mxu2 }
 0xb1a   : > { %v19748_v55 = vpop.f32.mrf.mxu3  ;;  %v8512_v61 = vpop.f32.mrf.mxu0 }
 0xb1b   : > { %v19751_v37 = vadd.f32 %v8512_v61, %v19506_v38  ;;  %v8571_v15 = vpop.f32.mrf.mxu1  ;;  %v14235_v38 = vld [vmem:[#allocation2 + $0xd0] sm:$0xff] }
 0xb1c   : > { %v19754_v42 = vadd.f32 %v8571_v15, %v19508_v30  ;;  %v21368_v61 = vld [vmem:[#allocation80_spill] sm:$0xff] }
 0xb1d   : > { %21364 = vst [vmem:[#allocation36_spill] sm:$0xff] %v19751_v37 }
 0xb1e   : > { %21365 = vst [vmem:[#allocation8_spill] sm:$0xff] %v19754_v42 }
 0xb21   : > { %v19758_v57 = vpop.f32.mrf.mxu2 }
 0xb22   : > { %v19760_v6 = vpop.f32.mrf.mxu3  ;;  %v8515_v62 = vpop.f32.mrf.mxu0 }
 0xb23   : > { %v19763_v31 = vadd.f32 %v8515_v62, %v19518_v46  ;;  %v8574_v13 = vpop.f32.mrf.mxu1 }
 0xb24   : > { %v19766_v32 = vadd.f32 %v8574_v13, %v19520_v21 }
 0xb25   : > { %21366 = vst [vmem:[#allocation16_spill] sm:$0xff] %v19763_v31  ;;  %8800 = vmatmul.bf16.gmra.mxu0 %v14235_v38 }
 0xb26   : > { %21367 = vst [vmem:[#allocation90_spill] sm:$0xff] %v19766_v32  ;;  %8859 = vmatmul.bf16.gmra.mxu1 %v14235_v38  ;;  %8918 = vmatmul.bf16.gmra.mxu2 %v21368_v61 }
 0xb27   : > { %8977 = vmatmul.bf16.gmra.mxu3 %v21368_v61 }
 0xb29   : > { %v19772_v15 = vpop.f32.mrf.mxu2 }
 0xb2a   : > { %v19774_v52 = vpop.f32.mrf.mxu3  ;;  %v8517_v46 = vpop.f32.mrf.mxu0 }
 0xb2b   : > { %v19777_v62 = vadd.f32 %v8517_v46, %v19524_v20  ;;  %v8576_v21 = vpop.f32.mrf.mxu1  ;;  %v14236_v20 = vld [vmem:[#allocation2 + $0xa8] sm:$0xff]  ;;  %v21375_v46 = vld [vmem:[#allocation13_spill] sm:$0xff] }
 0xb2c   : > { %v19780_v13 = vadd.f32 %v8576_v21, %v19526_v60 }
 0xb2d   : > { %21369 = vst [vmem:[#allocation92_spill] sm:$0xff] %v19777_v62  ;;  %v21380_v62 = vld [vmem:[#allocation19_spill] sm:$0xff] }
 0xb2e   : > { %21370 = vst [vmem:[#allocation45_spill] sm:$0xff] %v19780_v13  ;;  %v14237_v13 = vld [vmem:[#allocation2 + $0x98] sm:$0xff] }
 0xb31   : > { %v19784_v38 = vpop.f32.mrf.mxu2 }
 0xb32   : > { %21371 = vst [vmem:[#allocation41_spill] sm:$0xff] %v19784_v38  ;;  %v19786_v32 = vpop.f32.mrf.mxu3  ;;  %v8520_v61 = vpop.f32.mrf.mxu0 }
 0xb33   : > { %21372 = vst [vmem:[#allocation49_spill] sm:$0xff] %v19786_v32  ;;  %v19789_v31 = vadd.f32 %v8520_v61, %v19536_v63  ;;  %v8579_v42 = vpop.f32.mrf.mxu1 }
 0xb34   : > { %v19792_v37 = vadd.f32 %v8579_v42, %v19538_v51 }
 0xb35   : > { %21373 = vst [vmem:[#allocation50_spill] sm:$0xff] %v19789_v31  ;;  %8805 = vmatmul.bf16.gmra.mxu0 %v14236_v20 }
 0xb36   : > { %21374 = vst [vmem:[#allocation51_spill] sm:$0xff] %v19792_v37  ;;  %8864 = vmatmul.bf16.gmra.mxu1 %v14236_v20  ;;  %8923 = vmatmul.bf16.gmra.mxu2 %v21375_v46 }
 0xb37   : > { %8982 = vmatmul.bf16.gmra.mxu3 %v21375_v46 }
 0xb39   : > { %v19798_v21 = vpop.f32.mrf.mxu2 }
 0xb3a   : > { %v19800_v30 = vpop.f32.mrf.mxu3  ;;  %v8522_v63 = vpop.f32.mrf.mxu0 }
 0xb3b   : > { %v19803_v61 = vadd.f32 %v8522_v63, %v19542_v16  ;;  %v8581_v51 = vpop.f32.mrf.mxu1 }
 0xb3c   : > { %v19806_v42 = vadd.f32 %v8581_v51, %v19544_v18 }
 0xb3d   : > { %21376 = vst [vmem:[#allocation52_spill] sm:$0xff] %v19803_v61 }
 0xb3e   : > { %21377 = vst [vmem:[#allocation55_spill] sm:$0xff] %v19806_v42 }
 0xb41   : > { %v19810_v20 = vpop.f32.mrf.mxu2 }
 0xb42   : > { %21378 = vst [vmem:[#allocation5_spill] sm:$0xff] %v19810_v20  ;;  %v19812_v37 = vpop.f32.mrf.mxu3  ;;  %v8771_v46 = vpop.f32.mrf.mxu0 }
 0xb43   : > { %21379 = vst [vmem:[#allocation26_spill] sm:$0xff] %v19812_v37  ;;  %v8830_v31 = vpop.f32.mrf.mxu1  ;;  %v8772_v16 = vadd.f32 %v8771_v46, %v19560_v8 }
 0xb44   : > { %v8831_v18 = vadd.f32 %v8830_v31, %v19562_v54  ;;  %v14238_v31 = vld [vmem:[#allocation2 + $0xa0] sm:$0xff] }
 0xb45   : > { %8810 = vmatmul.bf16.gmra.mxu0 %v14237_v13 }
 0xb46   : > { %8869 = vmatmul.bf16.gmra.mxu1 %v14237_v13  ;;  %8928 = vmatmul.bf16.gmra.mxu2 %v21380_v62 }
 0xb47   : > { %8987 = vmatmul.bf16.gmra.mxu3 %v21380_v62 }
 0xb49   : > { %v8889_v63 = vpop.f32.mrf.mxu2 }
 0xb4a   : > { %v19818_v51 = vadd.f32 %v8889_v63, %v8772_v16  ;;  %v8948_v60 = vpop.f32.mrf.mxu3  ;;  %v8773_v42 = vpop.f32.mrf.mxu0 }
 0xb4b   : > { %v19820_v61 = vadd.f32 %v8948_v60, %v8831_v18  ;;  %v8832_v37 = vpop.f32.mrf.mxu1  ;;  %v8774_v20 = vadd.f32 %v8773_v42, %v19572_v45 }
 0xb4c   : > { %v8833_v13 = vadd.f32 %v8832_v37, %v19574_v14 }
 0xb51   : > { %v8891_v32 = vpop.f32.mrf.mxu2 }
 0xb52   : > { %v19824_v38 = vadd.f32 %v8891_v32, %v8774_v20  ;;  %v8950_v62 = vpop.f32.mrf.mxu3  ;;  %v8776_v3 = vpop.f32.mrf.mxu0 }
 0xb53   : > { %v19826_v8 = vadd.f32 %v8950_v62, %v8833_v13  ;;  %v8835_v54 = vpop.f32.mrf.mxu1  ;;  %v8777_v60 = vadd.f32 %v8776_v3, %v19590_v19 }
 0xb54   : > { %v8836_v45 = vadd.f32 %v8835_v54, %v19592_v28  ;;  %v13819_v28 = vld [vmem:[#allocation2 + $0xc0] sm:$0xff] }
 0xb55   : > { %8815 = vmatmul.bf16.gmra.mxu0 %v14238_v31 }
 0xb56   : > { %8874 = vmatmul.bf16.gmra.mxu1 %v14238_v31  ;;  %8933 = vmatmul.bf16.gmra.mxu2 %v19351_v10 }
 0xb57   : > { %8992 = vmatmul.bf16.gmra.mxu3 %v19351_v10 }
 0xb59   : > { %v8894_v14 = vpop.f32.mrf.mxu2 }
 0xb5a   : > { %v19832_v37 = vadd.f32 %v8894_v14, %v8777_v60  ;;  %v8953_v32 = vpop.f32.mrf.mxu3  ;;  %v8778_v42 = vpop.f32.mrf.mxu0 }
 0xb5b   : > { %v19834_v20 = vadd.f32 %v8953_v32, %v8836_v45  ;;  %v8837_v46 = vpop.f32.mrf.mxu1  ;;  %v8779_v16 = vadd.f32 %v8778_v42, %v19602_v47 }
 0xb5c   : > { %v8838_v18 = vadd.f32 %v8837_v46, %v19604_v56 }
 0xb61   : > { %v8896_v63 = vpop.f32.mrf.mxu2 }
 0xb62   : > { %v19838_v13 = vadd.f32 %v8896_v63, %v8779_v16  ;;  %v8955_v10 = vpop.f32.mrf.mxu3  ;;  %v8781_v62 = vpop.f32.mrf.mxu0 }
 0xb63   : > { %v19840_v3 = vadd.f32 %v8955_v10, %v8838_v18  ;;  %v8840_v19 = vpop.f32.mrf.mxu1  ;;  %v8782_v54 = vadd.f32 %v8781_v62, %v19616_v22  ;;  %v13820_v10 = vld [vmem:[#allocation2 + $0x60] sm:$0xff] }
 0xb64   : > { %v8841_v47 = vadd.f32 %v8840_v19, %v19618_v58 }
 0xb65   : > { %9046 = vmatmul.bf16.vlgmr.msra.gmra.mxu0 %v19371_v48 }
 0xb66   : > { %9105 = vmatmul.bf16.vlgmr.msra.gmra.mxu1 %v19371_v48  ;;  %9284 = vmatmul.bf16.vlgmr.msra.gmra.mxu2 %v13819_v28 }
 0xb67   : > { %9343 = vmatmul.bf16.vlgmr.msra.gmra.mxu3 %v13819_v28 }
 0xb69   : > { %v8899_v56 = vpop.f32.mrf.mxu2 }
 0xb6a   : > { %v19846_v31 = vadd.f32 %v8899_v56, %v8782_v54  ;;  %v8958_v60 = vpop.f32.mrf.mxu3  ;;  %v8783_v45 = vpop.f32.mrf.mxu0 }
 0xb6b   : > { %v19848_v14 = vadd.f32 %v8958_v60, %v8841_v47  ;;  %v8842_v32 = vpop.f32.mrf.mxu1  ;;  %v8784_v42 = vadd.f32 %v8783_v45, %v19628_v33 }
 0xb6c   : > { %v8843_v46 = vadd.f32 %v8842_v32, %v19630_v29 }
 0xb71   : > { %v8901_v16 = vpop.f32.mrf.mxu2 }
 0xb72   : > { %v19852_v48 = vadd.f32 %v8901_v16, %v8784_v42  ;;  %v8960_v18 = vpop.f32.mrf.mxu3  ;;  %v8786_v63 = vpop.f32.mrf.mxu0  ;;  %v13821_v16 = vld [vmem:[#allocation2 + $0xd0] sm:$0xff] }
 0xb73   : > { %v19854_v22 = vadd.f32 %v8960_v18, %v8843_v46  ;;  %v8845_v58 = vpop.f32.mrf.mxu1  ;;  %v8787_v62 = vadd.f32 %v8786_v63, %v19642_v5 }
 0xb74   : > { %v8846_v33 = vadd.f32 %v8845_v58, %v19644_v27 }
 0xb75   : > { %9051 = vmatmul.bf16.gmra.mxu0 %v19401_v24 }
 0xb76   : > { %9110 = vmatmul.bf16.gmra.mxu1 %v19401_v24  ;;  %9289 = vmatmul.bf16.gmra.mxu2 %v13820_v10 }
 0xb77   : > { %9348 = vmatmul.bf16.gmra.mxu3 %v13820_v10 }
 0xb79   : > { %v8904_v29 = vpop.f32.mrf.mxu2 }
 0xb7a   : > { %v19860_v19 = vadd.f32 %v8904_v29, %v8787_v62  ;;  %v8963_v28 = vpop.f32.mrf.mxu3  ;;  %v8788_v54 = vpop.f32.mrf.mxu0 }
 0xb7b   : > { %v19862_v47 = vadd.f32 %v8963_v28, %v8846_v33  ;;  %v8847_v56 = vpop.f32.mrf.mxu1  ;;  %v8789_v60 = vadd.f32 %v8788_v54, %v19654_v12 }
 0xb7c   : > { %v8848_v45 = vadd.f32 %v8847_v56, %v19656_v35 }
 0xb81   : > { %v8906_v32 = vpop.f32.mrf.mxu2 }
 0xb82   : > { %v19866_v24 = vadd.f32 %v8906_v32, %v8789_v60  ;;  %v8965_v42 = vpop.f32.mrf.mxu3  ;;  %v8791_v46 = vpop.f32.mrf.mxu0 }
 0xb83   : > { %v19868_v5 = vadd.f32 %v8965_v42, %v8848_v45  ;;  %v8850_v27 = vpop.f32.mrf.mxu1  ;;  %v8792_v18 = vadd.f32 %v8791_v46, %v19668_v59  ;;  %v13822_v45 = vld [vmem:[#allocation2 + $0xa8] sm:$0xff] }
 0xb84   : > { %v8851_v12 = vadd.f32 %v8850_v27, %v19670_v1 }
 0xb85   : > { %9056 = vmatmul.bf16.gmra.mxu0 %v19435_v2 }
 0xb86   : > { %9115 = vmatmul.bf16.gmra.mxu1 %v19435_v2  ;;  %9294 = vmatmul.bf16.gmra.mxu2 %v13821_v16 }
 0xb87   : > { %9353 = vmatmul.bf16.gmra.mxu3 %v13821_v16 }
 0xb89   : > { %v8909_v35 = vpop.f32.mrf.mxu2 }
 0xb8a   : > { %v19874_v63 = vadd.f32 %v8909_v35, %v8792_v18  ;;  %v8968_v58 = vpop.f32.mrf.mxu3  ;;  %v8793_v10 = vpop.f32.mrf.mxu0 }
 0xb8b   : > { %v19876_v62 = vadd.f32 %v8968_v58, %v8851_v12  ;;  %v8852_v33 = vpop.f32.mrf.mxu1  ;;  %v8794_v29 = vadd.f32 %v8793_v10, %v19680_v44 }
 0xb8c   : > { %v8853_v28 = vadd.f32 %v8852_v33, %v19682_v39 }
 0xb91   : > { %v8911_v54 = vpop.f32.mrf.mxu2 }
 0xb92   : > { %v19880_v2 = vadd.f32 %v8911_v54, %v8794_v29  ;;  %v8970_v56 = vpop.f32.mrf.mxu3  ;;  %v8796_v60 = vpop.f32.mrf.mxu0  ;;  %v13823_v29 = vld [vmem:[#allocation2 + $0x98] sm:$0xff] }
 0xb93   : > { %v19882_v59 = vadd.f32 %v8970_v56, %v8853_v28  ;;  %v8855_v1 = vpop.f32.mrf.mxu1  ;;  %v8797_v32 = vadd.f32 %v8796_v60, %v19694_v9 }
 0xb94   : > { %v8856_v44 = vadd.f32 %v8855_v1, %v19696_v36 }
 0xb95   : > { %9061 = vmatmul.bf16.gmra.mxu0 %v19457_v0 }
 0xb96   : > { %9120 = vmatmul.bf16.gmra.mxu1 %v19457_v0  ;;  %9299 = vmatmul.bf16.gmra.mxu2 %v13822_v45 }
 0xb97   : > { %9358 = vmatmul.bf16.gmra.mxu3 %v13822_v45 }
 0xb99   : > { %v8914_v39 = vpop.f32.mrf.mxu2 }
 0xb9a   : > { %v19888_v42 = vadd.f32 %v8914_v39, %v8797_v32  ;;  %v8973_v46 = vpop.f32.mrf.mxu3  ;;  %v8798_v27 = vpop.f32.mrf.mxu0  ;;  %v13848_v32 = vld [vmem:[%s20284_s5 + $0x78] sm:$0xff] }
 0xb9b   : > { %v19890_v16 = vadd.f32 %v8973_v46, %v8856_v44  ;;  %v8857_v18 = vpop.f32.mrf.mxu1  ;;  %v8799_v12 = vadd.f32 %v8798_v27, %v19706_v11  ;;  %9659 = vmatpush.bf16.msrb.mxu0 %v13848_v32  ;;  %v13847_v32 = vld [vmem:[%s20284_s5 + $0x70] sm:$0xff] }
 0xb9c   : > { %v8858_v35 = vadd.f32 %v8857_v18, %v19708_v4 }
 0xb9f   : > { %9660 = vmatpush.bf16.msrb.mxu0 %v13847_v32 }
 0xba1   : > { %v8916_v58 = vpop.f32.mrf.mxu2 }
 0xba2   : > { %v19894_v0 = vadd.f32 %v8916_v58, %v8799_v12  ;;  %v8975_v10 = vpop.f32.mrf.mxu3  ;;  %v8801_v33 = vpop.f32.mrf.mxu0  ;;  %v13824_v12 = vld [vmem:[#allocation2 + $0xa0] sm:$0xff] }
 0xba3   : > { %v19896_v9 = vadd.f32 %v8975_v10, %v8858_v35  ;;  %v8860_v36 = vpop.f32.mrf.mxu1  ;;  %v8802_v28 = vadd.f32 %v8801_v33, %v19720_v23 }
 0xba4   : > { %v8861_v11 = vadd.f32 %v8860_v36, %v19722_v49 }
 0xba5   : > { %9066 = vmatmul.bf16.gmra.mxu0 %v19475_v34 }
 0xba6   : > { %9125 = vmatmul.bf16.gmra.mxu1 %v19475_v34  ;;  %9304 = vmatmul.bf16.gmra.mxu2 %v13823_v29 }
 0xba7   : > { %9363 = vmatmul.bf16.gmra.mxu3 %v13823_v29 }
 0xba9   : > { %v8919_v4 = vpop.f32.mrf.mxu2 }
 0xbaa   : > { %v19902_v54 = vadd.f32 %v8919_v4, %v8802_v28  ;;  %v8978_v56 = vpop.f32.mrf.mxu3  ;;  %v8803_v60 = vpop.f32.mrf.mxu0 }
 0xbab   : > { %v19904_v1 = vadd.f32 %v8978_v56, %v8861_v11  ;;  %v8862_v45 = vpop.f32.mrf.mxu1  ;;  %v8804_v34 = vadd.f32 %v8803_v60, %v19732_v25  ;;  %v13868_v25 = vld [vmem:[%s20284_s5 + $0xf8] sm:$0xff] }
 0xbac   : > { %v8863_v44 = vadd.f32 %v8862_v45, %v19734_v53  ;;  %9942 = vmatpush.bf16.msrb.mxu3 %v13868_v25 }
 0xbb1   : > { %v8921_v23 = vpop.f32.mrf.mxu2 }
 0xbb2   : > { %v19911_v39 = vadd.f32 %v8921_v23, %v8804_v34  ;;  %v8980_v49 = vpop.f32.mrf.mxu3  ;;  %v8806_v46 = vpop.f32.mrf.mxu0  ;;  %v13825_v34 = vld [vmem:[#allocation2 + $0x20] sm:$0xff] }
 0xbb3   : > { %v19913_v27 = vadd.f32 %v8980_v49, %v8863_v44  ;;  %v8865_v18 = vpop.f32.mrf.mxu1  ;;  %v8807_v53 = vadd.f32 %v8806_v46, %v19746_v26  ;;  %v13858_v44 = vld [vmem:[%s20284_s5 + $0xb8] sm:$0xff] }
 0xbb4   : > { %v8866_v35 = vadd.f32 %v8865_v18, %v19748_v55  ;;  %9838 = vmatpush.bf16.msrb.mxu2 %v13858_v44 }
 0xbb5   : > { %9071 = vmatmul.bf16.gmra.mxu0 %v19493_v50 }
 0xbb6   : > { %9130 = vmatmul.bf16.gmra.mxu1 %v19493_v50  ;;  %9309 = vmatmul.bf16.gmra.mxu2 %v13824_v12 }
 0xbb7   : > { %9368 = vmatmul.bf16.gmra.mxu3 %v13824_v12 }
 0xbb9   : > { %v8924_v58 = vpop.f32.mrf.mxu2 }
 0xbba   : > { %v19922_v10 = vadd.f32 %v8924_v58, %v8807_v53  ;;  %v8983_v33 = vpop.f32.mrf.mxu3  ;;  %v8808_v36 = vpop.f32.mrf.mxu0  ;;  %v13837_v53 = vld [vmem:[%s20284_s5 + $0x30] sm:$0xff] }
 0xbbb   : > { %v19924_v29 = vadd.f32 %v8983_v33, %v8866_v35  ;;  %v8867_v28 = vpop.f32.mrf.mxu1  ;;  %v8809_v50 = vadd.f32 %v8808_v36, %v19758_v57  ;;  %v13867_v36 = vld [vmem:[%s20284_s5 + $0xf0] sm:$0xff] }
 0xbbc   : > { %v8868_v11 = vadd.f32 %v8867_v28, %v19760_v6  ;;  %v13838_v6 = vld [vmem:[%s20284_s5 + $0x38] sm:$0xff]  ;;  %v13826_v28 = vld [vmem:[#allocation2 + $0x10] sm:$0xff]  ;;  %9943 = vmatpush.bf16.msrb.mxu3 %v13867_v36 }
 0xbbd   : > { %9738 = vmatpush.bf16.msrb.mxu1 %v13838_v6  ;;  %v13846_v6 = vld [vmem:[%s20284_s5 + $0x68] sm:$0xff] }
 0xbbe   : > { %9661 = vmatpush.bf16.msrb.mxu0 %v13846_v6  ;;  %v21381_v6 = vmax.f32 %v19547_v17, %v19552_v40  ;;  %v13845_v17 = vld [vmem:[%s20284_s5 + $0x60] sm:$0xff]  ;;  %v13856_v40 = vld [vmem:[%s20284_s5 + $0xa8] sm:$0xff] }
 0xbc1   : > { %v8926_v4 = vpop.f32.mrf.mxu2  ;;  %9739 = vmatpush.bf16.msrb.mxu1 %v13837_v53 }
 0xbc2   : > { %v19928_v56 = vadd.f32 %v8926_v4, %v8809_v50  ;;  %v8985_v60 = vpop.f32.mrf.mxu3  ;;  %v8811_v26 = vpop.f32.mrf.mxu0  ;;  %v13835_v50 = vld [vmem:[%s20284_s5 + $0x20] sm:$0xff]  ;;  %v13834_v4 = vld [vmem:[%s20284_s5 + $0x18] sm:$0xff]  ;;  %9662 = vmatpush.bf16.msrb.mxu0 %v13845_v17 }
 0xbc3   : > { %v19930_v45 = vadd.f32 %v8985_v60, %v8868_v11  ;;  %v8870_v55 = vpop.f32.mrf.mxu1  ;;  %v8812_v57 = vadd.f32 %v8811_v26, %v19772_v15 }
 0xbc4   : > { %v8871_v23 = vadd.f32 %v8870_v55, %v19774_v52  ;;  %v13836_v52 = vld [vmem:[%s20284_s5 + $0x28] sm:$0xff] }
 0xbc5   : > { %9076 = vmatmul.bf16.gmra.mxu0 %v19511_v41  ;;  %9740 = vmatpush.bf16.msrb.mxu1 %v13836_v52  ;;  %v13866_v52 = vld [vmem:[%s20284_s5 + $0xe8] sm:$0xff] }
 0xbc6   : > { %9135 = vmatmul.bf16.gmra.mxu1 %v19511_v41  ;;  %9314 = vmatmul.bf16.gmra.mxu2 %v13825_v34 }
 0xbc7   : > { %9373 = vmatmul.bf16.gmra.mxu3 %v13825_v34 }
 0xbc8   : > { %9944 = vmatpush.bf16.msrb.mxu3 %v13866_v52 }
 0xbc9   : > { %v8929_v49 = vpop.f32.mrf.mxu2  ;;  %9741 = vmatpush.bf16.msrb.mxu1 %v13835_v50 }
 0xbca   : > { %v19945_v46 = vadd.f32 %v8929_v49, %v8812_v57  ;;  %v8988_v18 = vpop.f32.mrf.mxu3  ;;  %v19947_v12 = vpop.f32.mrf.mxu0  ;;  %v13832_v57 = vld [vmem:[%s20284_s5 + $0x8] sm:$0xff] }
 0xbcb   : > { %v19949_v41 = vadd.f32 %v8988_v18, %v8871_v23  ;;  %v19951_v25 = vpop.f32.mrf.mxu1 }
 0xbcd   : > { %9742 = vmatpush.bf16.msrb.mxu1 %v13834_v4 }
 0xbd1   : > { %v19959_v15 = vpop.f32.mrf.mxu2 }
 0xbd2   : > { %v19961_v35 = vpop.f32.mrf.mxu3  ;;  %v8816_v58 = vpop.f32.mrf.mxu0 }
 0xbd3   : > { %v8875_v33 = vpop.f32.mrf.mxu1  ;;  %v8817_v11 = vadd.f32 %v8816_v58, %v19798_v21  ;;  %v13833_v21 = vld [vmem:[%s20284_s5 + $0x10] sm:$0xff]  ;;  %v13827_v58 = vld [vmem:[#allocation2 + $0xc8] sm:$0xff] }
 0xbd4   : > { %v8876_v60 = vadd.f32 %v8875_v33, %v19800_v30  ;;  %v13857_v30 = vld [vmem:[%s20284_s5 + $0xb0] sm:$0xff]  ;;  %9743 = vmatpush.bf16.msrb.mxu1 %v13833_v21  ;;  %v13831_v33 = vld [vmem:[%s20284_s5] sm:$0xff] }
 0xbd5   : > { %9081 = vmatmul.bf16.gmra.mxu0 %v19529_v7  ;;  %9839 = vmatpush.bf16.msrb.mxu2 %v13857_v30 }
 0xbd6   : > { %9140 = vmatmul.bf16.gmra.mxu1 %v19529_v7  ;;  %9319 = vmatmul.bf16.gmra.mxu2 %v13826_v28 }
 0xbd7   : > { %9378 = vmatmul.bf16.gmra.mxu3 %v13826_v28 }
 0xbd8   : > { %9744 = vmatpush.bf16.msrb.mxu1 %v13832_v57 }
 0xbd9   : > { %v8934_v26 = vpop.f32.mrf.mxu2  ;;  %9840 = vmatpush.bf16.msrb.mxu2 %v13856_v40 }
 0xbda   : > { %v19976_v55 = vadd.f32 %v8934_v26, %v8817_v11  ;;  %v8993_v32 = vpop.f32.mrf.mxu3  ;;  %v19978_v34 = vpop.f32.mrf.mxu0 }
 0xbdb   : > { %v19980_v44 = vadd.f32 %v8993_v32, %v8876_v60  ;;  %v19982_v7 = vpop.f32.mrf.mxu1 }
 0xbdc   : > { %9745 = vmatpush.bf16.msrb.mxu1 %v13831_v33 }
 0xbe1   : > { %v19996_v23 = vpop.f32.mrf.mxu2 }
 0xbe2   : > { %v19998_v49 = vpop.f32.mrf.mxu3  ;;  %v9047_v18 = vpop.f32.mrf.mxu0 }
 0xbe3   : > { %v9106_v53 = vpop.f32.mrf.mxu1  ;;  %v9156_v36 = vadd.f32 %v9047_v18, %v19818_v51 }
 0xbe4   : > { %v9157_v28 = vadd.f32 %v9106_v53, %v19820_v61  ;;  %v20018_v61 = vld [vmem:[%s20283_s4] ss:$0 sm:$0xff] }
 0xbe5   : > { %9086 = vmatmul.bf16.gmra.mxu0 %v19549_v43 }
 0xbe6   : > { %9145 = vmatmul.bf16.gmra.mxu1 %v19549_v43  ;;  %9324 = vmatmul.bf16.gmra.mxu2 %v13827_v58 }
 0xbe7   : > { %9383 = vmatmul.bf16.gmra.mxu3 %v13827_v58 }
 0xbe9   : > { %v9285_v50 = vpop.f32.mrf.mxu2 }
 0xbea   : > { %v9394_v11 = vadd.f32 %v9285_v50, %v9156_v36  ;;  %v9344_v4 = vpop.f32.mrf.mxu3  ;;  %v9049_v60 = vpop.f32.mrf.mxu0  ;;  %v21382_v36 = vld [vmem:[#allocation14_spill] sm:$0xff] }
 0xbeb   : > { %v9395_v26 = vadd.f32 %v9344_v4, %v9157_v28  ;;  %v9108_v32 = vpop.f32.mrf.mxu1  ;;  %v9158_v43 = vadd.f32 %v9049_v60, %v19824_v38  ;;  %v13828_v38 = vld [vmem:[#allocation2 + $0x70] sm:$0xff]  ;;  %v21383_v50 = vld [vmem:[#allocation18_spill] sm:$0xff] }
 0xbec   : > { %v9159_v57 = vadd.f32 %v9108_v32, %v19826_v8  ;;  %v13844_v32 = vld [vmem:[%s20284_s5 + $0x58] sm:$0xff] }
 0xbed   : > { %v9434_v21 = vmax.f32 %v9394_v11, %v9395_v26  ;;  %v21384_v11 = vld [vmem:[#allocation84_spill] sm:$0xff]  ;;  %9663 = vmatpush.bf16.msrb.mxu0 %v13844_v32 }
 0xbee   : > { %v21385_v4 = vmax.f32 %v21383_v50, %v21384_v11  ;;  %v13842_v50 = vld [vmem:[%s20284_s5 + $0x48] sm:$0xff] }
 0xbef   : > { %v9454_v30 = vmax.f32 %v21381_v6, %v9434_v21 }
 0xbf1   : > { %v9287_v52 = vpop.f32.mrf.mxu2  ;;  %v9478_v28 = vadd.f32 %v20018_v61, %v9454_v30 }
 0xbf2   : > { %v9396_v58 = vadd.f32 %v9287_v52, %v9158_v43  ;;  %v9346_v51 = vpop.f32.mrf.mxu3  ;;  %v9052_v18 = vpop.f32.mrf.mxu0 }
 0xbf3   : > { %v9397_v53 = vadd.f32 %v9346_v51, %v9159_v57  ;;  %v9111_v33 = vpop.f32.mrf.mxu1  ;;  %v9160_v26 = vadd.f32 %v9052_v18, %v19832_v37  ;;  %v13843_v37 = vld [vmem:[%s20284_s5 + $0x50] sm:$0xff] }
 0xbf4   : > { %v9161_v6 = vadd.f32 %v9111_v33, %v19834_v20  ;;  %v13865_v33 = vld [vmem:[%s20284_s5 + $0xe0] sm:$0xff]  ;;  %9664 = vmatpush.bf16.msrb.mxu0 %v13843_v37 }
 0xbf5   : > { %v9435_v8 = vmax.f32 %v9396_v58, %v9397_v53  ;;  %9091 = vmatmul.bf16.gmra.mxu0 %v21382_v36  ;;  %v9498_v58 = vmax.f32 %v9478_v28, 0.0  ;;  %9945 = vmatpush.bf16.msrb.mxu3 %v13865_v33 }
 0xbf6   : > { %9150 = vmatmul.bf16.gmra.mxu1 %v21382_v36  ;;  %9329 = vmatmul.bf16.gmra.mxu2 %v13828_v38 }
 0xbf7   : > { %v9455_v60 = vmax.f32 %v21385_v4, %v9435_v8  ;;  %9388 = vmatmul.bf16.gmra.mxu3 %v13828_v38  ;;  %v21386_v38 = vld [vmem:[#allocation24_spill] sm:$0xff]  ;;  %v21387_v8 = vld [vmem:[#allocation57_spill] sm:$0xff] }
 0xbf8   : > { %v21388_v36 = vmax.f32 %v21386_v38, %v21387_v8  ;;  %9665 = vmatpush.bf16.msrb.mxu0 %v13842_v50 }
 0xbf9   : > { %v9479_v21 = vadd.f32 %v20018_v61, %v9455_v60  ;;  %v9290_v43 = vpop.f32.mrf.mxu2 }
 0xbfa   : > { %v9398_v57 = vadd.f32 %v9290_v43, %v9160_v26  ;;  %v9349_v52 = vpop.f32.mrf.mxu3  ;;  %v9054_v30 = vpop.f32.mrf.mxu0  ;;  %v13855_v43 = vld [vmem:[%s20284_s5 + $0xa0] sm:$0xff] }
 0xbfb   : > { %v9499_v51 = vmax.f32 %v9479_v21, 0.0  ;;  %v9399_v53 = vadd.f32 %v9349_v52, %v9161_v6  ;;  %v9113_v40 = vpop.f32.mrf.mxu1  ;;  %v9162_v28 = vadd.f32 %v9054_v30, %v19838_v13  ;;  %v13841_v13 = vld [vmem:[%s20284_s5 + $0x40] sm:$0xff]  ;;  %9841 = vmatpush.bf16.msrb.mxu2 %v13855_v43  ;;  %v21389_v30 = vld [vmem:[#allocation28_spill] sm:$0xff] }
 0xbfc   : > { %v9163_v11 = vadd.f32 %v9113_v40, %v19840_v3  ;;  %9666 = vmatpush.bf16.msrb.mxu0 %v13841_v13 }
 0xbfd   : > { %v14038_v18 = vpack.c.bf16 %v9499_v51, %v9498_v58  ;;  %v9436_v17 = vmax.f32 %v9398_v57, %v9399_v53  ;;  %v21390_v58 = vld [vmem:[#allocation23_spill] sm:$0xff] }
 0xbfe   : > { %v21391_v51 = vmax.f32 %v21389_v30, %v21390_v58 }
 0xbff   : > { %14039 = vst [vmem:[#allocation3] sm:$0xff] %v14038_v18   ;;  %v9456_v20 = vmax.f32 %v21388_v36, %v9436_v17 }
 0xc01   : > { %v9292_v4 = vpop.f32.mrf.mxu2  ;;  %v9480_v3 = vadd.f32 %v20018_v61, %v9456_v20 }
 0xc02   : > { %v9400_v60 = vadd.f32 %v9292_v4, %v9162_v28  ;;  %v9351_v26 = vpop.f32.mrf.mxu3  ;;  %v9057_v32 = vpop.f32.mrf.mxu0 }
 0xc03   : > { %v9401_v21 = vadd.f32 %v9351_v26, %v9163_v11  ;;  %v9116_v6 = vpop.f32.mrf.mxu1  ;;  %v9164_v40 = vadd.f32 %v9057_v32, %v19846_v31  ;;  %v9500_v33 = vmax.f32 %v9480_v3, 0.0  ;;  %v21393_v26 = vld [vmem:[#allocation30_spill] sm:$0xff]  ;;  %v13864_v32 = vld [vmem:[%s20284_s5 + $0xd8] sm:$0xff] }
 0xc04   : > { %v9165_v18 = vadd.f32 %v9116_v6, %v19848_v14  ;;  %9946 = vmatpush.bf16.msrb.mxu3 %v13864_v32  ;;  %v21399_v32 = vld [vmem:[#allocation29_spill] sm:$0xff] }
 0xc05   : > { %v9437_v57 = vmax.f32 %v9400_v60, %v9401_v21  ;;  %v21392_v60 = vld [vmem:[#allocation27_spill] sm:$0xff] }
 0xc06   : > { %v13829_v52 = vld [vmem:[#allocation3] sm:$0xff]  ;;  %v21394_v21 = vmax.f32 %v21392_v60, %v21393_v26 }
 0xc07   : > { %v9457_v53 = vmax.f32 %v21391_v51, %v9437_v57  ;;  %9746 = vmatmul.bf16.vlgmr.msrb.gmra.mxu1 %v13829_v52 }
 0xc09   : > { %v9481_v37 = vadd.f32 %v20018_v61, %v9457_v53  ;;  %v9295_v17 = vpop.f32.mrf.mxu2 }
 0xc0a   : > { %v9402_v38 = vadd.f32 %v9295_v17, %v9164_v40  ;;  %v9354_v8 = vpop.f32.mrf.mxu3  ;;  %v9059_v36 = vpop.f32.mrf.mxu0  ;;  %v21395_v40 = vld [vmem:[#allocation25_spill] sm:$0xff] }
 0xc0b   : > { %v9501_v28 = vmax.f32 %v9481_v37, 0.0  ;;  %v9403_v50 = vadd.f32 %v9354_v8, %v9165_v18  ;;  %v9118_v20 = vpop.f32.mrf.mxu1  ;;  %v9166_v14 = vadd.f32 %v9059_v36, %v19852_v48  ;;  %v21396_v37 = vld [vmem:[#allocation32_spill] sm:$0xff]  ;;  %v13854_v48 = vld [vmem:[%s20284_s5 + $0x98] sm:$0xff] }
 0xc0c   : > { %v9167_v6 = vadd.f32 %v9118_v20, %v19854_v22  ;;  %v21397_v18 = vmax.f32 %v21395_v40, %v21396_v37  ;;  %9842 = vmatpush.bf16.msrb.mxu2 %v13854_v48 }
 0xc0d   : > { %v14043_v11 = vpack.c.bf16 %v9501_v28, %v9500_v33  ;;  %v9438_v4 = vmax.f32 %v9402_v38, %v9403_v50 }
 0xc0f   : > { %14111 = vst [vmem:[#allocation3 + $0x40] sm:$0xff] %v14043_v11   ;;  %v9458_v31 = vmax.f32 %v21394_v21, %v9438_v4 }
 0xc11   : > { %v9297_v43 = vpop.f32.mrf.mxu2  ;;  %v9482_v53 = vadd.f32 %v20018_v61, %v9458_v31  ;;  %v21398_v31 = vld [vmem:[#allocation33_spill] sm:$0xff] }
 0xc12   : > { %v9404_v13 = vadd.f32 %v9297_v43, %v9166_v14  ;;  %v9356_v57 = vpop.f32.mrf.mxu3  ;;  %v9062_v52 = vpop.f32.mrf.mxu0  ;;  %v13852_v43 = vld [vmem:[%s20284_s5 + $0x88] sm:$0xff] }
 0xc13   : > { %v9405_v3 = vadd.f32 %v9356_v57, %v9167_v6  ;;  %v9121_v30 = vpop.f32.mrf.mxu1  ;;  %v9168_v38 = vadd.f32 %v9062_v52, %v19860_v19  ;;  %v9502_v20 = vmax.f32 %v9482_v53, 0.0  ;;  %v13853_v19 = vld [vmem:[%s20284_s5 + $0x90] sm:$0xff] }
 0xc14   : > { %v9169_v8 = vadd.f32 %v9121_v30, %v19862_v47  ;;  %9843 = vmatpush.bf16.msrb.mxu2 %v13853_v19  ;;  %v21400_v47 = vmax.f32 %v21398_v31, %v21399_v32  ;;  %v13863_v53 = vld [vmem:[%s20284_s5 + $0xd0] sm:$0xff]  ;;  %v21404_v31 = vld [vmem:[#allocation42_spill] sm:$0xff] }
 0xc15   : > { %v9439_v58 = vmax.f32 %v9404_v13, %v9405_v3  ;;  %9947 = vmatpush.bf16.msrb.mxu3 %v13863_v53  ;;  %v21405_v32 = vld [vmem:[#allocation38_spill] sm:$0xff] }
 0xc16   : > { %v13830_v51 = vld [vmem:[#allocation3 + $0x40] sm:$0xff] }
 0xc17   : > { %v9459_v17 = vmax.f32 %v21397_v18, %v9439_v58  ;;  %9751 = vmatmul.bf16.gmra.mxu1 %v13830_v51  ;;  %v21401_v18 = vld [vmem:[#allocation35_spill] sm:$0xff] }
 0xc18   : > { %9844 = vmatpush.bf16.msrb.mxu2 %v13852_v43 }
 0xc19   : > { %v9483_v22 = vadd.f32 %v20018_v61, %v9459_v17  ;;  %v9300_v36 = vpop.f32.mrf.mxu2  ;;  %v21402_v17 = vld [vmem:[#allocation71_spill] sm:$0xff] }
 0xc1a   : > { %v9406_v33 = vadd.f32 %v9300_v36, %v9168_v38  ;;  %v9359_v28 = vpop.f32.mrf.mxu3  ;;  %v9064_v50 = vpop.f32.mrf.mxu0  ;;  %v21403_v38 = vmax.f32 %v21401_v18, %v21402_v17 }
 0xc1b   : > { %v9503_v11 = vmax.f32 %v9483_v22, 0.0  ;;  %v9407_v4 = vadd.f32 %v9359_v28, %v9169_v8  ;;  %v9123_v60 = vpop.f32.mrf.mxu1  ;;  %v9170_v6 = vadd.f32 %v9064_v50, %v19866_v24  ;;  %v13851_v24 = vld [vmem:[%s20284_s5 + $0x80] sm:$0xff] }
 0xc1c   : > { %v9171_v13 = vadd.f32 %v9123_v60, %v19868_v5  ;;  %9845 = vmatpush.bf16.msrb.mxu2 %v13851_v24  ;;  %v21407_v24 = vld [vmem:[#allocation48_spill] sm:$0xff] }
 0xc1d   : > { %v14048_v26 = vpack.c.bf16 %v9503_v11, %v9502_v20  ;;  %v9440_v21 = vmax.f32 %v9406_v33, %v9407_v4 }
 0xc1f   : > { %14112 = vst [vmem:[#allocation3 + $0x18] sm:$0xff] %v14048_v26   ;;  %v9460_v14 = vmax.f32 %v21400_v47, %v9440_v21  ;;  %v21406_v47 = vmax.f32 %v21404_v31, %v21405_v32 }
 0xc21   : > { %v9302_v57 = vpop.f32.mrf.mxu2  ;;  %v9484_v5 = vadd.f32 %v20018_v61, %v9460_v14 }
 0xc22   : > { %v9408_v52 = vadd.f32 %v9302_v57, %v9170_v6  ;;  %v9361_v3 = vpop.f32.mrf.mxu3  ;;  %v9067_v30 = vpop.f32.mrf.mxu0 }
 0xc23   : > { %v9409_v58 = vadd.f32 %v9361_v3, %v9171_v13  ;;  %v9126_v51 = vpop.f32.mrf.mxu1  ;;  %v9172_v22 = vadd.f32 %v9067_v30, %v19874_v63  ;;  %v9504_v11 = vmax.f32 %v9484_v5, 0.0  ;;  %v13862_v30 = vld [vmem:[%s20284_s5 + $0xc8] sm:$0xff] }
 0xc24   : > { %v9173_v36 = vadd.f32 %v9126_v51, %v19876_v62  ;;  %9948 = vmatpush.bf16.msrb.mxu3 %v13862_v30 }
 0xc25   : > { %v9441_v40 = vmax.f32 %v9408_v52, %v9409_v58 }
 0xc26   : > { %v13839_v37 = vld [vmem:[#allocation3 + $0x18] sm:$0xff] }
 0xc27   : > { %v9461_v48 = vmax.f32 %v21403_v38, %v9441_v40  ;;  %9667 = vmatmul.bf16.vlgmr.msrb.gmra.mxu0 %v13839_v37  ;;  %v21408_v40 = vld [vmem:[#allocation46_spill] sm:$0xff] }
 0xc29   : > { %v9485_v8 = vadd.f32 %v20018_v61, %v9461_v48  ;;  %v9305_v33 = vpop.f32.mrf.mxu2 }
 0xc2a   : > { %v9410_v28 = vadd.f32 %v9305_v33, %v9172_v22  ;;  %v9364_v50 = vpop.f32.mrf.mxu3  ;;  %v9069_v20 = vpop.f32.mrf.mxu0 }
 0xc2b   : > { %v9505_v4 = vmax.f32 %v9485_v8, 0.0  ;;  %v9411_v60 = vadd.f32 %v9364_v50, %v9173_v36  ;;  %v9128_v19 = vpop.f32.mrf.mxu1  ;;  %v9174_v14 = vadd.f32 %v9069_v20, %v19880_v2  ;;  %v21409_v2 = vmax.f32 %v21407_v24, %v21408_v40 }
 0xc2c   : > { %v9175_v6 = vadd.f32 %v9128_v19, %v19882_v59 }
 0xc2d   : > { %v14053_v26 = vpack.c.bf16 %v9505_v4, %v9504_v11  ;;  %v9442_v21 = vmax.f32 %v9410_v28, %v9411_v60  ;;  %v21410_v11 = vld [vmem:[#allocation47_spill] sm:$0xff] }
 0xc2e   : > { %v21411_v4 = vld [vmem:[#allocation31_spill] sm:$0xff] }
 0xc2f   : > { %14113 = vst [vmem:[#allocation3 + $0x20] sm:$0xff] %v14053_v26   ;;  %v9462_v63 = vmax.f32 %v21406_v47, %v9442_v21  ;;  %v21412_v60 = vmax.f32 %v21410_v11, %v21411_v4 }
 0xc31   : > { %v9307_v62 = vpop.f32.mrf.mxu2  ;;  %v9486_v53 = vadd.f32 %v20018_v61, %v9462_v63 }
 0xc32   : > { %v9412_v43 = vadd.f32 %v9307_v62, %v9174_v14  ;;  %v9366_v13 = vpop.f32.mrf.mxu3  ;;  %v9072_v57 = vpop.f32.mrf.mxu0  ;;  %v13861_v14 = vld [vmem:[%s20284_s5 + $0xc0] sm:$0xff] }
 0xc33   : > { %v9413_v52 = vadd.f32 %v9366_v13, %v9175_v6  ;;  %v9131_v3 = vpop.f32.mrf.mxu1  ;;  %v9176_v59 = vadd.f32 %v9072_v57, %v19888_v42  ;;  %v9506_v8 = vmax.f32 %v9486_v53, 0.0  ;;  %9949 = vmatpush.bf16.msrb.mxu3 %v13861_v14  ;;  %v21413_v13 = vld [vmem:[#allocation37_spill] sm:$0xff]  ;;  %v21414_v57 = vld [vmem:[#allocation91_spill] sm:$0xff] }
 0xc34   : > { %v9177_v18 = vadd.f32 %v9131_v3, %v19890_v16  ;;  %v13878_v3 = vld [vmem:[%s20284_s5 + $0x138] sm:$0xff] }
 0xc35   : > { %v9443_v58 = vmax.f32 %v9412_v43, %v9413_v52  ;;  %10046 = vmatpush.bf16.msra.mxu0 %v13878_v3 }
 0xc36   : > { %v13840_v51 = vld [vmem:[#allocation3 + $0x20] sm:$0xff] }
 0xc37   : > { %v9463_v37 = vmax.f32 %v21409_v2, %v9443_v58  ;;  %9672 = vmatmul.bf16.gmra.mxu0 %v13840_v51  ;;  %14120 = vmatpush.bf16.msra.mxu3 %v13878_v3 }
 0xc39   : > { %v9487_v5 = vadd.f32 %v20018_v61, %v9463_v37  ;;  %v9310_v17 = vpop.f32.mrf.mxu2 }
 0xc3a   : > { %v9414_v38 = vadd.f32 %v9310_v17, %v9176_v59  ;;  %v9369_v48 = vpop.f32.mrf.mxu3  ;;  %v9074_v22 = vpop.f32.mrf.mxu0 }
 0xc3b   : > { %v9507_v36 = vmax.f32 %v9487_v5, 0.0  ;;  %v9415_v33 = vadd.f32 %v9369_v48, %v9177_v18  ;;  %v9133_v28 = vpop.f32.mrf.mxu1  ;;  %v9178_v19 = vadd.f32 %v9074_v22, %v19894_v0  ;;  %v21415_v0 = vmax.f32 %v21413_v13, %v21414_v57 }
 0xc3c   : > { %v9179_v26 = vadd.f32 %v9133_v28, %v19896_v9 }
 0xc3d   : > { %v14058_v50 = vpack.c.bf16 %v9507_v36, %v9506_v8  ;;  %v9444_v20 = vmax.f32 %v9414_v38, %v9415_v33  ;;  %v21417_v38 = vld [vmem:[#allocation93_spill] sm:$0xff]  ;;  %v13876_v36 = vld [vmem:[%s20284_s5 + $0x128] sm:$0xff] }
 0xc3f   : > { %14114 = vst [vmem:[#allocation3 + $0x38] sm:$0xff] %v14058_v50   ;;  %v9464_v42 = vmax.f32 %v21412_v60, %v9444_v20 }
 0xc41   : > { %v9312_v16 = vpop.f32.mrf.mxu2  ;;  %v9488_v43 = vadd.f32 %v20018_v61, %v9464_v42  ;;  %v13875_v42 = vld [vmem:[%s20284_s5 + $0x120] sm:$0xff] }
 0xc42   : > { %v9416_v21 = vadd.f32 %v9312_v16, %v9178_v19  ;;  %v9371_v31 = vpop.f32.mrf.mxu3  ;;  %v9077_v32 = vpop.f32.mrf.mxu0  ;;  %v21419_v16 = vld [vmem:[#allocation4_spill] sm:$0xff] }
 0xc43   : > { %v9417_v47 = vadd.f32 %v9371_v31, %v9179_v26  ;;  %v9136_v63 = vpop.f32.mrf.mxu1  ;;  %v9180_v9 = vadd.f32 %v9077_v32, %v19902_v54  ;;  %v9508_v2 = vmax.f32 %v9488_v43, 0.0  ;;  %v13877_v54 = vld [vmem:[%s20284_s5 + $0x130] sm:$0xff] }
 0xc44   : > { %v9181_v58 = vadd.f32 %v9136_v63, %v19904_v1  ;;  %10047 = vmatpush.bf16.msra.mxu0 %v13877_v54  ;;  %14121 = vmatpush.bf16.msra.mxu3 %v13877_v54  ;;  %v21416_v1 = vld [vmem:[#allocation54_spill] sm:$0xff] }
 0xc45   : > { %v9445_v6 = vmax.f32 %v9416_v21, %v9417_v47  ;;  %v21418_v48 = vmax.f32 %v21416_v1, %v21417_v38  ;;  %v13874_v47 = vld [vmem:[%s20284_s5 + $0x118] sm:$0xff]  ;;  %v13871_v1 = vld [vmem:[%s20284_s5 + $0x100] sm:$0xff] }
 0xc46   : > { %v13849_v62 = vld [vmem:[#allocation3 + $0x38] sm:$0xff] }
 0xc47   : > { %v9465_v52 = vmax.f32 %v21415_v0, %v9445_v6  ;;  %9846 = vmatmul.bf16.vlgmr.msrb.gmra.mxu2 %v13849_v62 }
 0xc48   : > { %10048 = vmatpush.bf16.msra.mxu0 %v13876_v36  ;;  %14122 = vmatpush.bf16.msra.mxu3 %v13876_v36 }
 0xc49   : > { %v9489_v30 = vadd.f32 %v20018_v61, %v9465_v52  ;;  %v9315_v51 = vpop.f32.mrf.mxu2 }
 0xc4a   : > { %v9418_v53 = vadd.f32 %v9315_v51, %v9180_v9  ;;  %v9374_v24 = vpop.f32.mrf.mxu3  ;;  %v9079_v40 = vpop.f32.mrf.mxu0 }
 0xc4b   : > { %v9509_v37 = vmax.f32 %v9489_v30, 0.0  ;;  %v9419_v59 = vadd.f32 %v9374_v24, %v9181_v58  ;;  %v9138_v5 = vpop.f32.mrf.mxu1  ;;  %v9182_v8 = vadd.f32 %v9079_v40, %v19911_v39  ;;  %v21423_v58 = vld [vmem:[#allocation34_spill] sm:$0xff]  ;;  %v13872_v40 = vld [vmem:[%s20284_s5 + $0x108] sm:$0xff] }
 0xc4c   : > { %v9183_v33 = vadd.f32 %v9138_v5, %v19913_v27  ;;  %10049 = vmatpush.bf16.msra.mxu0 %v13875_v42  ;;  %14123 = vmatpush.bf16.msra.mxu3 %v13875_v42  ;;  %v21420_v27 = vld [vmem:[#allocation6_spill] sm:$0xff] }
 0xc4d   : > { %v14063_v18 = vpack.c.bf16 %v9509_v37, %v9508_v2  ;;  %v9446_v17 = vmax.f32 %v9418_v53, %v9419_v59  ;;  %v21421_v21 = vmax.f32 %v21419_v16, %v21420_v27  ;;  %v21428_v16 = vld [vmem:[#allocation41_spill] sm:$0xff] }
 0xc4e   : > { %v8814_v27 = vadd.f32 %v19947_v12, %v21428_v16 }
 0xc4f   : > { %14115 = vst [vmem:[#allocation3 + $0x48] sm:$0xff] %v14063_v18   ;;  %v9466_v22 = vmax.f32 %v21418_v48, %v9446_v17 }
 0xc50   : > { %10050 = vmatpush.bf16.msra.mxu0 %v13874_v47  ;;  %14124 = vmatpush.bf16.msra.mxu3 %v13874_v47  ;;  %v9032_v47 = vadd.f32 %v19959_v15, %v8814_v27  ;;  %v21433_v15 = vld [vmem:[#allocation92_spill] sm:$0xff] }
 0xc51   : > { %v9317_v28 = vpop.f32.mrf.mxu2  ;;  %v9490_v26 = vadd.f32 %v20018_v61, %v9466_v22  ;;  %v21425_v22 = vld [vmem:[#allocation36_spill] sm:$0xff] }
 0xc52   : > { %v9420_v50 = vadd.f32 %v9317_v28, %v9182_v8  ;;  %v9376_v20 = vpop.f32.mrf.mxu3  ;;  %v9082_v11 = vpop.f32.mrf.mxu0 }
 0xc53   : > { %v9421_v4 = vadd.f32 %v9376_v20, %v9183_v33  ;;  %v9141_v60 = vpop.f32.mrf.mxu1  ;;  %v9184_v32 = vadd.f32 %v9082_v11, %v19922_v10  ;;  %v9510_v57 = vmax.f32 %v9490_v26, 0.0  ;;  %v13873_v10 = vld [vmem:[%s20284_s5 + $0x110] sm:$0xff] }
 0xc54   : > { %v9185_v14 = vadd.f32 %v9141_v60, %v19924_v29  ;;  %10051 = vmatpush.bf16.msra.mxu0 %v13873_v10  ;;  %14125 = vmatpush.bf16.msra.mxu3 %v13873_v10  ;;  %v21422_v29 = vld [vmem:[#allocation81_spill] sm:$0xff] }
 0xc55   : > { %v9447_v19 = vmax.f32 %v9420_v50, %v9421_v4  ;;  %v21424_v51 = vmax.f32 %v21422_v29, %v21423_v58  ;;  %v21434_v29 = vld [vmem:[#allocation45_spill] sm:$0xff] }
 0xc56   : > { %v13850_v39 = vld [vmem:[#allocation3 + $0x48] sm:$0xff] }
 0xc57   : > { %v9467_v31 = vmax.f32 %v21421_v21, %v9447_v19  ;;  %9851 = vmatmul.bf16.gmra.mxu2 %v13850_v39  ;;  %v21429_v21 = vld [vmem:[#allocation49_spill] sm:$0xff] }
 0xc58   : > { %10052 = vmatpush.bf16.msra.mxu0 %v13872_v40  ;;  %14126 = vmatpush.bf16.msra.mxu3 %v13872_v40 }
 0xc59   : > { %v9491_v63 = vadd.f32 %v20018_v61, %v9467_v31  ;;  %v9320_v6 = vpop.f32.mrf.mxu2  ;;  %v8873_v31 = vadd.f32 %v19951_v25, %v21429_v21 }
 0xc5a   : > { %v9422_v62 = vadd.f32 %v9320_v6, %v9184_v32  ;;  %v9379_v43 = vpop.f32.mrf.mxu3  ;;  %v9084_v13 = vpop.f32.mrf.mxu0 }
 0xc5b   : > { %v9511_v0 = vmax.f32 %v9491_v63, 0.0  ;;  %v9423_v52 = vadd.f32 %v9379_v43, %v9185_v14  ;;  %v9143_v9 = vpop.f32.mrf.mxu1  ;;  %v9186_v24 = vadd.f32 %v9084_v13, %v19928_v56  ;;  %v21430_v63 = vld [vmem:[#allocation16_spill] sm:$0xff]  ;;  %v21431_v14 = vld [vmem:[#allocation90_spill] sm:$0xff] }
 0xc5c   : > { %v9187_v2 = vadd.f32 %v9143_v9, %v19930_v45  ;;  %10053 = vmatpush.bf16.msra.mxu0 %v13871_v1  ;;  %14127 = vmatpush.bf16.msra.mxu3 %v13871_v1  ;;  %v21426_v45 = vld [vmem:[#allocation8_spill] sm:$0xff]  ;;  %v21432_v6 = vmax.f32 %v21430_v63, %v21431_v14  ;;  %v21437_v1 = vld [vmem:[#allocation26_spill] sm:$0xff]  ;;  %v13882_v14 = vld [vmem:[%s20286_s7 + $0x18] sm:$0xff] }
 0xc5d   : > { %v14068_v3 = vpack.c.bf16 %v9511_v0, %v9510_v57  ;;  %v9448_v30 = vmax.f32 %v9422_v62, %v9423_v52  ;;  %v21427_v8 = vmax.f32 %v21425_v22, %v21426_v45  ;;  %v13883_v63 = vld [vmem:[%s20286_s7 + $0x20] sm:$0xff] }
 0xc5f   : > { %14116 = vst [vmem:[#allocation3 + $0x8] sm:$0xff] %v14068_v3   ;;  %v9468_v53 = vmax.f32 %v21424_v51, %v9448_v30 }
 0xc61   : > { %v9322_v37 = vpop.f32.mrf.mxu2  ;;  %v9492_v48 = vadd.f32 %v20018_v61, %v9468_v53 }
 0xc62   : > { %v9424_v59 = vadd.f32 %v9322_v37, %v9186_v24  ;;  %v9381_v5 = vpop.f32.mrf.mxu3  ;;  %v9087_v54 = vpop.f32.mrf.mxu0 }
 0xc63   : > { %v9425_v18 = vadd.f32 %v9381_v5, %v9187_v2  ;;  %v9146_v17 = vpop.f32.mrf.mxu1  ;;  %v9188_v33 = vadd.f32 %v9087_v54, %v19945_v46  ;;  %v9512_v42 = vmax.f32 %v9492_v48, 0.0 }
 0xc64   : > { %v9189_v50 = vadd.f32 %v9146_v17, %v19949_v41  ;;  %v9033_v41 = vadd.f32 %v19961_v35, %v8873_v31  ;;  %v21435_v35 = vmax.f32 %v21433_v15, %v21434_v29 }
 0xc65   : > { %v9449_v38 = vmax.f32 %v9424_v59, %v9425_v18  ;;  %v21436_v18 = vld [vmem:[#allocation5_spill] sm:$0xff] }
 0xc66   : > { %v13859_v56 = vld [vmem:[#allocation3 + $0x8] sm:$0xff]  ;;  %v8819_v17 = vadd.f32 %v19978_v34, %v21436_v18  ;;  %v13893_v18 = vld [vmem:[%s20288_s9 + $0x30] sm:$0xff] }
 0xc67   : > { %v9469_v36 = vmax.f32 %v21427_v8, %v9449_v38  ;;  %9950 = vmatmul.bf16.vlgmr.msrb.gmra.mxu3 %v13859_v56  ;;  %v8878_v38 = vadd.f32 %v19982_v7, %v21437_v1  ;;  %v21438_v8 = vld [vmem:[#allocation50_spill] sm:$0xff] }
 0xc68   : > { %v9036_v22 = vadd.f32 %v19996_v23, %v8819_v17  ;;  %v21442_v23 = vld [vmem:[#allocation55_spill] sm:$0xff] }
 0xc69   : > { %v9493_v28 = vadd.f32 %v20018_v61, %v9469_v36  ;;  %v9325_v20 = vpop.f32.mrf.mxu2  ;;  %v21439_v36 = vld [vmem:[#allocation51_spill] sm:$0xff] }
 0xc6a   : > { %v9426_v11 = vadd.f32 %v9325_v20, %v9188_v33  ;;  %v9384_v4 = vpop.f32.mrf.mxu3  ;;  %v9089_v60 = vpop.f32.mrf.mxu0  ;;  %v21440_v33 = vmax.f32 %v21438_v8, %v21439_v36 }
 0xc6b   : > { %v9513_v19 = vmax.f32 %v9493_v28, 0.0  ;;  %v9427_v39 = vadd.f32 %v9384_v4, %v9189_v50  ;;  %v9148_v26 = vpop.f32.mrf.mxu1  ;;  %v9190_v43 = vadd.f32 %v9089_v60, %v9032_v47  ;;  %v13885_v47 = vld [vmem:[%s20286_s7 + $0x30] sm:$0xff] }
 0xc6c   : > { %v9191_v13 = vadd.f32 %v9148_v26, %v9033_v41 }
 0xc6d   : > { %v14073_v46 = vpack.c.bf16 %v9513_v19, %v9512_v42  ;;  %v9450_v32 = vmax.f32 %v9426_v11, %v9427_v39  ;;  %v21441_v39 = vld [vmem:[#allocation52_spill] sm:$0xff] }
 0xc6e   : > { %v21443_v26 = vmax.f32 %v21441_v39, %v21442_v23 }
 0xc6f   : > { %14117 = vst [vmem:[#allocation3 + $0x10] sm:$0xff] %v14073_v46   ;;  %v9470_v62 = vmax.f32 %v21432_v6, %v9450_v32  ;;  %v13886_v32 = vld [vmem:[%s20286_s7 + $0x38] sm:$0xff] }
 0xc70   : > { %10151 = vmatpush.bf16.msra.mxu1 %v13886_v32  ;;  %v14140_v32 = vld [vmem:[%s20287_s8] ss:$0 sm:$0xff] }
 0xc71   : > { %v9327_v57 = vpop.f32.mrf.mxu2  ;;  %v9494_v30 = vadd.f32 %v20018_v61, %v9470_v62  ;;  %v13881_v62 = vld [vmem:[%s20286_s7 + $0x10] sm:$0xff] }
 0xc72   : > { %v9428_v0 = vadd.f32 %v9327_v57, %v9190_v43  ;;  %v9386_v52 = vpop.f32.mrf.mxu3  ;;  %v9092_v9 = vpop.f32.mrf.mxu0  ;;  %v13880_v43 = vld [vmem:[%s20286_s7 + $0x8] sm:$0xff] }
 0xc73   : > { %v9429_v12 = vadd.f32 %v9386_v52, %v9191_v13  ;;  %v9151_v10 = vpop.f32.mrf.mxu1  ;;  %v9192_v51 = vadd.f32 %v9092_v9, %v19976_v55  ;;  %v9514_v59 = vmax.f32 %v9494_v30, 0.0  ;;  %v13879_v13 = vld [vmem:[%s20286_s7] sm:$0xff] }
 0xc74   : > { %v9193_v24 = vadd.f32 %v9151_v10, %v19980_v44  ;;  %v9037_v44 = vadd.f32 %v19998_v49, %v8878_v38  ;;  %10152 = vmatpush.bf16.msra.mxu1 %v13885_v47 }
 0xc75   : > { %v9451_v25 = vmax.f32 %v9428_v0, %v9429_v12 }
 0xc76   : > { %v13860_v3 = vld [vmem:[#allocation3 + $0x10] sm:$0xff] }
 0xc77   : > { %v9471_v58 = vmax.f32 %v21435_v35, %v9451_v25  ;;  %9955 = vmatmul.bf16.gmra.mxu3 %v13860_v3 }
 0xc79   : > { %v9495_v53 = vadd.f32 %v20018_v61, %v9471_v58  ;;  %v9330_v40 = vpop.f32.mrf.mxu2 }
 0xc7a   : > { %v9430_v2 = vadd.f32 %v9330_v40, %v9192_v51  ;;  %v9389_v37 = vpop.f32.mrf.mxu3  ;;  %v9094_v55 = vpop.f32.mrf.mxu0  ;;  %v14139_v40 = vld [vmem:[%s20285_s6] ss:$0 sm:$0xff] }
 0xc7b   : > { %v9515_v5 = vmax.f32 %v9495_v53, 0.0  ;;  %v9431_v54 = vadd.f32 %v9389_v37, %v9193_v24  ;;  %v9153_v45 = vpop.f32.mrf.mxu1  ;;  %v9194_v50 = vadd.f32 %v9094_v55, %v9036_v22  ;;  %v13894_v37 = vld [vmem:[%s20288_s9 + $0x38] sm:$0xff] }
 0xc7c   : > { %v9195_v20 = vadd.f32 %v9153_v45, %v9037_v44  ;;  %10244 = vmatpush.bf16.msra.mxu2 %v13894_v37  ;;  %v13891_v44 = vld [vmem:[%s20288_s9 + $0x20] sm:$0xff] }
 0xc7d   : > { %v14078_v56 = vpack.c.bf16 %v9515_v5, %v9514_v59  ;;  %v9452_v48 = vmax.f32 %v9430_v2, %v9431_v54 }
 0xc7f   : > { %14118 = vst [vmem:[#allocation3 + $0x30] sm:$0xff] %v14078_v56   ;;  %v9472_v28 = vmax.f32 %v21440_v33, %v9452_v48  ;;  %v13892_v48 = vld [vmem:[%s20288_s9 + $0x28] sm:$0xff] }
 0xc80   : > { %10245 = vmatpush.bf16.msra.mxu2 %v13893_v18 }
 0xc81   : > { %v9332_v11 = vpop.f32.mrf.mxu2  ;;  %v9496_v19 = vadd.f32 %v20018_v61, %v9472_v28 }
 0xc82   : > { %v9432_v34 = vadd.f32 %v9332_v11, %v9194_v50  ;;  %v9391_v4 = vpop.f32.mrf.mxu3 }
 0xc83   : > { %v9433_v60 = vadd.f32 %v9391_v4, %v9195_v20  ;;  %v9516_v27 = vmax.f32 %v9496_v19, 0.0 }
 0xc84   : > { %v9747_v52 = vpop.f32.mrf.mxu1  ;;  %10246 = vmatpush.bf16.msra.mxu2 %v13892_v48 }
 0xc85   : > { %v9453_v7 = vmax.f32 %v9432_v34, %v9433_v60 }
 0xc86   : > { %v13869_v42 = vld [vmem:[#allocation3 + $0x30] sm:$0xff] }
 0xc87   : > { %v9473_v16 = vmax.f32 %v21443_v26, %v9453_v7  ;;  %10054 = vmatmul.bf16.vlgmr.msra.gmra.mxu0 %v13869_v42 }
 0xc88   : > { %10247 = vmatpush.bf16.msra.mxu2 %v13891_v44 }
 0xc89   : > { %v9497_v49 = vadd.f32 %v20018_v61, %v9473_v16  ;;  %v13884_v61 = vld [vmem:[%s20286_s7 + $0x28] sm:$0xff] }
 0xc8a   : > { %10153 = vmatpush.bf16.msra.mxu1 %v13884_v61 }
 0xc8b   : > { %v9517_v21 = vmax.f32 %v9497_v49, 0.0  ;;  %v13890_v49 = vld [vmem:[%s20288_s9 + $0x18] sm:$0xff] }
 0xc8c   : > { %v9749_v15 = vpop.f32.mrf.mxu1  ;;  %10248 = vmatpush.bf16.msra.mxu2 %v13890_v49 }
 0xc8d   : > { %v14083_v31 = vpack.c.bf16 %v9517_v21, %v9516_v27  ;;  %v13889_v27 = vld [vmem:[%s20288_s9 + $0x10] sm:$0xff]  ;;  %v13888_v21 = vld [vmem:[%s20288_s9 + $0x8] sm:$0xff] }
 0xc8e   : > { %10154 = vmatpush.bf16.msra.mxu1 %v13883_v63 }
 0xc8f   : > { %14119 = vst [vmem:[#allocation3 + $0x28] sm:$0xff] %v14083_v31   ;;  %v13887_v31 = vld [vmem:[%s20288_s9] sm:$0xff] }
 0xc90   : > { %10249 = vmatpush.bf16.msra.mxu2 %v13889_v27 }
 0xc92   : > { %10155 = vmatpush.bf16.msra.mxu1 %v13882_v14 }
 0xc94   : > { %v9752_v1 = vpop.f32.mrf.mxu1  ;;  %10250 = vmatpush.bf16.msra.mxu2 %v13888_v21 }
 0xc96   : > { %v13870_v46 = vld [vmem:[#allocation3 + $0x28] sm:$0xff]  ;;  %10156 = vmatpush.bf16.msra.mxu1 %v13881_v62 }
 0xc97   : > { %10059 = vmatmul.bf16.vlgmr.msra.gmra.mxu3 %v13870_v46 }
 0xc98   : > { %10251 = vmatpush.bf16.msra.mxu2 %v13887_v31 }
 0xc9a   : > { %10157 = vmatpush.bf16.msra.mxu1 %v13880_v43 }
 0xc9c   : > { %v9754_v28 = vpop.f32.mrf.mxu1 }
 0xc9e   : > { %10158 = vmatpush.bf16.msra.mxu1 %v13879_v13 }
 0xca4   : > { %v9668_v41 = vpop.f32.mrf.mxu0 }
 0xca5   : > { %v9748_v25 = vadd.f32 %v9747_v52, %v9668_v41 }
 0xcac   : > { %v9670_v6 = vpop.f32.mrf.mxu0 }
 0xcad   : > { %v9750_v35 = vadd.f32 %v9749_v15, %v9670_v6 }
 0xcb4   : > { %v9673_v57 = vpop.f32.mrf.mxu0 }
 0xcb5   : > { %v9753_v8 = vadd.f32 %v9752_v1, %v9673_v57 }
 0xcbc   : > { %v9675_v12 = vpop.f32.mrf.mxu0 }
 0xcbd   : > { %v9755_v20 = vadd.f32 %v9754_v28, %v9675_v12 }
 0xcca   : > { %v9847_v9 = vpop.f32.mrf.mxu2 }
 0xccb   : > { %v9857_v30 = vadd.f32 %v9847_v9, %v9748_v25  ;;  %v14141_v9 = vld [vmem:[%s20289_s10] ss:$0 sm:$0xff] }
 0xcd2   : > { %v9849_v29 = vpop.f32.mrf.mxu2 }
 0xcd3   : > { %v9858_v53 = vadd.f32 %v9849_v29, %v9750_v35 }
 0xcda   : > { %v9852_v55 = vpop.f32.mrf.mxu2 }
 0xcdb   : > { %v9859_v33 = vadd.f32 %v9852_v55, %v9753_v8 }
 0xce2   : > { %v9854_v50 = vpop.f32.mrf.mxu2 }
 0xce3   : > { %v9860_v34 = vadd.f32 %v9854_v50, %v9755_v20 }
 0xcea   : > { %v9951_v0 = vpop.f32.mrf.mxu3 }
 0xceb   : > { %v9961_v58 = vadd.f32 %v9951_v0, %v9857_v30 }
 0xcf2   : > { %v9953_v10 = vpop.f32.mrf.mxu3 }
 0xcf3   : > { %v9962_v2 = vadd.f32 %v9953_v10, %v9858_v53 }
 0xcfa   : > { %v9956_v51 = vpop.f32.mrf.mxu3 }
 0xcfb   : > { %v9963_v11 = vadd.f32 %v9956_v51, %v9859_v33 }
 0xd02   : > { %v9958_v22 = vpop.f32.mrf.mxu3 }
 0xd03   : > { %v9964_v60 = vadd.f32 %v9958_v22, %v9860_v34 }
 0xd04   : > { %v10055_v3 = vpop.f32.mrf.mxu0 }
 0xd05   : > { %v10065_v24 = vadd.f32 %v10055_v3, %v9961_v58 }
 0xd07   : > { %v10073_v5 = vadd.f32 %v14139_v40, %v10065_v24 }
 0xd09   : > { %v10077_v38 = vmax.f32 %v10073_v5, 0.0 }
 0xd0c   : > { %v10057_v59 = vpop.f32.mrf.mxu0 }
 0xd0d   : > { %v10066_v54 = vadd.f32 %v10057_v59, %v9962_v2 }
 0xd0f   : > { %v10074_v17 = vadd.f32 %v14139_v40, %v10066_v54 }
 0xd11   : > { %v10078_v56 = vmax.f32 %v10074_v17, 0.0 }
 0xd13   : > { %v10081_v45 = vpack.c.bf16 %v10078_v56, %v10077_v38 }
 0xd15   : > { %10159 = vmatmul.bf16.vlgmr.msra.gmra.mxu1 %v10081_v45 }
 0xd1a   : > { %v10060_v36 = vpop.f32.mrf.mxu3 }
 0xd1b   : > { %v10067_v4 = vadd.f32 %v10060_v36, %v9963_v11 }
 0xd1d   : > { %v10075_v42 = vadd.f32 %v14139_v40, %v10067_v4 }
 0xd1f   : > { %v10079_v23 = vmax.f32 %v10075_v42, 0.0 }
 0xd22   : > { %v10062_v7 = vpop.f32.mrf.mxu3 }
 0xd23   : > { %v10068_v19 = vadd.f32 %v10062_v7, %v9964_v60 }
 0xd25   : > { %v10076_v39 = vadd.f32 %v14139_v40, %v10068_v19 }
 0xd27   : > { %v10080_v26 = vmax.f32 %v10076_v39, 0.0 }
 0xd29   : > { %v10082_v16 = vpack.c.bf16 %v10080_v26, %v10079_v23 }
 0xd2b   : > { %10164 = vmatmul.bf16.gmra.mxu1 %v10082_v16 }
 0xd92   : > { %v10160_v46 = vpop.f32.mrf.mxu1 }
 0xd93   : > { %v10161_v47 = vadd.f32 %v14140_v32, %v10160_v46 }
 0xd95   : > { %v10170_v63 = vmax.f32 %v10161_v47, 0.0 }
 0xd9a   : > { %v10162_v61 = vpop.f32.mrf.mxu1 }
 0xd9b   : > { %v10163_v41 = vadd.f32 %v14140_v32, %v10162_v61 }
 0xd9d   : > { %v10171_v14 = vmax.f32 %v10163_v41, 0.0 }
 0xd9f   : > { %v10174_v6 = vpack.c.bf16 %v10171_v14, %v10170_v63 }
 0xda1   : > { %10252 = vmatmul.bf16.vlgmr.msra.gmra.mxu2 %v10174_v6 }
 0xda8   : > { %v10165_v62 = vpop.f32.mrf.mxu1 }
 0xda9   : > { %v10166_v43 = vadd.f32 %v14140_v32, %v10165_v62 }
 0xdab   : > { %v10172_v0 = vmax.f32 %v10166_v43, 0.0 }
 0xdb0   : > { %v10167_v13 = vpop.f32.mrf.mxu1 }
 0xdb1   : > { %v10168_v57 = vadd.f32 %v14140_v32, %v10167_v13 }
 0xdb3   : > { %v10173_v52 = vmax.f32 %v10168_v57, 0.0 }
 0xdb5   : > { %v10175_v12 = vpack.c.bf16 %v10173_v52, %v10172_v0 }
 0xdb7   : > { %10257 = vmatmul.bf16.gmra.mxu2 %v10175_v12 }
 0xe24   : > { %v10253_v10 = vpop.f32.mrf.mxu2 }
 0xe25   : > { %v10254_v25 = vadd.f32 %v14141_v9, %v10253_v10 }
 0xe27   : > { %10263 = vst [vmem:[%s386_s19] sm:$0xff] %v10254_v25 }
 0xe2c   : > { %v10255_v3 = vpop.f32.mrf.mxu2 }
 0xe2d   : > { %v10256_v30 = vadd.f32 %v14141_v9, %v10255_v3 }
 0xe2f   : > { %10264 = vst [vmem:[%s386_s19 + $0x8] sm:$0xff] %v10256_v30 }
 0xe3a   : > { %v10258_v15 = vpop.f32.mrf.mxu2 }
 0xe3b   : > { %v10259_v29 = vadd.f32 %v14141_v9, %v10258_v15 }
 0xe3d   : > { %10265 = vst [vmem:[%s386_s19 + $0x10] sm:$0xff] %v10259_v29 }
 0xe42   : > { %v10260_v35 = vpop.f32.mrf.mxu2 }
 0xe43   : > { %v10261_v58 = vadd.f32 %v14141_v9, %v10260_v35 }
 0xe45   : > { %10266 = vst [vmem:[%s386_s19 + $0x18] sm:$0xff] %v10261_v58 }
 0xe46 PF: > { %s21_s17 = sadd.s32 1, %s14245_s17  }
 0xe47   : > { %p18_p5 = scmp.ge.s32.totalorder %s21_s17, 4  }
 0xe49   :  { %20 = sbr.rel (!%p18_p5) target bundleno = 1 (0x1), region = 114 }

</bundles_post_ra>
